<compile_context>
chip_gen: v7x
topology: tpu7x:2x2x1
jax: 0.10.0
libtpu: 0.0.40
codegen_flags: <defaults>
</compile_context>

<pallas_src>
import jax
import jax.numpy as jnp
from jax import lax
from jax.experimental import pallas as pl
from jax.experimental.pallas import tpu as pltpu

KW = 10           # conv tap width for the (1, 10) convs
KH = 22           # conv2 kernel height == input "channel rows"
POOL = 6          # MaxPool2d((1, 6))
C1, C2, C3 = 16, 32, 64
FC1, FC2, NCLS = 832, 416, 4


def _elu(v):
    # PyTorch ELU (alpha=1).  exp(min(v,0)) - 1 instead of expm1 to guarantee
    # Mosaic lowering; precision near 0 is within test tolerance.
    return jnp.where(v > 0.0, v, jnp.exp(jnp.minimum(v, 0.0)) - 1.0)


# ---------------------------------------------------------------------------
# Fused Pallas kernel: whole Conv1 forward (eval mode) for one batch tile
# ---------------------------------------------------------------------------
def _fused_forward_kernel(p1_ref, r1_ref, t1_ref, w2_ref, t2_ref, w3_ref, t3_ref,
                          wf1_ref, bf1_ref, wf2_ref, bf2_ref, wf3_ref, bf3_ref,
                          o_ref):
    TN, W1, K1 = p1_ref.shape            # (tile_n, 126, 220)
    P1 = W1 // POOL                      # 21
    W2 = P1 - KW + 1                     # 12
    T = W2 // POOL                       # 2

    # --- Conv2d(1,16,(1,10)) + BN(folded) + ELU: one K=220 MXU matmul ----------
    # Rows = (n, w), cols = (h*16 + c1)  ==  conv2's patch matrix directly.
    p1 = p1_ref[...].reshape(TN * W1, K1)                                 # bf16
    y1 = _elu(jnp.dot(p1, r1_ref[...],
                      preferred_element_type=jnp.float32) + t1_ref[...])  # f32

    # --- Conv2d(16,32,(22,1)) + BN + ELU ---------------------------------------
    y2 = _elu(jnp.dot(y1.astype(jnp.bfloat16), w2_ref[...],
                      preferred_element_type=jnp.float32) + t2_ref[...])  # (TN*W1,32)

    # --- MaxPool2d((1,6)) + Dropout(eval => identity) --------------------------
    if W1 == P1 * POOL:
        y2 = y2.reshape(TN * P1, POOL, C2)
    else:  # generic trial_length: drop the pool remainder first
        y2 = y2.reshape(TN, W1, C2)[:, :P1 * POOL, :].reshape(TN * P1, POOL, C2)
    y2 = jnp.max(y2, axis=1).reshape(TN, P1, C2)                          # (TN,21,32)

    # --- Conv2d(32,64,(1,10)) + BN + ELU: single K=320 matmul ------------------
    # im2col built once; columns ordered (tap k, c2) to match w3 row order.
    p3 = jnp.concatenate([y2[:, k:k + W2, :] for k in range(KW)], axis=-1)
    p3 = p3.reshape(TN * W2, KW * C2).astype(jnp.bfloat16)                # (TN*12,320)
    y3 = _elu(jnp.dot(p3, w3_ref[...],
                      preferred_element_type=jnp.float32) + t3_ref[...])  # (TN*12,64)

    # --- MaxPool2d((1,6)) + squeeze + permute(0,2,1) + reshape -----------------
    y3 = y3.reshape(TN, W2, C3)
    feat = jnp.concatenate(
        [jnp.max(y3[:, t * POOL:(t + 1) * POOL, :], axis=1) for t in range(T)],
        axis=-1)                                                           # (TN, T*64)

    # --- fullycon: Linear(.,832)+BN+ReLU, Linear(832,416)+BN+ReLU, Linear(416,4)
    h = jnp.maximum(jnp.dot(feat.astype(jnp.bfloat16), wf1_ref[...],
                            preferred_element_type=jnp.float32) + bf1_ref[...], 0.0)
    h = jnp.maximum(jnp.dot(h.astype(jnp.bfloat16), wf2_ref[...],
                            preferred_element_type=jnp.float32) + bf2_ref[...], 0.0)
    o_ref[0] = (jnp.dot(h.astype(jnp.bfloat16), wf3_ref[...],
                        preferred_element_type=jnp.float32) + bf3_ref[...])


def conv1_forward(x, kp, *, tile_n=2):
    """x: (N, 1, 22, trial_length) float32, NCHW (matches the PyTorch module)."""
    n = x.shape[0]
    w0 = x.shape[3]
    w1 = w0 - KW + 1
    k1 = KW * KH

    # Channels-last + conv1 im2col on the wrapper side (XLA layout plumbing).
    # Patch columns ordered (tap k, input row h) to match kp["r1"] row order.
    xt = jnp.transpose(x[:, 0, :, :], (0, 2, 1))                  # (N, W0, 22)
    p1 = jnp.stack([xt[:, k:k + w1, :] for k in range(KW)], axis=2)
    p1 = p1.reshape(n, w1, k1).astype(jnp.bfloat16)               # (N, W1, 220)

    g = pl.cdiv(n, tile_n)
    n_pad = g * tile_n
    if n_pad != n:
        p1 = jnp.pad(p1, ((0, n_pad - n), (0, 0), (0, 0)))

    def resident(a):          # weights/biases: DMA'd once, stay VMEM-resident
        nd = a.ndim
        return pl.BlockSpec(a.shape, lambda i, _nd=nd: (0,) * _nd)

    weights = (kp["r1"], kp["t1"], kp["w2"], kp["t2"], kp["w3"], kp["t3"],
               kp["wf1"], kp["bf1"], kp["wf2"], kp["bf2"], kp["wf3"], kp["bf3"])

    out = pl.pallas_call(
        _fused_forward_kernel,
        out_shape=jax.ShapeDtypeStruct((g, tile_n, NCLS), jnp.float32),
        grid_spec=pltpu.PrefetchScalarGridSpec(
            num_scalar_prefetch=0,
            grid=(g,),
            in_specs=[pl.BlockSpec((tile_n, w1, k1), lambda i: (i, 0, 0))]
                     + [resident(a) for a in weights],
            out_specs=pl.BlockSpec((1, tile_n, NCLS), lambda i: (i, 0, 0)),
        ),
        compiler_params=pltpu.CompilerParams(
            dimension_semantics=("parallel",)),        # v7x: shard batch over 2 TCs
    )(p1, *weights)
    return out.reshape(n_pad, NCLS)[:n]


# ---------------------------------------------------------------------------
# Parameters: PyTorch-layout synthetic init + host-side BN fold / re-layout
# ---------------------------------------------------------------------------
def init_torch_params(key, trial_length):
    li = trial_length
    for _ in range(2):
        li = (li - 9) // 6
    t_steps = li
    linear_input = li * C3

    ks = iter(jax.random.split(key, 40))
    nrm = lambda shape, s: s * jax.random.normal(next(ks), shape, jnp.float32)

    def bn_stats(c):
        gamma = 1.0 + 0.1 * jax.random.normal(next(ks), (c,), jnp.float32)
        beta = 0.1 * jax.random.normal(next(ks), (c,), jnp.float32)
        mean = 0.1 * jax.random.normal(next(ks), (c,), jnp.float32)
        var = 0.5 + jax.random.uniform(next(ks), (c,), jnp.float32)
        return gamma, beta, mean, var

    p = {
        "conv1_w": nrm((C1, 1, 1, KW), 0.1), "conv1_b": nrm((C1,), 0.1),
        "bn1": bn_stats(C1),
        "conv2_w": nrm((C2, C1, KH, 1), 0.05), "conv2_b": nrm((C2,), 0.1),
        "bn2": bn_stats(C2),
        "conv3_w": nrm((C3, C2, 1, KW), 0.05), "conv3_b": nrm((C3,), 0.1),
        "bn3": bn_stats(C3),
        "fc1_w": nrm((FC1, linear_input), 0.05), "fc1_b": nrm((FC1,), 0.1),
        "bnf1": bn_stats(FC1),
        "fc2_w": nrm((FC2, FC1), 0.03), "fc2_b": nrm((FC2,), 0.1),
        "bnf2": bn_stats(FC2),
        "fc3_w": nrm((NCLS, FC2), 0.05), "fc3_b": nrm((NCLS,), 0.1),
    }
    return p, t_steps, linear_input


def fold_params(tp, eps=1e-5):
    def fold(bn, conv_bias):
        gamma, beta, mean, var = bn
        scale = gamma * lax.rsqrt(var + eps)
        shift = beta + (conv_bias - mean) * scale
        return scale, shift

    s1, sh1 = fold(tp["bn1"], tp["conv1_b"])
    s2, sh2 = fold(tp["bn2"], tp["conv2_b"])
    s3, sh3 = fold(tp["bn3"], tp["conv3_b"])
    sf1, shf1 = fold(tp["bnf1"], tp["fc1_b"])
    sf2, shf2 = fold(tp["bnf2"], tp["fc2_b"])

    bf16 = lambda a: a.astype(jnp.bfloat16)

    # conv1: per-tap matrices concatenated along K -> rows (k, h), cols (h*16+c).
    w1f = tp["conv1_w"][:, 0, 0, :].T * s1[None, :]                      # (10, 16)
    eye_h = jnp.eye(KH, dtype=jnp.float32)
    r1 = jnp.einsum("pg,kc->kpgc", eye_h, w1f).reshape(KW * KH, KH * C1)  # (220, 352)
    t1 = jnp.tile(sh1, KH)[None, :]                                      # (1, 352)

    # conv2 flattened over (h, c1) rows, BN2 scale folded
    w2 = (jnp.transpose(tp["conv2_w"][:, :, :, 0], (2, 1, 0))
          .reshape(KH * C1, C2) * s2[None, :])                           # (352, 32)
    t2 = sh2[None, :]

    # conv3 taps concatenated along K -> rows (k, c2), BN3 scale folded
    w3 = (jnp.transpose(tp["conv3_w"][:, :, 0, :], (2, 1, 0))
          .reshape(KW * C2, C3) * s3[None, None, :].reshape(1, C3))      # (320, 64)
    t3 = sh3[None, :]

    # fullycon head, BN1d scales folded; fc1 rows already ordered (t, c)
    wf1 = tp["fc1_w"].T * sf1[None, :]                                   # (T*64, 832)
    bf1 = shf1[None, :]
    wf2 = tp["fc2_w"].T * sf2[None, :]                                   # (832, 416)
    bf2 = shf2[None, :]
    wf3 = tp["fc3_w"].T                                                  # (416, 4)
    bf3 = tp["fc3_b"][None, :]

    return {"r1": bf16(r1), "t1": t1, "w2": bf16(w2), "t2": t2,
            "w3": bf16(w3), "t3": t3, "wf1": bf16(wf1), "bf1": bf1,
            "wf2": bf16(wf2), "bf2": bf2, "wf3": bf16(wf3), "bf3": bf3}


# ---------------------------------------------------------------------------
# Independent plain-XLA reference (eval-mode PyTorch semantics) for validation
# ---------------------------------------------------------------------------
def reference_forward(x, tp, eps=1e-5):
    dn = ("NCHW", "OIHW", "NCHW")
    hp = lax.Precision.HIGHEST
    mm = lambda a, b: jnp.dot(a, b, precision=hp)

    def bn2d(y, bn):
        g, b, m, v = bn
        s = g * lax.rsqrt(v + eps)
        return (y - m[None, :, None, None]) * s[None, :, None, None] + b[None, :, None, None]

    def bn1d(y, bn):
        g, b, m, v = bn
        s = g * lax.rsqrt(v + eps)
        return (y - m[None, :]) * s[None, :] + b[None, :]

    def conv(y, w, b):
        return (lax.conv_general_dilated(y, w, (1, 1), "VALID",
                                         dimension_numbers=dn, precision=hp)
                + b[None, :, None, None])

    def pool16(y):
        return lax.reduce_window(y, -jnp.inf, lax.max,
                                 (1, 1, 1, POOL), (1, 1, 1, POOL), "VALID")

    y = _elu(bn2d(conv(x, tp["conv1_w"], tp["conv1_b"]), tp["bn1"]))
    y = _elu(bn2d(conv(y, tp["conv2_w"], tp["conv2_b"]), tp["bn2"]))
    y = pool16(y)
    y = _elu(bn2d(conv(y, tp["conv3_w"], tp["conv3_b"]), tp["bn3"]))
    y = pool16(y)                                    # (N, 64, 1, T)
    y = jnp.squeeze(y, axis=2)                       # torch.squeeze() (assumes N > 1)
    y = jnp.transpose(y, (0, 2, 1)).reshape(x.shape[0], -1)
    h = jnp.maximum(bn1d(mm(y, tp["fc1_w"].T) + tp["fc1_b"], tp["bnf1"]), 0.0)
    h = jnp.maximum(bn1d(mm(h, tp["fc2_w"].T) + tp["fc2_b"], tp["bnf2"]), 0.0)
    return mm(h, tp["fc3_w"].T) + tp["fc3_b"]


if __name__ == "__main__":
    TRIAL_LENGTH = 135    # (135-9)//6 = 21 -> (21-9)//6 = 2 steps, linear_input = 128
    N = 4                 # with TILE_N=2 the kernel runs a 2-step parallel batch grid
    TILE_N = 2
    key = jax.random.PRNGKey(0)
    kx, kparam = jax.random.split(key)
    x = jax.random.normal(kx, (N, 1, KH, TRIAL_LENGTH), jnp.float32)

    torch_params, t_steps, linear_input = init_torch_params(kparam, TRIAL_LENGTH)
    assert linear_input == t_steps * C3
    kernel_params = fold_params(torch_params)

    fwd = jax.jit(lambda xx, pp: conv1_forward(xx, pp, tile_n=TILE_N))
    out = jax.block_until_ready(fwd(x, kernel_params))
    assert out.shape == (N, NCLS) and out.dtype == jnp.float32
    assert bool(jnp.all(jnp.isfinite(out)))

    ref = jax.block_until_ready(jax.jit(reference_forward)(x, torch_params))
    # bf16 matmul operands -> slightly looser tolerance than the pure-f32 version.
    assert jnp.allclose(out, ref, rtol=3e-2, atol=3e-2), (out, ref)

    print("KERNEL_OK")
</pallas_src>

<mosaic_0001>
module attributes {stable_mosaic.version = 11 : i64} {
  func.func @_fused_forward_kernel(%arg0: i32, %arg1: memref<2x126x220xbf16, #tpu.memory_space<vmem>>, %arg2: memref<220x352xbf16, #tpu.memory_space<vmem>>, %arg3: memref<1x352xf32, #tpu.memory_space<vmem>>, %arg4: memref<352x32xbf16, #tpu.memory_space<vmem>>, %arg5: memref<1x32xf32, #tpu.memory_space<vmem>>, %arg6: memref<320x64xbf16, #tpu.memory_space<vmem>>, %arg7: memref<1x64xf32, #tpu.memory_space<vmem>>, %arg8: memref<128x832xbf16, #tpu.memory_space<vmem>>, %arg9: memref<1x832xf32, #tpu.memory_space<vmem>>, %arg10: memref<832x416xbf16, #tpu.memory_space<vmem>>, %arg11: memref<1x416xf32, #tpu.memory_space<vmem>>, %arg12: memref<416x4xbf16, #tpu.memory_space<vmem>>, %arg13: memref<1x4xf32, #tpu.memory_space<vmem>>, %arg14: memref<1x2x4xf32, #tpu.memory_space<vmem>>) attributes {dimension_semantics = [#tpu.dimension_semantics<parallel>], iteration_bounds = array<i64: 2>, scalar_prefetch = 0 : i64, scratch_operands = 0 : i64, tpu.core_type = #tpu.core_type<tc>, window_params = [{transform_indices = @transform_0, window_bounds = array<i64: 2, 126, 220>}, {pipeline_mode = #tpu.pipeline_mode<synchronous>, transform_indices = @transform_1, window_bounds = array<i64: 220, 352>}, {pipeline_mode = #tpu.pipeline_mode<synchronous>, transform_indices = @transform_2, window_bounds = array<i64: 1, 352>}, {pipeline_mode = #tpu.pipeline_mode<synchronous>, transform_indices = @transform_3, window_bounds = array<i64: 352, 32>}, {pipeline_mode = #tpu.pipeline_mode<synchronous>, transform_indices = @transform_4, window_bounds = array<i64: 1, 32>}, {pipeline_mode = #tpu.pipeline_mode<synchronous>, transform_indices = @transform_5, window_bounds = array<i64: 320, 64>}, {pipeline_mode = #tpu.pipeline_mode<synchronous>, transform_indices = @transform_6, window_bounds = array<i64: 1, 64>}, {pipeline_mode = #tpu.pipeline_mode<synchronous>, transform_indices = @transform_7, window_bounds = array<i64: 128, 832>}, {pipeline_mode = #tpu.pipeline_mode<synchronous>, transform_indices = @transform_8, window_bounds = array<i64: 1, 832>}, {pipeline_mode = #tpu.pipeline_mode<synchronous>, transform_indices = @transform_9, window_bounds = array<i64: 832, 416>}, {pipeline_mode = #tpu.pipeline_mode<synchronous>, transform_indices = @transform_10, window_bounds = array<i64: 1, 416>}, {pipeline_mode = #tpu.pipeline_mode<synchronous>, transform_indices = @transform_11, window_bounds = array<i64: 416, 4>}, {pipeline_mode = #tpu.pipeline_mode<synchronous>, transform_indices = @transform_12, window_bounds = array<i64: 1, 4>}, {transform_indices = @transform_13, window_bounds = array<i64: 1, 2, 4>}]} {
    %c0 = arith.constant 0 : index
    %c0_0 = arith.constant 0 : index
    %c0_1 = arith.constant 0 : index
    %0 = vector.load %arg1[%c0, %c0_0, %c0_1] : memref<2x126x220xbf16, #tpu.memory_space<vmem>>, vector<2x126x220xbf16>
    %1 = vector.shape_cast %0 : vector<2x126x220xbf16> to vector<252x220xbf16>
    %c0_2 = arith.constant 0 : index
    %c0_3 = arith.constant 0 : index
    %2 = vector.load %arg2[%c0_2, %c0_3] : memref<220x352xbf16, #tpu.memory_space<vmem>>, vector<220x352xbf16>
    %cst = arith.constant dense<0.000000e+00> : vector<252x352xf32>
    %3 = tpu.matmul %1, %2, %cst {dimension_numbers = #tpu.dot_dimension_numbers<[1], [0], [0], [1], [0, 0, 1, 1], [], []>} : vector<252x220xbf16>, vector<220x352xbf16>, vector<252x352xf32> -> vector<252x352xf32>
    %c0_4 = arith.constant 0 : index
    %c0_5 = arith.constant 0 : index
    %4 = vector.load %arg3[%c0_4, %c0_5] : memref<1x352xf32, #tpu.memory_space<vmem>>, vector<1x352xf32>
    %5 = vector.broadcast %4 : vector<1x352xf32> to vector<252x352xf32>
    %6 = arith.addf %3, %5 : vector<252x352xf32>
    %cst_6 = arith.constant 0.000000e+00 : f32
    %7 = vector.broadcast %cst_6 : f32 to vector<252x352xf32>
    %8 = arith.cmpf ogt, %6, %7 : vector<252x352xf32>
    %cst_7 = arith.constant 0.000000e+00 : f32
    %9 = vector.broadcast %cst_7 : f32 to vector<252x352xf32>
    %10 = arith.minimumf %6, %9 : vector<252x352xf32>
    %11 = math.exp %10 : vector<252x352xf32>
    %cst_8 = arith.constant 1.000000e+00 : f32
    %12 = vector.broadcast %cst_8 : f32 to vector<252x352xf32>
    %13 = arith.subf %11, %12 : vector<252x352xf32>
    %14 = arith.select %8, %6, %13 : vector<252x352xi1>, vector<252x352xf32>
    %15 = arith.truncf %14 : vector<252x352xf32> to vector<252x352xbf16>
    %c0_9 = arith.constant 0 : index
    %c0_10 = arith.constant 0 : index
    %16 = vector.load %arg4[%c0_9, %c0_10] : memref<352x32xbf16, #tpu.memory_space<vmem>>, vector<352x32xbf16>
    %cst_11 = arith.constant dense<0.000000e+00> : vector<252x32xf32>
    %17 = tpu.matmul %15, %16, %cst_11 {dimension_numbers = #tpu.dot_dimension_numbers<[1], [0], [0], [1], [0, 0, 1, 1], [], []>} : vector<252x352xbf16>, vector<352x32xbf16>, vector<252x32xf32> -> vector<252x32xf32>
    %c0_12 = arith.constant 0 : index
    %c0_13 = arith.constant 0 : index
    %18 = vector.load %arg5[%c0_12, %c0_13] : memref<1x32xf32, #tpu.memory_space<vmem>>, vector<1x32xf32>
    %19 = vector.broadcast %18 : vector<1x32xf32> to vector<252x32xf32>
    %20 = arith.addf %17, %19 : vector<252x32xf32>
    %cst_14 = arith.constant 0.000000e+00 : f32
    %21 = vector.broadcast %cst_14 : f32 to vector<252x32xf32>
    %22 = arith.cmpf ogt, %20, %21 : vector<252x32xf32>
    %cst_15 = arith.constant 0.000000e+00 : f32
    %23 = vector.broadcast %cst_15 : f32 to vector<252x32xf32>
    %24 = arith.minimumf %20, %23 : vector<252x32xf32>
    %25 = math.exp %24 : vector<252x32xf32>
    %cst_16 = arith.constant 1.000000e+00 : f32
    %26 = vector.broadcast %cst_16 : f32 to vector<252x32xf32>
    %27 = arith.subf %25, %26 : vector<252x32xf32>
    %28 = arith.select %22, %20, %27 : vector<252x32xi1>, vector<252x32xf32>
    %29 = vector.shape_cast %28 : vector<252x32xf32> to vector<42x6x32xf32>
    %cst_17 = arith.constant dense<0xFF800000> : vector<42x32xf32>
    %30 = vector.multi_reduction <maximumf>, %29, %cst_17 [1] : vector<42x6x32xf32> to vector<42x32xf32>
    %31 = vector.shape_cast %30 : vector<42x32xf32> to vector<2x21x32xf32>
    %32 = vector.extract_strided_slice %31 {offsets = [0, 0, 0], sizes = [2, 12, 32], strides = [1, 1, 1]} : vector<2x21x32xf32> to vector<2x12x32xf32>
    %33 = vector.extract_strided_slice %31 {offsets = [0, 1, 0], sizes = [2, 12, 32], strides = [1, 1, 1]} : vector<2x21x32xf32> to vector<2x12x32xf32>
    %34 = vector.extract_strided_slice %31 {offsets = [0, 2, 0], sizes = [2, 12, 32], strides = [1, 1, 1]} : vector<2x21x32xf32> to vector<2x12x32xf32>
    %35 = vector.extract_strided_slice %31 {offsets = [0, 3, 0], sizes = [2, 12, 32], strides = [1, 1, 1]} : vector<2x21x32xf32> to vector<2x12x32xf32>
    %36 = vector.extract_strided_slice %31 {offsets = [0, 4, 0], sizes = [2, 12, 32], strides = [1, 1, 1]} : vector<2x21x32xf32> to vector<2x12x32xf32>
    %37 = vector.extract_strided_slice %31 {offsets = [0, 5, 0], sizes = [2, 12, 32], strides = [1, 1, 1]} : vector<2x21x32xf32> to vector<2x12x32xf32>
    %38 = vector.extract_strided_slice %31 {offsets = [0, 6, 0], sizes = [2, 12, 32], strides = [1, 1, 1]} : vector<2x21x32xf32> to vector<2x12x32xf32>
    %39 = vector.extract_strided_slice %31 {offsets = [0, 7, 0], sizes = [2, 12, 32], strides = [1, 1, 1]} : vector<2x21x32xf32> to vector<2x12x32xf32>
    %40 = vector.extract_strided_slice %31 {offsets = [0, 8, 0], sizes = [2, 12, 32], strides = [1, 1, 1]} : vector<2x21x32xf32> to vector<2x12x32xf32>
    %41 = vector.extract_strided_slice %31 {offsets = [0, 9, 0], sizes = [2, 12, 32], strides = [1, 1, 1]} : vector<2x21x32xf32> to vector<2x12x32xf32>
    %42 = tpu.concatenate %32, %33, %34, %35, %36, %37, %38, %39, %40, %41 in 2 : vector<2x12x32xf32>, vector<2x12x32xf32>, vector<2x12x32xf32>, vector<2x12x32xf32>, vector<2x12x32xf32>, vector<2x12x32xf32>, vector<2x12x32xf32>, vector<2x12x32xf32>, vector<2x12x32xf32>, vector<2x12x32xf32> -> vector<2x12x320xf32>
    %43 = vector.shape_cast %42 : vector<2x12x320xf32> to vector<24x320xf32>
    %44 = arith.truncf %43 : vector<24x320xf32> to vector<24x320xbf16>
    %c0_18 = arith.constant 0 : index
    %c0_19 = arith.constant 0 : index
    %45 = vector.load %arg6[%c0_18, %c0_19] : memref<320x64xbf16, #tpu.memory_space<vmem>>, vector<320x64xbf16>
    %cst_20 = arith.constant dense<0.000000e+00> : vector<24x64xf32>
    %46 = tpu.matmul %44, %45, %cst_20 {dimension_numbers = #tpu.dot_dimension_numbers<[1], [0], [0], [1], [0, 0, 1, 1], [], []>} : vector<24x320xbf16>, vector<320x64xbf16>, vector<24x64xf32> -> vector<24x64xf32>
    %c0_21 = arith.constant 0 : index
    %c0_22 = arith.constant 0 : index
    %47 = vector.load %arg7[%c0_21, %c0_22] : memref<1x64xf32, #tpu.memory_space<vmem>>, vector<1x64xf32>
    %48 = vector.broadcast %47 : vector<1x64xf32> to vector<24x64xf32>
    %49 = arith.addf %46, %48 : vector<24x64xf32>
    %cst_23 = arith.constant 0.000000e+00 : f32
    %50 = vector.broadcast %cst_23 : f32 to vector<24x64xf32>
    %51 = arith.cmpf ogt, %49, %50 : vector<24x64xf32>
    %cst_24 = arith.constant 0.000000e+00 : f32
    %52 = vector.broadcast %cst_24 : f32 to vector<24x64xf32>
    %53 = arith.minimumf %49, %52 : vector<24x64xf32>
    %54 = math.exp %53 : vector<24x64xf32>
    %cst_25 = arith.constant 1.000000e+00 : f32
    %55 = vector.broadcast %cst_25 : f32 to vector<24x64xf32>
    %56 = arith.subf %54, %55 : vector<24x64xf32>
    %57 = arith.select %51, %49, %56 : vector<24x64xi1>, vector<24x64xf32>
    %58 = vector.shape_cast %57 : vector<24x64xf32> to vector<2x12x64xf32>
    %59 = vector.extract_strided_slice %58 {offsets = [0, 0, 0], sizes = [2, 6, 64], strides = [1, 1, 1]} : vector<2x12x64xf32> to vector<2x6x64xf32>
    %cst_26 = arith.constant dense<0xFF800000> : vector<2x64xf32>
    %60 = vector.multi_reduction <maximumf>, %59, %cst_26 [1] : vector<2x6x64xf32> to vector<2x64xf32>
    %61 = vector.extract_strided_slice %58 {offsets = [0, 6, 0], sizes = [2, 6, 64], strides = [1, 1, 1]} : vector<2x12x64xf32> to vector<2x6x64xf32>
    %cst_27 = arith.constant dense<0xFF800000> : vector<2x64xf32>
    %62 = vector.multi_reduction <maximumf>, %61, %cst_27 [1] : vector<2x6x64xf32> to vector<2x64xf32>
    %63 = tpu.concatenate %60, %62 in 1 : vector<2x64xf32>, vector<2x64xf32> -> vector<2x128xf32>
    %64 = arith.truncf %63 : vector<2x128xf32> to vector<2x128xbf16>
    %c0_28 = arith.constant 0 : index
    %c0_29 = arith.constant 0 : index
    %65 = vector.load %arg8[%c0_28, %c0_29] : memref<128x832xbf16, #tpu.memory_space<vmem>>, vector<128x832xbf16>
    %cst_30 = arith.constant dense<0.000000e+00> : vector<2x832xf32>
    %66 = tpu.matmul %64, %65, %cst_30 {dimension_numbers = #tpu.dot_dimension_numbers<[1], [0], [0], [1], [0, 0, 1, 1], [], []>} : vector<2x128xbf16>, vector<128x832xbf16>, vector<2x832xf32> -> vector<2x832xf32>
    %c0_31 = arith.constant 0 : index
    %c0_32 = arith.constant 0 : index
    %67 = vector.load %arg9[%c0_31, %c0_32] : memref<1x832xf32, #tpu.memory_space<vmem>>, vector<1x832xf32>
    %68 = vector.broadcast %67 : vector<1x832xf32> to vector<2x832xf32>
    %69 = arith.addf %66, %68 : vector<2x832xf32>
    %cst_33 = arith.constant 0.000000e+00 : f32
    %70 = vector.broadcast %cst_33 : f32 to vector<2x832xf32>
    %71 = arith.maximumf %69, %70 : vector<2x832xf32>
    %72 = arith.truncf %71 : vector<2x832xf32> to vector<2x832xbf16>
    %c0_34 = arith.constant 0 : index
    %c0_35 = arith.constant 0 : index
    %73 = vector.load %arg10[%c0_34, %c0_35] : memref<832x416xbf16, #tpu.memory_space<vmem>>, vector<832x416xbf16>
    %cst_36 = arith.constant dense<0.000000e+00> : vector<2x416xf32>
    %74 = tpu.matmul %72, %73, %cst_36 {dimension_numbers = #tpu.dot_dimension_numbers<[1], [0], [0], [1], [0, 0, 1, 1], [], []>} : vector<2x832xbf16>, vector<832x416xbf16>, vector<2x416xf32> -> vector<2x416xf32>
    %c0_37 = arith.constant 0 : index
    %c0_38 = arith.constant 0 : index
    %75 = vector.load %arg11[%c0_37, %c0_38] : memref<1x416xf32, #tpu.memory_space<vmem>>, vector<1x416xf32>
    %76 = vector.broadcast %75 : vector<1x416xf32> to vector<2x416xf32>
    %77 = arith.addf %74, %76 : vector<2x416xf32>
    %cst_39 = arith.constant 0.000000e+00 : f32
    %78 = vector.broadcast %cst_39 : f32 to vector<2x416xf32>
    %79 = arith.maximumf %77, %78 : vector<2x416xf32>
    %80 = arith.truncf %79 : vector<2x416xf32> to vector<2x416xbf16>
    %c0_40 = arith.constant 0 : index
    %c0_41 = arith.constant 0 : index
    %81 = vector.load %arg12[%c0_40, %c0_41] : memref<416x4xbf16, #tpu.memory_space<vmem>>, vector<416x4xbf16>
    %cst_42 = arith.constant dense<0.000000e+00> : vector<2x4xf32>
    %82 = tpu.matmul %80, %81, %cst_42 {dimension_numbers = #tpu.dot_dimension_numbers<[1], [0], [0], [1], [0, 0, 1, 1], [], []>} : vector<2x416xbf16>, vector<416x4xbf16>, vector<2x4xf32> -> vector<2x4xf32>
    %c0_43 = arith.constant 0 : index
    %c0_44 = arith.constant 0 : index
    %83 = vector.load %arg13[%c0_43, %c0_44] : memref<1x4xf32, #tpu.memory_space<vmem>>, vector<1x4xf32>
    %84 = vector.broadcast %83 : vector<1x4xf32> to vector<2x4xf32>
    %85 = arith.addf %82, %84 : vector<2x4xf32>
    %c0_45 = arith.constant 0 : index
    %c0_46 = arith.constant 0 : index
    %c0_47 = arith.constant 0 : index
    %86 = vector.load %arg14[%c0_45, %c0_46, %c0_47] : memref<1x2x4xf32, #tpu.memory_space<vmem>>, vector<1x2x4xf32>
    %87 = vector.shape_cast %86 : vector<1x2x4xf32> to vector<2x4xf32>
    %88 = vector.shape_cast %85 : vector<2x4xf32> to vector<1x2x4xf32>
    tpu.vector_store %arg14[%c0_45, %c0_46, %c0_47], %88 {strides = array<i32>} : memref<1x2x4xf32, #tpu.memory_space<vmem>>, vector<1x2x4xf32>,
    return
  }
  func.func @transform_0(%arg0: i32) -> (i32, i32, i32) {
    %c0_i32 = arith.constant 0 : i32
    %c0_i32_0 = arith.constant 0 : i32
    %c0_i32_1 = arith.constant 0 : i32
    return %arg0, %c0_i32, %c0_i32_0 : i32, i32, i32
  }
  func.func @transform_1(%arg0: i32) -> (i32, i32) {
    %c0_i32 = arith.constant 0 : i32
    %c0_i32_0 = arith.constant 0 : i32
    %c0_i32_1 = arith.constant 0 : i32
    return %c0_i32, %c0_i32_0 : i32, i32
  }
  func.func @transform_2(%arg0: i32) -> (i32, i32) {
    %c0_i32 = arith.constant 0 : i32
    %c0_i32_0 = arith.constant 0 : i32
    %c0_i32_1 = arith.constant 0 : i32
    return %c0_i32, %c0_i32_0 : i32, i32
  }
  func.func @transform_3(%arg0: i32) -> (i32, i32) {
    %c0_i32 = arith.constant 0 : i32
    %c0_i32_0 = arith.constant 0 : i32
    %c0_i32_1 = arith.constant 0 : i32
    return %c0_i32, %c0_i32_0 : i32, i32
  }
  func.func @transform_4(%arg0: i32) -> (i32, i32) {
    %c0_i32 = arith.constant 0 : i32
    %c0_i32_0 = arith.constant 0 : i32
    %c0_i32_1 = arith.constant 0 : i32
    return %c0_i32, %c0_i32_0 : i32, i32
  }
  func.func @transform_5(%arg0: i32) -> (i32, i32) {
    %c0_i32 = arith.constant 0 : i32
    %c0_i32_0 = arith.constant 0 : i32
    %c0_i32_1 = arith.constant 0 : i32
    return %c0_i32, %c0_i32_0 : i32, i32
  }
  func.func @transform_6(%arg0: i32) -> (i32, i32) {
    %c0_i32 = arith.constant 0 : i32
    %c0_i32_0 = arith.constant 0 : i32
    %c0_i32_1 = arith.constant 0 : i32
    return %c0_i32, %c0_i32_0 : i32, i32
  }
  func.func @transform_7(%arg0: i32) -> (i32, i32) {
    %c0_i32 = arith.constant 0 : i32
    %c0_i32_0 = arith.constant 0 : i32
    %c0_i32_1 = arith.constant 0 : i32
    return %c0_i32, %c0_i32_0 : i32, i32
  }
  func.func @transform_8(%arg0: i32) -> (i32, i32) {
    %c0_i32 = arith.constant 0 : i32
    %c0_i32_0 = arith.constant 0 : i32
    %c0_i32_1 = arith.constant 0 : i32
    return %c0_i32, %c0_i32_0 : i32, i32
  }
  func.func @transform_9(%arg0: i32) -> (i32, i32) {
    %c0_i32 = arith.constant 0 : i32
    %c0_i32_0 = arith.constant 0 : i32
    %c0_i32_1 = arith.constant 0 : i32
    return %c0_i32, %c0_i32_0 : i32, i32
  }
  func.func @transform_10(%arg0: i32) -> (i32, i32) {
    %c0_i32 = arith.constant 0 : i32
    %c0_i32_0 = arith.constant 0 : i32
    %c0_i32_1 = arith.constant 0 : i32
    return %c0_i32, %c0_i32_0 : i32, i32
  }
  func.func @transform_11(%arg0: i32) -> (i32, i32) {
    %c0_i32 = arith.constant 0 : i32
    %c0_i32_0 = arith.constant 0 : i32
    %c0_i32_1 = arith.constant 0 : i32
    return %c0_i32, %c0_i32_0 : i32, i32
  }
  func.func @transform_12(%arg0: i32) -> (i32, i32) {
    %c0_i32 = arith.constant 0 : i32
    %c0_i32_0 = arith.constant 0 : i32
    %c0_i32_1 = arith.constant 0 : i32
    return %c0_i32, %c0_i32_0 : i32, i32
  }
  func.func @transform_13(%arg0: i32) -> (i32, i32, i32) {
    %c0_i32 = arith.constant 0 : i32
    %c0_i32_0 = arith.constant 0 : i32
    %c0_i32_1 = arith.constant 0 : i32
    return %arg0, %c0_i32, %c0_i32_0 : i32, i32, i32
  }
}

</mosaic_0001>

<bundles_post_ra>
// kernel: _lambda_.1
= control target key start
LH: loop header
LB: loop body
LE: loop exit
PB: predicated region body
PF: predicated region fallthrough
CT: control target
= control target key end

     0   :  { %18 = vsyncpa [#allocation3], 0  ;;  %s15248_s0 = inlined_call_operand.vmem [shape: bf16[4,126,220], index: 0, kind: input, shape index: {}]   ;;  %s15249_s1 = inlined_call_operand.vmem [shape: bf16[220,352], index: 1, kind: input, shape index: {}]   ;;  %s15250_s2 = inlined_call_operand.vmem [shape: f32[1,352], index: 2, kind: input, shape index: {}]   ;;  %s15251_s3 = inlined_call_operand.vmem [shape: bf16[352,32], index: 3, kind: input, shape index: {}]   ;;  %s15252_s4 = inlined_call_operand.vmem [shape: f32[1,32], index: 4, kind: input, shape index: {}]   ;;  %s15253_s5 = inlined_call_operand.vmem [shape: bf16[320,64], index: 5, kind: input, shape index: {}]   ;;  %s15254_s6 = inlined_call_operand.vmem [shape: f32[1,64], index: 6, kind: input, shape index: {}]   ;;  %s15255_s7 = inlined_call_operand.vmem [shape: bf16[128,832], index: 7, kind: input, shape index: {}]   ;;  %s15256_s8 = inlined_call_operand.vmem [shape: f32[1,832], index: 8, kind: input, shape index: {}]   ;;  %s15257_s9 = inlined_call_operand.vmem [shape: bf16[832,416], index: 9, kind: input, shape index: {}]   ;;  %s15258_s10 = inlined_call_operand.vmem [shape: f32[1,416], index: 10, kind: input, shape index: {}]   ;;  %s15259_s11 = inlined_call_operand.vmem [shape: bf16[416,4], index: 11, kind: input, shape index: {}]   ;;  %s15260_s12 = inlined_call_operand.vmem [shape: f32[1,4], index: 12, kind: input, shape index: {}]   ;;  %s15261_s13 = inlined_call_operand.hbm [shape: f32[2,2,4], index: 13, kind: output, shape index: {}]  }
   0x1   :  { %20 = vsyncpa [#allocation3 + $0x1], 0  ;;  %s11200_s25 = smov 0   ;;  %s11202_s26 = smov 0  }
   0x2   :  { %s11204_s27 = smov 0   ;;  %s11206_s28 = smov 0  }
   0x3 LB: > { %15278 = sst [smem:[#allocation5_spill]] %s11115_s27  ;;  %s11221_s29 = sadd.s32 4294967295, %s11119_s28   ;;  %s11119_s28 = sphi %s11206_s28, %s15340_s28   ;;  %s11115_s27 = sphi %s11204_s27, %s15342_s27   ;;  %s11111_s26 = sphi %s11202_s26, %s15344_s26   ;;  %s11107_s25 = sphi %s11200_s25, %s15343_s25  }
   0x4   : > { %s9289_s30 = sadd.s32 4294967294, %s11119_s28   ;;  %s11225_s14 = sadd.s32 1, %s11119_s28  }
   0x5   : > { %15279 = sst [smem:[#allocation6_spill]] %s11225_s14  ;;  %s311_s15 = sadd.s32 1, %s11115_s27 }
   0x6   : > { %s308_s16 = ssub.s32 %s11119_s28, %s11225_s14  ;;  %p321_p0 = scmp.ne.s32.totalorder %s11115_s27, %s11111_s26 }
   0x7   : > { %p309_p1 = scmp.eq.s32.totalorder %s308_s16, 0  ;;  %p322_p2 = scmp.eq.s32.totalorder %s11221_s29, 1 }
   0x8   : > { %p327_p3 = scmp.ne.s32.totalorder %s11111_s26, %s11107_s25  ;;  %p328_p4 = scmp.eq.s32.totalorder %s9289_s30, 1 }
   0x9   : > { %s11236_s17 = scalar_select %p309_p1, %s11115_s27, %s311_s15  }
   0xa   : > { %p11238_p5 = por %p322_p2, %p321_p0  ;;  %p11242_p6 = por %p328_p4, %p327_p3 }
   0xb   : > { %15280 = sst [smem:[#allocation7_spill]] %s11236_s17  ;;  %p9292_p7 = scmp.ge.s32.totalorder %s11119_s28, 1 }
   0xc   : > { %p392_p8 = scmp.lt.s32.totalorder %s11119_s28, 3 }
   0xe   : > { %p393_p9 = pnand %p9292_p7, %p392_p8 }
  0x10   : > { %396 = sbr.rel (%p393_p9) target bundleno = 2153 (0x869), region = 72 }
  0x17   : > { %v10278_v0 = vld [vmem:[%s15249_s1 + $0x4] ss:$12 sps:$4 sm:$0xff]   ;;  %v15265_v1 = vmov 0   ;;  %v10280_v2 = vld [vmem:[%s15249_s1 + $0x8] ss:$12 sps:$4 sm:$0xff]   ;;  %s9294_s23 = sshll.u32 %s11221_s29, 1  ;;  %v520_v22 = vlaneseq }
  0x18   : > { %2884 = vmatprep.subr.bf16.mxu1 %v15265_v1  ;;  %2691 = vmatprep.subr.bf16.mxu0 %v10278_v0  ;;  %v10281_v3 = vld [vmem:[%s15249_s1] ss:$12 sps:$4 sm:$0xff]   ;;  %v10282_v4 = vld [vmem:[%s15249_s1 + $0x1c] ss:$12 sps:$4 sm:$0xff]   ;;  %v10285_v6 = vld [vmem:[%s15249_s1 + $0x18] ss:$12 sps:$4 sm:$0xff]  }
  0x19   : > { %2885 = vmatpush1.bf16.msra.mxu1 %v10280_v2  ;;  %2692 = vmatpush1.bf16.msra.mxu0 %v10281_v3  ;;  %v10284_v5 = vld [vmem:[%s15249_s1 + $0x20] ss:$12 sps:$4 sm:$0xff]   ;;  %v10288_v8 = vld [vmem:[%s15249_s1 + $0x38] ss:$12 sps:$4 sm:$0xff]   ;;  %v10289_v9 = vld [vmem:[%s15249_s1 + $0x30] ss:$12 sps:$4 sm:$0xff]  }
  0x1a   : > { %2886 = vmatprep.subr.bf16.mxu1 %v15265_v1  ;;  %2693 = vmatprep.subr.bf16.mxu0 %v10282_v4  ;;  %v10286_v7 = vld [vmem:[%s15249_s1 + $0x34] ss:$12 sps:$4 sm:$0xff]   ;;  %v10290_v10 = vld [vmem:[%s15249_s1 + $0x4c] ss:$12 sps:$4 sm:$0xff]   ;;  %v10292_v11 = vld [vmem:[%s15249_s1 + $0x50] ss:$12 sps:$4 sm:$0xff]  }
  0x1b   : > { %v10293_v12 = vld [vmem:[%s15249_s1 + $0x48] ss:$12 sps:$4 sm:$0xff]   ;;  %v10294_v13 = vld [vmem:[%s15249_s1 + $0x64] ss:$12 sps:$4 sm:$0xff]   ;;  %v10297_v15 = vld [vmem:[%s15249_s1 + $0x60] ss:$12 sps:$4 sm:$0xff]  }
  0x1c   : > { %v10296_v14 = vld [vmem:[%s15249_s1 + $0x68] ss:$12 sps:$4 sm:$0xff]   ;;  %v10300_v17 = vld [vmem:[%s15249_s1 + $0x80] ss:$12 sps:$4 sm:$0xff]   ;;  %p438_p10 = scmp.lt.s32.totalorder %s9294_s23, 3  ;;  %v11322_v27 = vshrl.u32 %v520_v22, 7 }
  0x1d   : > { %2887 = vmatpush1.bf16.msra.mxu1 %v10284_v5  ;;  %2694 = vmatpush1.bf16.msra.mxu0 %v10285_v6  ;;  %v10298_v16 = vld [vmem:[%s15249_s1 + $0x7c] ss:$12 sps:$4 sm:$0xff]   ;;  %v10301_v18 = vld [vmem:[%s15249_s1 + $0x78] ss:$12 sps:$4 sm:$0xff]   ;;  %v10302_v19 = vld [vmem:[%s15249_s1 + $0x94] ss:$12 sps:$4 sm:$0xff]  }
  0x1e   : > { %2888 = vmatprep.subr.bf16.mxu1 %v15265_v1  ;;  %2695 = vmatprep.subr.bf16.mxu0 %v10286_v7  ;;  %v11122_v20 = vmov 1966171168   ;;  %v10304_v23 = vld [vmem:[%s15249_s1 + $0x98] ss:$12 sps:$4 sm:$0xff]   ;;  %s15346_s23 = smov (!%p438_p10, %s9294_s23), 3  ;;  %15283 = vst [vmem:[#allocation8_spill] sm:$0xff] %v11322_v27 }
  0x1f   : > { %v518_v21 = vunpack.c.l.s4 %v11122_v20  ;;  %v10305_v24 = vld [vmem:[%s15249_s1 + $0x90] ss:$12 sps:$4 sm:$0xff]   ;;  %v10306_v25 = vld [vmem:[%s15249_s1 + $0xac] ss:$12 sps:$4 sm:$0xff]   ;;  %s9914_s24 = sshll.u32 %s15346_s23, 7  ;;  %vm2681_vm0 = vcmask 1045504  }
  0x20   : > { %v10308_v28 = vld [vmem:[%s15249_s1 + $0xb0] ss:$12 sps:$4 sm:$0xff]   ;;  %v10309_v29 = vld [vmem:[%s15249_s1 + $0xa8] ss:$12 sps:$4 sm:$0xff]   ;;  %s11340_s23 = scalar_lea.vmem %s15248_s0, %s9914_s24  ;;  %v10313_v33 = vld [vmem:[%s15249_s1 + $0xc0] ss:$12 sps:$4 sm:$0xff]  }
  0x21   : > { %2889 = vmatpush1.bf16.msra.mxu1 %v10288_v8  ;;  %2696 = vmatpush1.bf16.msra.mxu0 %v10289_v9  ;;  %v519_v26 = vunpack.c.0.s8 %v518_v21  ;;  %v10310_v30 = vld [vmem:[%s15249_s1 + $0xc4] ss:$12 sps:$4 sm:$0xff]   ;;  %v10312_v31 = vld [vmem:[%s15249_s1 + $0xc8] ss:$12 sps:$4 sm:$0xff]   ;;  %v10316_v35 = vld [vmem:[%s15249_s1 + $0xe0] ss:$12 sps:$4 sm:$0xff]  }
  0x22   : > { %2890 = vmatprep.subr.bf16.mxu1 %v15265_v1  ;;  %2697 = vmatprep.subr.bf16.mxu0 %v10290_v10  ;;  %v10314_v34 = vld [vmem:[%s15249_s1 + $0xdc] ss:$12 sps:$4 sm:$0xff]   ;;  %v9297_v36 = vld.sshfl [vmem:[%s11340_s23] sm:$0xff pattern:$0x75316420]  ;;  %vm2632_vm1 = vcmask 752640  }
  0x23   : > { %v11343_v32 = vsub.s32 %v519_v26, %v11322_v27  ;;  %v10317_v37 = vld [vmem:[%s15249_s1 + $0xd8] ss:$12 sps:$4 sm:$0xff]   ;;  %v9298_v38 = vld.sshfl [vmem:[%s11340_s23 + $0x8] sm:$0xff pattern:$0x75316420]  ;;  %v516_v39 = vcombine.high %v9297_v36, %v9297_v36  ;;  %vm3852_vm3 = vcmask 785408  }
  0x24   : > { %v540_v41 = vcombine.high %v9298_v38, %v9298_v38  ;;  %v9299_v43 = vld.sshfl [vmem:[%s11340_s23 + $0x10] sm:$0xff pattern:$0x75316420]  ;;  %v9300_v45 = vld.sshfl [vmem:[%s11340_s23 + $0x18] sm:$0xff pattern:$0x75316420] }
  0x25   : > { %2891 = vmatpush1.bf16.msra.mxu1 %v10292_v11  ;;  %2698 = vmatpush1.bf16.msra.mxu0 %v10293_v12  ;;  %v523_v40 = vrot.slane %v9297_v36, %v11343_v32  ;;  %v547_v42 = vrot.slane %v9298_v38, %v11343_v32  ;;  %v530_v44 = vrot.slane %v516_v39, %v11343_v32  ;;  %v9301_v48 = vld.sshfl [vmem:[%s11340_s23 + $0x20] sm:$0xff pattern:$0x75316420]  ;;  %v10321_v61 = vld [vmem:[%s15249_s1 + $0xf0] ss:$12 sps:$4 sm:$0xff]   ;;  %s11124_s17 = smov 32  }
  0x26   : > { %2892 = vmatprep.subr.bf16.mxu1 %v15265_v1  ;;  %2699 = vmatprep.subr.bf16.mxu0 %v10294_v13  ;;  %v564_v46 = vcombine.high %v9299_v43, %v9299_v43  ;;  %v571_v47 = vrot.slane %v9299_v43, %v11343_v32  ;;  %v10318_v49 = vld [vmem:[%s15249_s1 + $0xf4] ss:$12 sps:$4 sm:$0xff]   ;;  %v554_v50 = vrot.slane %v540_v41, %v11343_v32  ;;  %v10320_v56 = vld [vmem:[%s15249_s1 + $0xf8] ss:$12 sps:$4 sm:$0xff]   ;;  %v10324_v10 = vld [vmem:[%s15249_s1 + $0x110] ss:$12 sps:$4 sm:$0xff]  }
  0x27   : > { %v588_v51 = vcombine.high %v9300_v45, %v9300_v45  ;;  %v595_v52 = vrot.slane %v9300_v45, %v11343_v32  ;;  %v1348_v53 = vcombine.low %v523_v40, %v530_v44  ;;  %v9329_v54 = vcombine.high %v523_v40, %v530_v44  ;;  %v10322_v2 = vld [vmem:[%s15249_s1 + $0x10c] ss:$12 sps:$4 sm:$0xff]   ;;  %v10326_v20 = vld [vmem:[%s15249_s1 + $0x124] ss:$12 sps:$4 sm:$0xff]   ;;  %s11125_s30 = smov 64   ;;  %s11126_s27 = smov 96  }
  0x28   : > { %v578_v55 = vrot.slane %v564_v46, %v11343_v32  ;;  %v1350_v57 = vcombine.low %v547_v42, %v554_v50  ;;  %v9330_v58 = vcombine.high %v547_v42, %v554_v50  ;;  %v612_v60 = vcombine.high %v9301_v48, %v9301_v48  ;;  %v10332_v21 = vld [vmem:[%s15249_s1 + $0x140] ss:$12 sps:$4 sm:$0x3f]   ;;  %v10330_v36 = vld [vmem:[%s15249_s1 + $0x13c] ss:$12 sps:$4 sm:$0x3f]  }
  0x29   : > { %2893 = vmatpush1.bf16.msra.mxu1 %v10296_v14  ;;  %2700 = vmatpush1.bf16.msra.mxu0 %v10297_v15  ;;  %v602_v59 = vrot.slane %v588_v51, %v11343_v32  ;;  %v1358_v62 = vrot.slane %v1348_v53, %v11343_v32  ;;  %v1365_v63 = vrot.slane %v9329_v54, %v11343_v32  ;;  %v9302_v15 = vld.sshfl [vmem:[%s11340_s23 + $0x28] sm:$0xff pattern:$0x75316420]  ;;  %v2689_v41 = vsel %vm2681_vm0, %v10332_v21, 0  ;;  %s434_s20 = sand.u32 1, %s11111_s26   ;;  %s9911_s14 = sshll.u32 %s11221_s29, 5 }
  0x2a   : > { %2894 = vmatprep.subr.bf16.mxu1 %v15265_v1  ;;  %2701 = vmatprep.subr.bf16.mxu0 %v10298_v16  ;;  %v1414_v0 = vcombine.low %v571_v47, %v578_v55  ;;  %v1372_v3 = vrot.slane %v1350_v57, %v11343_v32  ;;  %v1379_v4 = vrot.slane %v9330_v58, %v11343_v32  ;;  %v10325_v16 = vld [vmem:[%s15249_s1 + $0x108] ss:$12 sps:$4 sm:$0xff]   ;;  %v9304_v44 = vld.sshfl [vmem:[%s11340_s23 + $0x38] sm:$0xff pattern:$0x75316420]  ;;  %s9293_s21 = sshll.u32 %s434_s20, 1 }
  0x2b   : > { %v9331_v5 = vcombine.high %v571_v47, %v578_v55  ;;  %v1416_v6 = vcombine.low %v595_v52, %v602_v59  ;;  %v1381_v7 = vcombine.high %v1358_v62, %v1365_v63  ;;  %v9332_v8 = vcombine.high %v595_v52, %v602_v59  ;;  %v9305_v54 = vld.sshfl [vmem:[%s11340_s23 + $0x40] sm:$0xff pattern:$0x75316420]  ;;  %v9306_v59 = vld.sshfl [vmem:[%s11340_s23 + $0x48] sm:$0xff pattern:$0x75316420] }
  0x2c   : > { %v11390_v9 = vrot.slane %v1414_v0, %v11343_v32  ;;  %v1383_v11 = vcombine.high %v1372_v3, %v1379_v4  ;;  %v1380_v12 = vcombine.low %v1358_v62, %v1365_v63  ;;  %v684_v58 = vcombine.high %v9304_v44, %v9304_v44  ;;  %v10334_v0 = vld [vmem:[%s15251_s3 + $0x40] sm:$0xff]   ;;  %v10336_v21 = vld [vmem:[%s15251_s3 + $0x48] sm:$0xff]   ;;  %s9217_s29 = scalar_lea.sflag [#allocation3], %s434_s20 }
  0x2d   : > { %2895 = vmatpush1.bf16.msra.mxu1 %v10300_v17  ;;  %2702 = vmatpush1.bf16.msra.mxu0 %v10301_v18  ;;  %v11396_v13 = vrot.slane %v9331_v5, %v11343_v32  ;;  %v11399_v14 = vrot.slane %v1416_v6, %v11343_v32  ;;  %v1397_v17 = vrot.slane %v1381_v7, %v11343_v32 }
  0x2e   : > { %2896 = vmatprep.subr.bf16.mxu1 %v15265_v1  ;;  %2703 = vmatprep.subr.bf16.mxu0 %v10302_v19  ;;  %v1382_v18 = vcombine.low %v1372_v3, %v1379_v4  ;;  %v11408_v19 = vrot.slane %v9332_v8, %v11343_v32  ;;  %v1411_v22 = vrot.slane %v1383_v11, %v11343_v32 }
  0x2f   : > { %v1446_v39 = vcombine.low %v11390_v9, %v11396_v13  ;;  %v691_v63 = vrot.slane %v9304_v44, %v11343_v32  ;;  %v698_v3 = vrot.slane %v684_v58, %v11343_v32  ;;  %v708_v7 = vcombine.high %v9305_v54, %v9305_v54  ;;  %v9309_v44 = vld.sshfl [vmem:[%s11340_s23 + $0x60] sm:$0xff pattern:$0x75316420] }
  0x30   : > { %v1449_v26 = vcombine.high %v11399_v14, %v11408_v19  ;;  %v1404_v38 = vrot.slane %v1382_v18, %v11343_v32 }
  0x31   : > { %2897 = vmatpush1.bf16.msra.mxu1 %v10304_v23  ;;  %2704 = vmatpush1.bf16.msra.mxu0 %v10305_v24  ;;  %v619_v23 = vrot.slane %v9301_v48, %v11343_v32  ;;  %v626_v24 = vrot.slane %v612_v60, %v11343_v32  ;;  %v1456_v8 = vrot.slane %v1446_v39, %v11343_v32 }
  0x32   : > { %2898 = vmatprep.subr.bf16.mxu1 %v15265_v1  ;;  %2705 = vmatprep.subr.bf16.mxu0 %v10306_v25  ;;  %v1447_v25 = vcombine.high %v11390_v9, %v11396_v13  ;;  %v1477_v47 = vrot.slane %v1449_v26, %v11343_v32  ;;  %v1548_v9 = vcombine.low %v691_v63, %v698_v3 }
  0x33   : > { %v1480_v42 = vcombine.low %v619_v23, %v626_v24  ;;  %v9333_v43 = vcombine.high %v619_v23, %v626_v24  ;;  %v722_v13 = vrot.slane %v708_v7, %v11343_v32  ;;  %v739_v24 = vrot.slane %v9306_v59, %v11343_v32 }
  0x34   : > { %v1463_v46 = vrot.slane %v1447_v25, %v11343_v32  ;;  %v10342_v25 = vld [vmem:[%s15251_s3 + $0x80] sm:$0xff]  }
  0x35   : > { %2899 = vmatpush1.bf16.msra.mxu1 %v10308_v28  ;;  %2706 = vmatpush1.bf16.msra.mxu0 %v10309_v29  ;;  %v636_v28 = vcombine.high %v9302_v15, %v9302_v15  ;;  %v643_v29 = vrot.slane %v9302_v15, %v11343_v32  ;;  %v11450_v50 = vrot.slane %v1480_v42, %v11343_v32  ;;  %v9307_v15 = vld.sshfl [vmem:[%s11340_s23 + $0x50] sm:$0xff pattern:$0x75316420] }
  0x36   : > { %2900 = vmatprep.subr.bf16.mxu1 %v15265_v1  ;;  %2707 = vmatprep.subr.bf16.mxu0 %v10310_v30  ;;  %v9303_v30 = vld.sshfl [vmem:[%s11340_s23 + $0x30] sm:$0xff pattern:$0x75316420]  ;;  %v11453_v51 = vrot.slane %v9333_v43, %v11343_v32  ;;  %v1479_v6 = vcombine.low %v1463_v46, %v1477_v47  ;;  %v756_v39 = vcombine.high %v9307_v15, %v9307_v15 }
  0x37   : > { %v650_v40 = vrot.slane %v636_v28, %v11343_v32  ;;  %v660_v45 = vcombine.high %v9303_v30, %v9303_v30  ;;  %v667_v52 = vrot.slane %v9303_v30, %v11343_v32  ;;  %v9308_v30 = vld.sshfl [vmem:[%s11340_s23 + $0x58] sm:$0xff pattern:$0x75316420] }
  0x38   : > { %v1513_v62 = vcombine.high %v11450_v50, %v11453_v51  ;;  %v1512_v26 = vcombine.low %v11450_v50, %v11453_v51  ;;  %v10339_v50 = vld [vmem:[%s15251_s3 + $0x10] sm:$0xff]   ;;  %v787_v58 = vrot.slane %v9308_v30, %v11343_v32 }
  0x39   : > { %2901 = vmatpush1.bf16.msra.mxu1 %v10312_v31  ;;  %2708 = vmatpush1.bf16.msra.mxu0 %v10313_v33  ;;  %v10328_v31 = vld [vmem:[%s15249_s1 + $0x128] ss:$12 sps:$4 sm:$0xff]   ;;  %v10329_v33 = vld [vmem:[%s15249_s1 + $0x120] ss:$12 sps:$4 sm:$0xff]   ;;  %v1482_v48 = vcombine.low %v643_v29, %v650_v40  ;;  %v674_v53 = vrot.slane %v660_v45, %v11343_v32 }
  0x3a   : > { %2902 = vmatprep.subr.bf16.mxu1 %v15265_v1  ;;  %2709 = vmatprep.subr.bf16.mxu0 %v10314_v34  ;;  %v1413_v34 = vcombine.low %v1397_v17, %v1411_v22  ;;  %v1529_v17 = vrot.slane %v1513_v62, %v11343_v32  ;;  %v11500_v22 = vrot.slane %v1548_v9, %v11343_v32  ;;  %v10338_v45 = vld [vmem:[%s15251_s3 + $0x50] sm:$0xff]  }
  0x3b   : > { %v1546_v4 = vcombine.low %v667_v52, %v674_v53  ;;  %v9335_v5 = vcombine.high %v667_v52, %v674_v53  ;;  %v1522_v42 = vrot.slane %v1512_v26, %v11343_v32  ;;  %v763_v53 = vrot.slane %v9307_v15, %v11343_v32  ;;  %v10343_v15 = vld [vmem:[%s15251_s3 + $0x60] sm:$0xff]  }
  0x3c   : > { %9403 = vmatprep.mubr.msk.bf16.mxu1 %vm2632_vm1, %v1413_v34  ;;  %9387 = vmatprep.mubr.msk.bf16.mxu0 %vm2632_vm1, %v1413_v34 }
  0x3d   : > { %2903 = vmatpush1.bf16.msra.mxu1 %v10316_v35  ;;  %2710 = vmatpush1.bf16.msra.mxu0 %v10317_v37  ;;  %v1390_v35 = vrot.slane %v1380_v12, %v11343_v32  ;;  %v10333_v37 = vld [vmem:[%s15249_s1 + $0x138] ss:$12 sps:$4 sm:$0x3f]   ;;  %v715_v12 = vrot.slane %v9305_v54, %v11343_v32  ;;  %v770_v54 = vrot.slane %v756_v39, %v11343_v32 }
  0x3e   : > { %2904 = vmatprep.subr.bf16.mxu1 %v15265_v1  ;;  %2711 = vmatprep.subr.bf16.mxu0 %v10318_v49  ;;  %v9334_v49 = vcombine.high %v643_v29, %v650_v40  ;;  %v2683_v55 = vsel %vm2681_vm0, %v10333_v37, 0 }
  0x3f   : > { %v1412_v60 = vcombine.low %v1390_v35, %v1404_v38  ;;  %v1612_v29 = vcombine.low %v715_v12, %v722_v13  ;;  %v9337_v34 = vcombine.high %v715_v12, %v722_v13  ;;  %v10337_v35 = vld [vmem:[%s15251_s3 + $0x8] sm:$0xff]   ;;  %v10341_v12 = vld [vmem:[%s15251_s3 + $0x18] sm:$0xff]  }
  0x40   : > { %v11464_v57 = vrot.slane %v9334_v49, %v11343_v32  ;;  %v780_v49 = vcombine.high %v9308_v30, %v9308_v30  ;;  %v10344_v30 = vld [vmem:[%s15251_s3 + $0x20] sm:$0xff]  }
  0x41   : > { %2905 = vmatpush1.bf16.msra.mxu1 %v10320_v56  ;;  %2712 = vmatpush1.bf16.msra.mxu0 %v10321_v61  ;;  %v11461_v56 = vrot.slane %v1482_v48, %v11343_v32  ;;  %v1448_v61 = vcombine.low %v11399_v14, %v11408_v19  ;;  %v732_v14 = vcombine.high %v9306_v59, %v9306_v59 }
  0x42   : > { %2906 = vmatprep.subr.bf16.mxu1 %v15265_v1  ;;  %2713 = vmatprep.subr.bf16.mxu0 %v10322_v2  ;;  %v11490_v19 = vrot.slane %v1546_v4, %v11343_v32  ;;  %v11525_v43 = vrot.slane %v1612_v29, %v11343_v32  ;;  %v11532_v46 = vrot.slane %v9337_v34, %v11343_v32 }
  0x43   : > { %v1515_v2 = vcombine.high %v11461_v56, %v11464_v57  ;;  %v1470_v11 = vrot.slane %v1448_v61, %v11343_v32  ;;  %v746_v28 = vrot.slane %v732_v14, %v11343_v32  ;;  %v794_v59 = vrot.slane %v780_v49, %v11343_v32 }
  0x44   : > { %v1678_v4 = vcombine.low %v763_v53, %v770_v54 }
  0x45   : > { %2907 = vmatpush1.bf16.msra.mxu1 %v10324_v10  ;;  %2714 = vmatpush1.bf16.msra.mxu0 %v10325_v16  ;;  %v9336_v10 = vcombine.high %v691_v63, %v698_v3  ;;  %v10335_v16 = vld [vmem:[%s15251_s3] sm:$0xff]   ;;  %v1543_v18 = vrot.slane %v1515_v2, %v11343_v32  ;;  %v1614_v37 = vcombine.low %v739_v24, %v746_v28 }
  0x46   : > { %2908 = vmatprep.subr.bf16.mxu1 %v15265_v1  ;;  %2715 = vmatprep.subr.bf16.mxu0 %v10326_v20  ;;  %v11493_v20 = vrot.slane %v9335_v5, %v11343_v32  ;;  %v9338_v38 = vcombine.high %v739_v24, %v746_v28  ;;  %v1645_v63 = vcombine.high %v11525_v43, %v11532_v46  ;;  %v9313_v28 = vld.sshfl [vmem:[%s11340_s23 + $0x80] sm:$0xff pattern:$0x75316420] }
  0x47   : > { %v11503_v23 = vrot.slane %v9336_v10, %v11343_v32  ;;  %v1545_v40 = vcombine.low %v1529_v17, %v1543_v18  ;;  %v11535_v47 = vrot.slane %v1614_v37, %v11343_v32  ;;  %v804_v2 = vcombine.high %v9309_v44, %v9309_v44 }
  0x48   : > { %v11538_v48 = vrot.slane %v9338_v38, %v11343_v32  ;;  %v1578_v61 = vcombine.low %v11490_v19, %v11493_v20  ;;  %v9339_v5 = vcombine.high %v763_v53, %v770_v54  ;;  %v9340_v9 = vcombine.high %v787_v58, %v794_v59 }
  0x49   : > { %2909 = vmatpush1.bf16.msra.mxu1 %v10328_v31  ;;  %2716 = vmatpush1.bf16.msra.mxu0 %v10329_v33  ;;  %v1478_v31 = vcombine.low %v1456_v8, %v1470_v11  ;;  %v1514_v33 = vcombine.low %v11461_v56, %v11464_v57  ;;  %v10340_v56 = vld [vmem:[%s15251_s3 + $0x58] sm:$0xff]   ;;  %v1580_v62 = vcombine.low %v11500_v22, %v11503_v23 }
  0x4a   : > { %2910 = vmatprep.subr.bf16.mxu1 %v15265_v1  ;;  %9386 = vmatprep.subr.msk.bf16.mxu0 %vm2681_vm0, %v10330_v36  ;;  %v1579_v36 = vcombine.high %v11490_v19, %v11493_v20  ;;  %v1680_v8 = vcombine.low %v787_v58, %v794_v59  ;;  %v9312_v11 = vld.sshfl [vmem:[%s11340_s23 + $0x78] sm:$0x5f pattern:$0x75316420]  ;;  %v1588_v13 = vrot.slane %v1578_v61, %v11343_v32  ;;  %v10350_v20 = vld [vmem:[%s15251_s3 + $0x90] sm:$0xff]  }
  0x4b   : > { %v1536_v51 = vrot.slane %v1514_v33, %v11343_v32  ;;  %v1602_v14 = vrot.slane %v1580_v62, %v11343_v32  ;;  %v811_v18 = vrot.slane %v9309_v44, %v11343_v32  ;;  %v818_v19 = vrot.slane %v804_v2, %v11343_v32 }
  0x4c   : > { %v1595_v52 = vrot.slane %v1579_v36, %v11343_v32  ;;  %v11597_v26 = vrot.slane %v9340_v9, %v11343_v32  ;;  %v883_v33 = vrot.slane %v9312_v11, %v11343_v32  ;;  %v1646_v36 = vcombine.low %v11535_v47, %v11538_v48 }
  0x4d   : > { %2911 = vmatpush1.bf16.msra.mxu1 %v2689_v41  ;;  %2718 = vmatpush1.bf16.msra.mxu0 %v2683_v55  ;;  %v1581_v41 = vcombine.high %v11500_v22, %v11503_v23  ;;  %v9310_v55 = vld.sshfl [vmem:[%s11340_s23 + $0x68] sm:$0xff pattern:$0x75316420]  ;;  %v1544_v3 = vcombine.low %v1522_v42, %v1536_v51  ;;  %v11588_v22 = vrot.slane %v9339_v5, %v11343_v32 }
  0x4e   : > { %9915 = vmatprep.subr.bf16.mxu0 %v10334_v0  ;;  %10114 = vmatprep.subr.bf16.mxu1 %v10342_v25  ;;  %v1647_v0 = vcombine.high %v11535_v47, %v11538_v48  ;;  %v828_v10 = vcombine.high %v9310_v55, %v9310_v55  ;;  %v835_v23 = vrot.slane %v9310_v55, %v11343_v32  ;;  %v10346_v47 = vld [vmem:[%s15251_s3 + $0x68] sm:$0xff]   ;;  %v10348_v55 = vld [vmem:[%s15251_s3 + $0x70] sm:$0xff]  }
  0x4f   : > { %v1609_v57 = vrot.slane %v1581_v41, %v11343_v32  ;;  %v1610_v34 = vcombine.low %v1588_v13, %v1602_v14  ;;  %v1744_v37 = vcombine.low %v811_v18, %v818_v19  ;;  %v9341_v39 = vcombine.high %v811_v18, %v818_v19  ;;  %v10347_v51 = vld [vmem:[%s15251_s3 + $0x28] sm:$0xff]  }
  0x50   : > { %2917 = vmatmul.mubr.bf16.vlgmr.msra.gmra.mrb[0].mxu1 %v1412_v60  ;;  %2724 = vmatmul.mubr.bf16.vlgmr.msra.gmra.mrb[0].mxu0 %v1412_v60  ;;  %v10345_v60 = vld [vmem:[%s15251_s3 + $0x88] sm:$0xff]   ;;  %v1675_v17 = vrot.slane %v1647_v0, %v11343_v32  ;;  %v842_v24 = vrot.slane %v828_v10, %v11343_v32  ;;  %v891_v49 = vcombine.high %v883_v33, %v883_v33  ;;  %v9315_v10 = vld.sshfl [vmem:[%s11340_s23 + $0x90] sm:$0xff pattern:$0x75316420] }
  0x51   : > { %9404 = vmatprep.mubr.msk.bf16.mxu1 %vm2632_vm1, %v1479_v6  ;;  %9388 = vmatprep.mubr.msk.bf16.mxu0 %vm2632_vm1, %v1479_v6  ;;  %v9311_v6 = vld.sshfl [vmem:[%s11340_s23 + $0x70] sm:$0xff pattern:$0x75316420]  ;;  %v1611_v7 = vcombine.low %v1595_v52, %v1609_v57  ;;  %v1668_v53 = vrot.slane %v1646_v36, %v11343_v32  ;;  %v11627_v54 = vrot.slane %v1744_v37, %v11343_v32 }
  0x52   : > { %9916 = vmatpush3.bf16.msra.mxu0 %v10335_v16  ;;  %10115 = vmatpush3.bf16.msra.mxu1 %v10342_v25  ;;  %v1661_v16 = vrot.slane %v1645_v63, %v11343_v32  ;;  %v11594_v25 = vrot.slane %v1680_v8, %v11343_v32  ;;  %v852_v29 = vcombine.high %v9311_v6, %v9311_v6 }
  0x53   : > { %9917 = vmatprep.subr.bf16.mxu0 %v10336_v21  ;;  %10116 = vmatprep.subr.bf16.mxu1 %v10345_v60  ;;  %v11585_v21 = vrot.slane %v1678_v4, %v11343_v32  ;;  %v9342_v41 = vcombine.high %v835_v23, %v842_v24  ;;  %v899_v59 = vcombine.high %v9313_v28, %v9313_v28 }
  0x54   : > { %v1677_v38 = vcombine.low %v1661_v16, %v1675_v17  ;;  %v1713_v44 = vcombine.high %v11594_v25, %v11597_v26  ;;  %v1712_v5 = vcombine.low %v11594_v25, %v11597_v26 }
  0x55   : > { %v1711_v42 = vcombine.high %v11585_v21, %v11588_v22  ;;  %v11639_v58 = vrot.slane %v9342_v41, %v11343_v32  ;;  %v1710_v4 = vcombine.low %v11585_v21, %v11588_v22 }
  0x56   : > { %9918 = vmatpush3.bf16.msra.mxu0 %v10337_v35  ;;  %10117 = vmatpush3.bf16.msra.mxu1 %v10345_v60  ;;  %v1644_v35 = vcombine.low %v11525_v43, %v11532_v46  ;;  %v866_v43 = vrot.slane %v852_v29, %v11343_v32  ;;  %v9314_v46 = vld.sshfl [vmem:[%s11340_s23 + $0x88] sm:$0xff pattern:$0x75316420]  ;;  %v1741_v61 = vrot.slane %v1713_v44, %v11343_v32 }
  0x57   : > { %9919 = vmatprep.subr.bf16.mxu0 %v10338_v45  ;;  %v859_v45 = vrot.slane %v9311_v6, %v11343_v32  ;;  %10118 = vmatprep.subr.bf16.mxu1 %v10350_v20  ;;  %v1727_v60 = vrot.slane %v1711_v42, %v11343_v32  ;;  %v913_v6 = vrot.slane %v899_v59, %v11343_v32 }
  0x58   : > { %2925 = vmatmul.mubr.bf16.gmra.mrb[4].mxu1 %v1478_v31  ;;  %2734 = vmatmul.mubr.bf16.gmra.mrb[4].mxu0 %v1478_v31  ;;  %v876_v31 = vcombine.high %v9312_v11, %v9312_v11  ;;  %v1654_v52 = vrot.slane %v1644_v35, %v11343_v32  ;;  %v930_v11 = vrot.slane %v9314_v46, %v11343_v32 }
  0x59   : > { %9405 = vmatprep.mubr.msk.bf16.mxu1 %vm2632_vm1, %v1545_v40  ;;  %9389 = vmatprep.mubr.msk.bf16.mxu0 %vm2632_vm1, %v1545_v40  ;;  %v1746_v40 = vcombine.low %v835_v23, %v842_v24  ;;  %v1810_v62 = vcombine.low %v859_v45, %v866_v43  ;;  %v9343_v63 = vcombine.high %v859_v45, %v866_v43 }
  0x5a   : > { %9920 = vmatpush3.bf16.msra.mxu0 %v10339_v50  ;;  %v890_v48 = vrot.slane %v876_v31, %v11343_v32  ;;  %v906_v50 = vrot.slane %v9313_v28, %v11343_v32  ;;  %10119 = vmatpush3.bf16.msra.mxu1 %v10350_v20  ;;  %v1743_v13 = vcombine.low %v1727_v60, %v1741_v61 }
  0x5b   : > { %9921 = vmatprep.subr.bf16.mxu0 %v10340_v56  ;;  %v11633_v56 = vrot.slane %v9341_v39, %v11343_v32  ;;  %v11636_v57 = vrot.slane %v1746_v40, %v11343_v32  ;;  %v11662_v16 = vrot.slane %v1810_v62, %v11343_v32  ;;  %v11665_v17 = vrot.slane %v9343_v63, %v11343_v32  ;;  %v9317_v39 = vld.sshfl [vmem:[%s11340_s23 + $0xa0] sm:$0xff pattern:$0x75316420]  ;;  %v9318_v40 = vld.sshfl [vmem:[%s11340_s23 + $0xa8] sm:$0xff pattern:$0x75316420] }
  0x5c   : > { %v1812_v0 = vcombine.low %v883_v33, %v890_v48  ;;  %v1813_v2 = vcombine.low %v891_v49, %v906_v50  ;;  %v1720_v20 = vrot.slane %v1710_v4, %v11343_v32  ;;  %v1734_v21 = vrot.slane %v1712_v5, %v11343_v32 }
  0x5d   : > { %v1777_v8 = vcombine.high %v11627_v54, %v11633_v56  ;;  %v1779_v9 = vcombine.high %v11636_v57, %v11639_v58  ;;  %v914_v22 = vcombine.high %v906_v50, %v906_v50  ;;  %v915_v23 = vcombine.high %v913_v6, %v913_v6 }
  0x5e   : > { %9922 = vmatpush3.bf16.msra.mxu0 %v10341_v12  ;;  %v9316_v12 = vld.sshfl [vmem:[%s11340_s23 + $0x98] sm:$0xff pattern:$0x75316420]  ;;  %v11668_v18 = vrot.slane %v1812_v0, %v11343_v32  ;;  %v11671_v19 = vrot.slane %v1813_v2, %v11343_v32  ;;  %v938_v26 = vcombine.high %v930_v11, %v930_v11  ;;  %v947_v28 = vcombine.high %v9315_v10, %v9315_v10  ;;  %v9319_v2 = vld.sshfl [vmem:[%s11340_s23 + $0xb0] sm:$0xff pattern:$0x75316420] }
  0x5f   : > { %9923 = vmatprep.subr.bf16.mxu0 %v10343_v15  ;;  %v10349_v15 = vld [vmem:[%s15251_s3 + $0x30] sm:$0xff]   ;;  %v1793_v24 = vrot.slane %v1777_v8, %v11343_v32  ;;  %v1807_v25 = vrot.slane %v1779_v9, %v11343_v32  ;;  %v971_v31 = vcombine.high %v9316_v12, %v9316_v12  ;;  %v1776_v33 = vcombine.low %v11627_v54, %v11633_v56 }
  0x60   : > { %2933 = vmatmul.mubr.bf16.gmra.mrb[8].mxu1 %v1544_v3  ;;  %2744 = vmatmul.mubr.bf16.gmra.mrb[8].mxu0 %v1544_v3  ;;  %v923_v3 = vcombine.high %v9314_v46, %v9314_v46  ;;  %v1843_v35 = vcombine.high %v11662_v16, %v11665_v17  ;;  %v1845_v36 = vcombine.high %v11668_v18, %v11671_v19 }
  0x61   : > { %9406 = vmatprep.mubr.msk.bf16.mxu1 %vm2632_vm1, %v1611_v7  ;;  %9390 = vmatprep.mubr.msk.bf16.mxu0 %vm2632_vm1, %v1611_v7  ;;  %v1676_v7 = vcombine.low %v1654_v52, %v1668_v53  ;;  %v1876_v37 = vcombine.low %v913_v6, %v914_v22  ;;  %v1742_v41 = vcombine.low %v1720_v20, %v1734_v21  ;;  %v9320_v6 = vld.sshfl [vmem:[%s11340_s23 + $0xb8] sm:$0xff pattern:$0x75316420] }
  0x62   : > { %9924 = vmatpush3.bf16.msra.mxu0 %v10344_v30  ;;  %v937_v14 = vrot.slane %v923_v3, %v11343_v32  ;;  %v954_v30 = vrot.slane %v9315_v10, %v11343_v32  ;;  %v961_v44 = vrot.slane %v947_v28, %v11343_v32  ;;  %v1809_v45 = vcombine.low %v1793_v24, %v1807_v25 }
  0x63   : > { %9925 = vmatprep.subr.bf16.mxu0 %v10346_v47  ;;  %v978_v46 = vrot.slane %v9316_v12, %v11343_v32  ;;  %v985_v47 = vrot.slane %v971_v31, %v11343_v32  ;;  %v1786_v48 = vrot.slane %v1776_v33, %v11343_v32  ;;  %v1859_v50 = vrot.slane %v1843_v35, %v11343_v32 }
  0x64   : > { %v939_v29 = vcombine.high %v937_v14, %v937_v14  ;;  %v1878_v42 = vcombine.low %v937_v14, %v938_v26  ;;  %v11698_v52 = vrot.slane %v1876_v37, %v11343_v32  ;;  %v962_v54 = vcombine.high %v954_v30, %v954_v30 }
  0x65   : > { %v1019_v59 = vcombine.high %v9318_v40, %v9318_v40  ;;  %v986_v61 = vcombine.high %v978_v46, %v978_v46  ;;  %v987_v62 = vcombine.high %v985_v47, %v985_v47  ;;  %v1842_v63 = vcombine.low %v11662_v16, %v11665_v17 }
  0x66   : > { %9926 = vmatpush3.bf16.msra.mxu0 %v10347_v51  ;;  %v1879_v43 = vcombine.low %v939_v29, %v954_v30  ;;  %v1873_v51 = vrot.slane %v1845_v36, %v11343_v32  ;;  %v1900_v56 = vrot.slane %v1878_v42, %v11343_v32  ;;  %v1844_v0 = vcombine.low %v11668_v18, %v11671_v19 }
  0x67   : > { %9927 = vmatprep.subr.bf16.mxu0 %v10348_v55  ;;  %v995_v55 = vcombine.high %v9317_v39, %v9317_v39  ;;  %v1026_v4 = vrot.slane %v9318_v40, %v11343_v32  ;;  %v1033_v5 = vrot.slane %v1019_v59, %v11343_v32  ;;  %v1942_v9 = vcombine.low %v961_v44, %v962_v54 }
  0x68   : > { %2941 = vmatmul.mubr.bf16.gmra.mrb[12].mxu1 %v1610_v34  ;;  %2754 = vmatmul.mubr.bf16.gmra.mrb[12].mxu0 %v1610_v34  ;;  %v1778_v34 = vcombine.low %v11636_v57, %v11639_v58  ;;  %v963_v57 = vcombine.high %v961_v44, %v961_v44  ;;  %v1002_v58 = vrot.slane %v9317_v39, %v11343_v32  ;;  %v9321_v39 = vld.sshfl [vmem:[%s11340_s23 + $0xc0] sm:$0xff pattern:$0x75316420]  ;;  %v9322_v44 = vld.sshfl [vmem:[%s11340_s23 + $0xc8] sm:$0xff pattern:$0x75316420] }
  0x69   : > { %9407 = vmatprep.mubr.msk.bf16.mxu1 %vm2632_vm1, %v1677_v38  ;;  %9391 = vmatprep.mubr.msk.bf16.mxu0 %vm2632_vm1, %v1677_v38  ;;  %v1877_v38 = vcombine.low %v915_v23, %v930_v11  ;;  %v1907_v60 = vrot.slane %v1879_v43, %v11343_v32  ;;  %v1009_v3 = vrot.slane %v995_v55, %v11343_v32 }
  0x6a   : > { %9928 = vmatpush3.bf16.msra.mxu0 %v10349_v15  ;;  %v1800_v49 = vrot.slane %v1778_v34, %v11343_v32  ;;  %v1943_v10 = vcombine.low %v963_v57, %v978_v46  ;;  %v1875_v11 = vcombine.low %v1859_v50, %v1873_v51  ;;  %v1945_v14 = vcombine.low %v987_v62, %v1002_v58 }
  0x6b   : > { %v11701_v53 = vrot.slane %v1877_v38, %v11343_v32  ;;  %v1911_v12 = vcombine.high %v1900_v56, %v1907_v60  ;;  %v1852_v15 = vrot.slane %v1842_v63, %v11343_v32  ;;  %v1866_v16 = vrot.slane %v1844_v0, %v11343_v32 }
  0x6c   : > { %v1010_v17 = vcombine.high %v1002_v58, %v1002_v58  ;;  %v1043_v18 = vcombine.high %v9319_v2, %v9319_v2  ;;  %v1011_v19 = vcombine.high %v1009_v3, %v1009_v3  ;;  %v1034_v20 = vcombine.high %v1026_v4, %v1026_v4 }
  0x6d   : > { %v1909_v8 = vcombine.high %v11698_v52, %v11701_v53  ;;  %v1035_v21 = vcombine.high %v1033_v5, %v1033_v5  ;;  %v1050_v22 = vrot.slane %v9319_v2, %v11343_v32  ;;  %v1952_v24 = vrot.slane %v1942_v9, %v11343_v32  ;;  %v9323_v9 = vld.sshfl [vmem:[%s11340_s23 + $0xd0] sm:$0xff pattern:$0x75316420] }
  0x6e   : > { %v1959_v25 = vrot.slane %v1943_v10, %v11343_v32  ;;  %v1067_v26 = vcombine.high %v9320_v6, %v9320_v6  ;;  %v1939_v28 = vrot.slane %v1911_v12, %v11343_v32  ;;  %v1973_v30 = vrot.slane %v1945_v14, %v11343_v32 }
  0x6f   : > { %v1925_v23 = vrot.slane %v1909_v8, %v11343_v32  ;;  %v1908_v31 = vcombine.low %v11698_v52, %v11701_v53  ;;  %v1910_v33 = vcombine.low %v1900_v56, %v1907_v60  ;;  %v1057_v34 = vrot.slane %v1043_v18, %v11343_v32 }
  0x70   : > { %2949 = vmatmul.mubr.bf16.gmra.mrb[16].mxu1 %v1676_v7  ;;  %2764 = vmatmul.mubr.bf16.gmra.mrb[16].mxu0 %v1676_v7  ;;  %v1808_v7 = vcombine.low %v1786_v48, %v1800_v49  ;;  %v2008_v35 = vcombine.low %v1009_v3, %v1010_v17  ;;  %v2009_v36 = vcombine.low %v1011_v19, %v1026_v4  ;;  %v9324_v3 = vld.sshfl [vmem:[%s11340_s23 + $0xd8] sm:$0xff pattern:$0x75316420] }
  0x71   : > { %9408 = vmatprep.mubr.msk.bf16.mxu1 %vm2632_vm1, %v1743_v13  ;;  %9392 = vmatprep.mubr.msk.bf16.mxu0 %vm2632_vm1, %v1743_v13  ;;  %v1944_v13 = vcombine.low %v985_v47, %v986_v61  ;;  %v2010_v37 = vcombine.low %v1033_v5, %v1034_v20  ;;  %v2011_v38 = vcombine.low %v1035_v21, %v1050_v22 }
  0x72   : > { %v1874_v40 = vcombine.low %v1852_v15, %v1866_v16  ;;  %v1081_v42 = vrot.slane %v1067_v26, %v11343_v32  ;;  %v1975_v43 = vcombine.high %v1952_v24, %v1959_v25  ;;  %v1918_v47 = vrot.slane %v1908_v31, %v11343_v32 }
  0x73   : > { %v1966_v29 = vrot.slane %v1944_v13, %v11343_v32  ;;  %v1932_v48 = vrot.slane %v1910_v33, %v11343_v32  ;;  %v1058_v49 = vcombine.high %v1050_v22, %v1050_v22  ;;  %v1059_v50 = vcombine.high %v1057_v34, %v1057_v34 }
  0x74   : > { %v11740_v51 = vrot.slane %v2008_v35, %v11343_v32  ;;  %v11743_v52 = vrot.slane %v2009_v36, %v11343_v32  ;;  %v11746_v53 = vrot.slane %v2010_v37, %v11343_v32  ;;  %v11749_v54 = vrot.slane %v2011_v38, %v11343_v32  ;;  %v9326_v38 = vld.sshfl [vmem:[%s11340_s23 + $0xe8] sm:$0xff pattern:$0x75316420] }
  0x75   : > { %v1977_v46 = vcombine.high %v1966_v29, %v1973_v30  ;;  %v1083_v56 = vcombine.high %v1081_v42, %v1081_v42  ;;  %v1098_v57 = vrot.slane %v9321_v39, %v11343_v32  ;;  %v1091_v58 = vcombine.high %v9321_v39, %v9321_v39 }
  0x76   : > { %v1991_v59 = vrot.slane %v1975_v43, %v11343_v32  ;;  %v1115_v61 = vcombine.high %v9322_v44, %v9322_v44  ;;  %v1974_v62 = vcombine.low %v1952_v24, %v1959_v25  ;;  %v1976_v63 = vcombine.low %v1966_v29, %v1973_v30 }
  0x77   : > { %v2005_v60 = vrot.slane %v1977_v46, %v11343_v32  ;;  %v2074_v0 = vcombine.low %v1057_v34, %v1058_v49  ;;  %v2041_v4 = vcombine.high %v11740_v51, %v11743_v52  ;;  %v2043_v5 = vcombine.high %v11746_v53, %v11749_v54  ;;  %v9325_v34 = vld.sshfl [vmem:[%s11340_s23 + $0xe0] sm:$0xff pattern:$0x75316420] }
  0x78   : > { %2957 = vmatmul.mubr.bf16.gmra.mrb[20].mxu1 %v1742_v41  ;;  %2774 = vmatmul.mubr.bf16.gmra.mrb[20].mxu0 %v1742_v41  ;;  %v1074_v41 = vrot.slane %v9320_v6, %v11343_v32  ;;  %v1940_v6 = vcombine.low %v1918_v47, %v1932_v48  ;;  %v2077_v8 = vcombine.low %v1083_v56, %v1098_v57 }
  0x79   : > { %9409 = vmatprep.mubr.msk.bf16.mxu1 %vm2632_vm1, %v1809_v45  ;;  %9393 = vmatprep.mubr.msk.bf16.mxu0 %vm2632_vm1, %v1809_v45  ;;  %v1941_v45 = vcombine.low %v1925_v23, %v1939_v28  ;;  %v1105_v10 = vrot.slane %v1091_v58, %v11343_v32  ;;  %v1122_v12 = vrot.slane %v9322_v44, %v11343_v32 }
  0x7a   : > { %v1082_v55 = vcombine.high %v1074_v41, %v1074_v41  ;;  %v2075_v2 = vcombine.low %v1059_v50, %v1074_v41  ;;  %v1129_v13 = vrot.slane %v1115_v61, %v11343_v32  ;;  %v1984_v14 = vrot.slane %v1974_v62, %v11343_v32 }
  0x7b   : > { %v1998_v15 = vrot.slane %v1976_v63, %v11343_v32  ;;  %v11768_v16 = vrot.slane %v2074_v0, %v11343_v32  ;;  %v2057_v18 = vrot.slane %v2041_v4, %v11343_v32  ;;  %v2071_v19 = vrot.slane %v2043_v5, %v11343_v32  ;;  %v9327_v4 = vld.sshfl [vmem:[%s11340_s23 + $0xf0] sm:$0xff pattern:$0x75316420] }
  0x7c   : > { %v11771_v17 = vrot.slane %v2075_v2, %v11343_v32  ;;  %v1139_v20 = vcombine.high %v9323_v9, %v9323_v9  ;;  %v1163_v21 = vcombine.high %v9324_v3, %v9324_v3  ;;  %v2105_v23 = vrot.slane %v2077_v8, %v11343_v32 }
  0x7d   : > { %v1106_v24 = vcombine.high %v1098_v57, %v1098_v57  ;;  %v1107_v25 = vcombine.high %v1105_v10, %v1105_v10  ;;  %v1130_v26 = vcombine.high %v1122_v12, %v1122_v12  ;;  %v1131_v28 = vcombine.high %v1129_v13, %v1129_v13 }
  0x7e   : > { %v1146_v29 = vrot.slane %v9323_v9, %v11343_v32  ;;  %v2040_v30 = vcombine.low %v11740_v51, %v11743_v52  ;;  %v2042_v31 = vcombine.low %v11746_v53, %v11749_v54  ;;  %v2107_v33 = vcombine.high %v11768_v16, %v11771_v17 }
  0x7f   : > { %v1153_v35 = vrot.slane %v1139_v20, %v11343_v32  ;;  %v1170_v36 = vrot.slane %v9324_v3, %v11343_v32  ;;  %v1177_v37 = vrot.slane %v1163_v21, %v11343_v32  ;;  %v2006_v39 = vcombine.low %v1984_v14, %v1998_v15 }
  0x80   : > { %2965 = vmatmul.mubr.bf16.gmra.mrb[24].mxu1 %v1808_v7  ;;  %2784 = vmatmul.mubr.bf16.gmra.mrb[24].mxu0 %v1808_v7  ;;  %v2076_v7 = vcombine.low %v1081_v42, %v1082_v55  ;;  %v2140_v41 = vcombine.low %v1105_v10, %v1106_v24  ;;  %v2073_v42 = vcombine.low %v2057_v18, %v2071_v19 }
  0x81   : > { %9410 = vmatprep.mubr.msk.bf16.mxu1 %vm2632_vm1, %v1875_v11  ;;  %9394 = vmatprep.mubr.msk.bf16.mxu0 %vm2632_vm1, %v1875_v11  ;;  %v2007_v11 = vcombine.low %v1991_v59, %v2005_v60  ;;  %v2141_v44 = vcombine.low %v1107_v25, %v1122_v12  ;;  %v2143_v43 = vcombine.low %v1131_v28, %v1146_v29 }
  0x82   : > { %v2098_v22 = vrot.slane %v2076_v7, %v11343_v32  ;;  %v2050_v46 = vrot.slane %v2040_v30, %v11343_v32  ;;  %v2064_v47 = vrot.slane %v2042_v31, %v11343_v32  ;;  %v2123_v48 = vrot.slane %v2107_v33, %v11343_v32 }
  0x83   : > { %v1154_v49 = vcombine.high %v1146_v29, %v1146_v29  ;;  %v1155_v50 = vcombine.high %v1153_v35, %v1153_v35  ;;  %v1178_v51 = vcombine.high %v1170_v36, %v1170_v36  ;;  %v1179_v52 = vcombine.high %v1177_v37, %v1177_v37 }
  0x84   : > { %v1194_v53 = vrot.slane %v9325_v34, %v11343_v32  ;;  %v2150_v55 = vrot.slane %v2140_v41, %v11343_v32  ;;  %v1187_v56 = vcombine.high %v9325_v34, %v9325_v34  ;;  %v1211_v57 = vcombine.high %v9326_v38, %v9326_v38 }
  0x85   : > { %v2157_v58 = vrot.slane %v2141_v44, %v11343_v32  ;;  %v2171_v60 = vrot.slane %v2143_v43, %v11343_v32  ;;  %v2106_v61 = vcombine.low %v11768_v16, %v11771_v17  ;;  %v2108_v62 = vcombine.low %v2098_v22, %v2105_v23 }
  0x86   : > { %v2206_v63 = vcombine.low %v1153_v35, %v1154_v49  ;;  %v2207_v0 = vcombine.low %v1155_v50, %v1170_v36  ;;  %v2208_v2 = vcombine.low %v1177_v37, %v1178_v51  ;;  %v2209_v3 = vcombine.low %v1179_v52, %v1194_v53 }
  0x87   : > { %v2072_v5 = vcombine.low %v2050_v46, %v2064_v47  ;;  %v1218_v7 = vrot.slane %v9326_v38, %v11343_v32  ;;  %v1225_v8 = vrot.slane %v1211_v57, %v11343_v32  ;;  %v2173_v10 = vcombine.high %v2150_v55, %v2157_v58 }
  0x88   : > { %2973 = vmatmul.mubr.bf16.gmra.mrb[28].mxu1 %v1874_v40  ;;  %2794 = vmatmul.mubr.bf16.gmra.mrb[28].mxu0 %v1874_v40  ;;  %v2109_v40 = vcombine.high %v2098_v22, %v2105_v23  ;;  %v2116_v12 = vrot.slane %v2106_v61, %v11343_v32  ;;  %v2216_v14 = vrot.slane %v2206_v63, %v11343_v32  ;;  %v9328_v23 = vld.sshfl [vmem:[%s11340_s23 + $0xf8] sm:$0x5f pattern:$0x75316420]  ;;  %s15206_s23 = scalar_lea.hbm %s15261_s13, %s9911_s14 }
  0x89   : > { %9411 = vmatprep.mubr.msk.bf16.mxu1 %vm2632_vm1, %v1941_v45  ;;  %9395 = vmatprep.mubr.msk.bf16.mxu0 %vm2632_vm1, %v1941_v45  ;;  %v2142_v45 = vcombine.low %v1129_v13, %v1130_v26  ;;  %v2130_v13 = vrot.slane %v2108_v62, %v11343_v32  ;;  %v2223_v15 = vrot.slane %v2207_v0, %v11343_v32 }
  0x8a   : > { %v2137_v54 = vrot.slane %v2109_v40, %v11343_v32  ;;  %v2230_v16 = vrot.slane %v2208_v2, %v11343_v32  ;;  %v2237_v17 = vrot.slane %v2209_v3, %v11343_v32  ;;  %v1202_v18 = vcombine.high %v1194_v53, %v1194_v53 }
  0x8b   : > { %v2164_v59 = vrot.slane %v2142_v45, %v11343_v32  ;;  %v1226_v20 = vcombine.high %v1218_v7, %v1218_v7  ;;  %v1227_v21 = vcombine.high %v1225_v8, %v1225_v8  ;;  %v1242_v22 = vrot.slane %v9327_v4, %v11343_v32 }
  0x8c   : > { %v2139_v9 = vcombine.low %v2123_v48, %v2137_v54  ;;  %v2189_v24 = vrot.slane %v2173_v10, %v11343_v32  ;;  %v1235_v26 = vcombine.high %v9327_v4, %v9327_v4  ;;  %v2172_v28 = vcombine.low %v2150_v55, %v2157_v58 }
  0x8d   : > { %v2174_v29 = vcombine.low %v2164_v59, %v2171_v60  ;;  %v2239_v30 = vcombine.high %v2216_v14, %v2223_v15  ;;  %v2241_v31 = vcombine.high %v2230_v16, %v2237_v17  ;;  %v2138_v34 = vcombine.low %v2116_v12, %v2130_v13 }
  0x8e   : > { %v2274_v36 = vcombine.low %v1225_v8, %v1226_v20  ;;  %v2275_v37 = vcombine.low %v1227_v21, %v1242_v22  ;;  %v1259_v40 = vcombine.high %v9328_v23, %v9328_v23  ;;  %v1266_v41 = vrot.slane %v9328_v23, %v11343_v32  ;;  %v10352_v21 = vld [vmem:[%s15251_s3 + $0x38] sm:$0xff]   ;;  %v10354_v23 = vld [vmem:[%s15251_s3 + $0xa0] sm:$0xff]  }
  0x8f   : > { %v2196_v44 = vrot.slane %v2174_v29, %v11343_v32  ;;  %v2255_v45 = vrot.slane %v2239_v30, %v11343_v32  ;;  %v2269_v43 = vrot.slane %v2241_v31, %v11343_v32  ;;  %v1250_v50 = vcombine.high %v1242_v22, %v1242_v22 }
  0x90   : > { %2981 = vmatmul.mubr.bf16.gmra.mrb[32].mxu1 %v1940_v6  ;;  %2804 = vmatmul.mubr.bf16.gmra.mrb[32].mxu0 %v1940_v6  ;;  %v1201_v6 = vrot.slane %v1187_v56, %v11343_v32  ;;  %v2296_v48 = vrot.slane %v2274_v36, %v11343_v32  ;;  %v2303_v49 = vrot.slane %v2275_v37, %v11343_v32  ;;  %v11868_v29 = vsub.s32 2, %v11322_v27 }
  0x91   : > { %9412 = vmatprep.mubr.msk.bf16.mxu1 %vm2632_vm1, %v2007_v11  ;;  %9396 = vmatprep.mubr.msk.bf16.mxu0 %vm2632_vm1, %v2007_v11  ;;  %v2175_v11 = vcombine.high %v2164_v59, %v2171_v60  ;;  %v1273_v52 = vrot.slane %v1259_v40, %v11343_v32  ;;  %v1274_v53 = vcombine.high %v1266_v41, %v1266_v41  ;;  %v11874_v30 = vsub.s32 0, %v11322_v27 }
  0x92   : > { %v1203_v19 = vcombine.high %v1201_v6, %v1201_v6  ;;  %v2272_v33 = vcombine.low %v1201_v6, %v1202_v18  ;;  %v2238_v55 = vcombine.low %v2216_v14, %v2223_v15  ;;  %v2240_v56 = vcombine.low %v2230_v16, %v2237_v17  ;;  %v10351_v17 = vld [vmem:[%s15251_s3 + $0x78] sm:$0xff]   ;;  %15284 = vst [vmem:[#allocation9_spill] sm:$0xff] %v11868_v29 }
  0x93   : > { %v2203_v25 = vrot.slane %v2175_v11, %v11343_v32  ;;  %v2271_v59 = vcombine.low %v2255_v45, %v2269_v43  ;;  %v2307_v60 = vcombine.high %v2296_v48, %v2303_v49  ;;  %v2340_v62 = vcombine.low %v1273_v52, %v1274_v53  ;;  %v10353_v18 = vld [vmem:[%s15251_s3 + $0x98] sm:$0xff]   ;;  %9929 = vmatprep.subr.bf16.mxu0 %v10351_v17 }
  0x94   : > { %v2273_v35 = vcombine.low %v1203_v19, %v1218_v7  ;;  %v2282_v46 = vrot.slane %v2272_v33, %v11343_v32  ;;  %v2248_v63 = vrot.slane %v2238_v55, %v11343_v32  ;;  %v2262_v0 = vrot.slane %v2240_v56, %v11343_v32  ;;  %10120 = vmatprep.subr.bf16.mxu1 %v10353_v18 }
  0x95   : > { %v2205_v38 = vcombine.low %v2189_v24, %v2203_v25  ;;  %v2335_v4 = vrot.slane %v2307_v60, %v11343_v32  ;;  %v2361_v6 = vrot.slane %v2340_v62, %v11343_v32  ;;  %9930 = vmatpush3.bf16.msra.mxu0 %v10352_v21  ;;  %10121 = vmatpush3.bf16.msra.mxu1 %v10353_v18  ;;  %v11880_v33 = vsub.s32 1, %v11322_v27 }
  0x96   : > { %v2289_v47 = vrot.slane %v2273_v35, %v11343_v32  ;;  %v2270_v7 = vcombine.low %v2248_v63, %v2262_v0  ;;  %10122 = vmatprep.subr.bf16.mxu1 %v10354_v23  ;;  %15285 = vst [vmem:[#allocation10_spill] sm:$0xff] %v11874_v30 }
  0x97   : > { %v2364_v12 = vcombine.high %v2361_v6, %v2361_v6  ;;  %v2385_v25 = vrot.slane %v2361_v6, %v11343_v32  ;;  %15286 = vst [vmem:[#allocation11_spill] sm:$0xff] %v11880_v33 }
  0x98   : > { %2989 = vmatmul.mubr.bf16.gmra.mrb[36].mxu1 %v2006_v39  ;;  %2814 = vmatmul.mubr.bf16.gmra.mrb[36].mxu0 %v2006_v39  ;;  %v1249_v39 = vrot.slane %v1235_v26, %v11343_v32  ;;  %v2305_v57 = vcombine.high %v2282_v46, %v2289_v47  ;;  %v2304_v8 = vcombine.low %v2282_v46, %v2289_v47 }
  0x99   : > { %9413 = vmatprep.mubr.msk.bf16.mxu1 %vm2632_vm1, %v2073_v42  ;;  %9397 = vmatprep.mubr.msk.bf16.mxu0 %vm2632_vm1, %v2073_v42  ;;  %v2182_v42 = vrot.slane %v2172_v28, %v11343_v32  ;;  %v2392_v16 = vrot.slane %v2364_v12, %v11343_v32  ;;  %v10355_v28 = vld [vmem:[%s15251_s3 + $0xa8] sm:$0xff]  }
  0x9a   : > { %v1251_v51 = vcombine.high %v1249_v39, %v1249_v39  ;;  %v2338_v58 = vcombine.low %v1249_v39, %v1250_v50  ;;  %v2321_v2 = vrot.slane %v2305_v57, %v11343_v32  ;;  %v2314_v13 = vrot.slane %v2304_v8, %v11343_v32  ;;  %10123 = vmatpush3.bf16.msra.mxu1 %v10354_v23 }
  0x9b   : > { %v2204_v54 = vcombine.low %v2182_v42, %v2196_v44  ;;  %10124 = vmatprep.subr.bf16.mxu1 %v10355_v28 }
  0x9c   : > { %v2339_v61 = vcombine.low %v1251_v51, %v1266_v41  ;;  %v2347_v3 = vrot.slane %v2338_v58, %v11343_v32  ;;  %v2337_v10 = vcombine.low %v2321_v2, %v2335_v4 }
  0x9e   : > { %10125 = vmatpush3.bf16.msra.mxu1 %v10355_v28 }
  0xa0   : > { %2997 = vmatmul.mubr.bf16.gmra.mrb[40].mxu1 %v2072_v5  ;;  %2824 = vmatmul.mubr.bf16.gmra.mrb[40].mxu0 %v2072_v5  ;;  %v2354_v5 = vrot.slane %v2339_v61, %v11343_v32 }
  0xa1   : > { %9414 = vmatprep.mubr.msk.bf16.mxu1 %vm2632_vm1, %v2139_v9  ;;  %9398 = vmatprep.mubr.msk.bf16.mxu0 %vm2632_vm1, %v2139_v9  ;;  %v2306_v9 = vcombine.low %v2296_v48, %v2303_v49 }
  0xa2   : > { %v2363_v11 = vcombine.high %v2347_v3, %v2354_v5  ;;  %v2362_v20 = vcombine.low %v2347_v3, %v2354_v5 }
  0xa3   : > { %v2328_v14 = vrot.slane %v2306_v9, %v11343_v32 }
  0xa4   : > { %v2378_v15 = vrot.slane %v2363_v11, %v11343_v32  ;;  %v2371_v24 = vrot.slane %v2362_v20, %v11343_v32  ;;  %v1331_v32 = vld [vmem:[%s15250_s2] sm:$0x7] }
  0xa5   : > { %v2336_v19 = vcombine.low %v2314_v13, %v2328_v14  ;;  %v11877_v31 = vrot.slane %v1331_v32, %v11868_v29  ;;  %v11889_v39 = vrot.slane %v1331_v32, %v11880_v33 }
  0xa6   : > { %v2394_v22 = vcombine.low %v2378_v15, %v2392_v16  ;;  %v2393_v26 = vcombine.low %v2371_v24, %v2385_v25 }
  0xa8   : > { %3005 = vmatmul.mubr.bf16.gmra.mrb[44].mxu1 %v2138_v34  ;;  %2834 = vmatmul.mubr.bf16.gmra.mrb[44].mxu0 %v2138_v34  ;;  %v11883_v34 = vrot.slane %v1331_v32, %v11874_v30 }
  0xa9   : > { %9415 = vmatprep.mubr.msk.bf16.mxu1 %vm2632_vm1, %v2205_v38  ;;  %9399 = vmatprep.mubr.msk.bf16.mxu0 %vm2632_vm1, %v2205_v38 }
  0xb0   : > { %3013 = vmatmul.mubr.bf16.gmra.mrb[48].mxu1 %v2204_v54  ;;  %2844 = vmatmul.mubr.bf16.gmra.mrb[48].mxu0 %v2204_v54 }
  0xb1   : > { %9416 = vmatprep.mubr.msk.bf16.mxu1 %vm2632_vm1, %v2271_v59  ;;  %9400 = vmatprep.mubr.msk.bf16.mxu0 %vm2632_vm1, %v2271_v59 }
  0xb8   : > { %3021 = vmatmul.mubr.bf16.gmra.mrb[52].mxu1 %v2270_v7  ;;  %2854 = vmatmul.mubr.bf16.gmra.mrb[52].mxu0 %v2270_v7 }
  0xb9   : > { %9417 = vmatprep.mubr.msk.bf16.mxu1 %vm2632_vm1, %v2337_v10  ;;  %9401 = vmatprep.mubr.msk.bf16.mxu0 %vm2632_vm1, %v2337_v10 }
  0xc0   : > { %3029 = vmatmul.mubr.bf16.gmra.mrb[56].mxu1 %v2336_v19  ;;  %2864 = vmatmul.mubr.bf16.gmra.mrb[56].mxu0 %v2336_v19 }
  0xc1   : > { %9418 = vmatprep.mubr.msk.bf16.mxu1 %vm2632_vm1, %v2394_v22  ;;  %9402 = vmatprep.mubr.msk.bf16.mxu0 %vm2632_vm1, %v2394_v22 }
  0xc8   : > { %3037 = vmatmul.mubr.bf16.gmra.mrb[60].mxu1 %v2393_v26  ;;  %2874 = vmatmul.mubr.bf16.gmra.mrb[60].mxu0 %v2393_v26 }
 0x123   : > { %v2918_v35 = vpop.f32.mrb[0].mxu1  ;;  %v2725_v37 = vpop.f32.mrb[0].mxu0 }
 0x124   : > { %v11886_v36 = vadd.f32 %v2918_v35, %v11877_v31  ;;  %v2920_v38 = vpop.f32.mrb[1].mxu1  ;;  %v11892_v40 = vadd.f32 %v2725_v37, %v11883_v34  ;;  %v2727_v41 = vpop.f32.mrb[1].mxu0 }
 0x125   : > { %v2921_v42 = vpop.f32.mrb[2].mxu1  ;;  %v2729_v43 = vpop.f32.mrb[2].mxu0  ;;  %v11903_v51 = vadd.f32 %v2727_v41, %v11889_v39 }
 0x126   : > { %v3143_v44 = vmin.f32 %v11886_v36, 0.0  ;;  %v11896_v45 = vadd.f32 %v2921_v42, %v11877_v31  ;;  %v2923_v46 = vpop.f32.mrb[3].mxu1  ;;  %v3141_v47 = vmin.f32 %v11892_v40, 0.0  ;;  %v11900_v48 = vadd.f32 %v2729_v43, %v11883_v34  ;;  %v2731_v49 = vpop.f32.mrb[3].mxu0 }
 0x127   : > { %v11908_v55 = vadd.f32 %v2731_v49, %v11889_v39  ;;  %v3142_v59 = vmin.f32 %v11903_v51, 0.0  ;;  %vm3047_vm2 = vcmp.gt.f32.partialorder %v11886_v36, 0.0  ;;  %vm3045_vm4 = vcmp.gt.f32.partialorder %v11892_v40, 0.0 }
 0x128   : > { %v3241_v50 = vmul.f32 1.442695, %v3143_v44  ;;  %v3237_v52 = vmul.f32 1.442695, %v3141_v47  ;;  %v3146_v53 = vmin.f32 %v11896_v45, 0.0  ;;  %v3144_v54 = vmin.f32 %v11900_v48, 0.0 }
 0x129   : > { %v3145_v63 = vmin.f32 %v11908_v55, 0.0  ;;  %v3239_v8 = vmul.f32 1.442695, %v3142_v59  ;;  %vm3050_vm5 = vcmp.gt.f32.partialorder %v11896_v45, 0.0  ;;  %vm3048_vm6 = vcmp.gt.f32.partialorder %v11900_v48, 0.0 }
 0x12a   : > { %10794 = vpow2.f32 %v3241_v50  ;;  %v3247_v56 = vmul.f32 1.442695, %v3146_v53  ;;  %v3243_v57 = vmul.f32 1.442695, %v3144_v54  ;;  %vm3046_vm9 = vcmp.gt.f32.partialorder %v11903_v51, 0.0 }
 0x12b   : > { %10796 = vpow2.f32 %v3237_v52  ;;  %v2926_v58 = vpop.f32.mrb[4].mxu1  ;;  %v2735_v61 = vpop.f32.mrb[4].mxu0  ;;  %v3245_v10 = vmul.f32 1.442695, %v3145_v63  ;;  %vm3049_vm10 = vcmp.gt.f32.partialorder %v11908_v55, 0.0 }
 0x12c   : > { %v11912_v60 = vadd.f32 %v2926_v58, %v11877_v31  ;;  %v2928_v62 = vpop.f32.mrb[5].mxu1  ;;  %10798 = vpow2.f32 %v3247_v56  ;;  %v2737_v0 = vpop.f32.mrb[5].mxu0  ;;  %v11920_v11 = vadd.f32 %v2735_v61, %v11883_v34 }
 0x12d   : > { %v2929_v2 = vpop.f32.mrb[6].mxu1  ;;  %10800 = vpow2.f32 %v3243_v57  ;;  %v2739_v4 = vpop.f32.mrb[6].mxu0  ;;  %v11924_v13 = vadd.f32 %v2737_v0, %v11889_v39 }
 0x12e   : > { %v3149_v3 = vmin.f32 %v11912_v60, 0.0  ;;  %v2931_v5 = vpop.f32.mrb[7].mxu1  ;;  %v11917_v6 = vadd.f32 %v2929_v2, %v11877_v31  ;;  %v2741_v7 = vpop.f32.mrb[7].mxu0  ;;  %v3147_v22 = vmin.f32 %v11920_v11, 0.0  ;;  %v11934_v26 = vadd.f32 %v2739_v4, %v11883_v34 }
 0x12f   : > { %v11927_v17 = vadd.f32 %v2741_v7, %v11889_v39  ;;  %v3148_v41 = vmin.f32 %v11924_v13, 0.0  ;;  %vm3053_vm7 = vcmp.gt.f32.partialorder %v11912_v60, 0.0  ;;  %vm3052_vm11 = vcmp.gt.f32.partialorder %v11924_v13, 0.0 }
 0x130   : > { %v3253_v9 = vmul.f32 1.442695, %v3149_v3  ;;  %v3152_v12 = vmin.f32 %v11917_v6, 0.0  ;;  %v3249_v54 = vmul.f32 1.442695, %v3147_v22  ;;  %v3150_v56 = vmin.f32 %v11934_v26, 0.0 }
 0x131   : > { %v3151_v46 = vmin.f32 %v11927_v17, 0.0  ;;  %v3251_v61 = vmul.f32 1.442695, %v3148_v41  ;;  %vm3056_vm8 = vcmp.gt.f32.partialorder %v11917_v6, 0.0  ;;  %vm3051_vm14 = vcmp.gt.f32.partialorder %v11920_v11, 0.0 }
 0x132   : > { %10802 = vpow2.f32 %v3253_v9  ;;  %v3259_v16 = vmul.f32 1.442695, %v3152_v12  ;;  %vm3055_vm15 = vcmp.gt.f32.partialorder %v11927_v17, 0.0  ;;  %vm3054_vm0 = vcmp.gt.f32.partialorder %v11934_v26, 0.0 }
 0x133   : > { %v2934_v14 = vpop.f32.mrb[8].mxu1  ;;  %10804 = vpow2.f32 %v3239_v8  ;;  %v2745_v19 = vpop.f32.mrb[8].mxu0  ;;  %v3257_v2 = vmul.f32 1.442695, %v3151_v46 }
 0x134   : > { %v10795_v15 = vpop.eup %10794  ;;  %v11930_v18 = vadd.f32 %v2934_v14, %v11877_v31  ;;  %v2936_v20 = vpop.f32.mrb[9].mxu1  ;;  %10806 = vpow2.f32 %v3245_v10  ;;  %v11964_v7 = vadd.f32 %v2745_v19, %v11883_v34 }
 0x135   : > { %v10797_v21 = vpop.eup %10796  ;;  %v2747_v23 = vpop.f32.mrb[9].mxu0  ;;  %v9421_v25 = vadd.f32 -1.0, %v10795_v15  ;;  %10808 = vpow2.f32 %v3259_v16 }
 0x136   : > { %v2937_v24 = vpop.f32.mrb[10].mxu1  ;;  %v3155_v28 = vmin.f32 %v11930_v18, 0.0  ;;  %v11937_v32 = vpop.f32.mrb[10].mxu0  ;;  %v9419_v38 = vadd.f32 -1.0, %v10797_v21  ;;  %v11973_v21 = vadd.f32 %v2747_v23, %v11889_v39  ;;  %vm3059_vm12 = vcmp.gt.f32.partialorder %v11930_v18, 0.0 }
 0x137   : > { %v2939_v35 = vpop.f32.mrb[11].mxu1  ;;  %v10799_v37 = vpop.eup %10798  ;;  %v11946_v50 = vadd.f32 %v2937_v24, %v11877_v31  ;;  %v3527_v52 = vsel %vm3047_vm2, %v11886_v36, %v9421_v25  ;;  %v3153_v24 = vmin.f32 %v11964_v7, 0.0  ;;  %v11985_v23 = vadd.f32 %v11937_v32, %v11883_v34 }
 0x138   : > { %v2751_v42 = vpop.f32.mrb[11].mxu0  ;;  %v10801_v44 = vpop.eup %10800  ;;  %v9424_v43 = vadd.f32 -1.0, %v10799_v37  ;;  %v3265_v49 = vmul.f32 1.442695, %v3155_v28  ;;  %v11952_v57 = vsel %vm3045_vm4, %v11892_v40, %v9419_v38  ;;  %vm3057_vm4 = vcmp.gt.f32.partialorder %v11964_v7, 0.0 }
 0x139   : > { %v9422_v47 = vadd.f32 -1.0, %v10801_v44  ;;  %v11978_v25 = vadd.f32 %v2751_v42, %v11889_v39  ;;  %vm3062_vm13 = vcmp.gt.f32.partialorder %v11946_v50, 0.0 }
 0x13a   : > { %v3530_v53 = vsel %vm3050_vm5, %v11896_v45, %v9424_v43  ;;  %10810 = vpow2.f32 %v3265_v49  ;;  %v3158_v45 = vmin.f32 %v11946_v50, 0.0  ;;  %v3154_v43 = vmin.f32 %v11973_v21, 0.0 }
 0x13b   : > { %v3623_v58 = vpack.c.bf16 %v3530_v53, %v3527_v52  ;;  %v11955_v59 = vsel %vm3048_vm6, %v11900_v48, %v9422_v47  ;;  %v2942_v62 = vpop.f32.mrb[12].mxu1  ;;  %v2755_v36 = vpop.f32.mrb[12].mxu0  ;;  %10812 = vpow2.f32 %v3249_v54  ;;  %v3255_v48 = vmul.f32 1.442695, %v3150_v56 }
 0x13c   : > { %v10803_v63 = vpop.eup %10802  ;;  %v3621_v0 = vpack.c.bf16 %v11955_v59, %v11952_v57  ;;  %v2944_v3 = vpop.f32.mrb[13].mxu1  ;;  %10814 = vpow2.f32 %v3251_v61  ;;  %v3271_v12 = vmul.f32 1.442695, %v3158_v45  ;;  %v11969_v14 = vadd.f32 %v2942_v62, %v11877_v31 }
 0x13d   : > { %10126 = vmatprep.mubr.msk.bf16.mxu1 %vm3852_vm3, %v3623_v58  ;;  %v11961_v40 = vpop.f32.mrb[13].mxu0  ;;  %v2945_v4 = vpop.f32.mrb[14].mxu1  ;;  %v9427_v10 = vadd.f32 -1.0, %v10803_v63  ;;  %10816 = vpow2.f32 %v3257_v2  ;;  %v3156_v56 = vmin.f32 %v11985_v23, 0.0  ;;  %v3261_v63 = vmul.f32 1.442695, %v3153_v24 }
 0x13e   : > { %v10805_v5 = vpop.eup %10804  ;;  %v11966_v8 = vpop.f32.mrb[14].mxu0  ;;  %10818 = vpow2.f32 %v3271_v12  ;;  %v3161_v28 = vmin.f32 %v11969_v14, 0.0  ;;  %v11989_v47 = vadd.f32 %v2945_v4, %v11877_v31  ;;  %v3263_v2 = vmul.f32 1.442695, %v3154_v43 }
 0x13f   : > { %v10807_v9 = vpop.eup %10806  ;;  %v2947_v15 = vpop.f32.mrb[15].mxu1  ;;  %v9420_v19 = vadd.f32 -1.0, %v10805_v5  ;;  %10820 = vpow2.f32 %v3255_v48  ;;  %v3533_v37 = vsel %vm3053_vm7, %v11912_v60, %v9427_v10  ;;  %v12011_v5 = vadd.f32 %v2755_v36, %v11883_v34 }
 0x140   : > { %v2761_v16 = vpop.f32.mrb[15].mxu0  ;;  %v10809_v20 = vpop.eup %10808  ;;  %v9423_v35 = vadd.f32 -1.0, %v10807_v9  ;;  %v3277_v46 = vmul.f32 1.442695, %v3161_v28  ;;  %v3164_v58 = vmin.f32 %v11989_v47, 0.0  ;;  %v12021_v36 = vadd.f32 %v11961_v40, %v11889_v39 }
 0x141   : > { %v9430_v22 = vadd.f32 -1.0, %v10809_v20  ;;  %v3526_v3 = vsel %vm3046_vm9, %v11903_v51, %v9420_v19  ;;  %v12024_v19 = vadd.f32 %v2761_v16, %v11889_v39  ;;  %v12035_v16 = vadd.f32 %v11966_v8, %v11883_v34 }
 0x142   : > { %10822 = vpow2.f32 %v3277_v46  ;;  %v3529_v45 = vsel %vm3049_vm10, %v11908_v55, %v9423_v35  ;;  %v3283_v48 = vmul.f32 1.442695, %v3164_v58  ;;  %v3267_v55 = vmul.f32 1.442695, %v3156_v56 }
 0x143   : > { %v3536_v38 = vsel %vm3056_vm8, %v11917_v6, %v9430_v22  ;;  %v2950_v41 = vpop.f32.mrb[16].mxu1  ;;  %v11991_v42 = vpop.f32.mrb[16].mxu0  ;;  %v3157_v6 = vmin.f32 %v11978_v25, 0.0  ;;  %v3622_v9 = vpack.c.bf16 %v3529_v45, %v3526_v3  ;;  %v3160_v8 = vmin.f32 %v12021_v36, 0.0 }
 0x144   : > { %v3626_v44 = vpack.c.bf16 %v3536_v38, %v3533_v37  ;;  %v2952_v49 = vpop.f32.mrb[17].mxu1  ;;  %v11993_v52 = vpop.f32.mrb[17].mxu0  ;;  %v12014_v10 = vadd.f32 %v2950_v41, %v11877_v31  ;;  %10824 = vpow2.f32 %v3283_v48  ;;  %v3162_v3 = vmin.f32 %v12035_v16, 0.0 }
 0x145   : > { %v11995_v60 = vpop.f32.mrb[18].mxu1  ;;  %v12000_v32 = vpop.f32.mrb[18].mxu0  ;;  %v3269_v51 = vmul.f32 1.442695, %v3157_v6  ;;  %3933 = vmatprep.mubr.bf16.mxu0 %v3622_v9  ;;  %10826 = vpow2.f32 %v3261_v63  ;;  %v3275_v48 = vmul.f32 1.442695, %v3160_v8 }
 0x146   : > { %10127 = vmatmul.mubr.msk.bf16.vlgmr.msra.gmra.mrb[64].mxu1 %vm3852_vm3, %v3626_v44  ;;  %v2955_v53 = vpop.f32.mrb[19].mxu1  ;;  %v10811_v54 = vpop.eup %10810  ;;  %3934 = vmatmul.mubr.bf16.vlgmr.msra.gmra.mrb[64].mxu0 %v3621_v0  ;;  %v3167_v37 = vmin.f32 %v12014_v10, 0.0  ;;  %10828 = vpow2.f32 %v3263_v2  ;;  %v3159_v44 = vmin.f32 %v12011_v5, 0.0  ;;  %vm3065_vm1 = vcmp.gt.f32.partialorder %v11969_v14, 0.0 }
 0x147   : > { %v12005_v61 = vpop.f32.mrb[19].mxu0  ;;  %v10813_v62 = vpop.eup %10812  ;;  %v9433_v15 = vadd.f32 -1.0, %v10811_v54  ;;  %10830 = vpow2.f32 %v3269_v51  ;;  %v3163_v53 = vmin.f32 %v12024_v19, 0.0  ;;  %vm3068_vm2 = vcmp.gt.f32.partialorder %v11989_v47, 0.0 }
 0x148   : > { %v10815_v4 = vpop.eup %10814  ;;  %v3289_v0 = vmul.f32 1.442695, %v3167_v37  ;;  %10832 = vpow2.f32 %v3267_v55  ;;  %v3273_v2 = vmul.f32 1.442695, %v3159_v44  ;;  %vm3058_vm5 = vcmp.gt.f32.partialorder %v11973_v21, 0.0 }
 0x149   : > { %v10817_v12 = vpop.eup %10816  ;;  %v9426_v28 = vadd.f32 -1.0, %v10815_v4  ;;  %v3539_v57 = vsel %vm3059_vm12, %v11930_v18, %v9433_v15  ;;  %v9425_v18 = vadd.f32 -1.0, %v10813_v62  ;;  %v12064_v62 = vadd.f32 %v11991_v42, %v11883_v34 }
 0x14a   : > { %v10819_v20 = vpop.eup %10818  ;;  %v9429_v41 = vadd.f32 -1.0, %v10817_v12  ;;  %10834 = vpow2.f32 %v3289_v0  ;;  %v3281_v9 = vmul.f32 1.442695, %v3163_v53  ;;  %v12072_v12 = vadd.f32 %v11993_v52, %v11889_v39 }
 0x14b   : > { %v2958_v22 = vpop.f32.mrb[20].mxu1  ;;  %v10821_v24 = vpop.eup %10820  ;;  %v9436_v35 = vadd.f32 -1.0, %v10819_v20  ;;  %v3531_v42 = vsel %vm3051_vm14, %v11920_v11, %v9425_v18  ;;  %10836 = vpow2.f32 %v3273_v2  ;;  %v3279_v52 = vmul.f32 1.442695, %v3162_v3 }
 0x14c   : > { %v12030_v38 = vpop.f32.mrb[20].mxu0  ;;  %v2960_v40 = vpop.f32.mrb[21].mxu1  ;;  %v9428_v58 = vadd.f32 -1.0, %v10821_v24  ;;  %v3535_v45 = vsel %vm3055_vm15, %v11927_v17, %v9429_v41  ;;  %v12085_v37 = vadd.f32 %v2958_v22, %v11877_v31  ;;  %v3166_v18 = vmin.f32 %v12072_v12, 0.0 }
 0x14d   : > { %v12037_v43 = vpop.f32.mrb[21].mxu0  ;;  %v3542_v59 = vsel %vm3062_vm13, %v11946_v50, %v9436_v35  ;;  %v12045_v46 = vpop.f32.mrb[22].mxu1  ;;  %v12056_v50 = vadd.f32 %v11995_v60, %v11877_v31  ;;  %v3532_v60 = vsel %vm3052_vm11, %v11924_v13, %v9426_v28  ;;  %v12109_v2 = vadd.f32 %v12000_v32, %v11883_v34 }
 0x14e   : > { %v12047_v49 = vpop.f32.mrb[22].mxu0  ;;  %v3629_v6 = vpack.c.bf16 %v3542_v59, %v3539_v57  ;;  %v2963_v54 = vpop.f32.mrb[23].mxu1  ;;  %v3625_v17 = vpack.c.bf16 %v3535_v45, %v3532_v60  ;;  %v3534_v55 = vsel %vm3054_vm0, %v11934_v26, %v9428_v58  ;;  %v3165_v57 = vmin.f32 %v12064_v62, 0.0 }
 0x14f   : > { %v12051_v56 = vpop.f32.mrb[23].mxu0  ;;  %v10823_v63 = vpop.eup %10822  ;;  %v3170_v4 = vmin.f32 %v12056_v50, 0.0  ;;  %v3624_v35 = vpack.c.bf16 %v3534_v55, %v3531_v42  ;;  %v12094_v26 = vadd.f32 %v12005_v61, %v11889_v39  ;;  %v3173_v22 = vmin.f32 %v12085_v37, 0.0 }
 0x150   : > { %10130 = vmatprep.mubr.msk.bf16.mxu1 %vm3852_vm3, %v3629_v6  ;;  %v9439_v51 = vadd.f32 -1.0, %v10823_v63  ;;  %v10825_v28 = vpop.eup %10824  ;;  %3941 = vmatprep.mubr.bf16.mxu0 %v3625_v17  ;;  %v12113_v45 = vadd.f32 %v12045_v46, %v11877_v31  ;;  %vm3060_vm6 = vcmp.gt.f32.partialorder %v11985_v23, 0.0  ;;  %vm3061_vm7 = vcmp.gt.f32.partialorder %v11978_v25, 0.0 }
 0x151   : > { %v3295_v20 = vmul.f32 1.442695, %v3170_v4  ;;  %v10827_v11 = vpop.eup %10826  ;;  %v9442_v44 = vadd.f32 -1.0, %v10825_v28  ;;  %3942 = vmatmul.mubr.bf16.gmra.mrb[68].mxu0 %v3624_v35  ;;  %v3301_v3 = vmul.f32 1.442695, %v3173_v22  ;;  %v3169_v4 = vmin.f32 %v12094_v26, 0.0 }
 0x152   : > { %v10829_v6 = vpop.eup %10828  ;;  %v3545_v61 = vsel %vm3065_vm1, %v11969_v14, %v9439_v51  ;;  %v3285_v14 = vmul.f32 1.442695, %v3165_v57  ;;  %v3176_v17 = vmin.f32 %v12113_v45, 0.0  ;;  %vm3071_vm8 = vcmp.gt.f32.partialorder %v12014_v10, 0.0 }
 0x153   : > { %v12074_v15 = vpop.f32.mrb[24].mxu1  ;;  %v12082_v13 = vpop.f32.mrb[24].mxu0  ;;  %10838 = vpow2.f32 %v3295_v20  ;;  %v3548_v54 = vsel %vm3068_vm2, %v11989_v47, %v9442_v44  ;;  %v9432_v47 = vadd.f32 -1.0, %v10829_v6  ;;  %v3287_v20 = vmul.f32 1.442695, %v3166_v18 }
 0x154   : > { %v2968_v24 = vpop.f32.mrb[25].mxu1  ;;  %v12087_v40 = vpop.f32.mrb[25].mxu0  ;;  %10840 = vpow2.f32 %v3281_v9  ;;  %v3632_v63 = vpack.c.bf16 %v3548_v54, %v3545_v61  ;;  %v9431_v9 = vadd.f32 -1.0, %v10827_v11  ;;  %v3168_v42 = vmin.f32 %v12109_v2, 0.0 }
 0x155   : > { %v12089_v41 = vpop.f32.mrb[26].mxu1  ;;  %v12096_v59 = vpop.f32.mrb[26].mxu0  ;;  %10842 = vpow2.f32 %v3275_v48  ;;  %v3293_v28 = vmul.f32 1.442695, %v3169_v4  ;;  %v12141_v22 = vadd.f32 %v12051_v56, %v11889_v39  ;;  %vm3064_vm9 = vcmp.gt.f32.partialorder %v12021_v36, 0.0 }
 0x156   : > { %v2971_v0 = vpop.f32.mrb[27].mxu1  ;;  %v12101_v8 = vpop.f32.mrb[27].mxu0  ;;  %10844 = vpow2.f32 %v3279_v52  ;;  %10131 = vmatmul.mubr.msk.bf16.gmra.mrb[68].mxu1 %vm3852_vm3, %v3632_v63  ;;  %v3307_v52 = vmul.f32 1.442695, %v3176_v17  ;;  %vm3074_vm10 = vcmp.gt.f32.partialorder %v12056_v50, 0.0  ;;  %v12152_v56 = vadd.f32 %v12030_v38, %v11883_v34 }
 0x157   : > { %v10831_v53 = vpop.eup %10830  ;;  %10846 = vpow2.f32 %v3301_v3  ;;  %v3538_v0 = vsel %vm3058_vm5, %v11973_v21, %v9432_v47  ;;  %v3291_v63 = vmul.f32 1.442695, %v3168_v42  ;;  %v3537_v3 = vsel %vm3057_vm4, %v11964_v7, %v9431_v9 }
 0x158   : > { %v10833_v58 = vpop.eup %10832  ;;  %v9435_v60 = vadd.f32 -1.0, %v10831_v53  ;;  %10848 = vpow2.f32 %v3285_v14  ;;  %v12159_v4 = vadd.f32 %v12037_v43, %v11889_v39  ;;  %v3175_v47 = vmin.f32 %v12141_v22, 0.0 }
 0x159   : > { %v10835_v48 = vpop.eup %10834  ;;  %v9434_v46 = vadd.f32 -1.0, %v10833_v58  ;;  %10850 = vpow2.f32 %v3307_v52  ;;  %vm3063_vm11 = vcmp.gt.f32.partialorder %v12011_v5, 0.0  ;;  %v12175_v43 = vadd.f32 %v12089_v41, %v11877_v31 }
 0x15a   : > { %v10837_v44 = vpop.eup %10836  ;;  %v9445_v57 = vadd.f32 -1.0, %v10835_v48  ;;  %v3541_v6 = vsel %vm3061_vm7, %v11978_v25, %v9435_v60  ;;  %v12164_v60 = vadd.f32 %v12074_v15, %v11877_v31  ;;  %10852 = vpow2.f32 %v3293_v28 }
 0x15b   : > { %v12120_v32 = vpop.f32.mrb[28].mxu1  ;;  %v12123_v51 = vpop.f32.mrb[28].mxu0  ;;  %v3628_v18 = vpack.c.bf16 %v3541_v6, %v3538_v0  ;;  %v3540_v21 = vsel %vm3060_vm6, %v11985_v23, %v9434_v46  ;;  %10854 = vpow2.f32 %v3287_v20  ;;  %vm3066_vm12 = vcmp.gt.f32.partialorder %v12035_v16, 0.0 }
 0x15c   : > { %v2976_v55 = vpop.f32.mrb[29].mxu1  ;;  %v12127_v24 = vpop.f32.mrb[29].mxu0  ;;  %v3627_v23 = vpack.c.bf16 %v3540_v21, %v3537_v3  ;;  %v3551_v38 = vsel %vm3071_vm8, %v12014_v10, %v9445_v57  ;;  %v3179_v17 = vmin.f32 %v12164_v60, 0.0  ;;  %10856 = vpow2.f32 %v3291_v63 }
 0x15d   : > { %v12129_v35 = vpop.f32.mrb[30].mxu1  ;;  %v12131_v11 = vpop.f32.mrb[30].mxu0  ;;  %3949 = vmatprep.mubr.bf16.mxu0 %v3628_v18  ;;  %v3172_v20 = vmin.f32 %v12159_v4, 0.0  ;;  %v12191_v57 = vadd.f32 %v12047_v49, %v11883_v34  ;;  %v3305_v0 = vmul.f32 1.442695, %v3175_v47  ;;  %vm3067_vm13 = vcmp.gt.f32.partialorder %v12024_v19, 0.0 }
 0x15e   : > { %v2979_v53 = vpop.f32.mrb[31].mxu1  ;;  %v12143_v61 = vpop.f32.mrb[31].mxu0  ;;  %3950 = vmatmul.mubr.bf16.gmra.mrb[72].mxu0 %v3627_v23  ;;  %v3313_v6 = vmul.f32 1.442695, %v3179_v17  ;;  %v3182_v21 = vmin.f32 %v12175_v43, 0.0  ;;  %vm3077_vm14 = vcmp.gt.f32.partialorder %v12085_v37, 0.0  ;;  %v12203_v49 = vadd.f32 %v12087_v40, %v11889_v39 }
 0x15f   : > { %v10839_v54 = vpop.eup %10838  ;;  %vm3080_vm15 = vcmp.gt.f32.partialorder %v12113_v45, 0.0  ;;  %v12213_v40 = vadd.f32 %v12082_v13, %v11883_v34  ;;  %vm3070_vm0 = vcmp.gt.f32.partialorder %v12072_v12, 0.0  ;;  %v12227_v13 = vadd.f32 %v12120_v32, %v11877_v31 }
 0x160   : > { %v10841_v58 = vpop.eup %10840  ;;  %v9448_v25 = vadd.f32 -1.0, %v10839_v54  ;;  %v9437_v54 = vadd.f32 -1.0, %v10837_v44  ;;  %10858 = vpow2.f32 %v3313_v6  ;;  %v3319_v47 = vmul.f32 1.442695, %v3182_v21 }
 0x161   : > { %v10843_v14 = vpop.eup %10842  ;;  %v9441_v15 = vadd.f32 -1.0, %v10841_v58  ;;  %10860 = vpow2.f32 %v3305_v0  ;;  %vm3069_vm1 = vcmp.gt.f32.partialorder %v12064_v62, 0.0  ;;  %vm3072_vm2 = vcmp.gt.f32.partialorder %v12109_v2, 0.0 }
 0x162   : > { %v3554_v7 = vsel %vm3074_vm10, %v12056_v50, %v9448_v25  ;;  %v10845_v9 = vpop.eup %10844  ;;  %v9438_v55 = vadd.f32 -1.0, %v10843_v14  ;;  %v3171_v50 = vmin.f32 %v12152_v56, 0.0  ;;  %10862 = vpow2.f32 %v3319_v47 }
 0x163   : > { %v12177_v48 = vpop.f32.mrb[32].mxu1  ;;  %v3635_v46 = vpack.c.bf16 %v3554_v7, %v3551_v38  ;;  %v12180_v42 = vpop.f32.mrb[32].mxu0  ;;  %v9440_v18 = vadd.f32 -1.0, %v10845_v9  ;;  %v3547_v3 = vsel %vm3067_vm13, %v12024_v19, %v9441_v15  ;;  %v3299_v7 = vmul.f32 1.442695, %v3172_v20 }
 0x164   : > { %v2984_v10 = vpop.f32.mrb[33].mxu1  ;;  %v12184_v41 = vpop.f32.mrb[33].mxu0  ;;  %v3297_v44 = vmul.f32 1.442695, %v3171_v50  ;;  %v3544_v23 = vsel %vm3064_vm9, %v12021_v36, %v9438_v55  ;;  %v3174_v9 = vmin.f32 %v12191_v57, 0.0  ;;  %v3178_v36 = vmin.f32 %v12203_v49, 0.0 }
 0x165   : > { %v12186_v28 = vpop.f32.mrb[34].mxu1  ;;  %v10847_v52 = vpop.eup %10846  ;;  %10134 = vmatprep.mubr.msk.bf16.mxu1 %vm3852_vm3, %v3635_v46  ;;  %v3631_v46 = vpack.c.bf16 %v3547_v3, %v3544_v23  ;;  %v3543_v15 = vsel %vm3063_vm11, %v12011_v5, %v9437_v54  ;;  %v3546_v10 = vsel %vm3066_vm12, %v12035_v16, %v9440_v18  ;;  %v12237_v5 = vadd.f32 %v12101_v8, %v11889_v39 }
 0x166   : > { %v12194_v53 = vpop.f32.mrb[34].mxu0  ;;  %v2987_v58 = vpop.f32.mrb[35].mxu1  ;;  %v9451_v14 = vadd.f32 -1.0, %v10847_v52  ;;  %v3630_v6 = vpack.c.bf16 %v3546_v10, %v3543_v15  ;;  %10864 = vpow2.f32 %v3299_v7  ;;  %v3303_v21 = vmul.f32 1.442695, %v3174_v9 }
 0x167   : > { %v12198_v25 = vpop.f32.mrb[35].mxu0  ;;  %v10849_v63 = vpop.eup %10848  ;;  %3957 = vmatprep.mubr.bf16.mxu0 %v3631_v46  ;;  %v3185_v58 = vmin.f32 %v12227_v13, 0.0  ;;  %vm3073_vm4 = vcmp.gt.f32.partialorder %v12094_v26, 0.0  ;;  %v12251_v8 = vadd.f32 %v12096_v59, %v11883_v34  ;;  %v3177_v7 = vmin.f32 %v12213_v40, 0.0 }
 0x168   : > { %v10851_v38 = vpop.eup %10850  ;;  %v3557_v20 = vsel %vm3077_vm14, %v12085_v37, %v9451_v14  ;;  %3958 = vmatmul.mubr.bf16.gmra.mrb[76].mxu0 %v3630_v6  ;;  %v9443_v23 = vadd.f32 -1.0, %v10849_v63  ;;  %10866 = vpow2.f32 %v3297_v44  ;;  %v3181_v59 = vmin.f32 %v12237_v5, 0.0 }
 0x169   : > { %v9454_v17 = vadd.f32 -1.0, %v10851_v38  ;;  %v10853_v52 = vpop.eup %10852  ;;  %v3325_v9 = vmul.f32 1.442695, %v3185_v58  ;;  %10868 = vpow2.f32 %v3303_v21  ;;  %vm3083_vm5 = vcmp.gt.f32.partialorder %v12164_v60, 0.0 }
 0x16a   : > { %v10855_v32 = vpop.eup %10854  ;;  %v9447_v38 = vadd.f32 -1.0, %v10853_v52  ;;  %vm3086_vm6 = vcmp.gt.f32.partialorder %v12175_v43, 0.0  ;;  %v12279_v21 = vadd.f32 %v12127_v24, %v11889_v39  ;;  %vm3075_vm7 = vcmp.gt.f32.partialorder %v12152_v56, 0.0 }
 0x16b   : > { %v12215_v19 = vpop.f32.mrb[36].mxu1  ;;  %v12229_v55 = vpop.f32.mrb[36].mxu0  ;;  %v3560_v0 = vsel %vm3080_vm15, %v12113_v45, %v9454_v17  ;;  %v12255_v45 = vadd.f32 %v12129_v35, %v11877_v31  ;;  %v9444_v46 = vadd.f32 -1.0, %v10855_v32  ;;  %v3311_v17 = vmul.f32 1.442695, %v3178_v36 }
 0x16c   : > { %v2992_v50 = vpop.f32.mrb[37].mxu1  ;;  %v12239_v16 = vpop.f32.mrb[37].mxu0  ;;  %v3638_v18 = vpack.c.bf16 %v3560_v0, %v3557_v20  ;;  %v12264_v35 = vadd.f32 %v12123_v51, %v11883_v34  ;;  %10870 = vpow2.f32 %v3325_v9  ;;  %v3309_v20 = vmul.f32 1.442695, %v3177_v7 }
 0x16d   : > { %v12241_v54 = vpop.f32.mrb[38].mxu1  ;;  %v12244_v3 = vpop.f32.mrb[38].mxu0  ;;  %v3188_v63 = vmin.f32 %v12255_v45, 0.0  ;;  %v3180_v50 = vmin.f32 %v12251_v8, 0.0  ;;  %v3553_v51 = vsel %vm3073_vm4, %v12094_v26, %v9447_v38  ;;  %10872 = vpow2.f32 %v3311_v17 }
 0x16e   : > { %v2995_v37 = vpop.f32.mrb[39].mxu1  ;;  %v10857_v14 = vpop.eup %10856  ;;  %10135 = vmatmul.mubr.msk.bf16.gmra.mrb[72].mxu1 %vm3852_vm3, %v3638_v18  ;;  %v3317_v18 = vmul.f32 1.442695, %v3181_v59  ;;  %v3550_v58 = vsel %vm3070_vm0, %v12072_v12, %v9444_v46  ;;  %v3183_v9 = vmin.f32 %v12264_v35, 0.0  ;;  %v12289_v26 = vadd.f32 %v12131_v11, %v11883_v34 }
 0x16f   : > { %v12257_v47 = vpop.f32.mrb[39].mxu0  ;;  %v10859_v15 = vpop.eup %10858  ;;  %v9446_v10 = vadd.f32 -1.0, %v10857_v14  ;;  %v3331_v0 = vmul.f32 1.442695, %v3188_v63  ;;  %v3634_v38 = vpack.c.bf16 %v3553_v51, %v3550_v58  ;;  %v3315_v24 = vmul.f32 1.442695, %v3180_v50 }
 0x170   : > { %v10861_v36 = vpop.eup %10860  ;;  %v9457_v52 = vadd.f32 -1.0, %v10859_v15  ;;  %v12300_v46 = vadd.f32 %v12177_v48, %v11877_v31  ;;  %v3321_v58 = vmul.f32 1.442695, %v3183_v9  ;;  %vm3076_vm8 = vcmp.gt.f32.partialorder %v12159_v4, 0.0 }
 0x171   : > { %v10863_v32 = vpop.eup %10862  ;;  %10874 = vpow2.f32 %v3331_v0  ;;  %v3552_v12 = vsel %vm3072_vm2, %v12109_v2, %v9446_v10  ;;  %3965 = vmatprep.mubr.bf16.mxu0 %v3634_v38  ;;  %v3549_v2 = vsel %vm3069_vm1, %v12064_v62, %v9443_v23  ;;  %v3184_v10 = vmin.f32 %v12279_v21, 0.0 }
 0x172   : > { %v9460_v7 = vadd.f32 -1.0, %v10863_v32  ;;  %v10865_v11 = vpop.eup %10864  ;;  %v9453_v32 = vadd.f32 -1.0, %v10861_v36  ;;  %v3563_v51 = vsel %vm3083_vm5, %v12164_v60, %v9457_v52  ;;  %v12316_v0 = vadd.f32 %v12143_v61, %v11889_v39 }
 0x173   : > { %v12270_v44 = vpop.f32.mrb[40].mxu1  ;;  %v12275_v6 = vpop.f32.mrb[40].mxu0  ;;  %v3633_v36 = vpack.c.bf16 %v3552_v12, %v3549_v2  ;;  %10876 = vpow2.f32 %v3317_v18  ;;  %v3186_v60 = vmin.f32 %v12289_v26, 0.0  ;;  %v3191_v52 = vmin.f32 %v12300_v46, 0.0 }
 0x174   : > { %v3000_v37 = vpop.f32.mrb[41].mxu1  ;;  %v12284_v14 = vpop.f32.mrb[41].mxu0  ;;  %v3566_v50 = vsel %vm3086_vm6, %v12175_v43, %v9460_v7  ;;  %v12323_v62 = vadd.f32 %v12186_v28, %v11877_v31  ;;  %vm3079_vm9 = vcmp.gt.f32.partialorder %v12141_v22, 0.0  ;;  %10878 = vpow2.f32 %v3309_v20 }
 0x175   : > { %v12291_v17 = vpop.f32.mrb[42].mxu1  ;;  %v12293_v59 = vpop.f32.mrb[42].mxu0  ;;  %v3641_v48 = vpack.c.bf16 %v3566_v50, %v3563_v51  ;;  %v9450_v37 = vadd.f32 -1.0, %v10865_v11  ;;  %3966 = vmatmul.mubr.bf16.gmra.mrb[80].mxu0 %v3633_v36  ;;  %v3337_v18 = vmul.f32 1.442695, %v3191_v52  ;;  %10880 = vpow2.f32 %v3315_v24 }
 0x176   : > { %v3003_v15 = vpop.f32.mrb[43].mxu1  ;;  %v12302_v63 = vpop.f32.mrb[43].mxu0  ;;  %v3323_v12 = vmul.f32 1.442695, %v3184_v10  ;;  %v3187_v28 = vmin.f32 %v12316_v0, 0.0  ;;  %vm3078_vm10 = vcmp.gt.f32.partialorder %v12191_v57, 0.0  ;;  %10882 = vpow2.f32 %v3321_v58 }
 0x177   : > { %v10867_v43 = vpop.eup %10866  ;;  %10138 = vmatprep.mubr.msk.bf16.mxu1 %vm3852_vm3, %v3641_v48  ;;  %v3559_v15 = vsel %vm3079_vm9, %v12141_v22, %v9453_v32  ;;  %v3327_v20 = vmul.f32 1.442695, %v3186_v60  ;;  %v3194_v50 = vmin.f32 %v12323_v62, 0.0  ;;  %10884 = vpow2.f32 %v3337_v18 }
 0x178   : > { %v10869_v61 = vpop.eup %10868  ;;  %v9449_v24 = vadd.f32 -1.0, %v10867_v43  ;;  %v3556_v22 = vsel %vm3076_vm8, %v12159_v4, %v9450_v37  ;;  %v12349_v58 = vadd.f32 %v12184_v41, %v11889_v39  ;;  %vm3089_vm11 = vcmp.gt.f32.partialorder %v12227_v13, 0.0 }
 0x179   : > { %v10871_v38 = vpop.eup %10870  ;;  %v9452_v10 = vadd.f32 -1.0, %v10869_v61  ;;  %v3343_v60 = vmul.f32 1.442695, %v3194_v50  ;;  %10886 = vpow2.f32 %v3323_v12  ;;  %vm3092_vm12 = vcmp.gt.f32.partialorder %v12255_v45, 0.0 }
 0x17a   : > { %v10873_v36 = vpop.eup %10872  ;;  %v9463_v52 = vadd.f32 -1.0, %v10871_v38  ;;  %v3329_v43 = vmul.f32 1.442695, %v3187_v28  ;;  %10888 = vpow2.f32 %v3327_v20  ;;  %v12355_v4 = vadd.f32 %v12180_v42, %v11883_v34 }
 0x17b   : > { %v12325_v23 = vpop.f32.mrb[44].mxu1  ;;  %v12330_v7 = vpop.f32.mrb[44].mxu0  ;;  %v12359_v41 = vadd.f32 %v12198_v25, %v11889_v39  ;;  %10890 = vpow2.f32 %v3343_v60  ;;  %v3555_v37 = vsel %vm3075_vm7, %v12152_v56, %v9449_v24  ;;  %v3558_v18 = vsel %vm3078_vm10, %v12191_v57, %v9452_v10 }
 0x17c   : > { %v3008_v9 = vpop.f32.mrb[45].mxu1  ;;  %v12334_v11 = vpop.f32.mrb[45].mxu0  ;;  %v3569_v12 = vsel %vm3089_vm11, %v12227_v13, %v9463_v52  ;;  %v3190_v28 = vmin.f32 %v12349_v58, 0.0  ;;  %10892 = vpow2.f32 %v3329_v43  ;;  %v12380_v57 = vadd.f32 %v12194_v53, %v11883_v34 }
 0x17d   : > { %v12336_v51 = vpop.f32.mrb[46].mxu1  ;;  %v12340_v2 = vpop.f32.mrb[46].mxu0  ;;  %v3637_v9 = vpack.c.bf16 %v3559_v15, %v3556_v22  ;;  %v3636_v15 = vpack.c.bf16 %v3558_v18, %v3555_v37  ;;  %v12390_v10 = vadd.f32 %v12241_v54, %v11877_v31  ;;  %vm3081_vm13 = vcmp.gt.f32.partialorder %v12213_v40, 0.0 }
 0x17e   : > { %v3011_v48 = vpop.f32.mrb[47].mxu1  ;;  %v12345_v32 = vpop.f32.mrb[47].mxu0  ;;  %v9456_v53 = vadd.f32 -1.0, %v10873_v36  ;;  %vm3082_vm14 = vcmp.gt.f32.partialorder %v12203_v49, 0.0  ;;  %vm3084_vm15 = vcmp.gt.f32.partialorder %v12251_v8, 0.0  ;;  %vm3085_vm0 = vcmp.gt.f32.partialorder %v12237_v5, 0.0 }
 0x17f   : > { %v10875_v1 = vpop.eup %10874  ;;  %3973 = vmatprep.mubr.bf16.mxu0 %v3637_v9  ;;  %v3335_v54 = vmul.f32 1.442695, %v3190_v28  ;;  %v3200_v18 = vmin.f32 %v12390_v10, 0.0  ;;  %v3192_v36 = vmin.f32 %v12380_v57, 0.0  ;;  %vm3095_vm1 = vcmp.gt.f32.partialorder %v12300_v46, 0.0 }
 0x180   : > { %v9466_v61 = vadd.f32 -1.0, %v10875_v1  ;;  %v12369_v1 = vadd.f32 %v12215_v19, %v11877_v31  ;;  %v10877_v38 = vpop.eup %10876  ;;  %3974 = vmatmul.mubr.bf16.gmra.mrb[84].mxu0 %v3636_v15  ;;  %vm3098_vm2 = vcmp.gt.f32.partialorder %v12323_v62, 0.0  ;;  %v3562_v28 = vsel %vm3082_vm14, %v12203_v49, %v9456_v53 }
 0x181   : > { %v10879_v13 = vpop.eup %10878  ;;  %v9459_v9 = vadd.f32 -1.0, %v10877_v38  ;;  %vm3088_vm4 = vcmp.gt.f32.partialorder %v12279_v21, 0.0  ;;  %vm3091_vm5 = vcmp.gt.f32.partialorder %v12316_v0, 0.0  ;;  %v12422_v53 = vadd.f32 %v12229_v55, %v11883_v34 }
 0x182   : > { %v3572_v25 = vsel %vm3092_vm12, %v12255_v45, %v9466_v61  ;;  %v3197_v19 = vmin.f32 %v12369_v1, 0.0  ;;  %v3193_v45 = vmin.f32 %v12359_v41, 0.0  ;;  %v10881_v60 = vpop.eup %10880  ;;  %v9455_v38 = vadd.f32 -1.0, %v10879_v13 }
 0x183   : > { %v12371_v42 = vpop.f32.mrb[48].mxu1  ;;  %v12376_v20 = vpop.f32.mrb[48].mxu0  ;;  %v3644_v50 = vpack.c.bf16 %v3572_v25, %v3569_v12  ;;  %v3189_v25 = vmin.f32 %v12355_v4, 0.0  ;;  %v9458_v15 = vadd.f32 -1.0, %v10881_v60  ;;  %vm3090_vm6 = vcmp.gt.f32.partialorder %v12289_v26, 0.0 }
 0x184   : > { %v3016_v56 = vpop.f32.mrb[49].mxu1  ;;  %v12383_v48 = vpop.f32.mrb[49].mxu0  ;;  %v3349_v43 = vmul.f32 1.442695, %v3197_v19  ;;  %vm3087_vm7 = vcmp.gt.f32.partialorder %v12264_v35, 0.0  ;;  %vm3101_vm8 = vcmp.gt.f32.partialorder %v12369_v1, 0.0 }
 0x185   : > { %v12385_v24 = vpop.f32.mrb[50].mxu1  ;;  %v12392_v22 = vpop.f32.mrb[50].mxu0  ;;  %10139 = vmatmul.mubr.msk.bf16.gmra.mrb[76].mxu1 %vm3852_vm3, %v3644_v50  ;;  %v3341_v56 = vmul.f32 1.442695, %v3193_v45  ;;  %v3355_v50 = vmul.f32 1.442695, %v3200_v18  ;;  %v12414_v45 = vadd.f32 %v12257_v47, %v11889_v39 }
 0x186   : > { %v3019_v52 = vpop.f32.mrb[51].mxu1  ;;  %v12396_v61 = vpop.f32.mrb[51].mxu0  ;;  %10894 = vpow2.f32 %v3349_v43  ;;  %v3333_v49 = vmul.f32 1.442695, %v3189_v25  ;;  %v3564_v25 = vsel %vm3084_vm15, %v12251_v8, %v9458_v15  ;;  %v12460_v15 = vadd.f32 %v12291_v17, %v11877_v31 }
 0x187   : > { %v10883_v37 = vpop.eup %10882  ;;  %v3565_v52 = vsel %vm3085_vm0, %v12237_v5, %v9459_v9  ;;  %10896 = vpow2.f32 %v3335_v54  ;;  %v3339_v5 = vmul.f32 1.442695, %v3192_v36  ;;  %vm3104_vm9 = vcmp.gt.f32.partialorder %v12390_v10, 0.0 }
 0x188   : > { %v10885_v12 = vpop.eup %10884  ;;  %v3640_v13 = vpack.c.bf16 %v3565_v52, %v3562_v28  ;;  %10898 = vpow2.f32 %v3355_v50  ;;  %v12438_v50 = vadd.f32 %v12239_v16, %v11889_v39  ;;  %vm3094_vm10 = vcmp.gt.f32.partialorder %v12349_v58, 0.0 }
 0x189   : > { %v10887_v19 = vpop.eup %10886  ;;  %v9469_v30 = vadd.f32 -1.0, %v10885_v12  ;;  %10900 = vpow2.f32 %v3341_v56  ;;  %v3561_v12 = vsel %vm3081_vm13, %v12213_v40, %v9455_v38  ;;  %v12442_v56 = vadd.f32 %v12244_v3, %v11883_v34 }
 0x18a   : > { %v10889_v33 = vpop.eup %10888  ;;  %3981 = vmatprep.mubr.bf16.mxu0 %v3640_v13  ;;  %v3639_v52 = vpack.c.bf16 %v3564_v25, %v3561_v12  ;;  %v12446_v40 = vadd.f32 %v12270_v44, %v11877_v31  ;;  %v3199_v3 = vmin.f32 %v12414_v45, 0.0  ;;  %v9461_v44 = vadd.f32 -1.0, %v10883_v37 }
 0x18b   : > { %v12410_v29 = vpop.f32.mrb[52].mxu1  ;;  %v12416_v60 = vpop.f32.mrb[52].mxu0  ;;  %v3575_v8 = vsel %vm3095_vm1, %v12300_v46, %v9469_v30  ;;  %v9462_v13 = vadd.f32 -1.0, %v10887_v19  ;;  %10902 = vpow2.f32 %v3333_v49  ;;  %v3196_v17 = vmin.f32 %v12438_v50, 0.0 }
 0x18c   : > { %v3024_v43 = vpop.f32.mrb[53].mxu1  ;;  %v10891_v18 = vpop.eup %10890  ;;  %3982 = vmatmul.mubr.bf16.gmra.mrb[88].mxu0 %v3639_v52  ;;  %10904 = vpow2.f32 %v3339_v5  ;;  %v3203_v30 = vmin.f32 %v12446_v40, 0.0  ;;  %v3198_v19 = vmin.f32 %v12442_v56, 0.0  ;;  %v12474_v5 = vadd.f32 %v12275_v6, %v11883_v34 }
 0x18d   : > { %v12424_v9 = vpop.f32.mrb[53].mxu0  ;;  %v12426_v54 = vpop.f32.mrb[54].mxu1  ;;  %v9472_v47 = vadd.f32 -1.0, %v10891_v18  ;;  %v9464_v18 = vadd.f32 -1.0, %v10889_v33  ;;  %v3353_v33 = vmul.f32 1.442695, %v3199_v3  ;;  %v12485_v52 = vadd.f32 %v12293_v59, %v11883_v34 }
 0x18e   : > { %v12434_v36 = vpop.f32.mrb[54].mxu0  ;;  %v3027_v55 = vpop.f32.mrb[55].mxu1  ;;  %v3361_v49 = vmul.f32 1.442695, %v3203_v30  ;;  %v3568_v6 = vsel %vm3088_vm4, %v12279_v21, %v9462_v13  ;;  %vm3097_vm11 = vcmp.gt.f32.partialorder %v12359_v41, 0.0  ;;  %vm3093_vm12 = vcmp.gt.f32.partialorder %v12355_v4, 0.0 }
 0x18f   : > { %v10893_v28 = vpop.eup %10892  ;;  %v12448_v38 = vpop.f32.mrb[55].mxu0  ;;  %v3578_v16 = vsel %vm3098_vm2, %v12323_v62, %v9472_v47  ;;  %v3195_v62 = vmin.f32 %v12422_v53, 0.0  ;;  %v3206_v47 = vmin.f32 %v12460_v15, 0.0  ;;  %v12481_v55 = vadd.f32 %v12284_v14, %v11889_v39 }
 0x190   : > { %v3647_v43 = vpack.c.bf16 %v3578_v16, %v3575_v8  ;;  %v9465_v12 = vadd.f32 -1.0, %v10893_v28  ;;  %v10895_v46 = vpop.eup %10894  ;;  %10906 = vpow2.f32 %v3361_v49  ;;  %vm3096_vm13 = vcmp.gt.f32.partialorder %v12380_v57, 0.0 }
 0x191   : > { %v3367_v28 = vmul.f32 1.442695, %v3206_v47  ;;  %v10897_v8 = vpop.eup %10896  ;;  %v9475_v16 = vadd.f32 -1.0, %v10895_v46  ;;  %v3345_v59 = vmul.f32 1.442695, %v3195_v62  ;;  %10908 = vpow2.f32 %v3353_v33 }
 0x192   : > { %10142 = vmatprep.mubr.msk.bf16.mxu1 %vm3852_vm3, %v3647_v43  ;;  %v3571_v3 = vsel %vm3091_vm5, %v12316_v0, %v9465_v12  ;;  %v10899_v14 = vpop.eup %10898  ;;  %v3347_v47 = vmul.f32 1.442695, %v3196_v17  ;;  %v3201_v0 = vmin.f32 %v12474_v5, 0.0  ;;  %v3570_v62 = vsel %vm3090_vm6, %v12289_v26, %v9464_v18 }
 0x193   : > { %v12469_v37 = vpop.f32.mrb[56].mxu1  ;;  %v12476_v25 = vpop.f32.mrb[56].mxu0  ;;  %v3643_v46 = vpack.c.bf16 %v3571_v3, %v3568_v6  ;;  %v9478_v13 = vadd.f32 -1.0, %v10899_v14  ;;  %10910 = vpow2.f32 %v3367_v28  ;;  %v12510_v17 = vadd.f32 %v12325_v23, %v11877_v31 }
 0x194   : > { %15287 = vst [vmem:[#allocation12_spill] sm:$0xff] %v12476_v25  ;;  %v3032_v43 = vpop.f32.mrb[57].mxu1  ;;  %v12493_v30 = vpop.f32.mrb[57].mxu0  ;;  %v3351_v25 = vmul.f32 1.442695, %v3198_v19  ;;  %v3581_v19 = vsel %vm3101_vm8, %v12369_v1, %v9475_v16  ;;  %v3204_v6 = vmin.f32 %v12485_v52, 0.0  ;;  %v3567_v28 = vsel %vm3087_vm7, %v12264_v35, %v9461_v44 }
 0x195   : > { %15288 = vst [vmem:[#allocation13_spill] sm:$0xff] %v12493_v30  ;;  %v12497_v49 = vpop.f32.mrb[58].mxu1  ;;  %v12499_v27 = vpop.f32.mrb[58].mxu0  ;;  %v3202_v30 = vmin.f32 %v12481_v55, 0.0  ;;  %3989 = vmatprep.mubr.bf16.mxu0 %v3643_v46  ;;  %v3584_v33 = vsel %vm3104_vm9, %v12390_v10, %v9478_v13  ;;  %v12524_v23 = vadd.f32 %v12302_v63, %v11889_v39  ;;  %v3642_v18 = vpack.c.bf16 %v3570_v62, %v3567_v28 }
 0x196   : > { %v10901_v21 = vpop.eup %10900  ;;  %v3035_v12 = vpop.f32.mrb[59].mxu1  ;;  %v3650_v26 = vpack.c.bf16 %v3584_v33, %v3581_v19  ;;  %v3209_v14 = vmin.f32 %v12510_v17, 0.0  ;;  %v9468_v10 = vadd.f32 -1.0, %v10897_v8  ;;  %10912 = vpow2.f32 %v3347_v47 }
 0x197   : > { %v12502_v43 = vpop.f32.mrb[59].mxu0  ;;  %v10903_v3 = vpop.eup %10902  ;;  %v9471_v46 = vadd.f32 -1.0, %v10901_v21  ;;  %v12532_v35 = vadd.f32 %v12330_v7, %v11883_v34  ;;  %10914 = vpow2.f32 %v3345_v59  ;;  %v3357_v63 = vmul.f32 1.442695, %v3201_v0  ;;  %3990 = vmatmul.mubr.bf16.gmra.mrb[92].mxu0 %v3642_v18 }
 0x198   : > { %v10905_v16 = vpop.eup %10904  ;;  %v3373_v12 = vmul.f32 1.442695, %v3209_v14  ;;  %v12538_v62 = vadd.f32 %v12336_v51, %v11877_v31  ;;  %10143 = vmatmul.mubr.msk.bf16.gmra.mrb[80].mxu1 %vm3852_vm3, %v3650_v26  ;;  %v9467_v21 = vadd.f32 -1.0, %v10903_v3  ;;  %10916 = vpow2.f32 %v3351_v25 }
 0x199   : > { %v3359_v7 = vmul.f32 1.442695, %v3202_v30  ;;  %v12547_v19 = vadd.f32 %v12334_v11, %v11889_v39  ;;  %v9470_v33 = vadd.f32 -1.0, %v10905_v16  ;;  %v3363_v28 = vmul.f32 1.442695, %v3204_v6 }
 0x19a   : > { %v3205_v51 = vmin.f32 %v12524_v23, 0.0  ;;  %v3212_v26 = vmin.f32 %v12538_v62, 0.0  ;;  %v10907_v14 = vpop.eup %10906  ;;  %10918 = vpow2.f32 %v3373_v12  ;;  %v3207_v25 = vmin.f32 %v12532_v35, 0.0 }
 0x19b   : > { %v12527_v1 = vpop.f32.mrb[60].mxu1  ;;  %v12534_v44 = vpop.f32.mrb[60].mxu0  ;;  %v3574_v11 = vsel %vm3094_vm10, %v12349_v58, %v9468_v10  ;;  %v3577_v30 = vsel %vm3097_vm11, %v12359_v41, %v9471_v46  ;;  %10920 = vpow2.f32 %v3357_v63  ;;  %v12564_v3 = vadd.f32 %v12340_v2, %v11883_v34 }
 0x19c   : > { %v3040_v13 = vpop.f32.mrb[61].mxu1  ;;  %v12541_v8 = vpop.f32.mrb[61].mxu0  ;;  %v3379_v6 = vmul.f32 1.442695, %v3212_v26  ;;  %v3646_v16 = vpack.c.bf16 %v3577_v30, %v3574_v11  ;;  %v9481_v12 = vadd.f32 -1.0, %v10907_v14  ;;  %10922 = vpow2.f32 %v3359_v7 }
 0x19d   : > { %v12543_v47 = vpop.f32.mrb[62].mxu1  ;;  %v12549_v59 = vpop.f32.mrb[62].mxu0  ;;  %vm3107_vm14 = vcmp.gt.f32.partialorder %v12446_v40, 0.0  ;;  %10924 = vpow2.f32 %v3363_v28  ;;  %v3365_v58 = vmul.f32 1.442695, %v3205_v51  ;;  %v12571_v41 = vadd.f32 %v12345_v32, %v11889_v39 }
 0x19e   : > { %v3043_v0 = vpop.f32.mrb[63].mxu1  ;;  %v12553_v18 = vpop.f32.mrb[63].mxu0  ;;  %3997 = vmatprep.mubr.bf16.mxu0 %v3646_v16  ;;  %vm3100_vm15 = vcmp.gt.f32.partialorder %v12438_v50, 0.0  ;;  %vm3110_vm0 = vcmp.gt.f32.partialorder %v12460_v15, 0.0  ;;  %v3369_v10 = vmul.f32 1.442695, %v3207_v25  ;;  %10926 = vpow2.f32 %v3379_v6 }
 0x19f   : > { %15289 = vst [vmem:[#allocation14_spill] sm:$0xff] %v12553_v18  ;;  %v10909_v13 = vpop.eup %10908  ;;  %v3208_v0 = vmin.f32 %v12547_v19, 0.0  ;;  %v3210_v46 = vmin.f32 %v12564_v3, 0.0  ;;  %v3573_v63 = vsel %vm3093_vm12, %v12355_v4, %v9467_v21  ;;  %v3576_v7 = vsel %vm3096_vm13, %v12380_v57, %v9470_v33 }
 0x1a0   : > { %v10911_v18 = vpop.eup %10910  ;;  %v12584_v32 = vadd.f32 %v12371_v42, %v11877_v31  ;;  %vm3099_vm1 = vcmp.gt.f32.partialorder %v12422_v53, 0.0  ;;  %v3587_v51 = vsel %vm3107_vm14, %v12446_v40, %v9481_v12  ;;  %v3645_v14 = vpack.c.bf16 %v3576_v7, %v3573_v63 }
 0x1a1   : > { %v9484_v2 = vadd.f32 -1.0, %v10911_v18  ;;  %v10913_v28 = vpop.eup %10912  ;;  %v3371_v18 = vmul.f32 1.442695, %v3208_v0  ;;  %10928 = vpow2.f32 %v3365_v58  ;;  %v3211_v57 = vmin.f32 %v12571_v41, 0.0 }
 0x1a2   : > { %v10915_v4 = vpop.eup %10914  ;;  %v3215_v33 = vmin.f32 %v12584_v32, 0.0  ;;  %vm3102_vm2 = vcmp.gt.f32.partialorder %v12442_v56, 0.0  ;;  %v9477_v25 = vadd.f32 -1.0, %v10909_v13  ;;  %3998 = vmatmul.mubr.bf16.gmra.mrb[96].mxu0 %v3645_v14  ;;  %v12596_v11 = vadd.f32 %v12376_v20, %v11883_v34 }
 0x1a3   : > { %v3590_v26 = vsel %vm3110_vm0, %v12460_v15, %v9484_v2  ;;  %v10917_v42 = vpop.eup %10916  ;;  %v12600_v40 = vadd.f32 %v12385_v24, %v11877_v31  ;;  %v9474_v15 = vadd.f32 -1.0, %v10913_v28  ;;  %10930 = vpow2.f32 %v3369_v10 }
 0x1a4   : > { %v3653_v21 = vpack.c.bf16 %v3590_v26, %v3587_v51  ;;  %v3375_v30 = vmul.f32 1.442695, %v3210_v46  ;;  %v3385_v6 = vmul.f32 1.442695, %v3215_v33  ;;  %v10919_v16 = vpop.eup %10918  ;;  %vm3103_vm4 = vcmp.gt.f32.partialorder %v12414_v45, 0.0 }
 0x1a5   : > { %10932 = vpow2.f32 %v3371_v18  ;;  %v12606_v13 = vadd.f32 %v12383_v48, %v11889_v39  ;;  %v3218_v20 = vmin.f32 %v12600_v40, 0.0  ;;  %v10921_v12 = vpop.eup %10920  ;;  %v9473_v0 = vadd.f32 -1.0, %v10915_v4 }
 0x1a6   : > { %10146 = vmatprep.mubr.msk.bf16.mxu1 %vm3852_vm3, %v3653_v21  ;;  %v9476_v24 = vadd.f32 -1.0, %v10917_v42  ;;  %v3377_v58 = vmul.f32 1.442695, %v3211_v57  ;;  %10934 = vpow2.f32 %v3385_v6  ;;  %v10923_v2 = vpop.eup %10922  ;;  %v3213_v10 = vmin.f32 %v12596_v11, 0.0 }
 0x1a7   : > { %v3391_v46 = vmul.f32 1.442695, %v3218_v20  ;;  %v12612_v63 = vadd.f32 %v12392_v22, %v11883_v34  ;;  %v3583_v7 = vsel %vm3103_vm4, %v12414_v45, %v9477_v25  ;;  %v10925_v28 = vpop.eup %10924  ;;  %vm3113_vm5 = vcmp.gt.f32.partialorder %v12510_v17, 0.0 }
 0x1a8   : > { %v9487_v48 = vadd.f32 -1.0, %v10919_v16  ;;  %10936 = vpow2.f32 %v3375_v30  ;;  %v3580_v51 = vsel %vm3100_vm15, %v12438_v50, %v9474_v15  ;;  %v10927_v26 = vpop.eup %10926  ;;  %vm3116_vm6 = vcmp.gt.f32.partialorder %v12538_v62, 0.0 }
 0x1a9   : > { %v3214_v18 = vmin.f32 %v12606_v13, 0.0  ;;  %10938 = vpow2.f32 %v3391_v46  ;;  %v3649_v14 = vpack.c.bf16 %v3583_v7, %v3580_v51  ;;  %vm3106_vm7 = vcmp.gt.f32.partialorder %v12481_v55, 0.0 }
 0x1aa   : > { %v9490_v22 = vadd.f32 -1.0, %v10927_v26  ;;  %10940 = vpow2.f32 %v3377_v58  ;;  %v3579_v45 = vsel %vm3099_vm1, %v12422_v53, %v9473_v0  ;;  %v3582_v4 = vsel %vm3102_vm2, %v12442_v56, %v9476_v24 }
 0x1ab   : > { %vm3109_vm8 = vcmp.gt.f32.partialorder %v12524_v23, 0.0  ;;  %v3381_v50 = vmul.f32 1.442695, %v3213_v10  ;;  %v3216_v21 = vmin.f32 %v12612_v63, 0.0  ;;  %4005 = vmatprep.mubr.bf16.mxu0 %v3649_v14  ;;  %v12632_v57 = vadd.f32 %v12396_v61, %v11889_v39  ;;  %v10929_v42 = vpop.eup %10928 }
 0x1ac   : > { %v3648_v33 = vpack.c.bf16 %v3582_v4, %v3579_v45  ;;  %v3593_v53 = vsel %vm3113_vm5, %v12510_v17, %v9487_v48  ;;  %v3596_v56 = vsel %vm3116_vm6, %v12538_v62, %v9490_v22  ;;  %v12642_v25 = vadd.f32 %v12410_v29, %v11877_v31 }
 0x1ad   : > { %v12646_v15 = vadd.f32 %v12416_v60, %v11883_v34  ;;  %vm3105_vm9 = vcmp.gt.f32.partialorder %v12474_v5, 0.0  ;;  %vm3108_vm10 = vcmp.gt.f32.partialorder %v12485_v52, 0.0  ;;  %v3656_v61 = vpack.c.bf16 %v3596_v56, %v3593_v53  ;;  %v10931_v29 = vpop.eup %10930 }
 0x1ae   : > { %v3383_v30 = vmul.f32 1.442695, %v3214_v18  ;;  %4006 = vmatmul.mubr.bf16.gmra.mrb[100].mxu0 %v3648_v33  ;;  %v12652_v17 = vadd.f32 %v12424_v9, %v11889_v39  ;;  %v12656_v62 = vadd.f32 %v12426_v54, %v11877_v31  ;;  %v9479_v6 = vadd.f32 -1.0, %v10921_v12 }
 0x1af   : > { %v9480_v16 = vadd.f32 -1.0, %v10923_v2  ;;  %v9482_v60 = vadd.f32 -1.0, %v10925_v28  ;;  %v3221_v20 = vmin.f32 %v12642_v25, 0.0  ;;  %v10933_v0 = vpop.eup %10932  ;;  %v9483_v24 = vadd.f32 -1.0, %v10929_v42  ;;  %10147 = vmatmul.mubr.msk.bf16.gmra.mrb[84].mxu1 %vm3852_vm3, %v3656_v61 }
 0x1b0   : > { %v3387_v58 = vmul.f32 1.442695, %v3216_v21  ;;  %v3217_v10 = vmin.f32 %v12632_v57, 0.0  ;;  %v3219_v46 = vmin.f32 %v12646_v15, 0.0  ;;  %v10935_v9 = vpop.eup %10934  ;;  %10942 = vpow2.f32 %v3381_v50 }
 0x1b1   : > { %v3397_v7 = vmul.f32 1.442695, %v3221_v20  ;;  %v3224_v54 = vmin.f32 %v12656_v62, 0.0  ;;  %v12665_v12 = vadd.f32 %v12434_v36, %v11883_v34  ;;  %vm3119_vm11 = vcmp.gt.f32.partialorder %v12584_v32, 0.0 }
 0x1b2   : > { %v9493_v2 = vadd.f32 -1.0, %v10935_v9  ;;  %10944 = vpow2.f32 %v3383_v30  ;;  %v3220_v28 = vmin.f32 %v12652_v17, 0.0  ;;  %v10937_v48 = vpop.eup %10936  ;;  %v9486_v51 = vadd.f32 -1.0, %v10933_v0  ;;  %v15290_v0 = vld [vmem:[#allocation12_spill] sm:$0xff] }
 0x1b3   : > { %vm3115_vm12 = vcmp.gt.f32.partialorder %v12571_v41, 0.0  ;;  %vm3122_vm13 = vcmp.gt.f32.partialorder %v12600_v40, 0.0  ;;  %10946 = vpow2.f32 %v3397_v7  ;;  %v3403_v26 = vmul.f32 1.442695, %v3224_v54  ;;  %v10939_v18 = vpop.eup %10938 }
 0x1b4   : > { %10948 = vpow2.f32 %v3387_v58  ;;  %v3389_v14 = vmul.f32 1.442695, %v3217_v10  ;;  %v3393_v22 = vmul.f32 1.442695, %v3219_v46  ;;  %v3586_v36 = vsel %vm3106_vm7, %v12481_v55, %v9480_v16  ;;  %v10941_v45 = vpop.eup %10940 }
 0x1b5   : > { %vm3112_vm14 = vcmp.gt.f32.partialorder %v12547_v19, 0.0  ;;  %v9496_v4 = vadd.f32 -1.0, %v10939_v18  ;;  %v3222_v50 = vmin.f32 %v12665_v12, 0.0  ;;  %v3589_v21 = vsel %vm3109_vm8, %v12524_v23, %v9483_v24 }
 0x1b6   : > { %v12681_v33 = vadd.f32 %v12448_v38, %v11889_v39  ;;  %v3599_v42 = vsel %vm3119_vm11, %v12584_v32, %v9493_v2  ;;  %v3395_v53 = vmul.f32 1.442695, %v3220_v28  ;;  %10950 = vpow2.f32 %v3403_v26 }
 0x1b7   : > { %v3652_v55 = vpack.c.bf16 %v3589_v21, %v3586_v36  ;;  %v3602_v56 = vsel %vm3122_vm13, %v12600_v40, %v9496_v4  ;;  %v3585_v23 = vsel %vm3105_vm9, %v12474_v5, %v9479_v6  ;;  %v3588_v38 = vsel %vm3108_vm10, %v12485_v52, %v9482_v60  ;;  %v15291_v5 = vld [vmem:[#allocation13_spill] sm:$0xff] }
 0x1b8   : > { %v3223_v61 = vmin.f32 %v12681_v33, 0.0  ;;  %v9489_v30 = vadd.f32 -1.0, %v10941_v45  ;;  %v3659_v16 = vpack.c.bf16 %v3602_v56, %v3599_v42  ;;  %10952 = vpow2.f32 %v3389_v14 }
 0x1b9   : > { %4013 = vmatprep.mubr.bf16.mxu0 %v3652_v55  ;;  %v3651_v32 = vpack.c.bf16 %v3588_v38, %v3585_v23  ;;  %vm3114_vm15 = vcmp.gt.f32.partialorder %v12564_v3, 0.0  ;;  %v3399_v20 = vmul.f32 1.442695, %v3222_v50  ;;  %v12699_v40 = vadd.f32 %v12469_v37, %v11877_v31 }
 0x1ba   : > { %v12703_v24 = vadd.f32 %v15290_v0, %v11883_v34  ;;  %v12707_v6 = vadd.f32 %v15291_v5, %v11889_v39  ;;  %vm3111_vm0 = vcmp.gt.f32.partialorder %v12532_v35, 0.0  ;;  %10954 = vpow2.f32 %v3393_v22  ;;  %v10943_v58 = vpop.eup %10942  ;;  %10150 = vmatprep.mubr.msk.bf16.mxu1 %vm3852_vm3, %v3659_v16 }
 0x1bb   : > { %v3401_v52 = vmul.f32 1.442695, %v3223_v61  ;;  %4014 = vmatmul.mubr.bf16.gmra.mrb[104].mxu0 %v3651_v32  ;;  %v12712_v60 = vadd.f32 %v12497_v49, %v11877_v31  ;;  %v12716_v37 = vadd.f32 %v12499_v27, %v11883_v34  ;;  %v9485_v10 = vadd.f32 -1.0, %v10931_v29 }
 0x1bc   : > { %v9488_v46 = vadd.f32 -1.0, %v10937_v48  ;;  %10956 = vpow2.f32 %v3395_v53  ;;  %v3227_v9 = vmin.f32 %v12699_v40, 0.0  ;;  %v10945_v7 = vpop.eup %10944  ;;  %vm3125_vm1 = vcmp.gt.f32.partialorder %v12642_v25, 0.0 }
 0x1bd   : > { %v3225_v54 = vmin.f32 %v12703_v24, 0.0  ;;  %v3226_v49 = vmin.f32 %v12707_v6, 0.0  ;;  %v3595_v27 = vsel %vm3115_vm12, %v12571_v41, %v9489_v30  ;;  %v10947_v2 = vpop.eup %10946  ;;  %vm3128_vm2 = vcmp.gt.f32.partialorder %v12656_v62, 0.0 }
 0x1be   : > { %10958 = vpow2.f32 %v3399_v20  ;;  %v3409_v29 = vmul.f32 1.442695, %v3227_v9  ;;  %v3230_v28 = vmin.f32 %v12712_v60, 0.0  ;;  %v10949_v48 = vpop.eup %10948  ;;  %v3228_v18 = vmin.f32 %v12716_v37, 0.0 }
 0x1bf   : > { %10960 = vpow2.f32 %v3401_v52  ;;  %v3405_v26 = vmul.f32 1.442695, %v3225_v54  ;;  %v3592_v14 = vsel %vm3112_vm14, %v12547_v19, %v9486_v51  ;;  %v9499_v22 = vadd.f32 -1.0, %v10947_v2 }
 0x1c0   : > { %10962 = vpow2.f32 %v3409_v29  ;;  %v3415_v36 = vmul.f32 1.442695, %v3230_v28  ;;  %v3655_v41 = vpack.c.bf16 %v3595_v27, %v3592_v14  ;;  %v10951_v45 = vpop.eup %10950  ;;  %v12732_v4 = vadd.f32 -1.0, %v10943_v58 }
 0x1c1   : > { %vm3118_vm4 = vcmp.gt.f32.partialorder %v12606_v13, 0.0  ;;  %10964 = vpow2.f32 %v3405_v26  ;;  %v3407_v50 = vmul.f32 1.442695, %v3226_v49  ;;  %v3411_v21 = vmul.f32 1.442695, %v3228_v18 }
 0x1c2   : > { %v9492_v42 = vadd.f32 -1.0, %v10945_v7  ;;  %v12735_v53 = vadd.f32 -1.0, %v10949_v48  ;;  %vm3121_vm5 = vcmp.gt.f32.partialorder %v12632_v57, 0.0  ;;  %v9502_v55 = vadd.f32 -1.0, %v10951_v45  ;;  %4021 = vmatprep.mubr.bf16.mxu0 %v3655_v41  ;;  %v10953_v51 = vpop.eup %10952  ;;  %v15292_v41 = vld [vmem:[#allocation14_spill] sm:$0xff] }
 0x1c3   : > { %v12740_v19 = vadd.f32 %v12502_v43, %v11889_v39  ;;  %10966 = vpow2.f32 %v3415_v36  ;;  %v3594_v56 = vsel %vm3114_vm15, %v12564_v3, %v9488_v46  ;;  %v12747_v61 = vadd.f32 %v12527_v1, %v11877_v31 }
 0x1c4   : > { %v12751_v23 = vadd.f32 %v12534_v44, %v11883_v34  ;;  %v3605_v38 = vsel %vm3125_vm1, %v12642_v25, %v9499_v22  ;;  %v3608_v43 = vsel %vm3128_vm2, %v12656_v62, %v9502_v55  ;;  %10968 = vpow2.f32 %v3411_v21  ;;  %v10955_v30 = vpop.eup %10954 }
 0x1c5   : > { %v3591_v3 = vsel %vm3111_vm0, %v12532_v35, %v9485_v10  ;;  %vm3117_vm6 = vcmp.gt.f32.partialorder %v12596_v11, 0.0  ;;  %vm3120_vm7 = vcmp.gt.f32.partialorder %v12612_v63, 0.0  ;;  %v3662_v1 = vpack.c.bf16 %v3608_v43, %v3605_v38 }
 0x1c6   : > { %10970 = vpow2.f32 %v3407_v50  ;;  %v3229_v44 = vmin.f32 %v12740_v19, 0.0  ;;  %v3654_v16 = vpack.c.bf16 %v3594_v56, %v3591_v3  ;;  %v10957_v25 = vpop.eup %10956  ;;  %v9495_v32 = vadd.f32 -1.0, %v10953_v51 }
 0x1c7   : > { %v3233_v20 = vmin.f32 %v12747_v61, 0.0  ;;  %v3231_v62 = vmin.f32 %v12751_v23, 0.0  ;;  %v12769_v0 = vadd.f32 %v12541_v8, %v11889_v39  ;;  %vm3123_vm8 = vcmp.gt.f32.partialorder %v12646_v15, 0.0  ;;  %10151 = vmatmul.mubr.msk.bf16.gmra.mrb[88].mxu1 %vm3852_vm3, %v3662_v1 }
 0x1c8   : > { %vm3124_vm9 = vcmp.gt.f32.partialorder %v12652_v17, 0.0  ;;  %vm3127_vm10 = vcmp.gt.f32.partialorder %v12681_v33, 0.0  ;;  %vm3131_vm11 = vcmp.gt.f32.partialorder %v12699_v40, 0.0  ;;  %v3413_v35 = vmul.f32 1.442695, %v3229_v44  ;;  %4022 = vmatmul.mubr.bf16.gmra.mrb[108].mxu0 %v3654_v16  ;;  %v10959_v8 = vpop.eup %10958 }
 0x1c9   : > { %v12777_v5 = vadd.f32 %v12543_v47, %v11877_v31  ;;  %v12781_v52 = vadd.f32 %v12549_v59, %v11883_v34  ;;  %vm3126_vm12 = vcmp.gt.f32.partialorder %v12665_v12, 0.0  ;;  %vm3134_vm13 = vcmp.gt.f32.partialorder %v12712_v60, 0.0  ;;  %v10961_v9 = vpop.eup %10960 }
 0x1ca   : > { %v3421_v58 = vmul.f32 1.442695, %v3233_v20  ;;  %v3417_v10 = vmul.f32 1.442695, %v3231_v62  ;;  %v3232_v46 = vmin.f32 %v12769_v0, 0.0  ;;  %v9497_v7 = vadd.f32 -1.0, %v10955_v30  ;;  %v10963_v34 = vpop.eup %10962 }
 0x1cb   : > { %v9498_v54 = vadd.f32 -1.0, %v10957_v25  ;;  %vm3129_vm14 = vcmp.gt.f32.partialorder %v12703_v24, 0.0  ;;  %vm3132_vm15 = vcmp.gt.f32.partialorder %v12716_v37, 0.0  ;;  %10972 = vpow2.f32 %v3413_v35  ;;  %v10965_v27 = vpop.eup %10964 }
 0x1cc   : > { %v3236_v31 = vmin.f32 %v12777_v5, 0.0  ;;  %10974 = vpow2.f32 %v3421_v58  ;;  %v3419_v47 = vmul.f32 1.442695, %v3232_v46  ;;  %v3234_v59 = vmin.f32 %v12781_v52, 0.0 }
 0x1cd   : > { %v3598_v49 = vsel %vm3118_vm4, %v12606_v13, %v9492_v42  ;;  %v9505_v2 = vadd.f32 -1.0, %v10963_v34  ;;  %10976 = vpow2.f32 %v3417_v10  ;;  %v3601_v28 = vsel %vm3121_vm5, %v12632_v57, %v9495_v32  ;;  %v10967_v14 = vpop.eup %10966 }
 0x1ce   : > { %v3427_v29 = vmul.f32 1.442695, %v3236_v31  ;;  %v9501_v48 = vadd.f32 -1.0, %v10961_v9  ;;  %10978 = vpow2.f32 %v3419_v47  ;;  %v3423_v26 = vmul.f32 1.442695, %v3234_v59  ;;  %v10969_v13 = vpop.eup %10968 }
 0x1cf   : > { %v3658_v18 = vpack.c.bf16 %v3601_v28, %v3598_v49  ;;  %v9500_v22 = vadd.f32 -1.0, %v10959_v8  ;;  %v9503_v36 = vadd.f32 -1.0, %v10965_v27  ;;  %v12799_v45 = vadd.f32 %v15292_v41, %v11889_v39 }
 0x1d0   : > { %10980 = vpow2.f32 %v3427_v29  ;;  %v9508_v50 = vadd.f32 -1.0, %v10967_v14  ;;  %v3597_v57 = vsel %vm3117_vm6, %v12596_v11, %v12732_v4  ;;  %v3600_v21 = vsel %vm3120_vm7, %v12612_v63, %v12735_v53  ;;  %v10971_v42 = vpop.eup %10970 }
 0x1d1   : > { %10982 = vpow2.f32 %v3423_v26  ;;  %4029 = vmatprep.mubr.bf16.mxu0 %v3658_v18  ;;  %v3611_v39 = vsel %vm3131_vm11, %v12699_v40, %v9505_v2  ;;  %v9506_v55 = vadd.f32 -1.0, %v10969_v13  ;;  %v3235_v51 = vmin.f32 %v12799_v45, 0.0 }
 0x1d2   : > { %v3657_v56 = vpack.c.bf16 %v3600_v21, %v3597_v57  ;;  %v3614_v38 = vsel %vm3134_vm13, %v12712_v60, %v9508_v50  ;;  %v3604_v11 = vsel %vm3124_vm9, %v12652_v17, %v9498_v54  ;;  %v3607_v63 = vsel %vm3127_vm10, %v12681_v33, %v9501_v48  ;;  %v12856_v48 = vld [vmem:[%s15252_s4] ss:$0 sm:$0xff] }
 0x1d3   : > { %v3603_v40 = vsel %vm3123_vm8, %v12646_v15, %v9497_v7  ;;  %v3665_v4 = vpack.c.bf16 %v3614_v38, %v3611_v39  ;;  %v3425_v53 = vmul.f32 1.442695, %v3235_v51  ;;  %v3661_v43 = vpack.c.bf16 %v3607_v63, %v3604_v11 }
 0x1d4   : > { %4030 = vmatmul.mubr.bf16.gmra.mrb[112].mxu0 %v3657_v56  ;;  %v3606_v60 = vsel %vm3126_vm12, %v12665_v12, %v9500_v22  ;;  %v9504_v3 = vadd.f32 -1.0, %v10971_v42  ;;  %v3609_v17 = vsel %vm3129_vm14, %v12703_v24, %v9503_v36  ;;  %v3612_v33 = vsel %vm3132_vm15, %v12716_v37, %v9506_v55 }
 0x1d5   : > { %v3660_v30 = vpack.c.bf16 %v3606_v60, %v3603_v40  ;;  %v10973_v1 = vpop.eup %10972  ;;  %10984 = vpow2.f32 %v3425_v53  ;;  %4037 = vmatprep.mubr.bf16.mxu0 %v3661_v43  ;;  %10154 = vmatprep.mubr.msk.bf16.mxu1 %vm3852_vm3, %v3665_v4  ;;  %v3663_v15 = vpack.c.bf16 %v3612_v33, %v3609_v17  ;;  %vm3130_vm0 = vcmp.gt.f32.partialorder %v12707_v6, 0.0 }
 0x1d6   : > { %v10975_v44 = vpop.eup %10974  ;;  %v9507_v16 = vadd.f32 -1.0, %v10973_v1  ;;  %vm3133_vm1 = vcmp.gt.f32.partialorder %v12740_v19, 0.0  ;;  %v3610_v24 = vsel %vm3130_vm0, %v12707_v6, %v9504_v3  ;;  %vm3137_vm2 = vcmp.gt.f32.partialorder %v12747_v61, 0.0 }
 0x1d7   : > { %v10977_v25 = vpop.eup %10976  ;;  %v9511_v32 = vadd.f32 -1.0, %v10975_v44  ;;  %vm3140_vm4 = vcmp.gt.f32.partialorder %v12777_v5, 0.0  ;;  %vm3135_vm5 = vcmp.gt.f32.partialorder %v12751_v23, 0.0  ;;  %vm3138_vm6 = vcmp.gt.f32.partialorder %v12781_v52, 0.0 }
 0x1d8   : > { %v10979_v12 = vpop.eup %10978  ;;  %v3613_v20 = vsel %vm3133_vm1, %v12740_v19, %v9507_v16  ;;  %v9509_v62 = vadd.f32 -1.0, %v10977_v25  ;;  %vm3136_vm7 = vcmp.gt.f32.partialorder %v12769_v0, 0.0  ;;  %vm3139_vm8 = vcmp.gt.f32.partialorder %v12799_v45, 0.0  ;;  %v15294_v25 = vld [vmem:[#allocation8_spill] sm:$0xff] }
 0x1d9   : > { %v3664_v35 = vpack.c.bf16 %v3613_v20, %v3610_v24  ;;  %v3617_v46 = vsel %vm3137_vm2, %v12747_v61, %v9511_v32  ;;  %v9510_v54 = vadd.f32 -1.0, %v10979_v12  ;;  %v11123_v56 = vmov 1983009808  }
 0x1da   : > { %v10981_v37 = vpop.eup %10980  ;;  %v3615_v19 = vsel %vm3135_vm5, %v12751_v23, %v9509_v62  ;;  %v15293_v23 = vmov 0   ;;  %v4449_v38 = vunpack.c.l.s4 %v11123_v56  ;;  %vm5696_vm12 = vcmask 259072  }
 0x1db   : > { %v10983_v8 = vpop.eup %10982  ;;  %v9514_v58 = vadd.f32 -1.0, %v10981_v37  ;;  %v3616_v61 = vsel %vm3136_vm7, %v12769_v0, %v9510_v54 }
 0x1dc   : > { %v9512_v10 = vadd.f32 -1.0, %v10983_v8  ;;  %4038 = vmatmul.mubr.bf16.gmra.mrb[116].mxu0 %v3660_v30  ;;  %v4450_v30 = vunpack.c.0.s8 %v4449_v38 }
 0x1dd   : > { %v3620_v9 = vsel %vm3140_vm4, %v12777_v5, %v9514_v58  ;;  %4045 = vmatprep.mubr.bf16.mxu0 %v3664_v35 }
 0x1de   : > { %v3668_v6 = vpack.c.bf16 %v3620_v9, %v3617_v46  ;;  %v3618_v7 = vsel %vm3138_vm6, %v12781_v52, %v9512_v10  ;;  %v12870_v12 = vsub.s32 %v4450_v30, %v15294_v25 }
 0x1df   : > { %v3666_v31 = vpack.c.bf16 %v3618_v7, %v3615_v19  ;;  %v10985_v34 = vpop.eup %10984 }
 0x1e0   : > { %10155 = vmatmul.mubr.msk.bf16.gmra.mrb[92].mxu1 %vm3852_vm3, %v3668_v6  ;;  %v9513_v47 = vadd.f32 -1.0, %v10985_v34 }
 0x1e2   : > { %v3619_v5 = vsel %vm3139_vm8, %v12799_v45, %v9513_v47 }
 0x1e3   : > { %v3667_v59 = vpack.c.bf16 %v3619_v5, %v3616_v61 }
 0x1e4   : > { %4046 = vmatmul.mubr.bf16.gmra.mrb[120].mxu0 %v3663_v15 }
 0x1e5   : > { %4053 = vmatprep.mubr.bf16.mxu0 %v3667_v59 }
 0x1ec   : > { %4054 = vmatmul.mubr.bf16.gmra.mrb[124].mxu0 %v3666_v31 }
 0x1ed   : > { %7203 = vmatprep.mubr.bf16.mxu0 %v15293_v23 }
 0x219   : > { %v10128_v52 = vpop.f32.mrb[64].mxu1  ;;  %v9931_v29 = vpop.f32.mrb[64].mxu0 }
 0x21a   : > { %v4096_v49 = vpop.f32.mrb[65].mxu1  ;;  %v9932_v28 = vpop.f32.mrb[65].mxu0 }
 0x21b   : > { %v10129_v27 = vpop.f32.mrb[66].mxu1  ;;  %v9933_v0 = vadd.f32 %v9932_v28, %v9931_v29  ;;  %v9934_v26 = vpop.f32.mrb[66].mxu0 }
 0x21c   : > { %v4099_v2 = vpop.f32.mrb[67].mxu1  ;;  %v9935_v18 = vpop.f32.mrb[67].mxu0 }
 0x21d   : > { %v9936_v14 = vadd.f32 %v9935_v18, %v9934_v26  ;;  %v3936_v22 = vadd.f32 %v9933_v0, %v12856_v48 }
 0x21f   : > { %v4097_v36 = vadd.f32 %v4096_v49, %v3936_v22  ;;  %v3939_v41 = vadd.f32 %v9936_v14, %v12856_v48 }
 0x221   : > { %v4255_v45 = vmin.f32 %v4097_v36, 0.0  ;;  %v4100_v13 = vadd.f32 %v4099_v2, %v3939_v41  ;;  %vm4223_vm9 = vcmp.gt.f32.partialorder %v4097_v36, 0.0 }
 0x223   : > { %v4287_v50 = vmul.f32 1.442695, %v4255_v45  ;;  %v4256_v57 = vmin.f32 %v4100_v13, 0.0  ;;  %vm4224_vm10 = vcmp.gt.f32.partialorder %v4100_v13, 0.0 }
 0x224   : > { %v9937_v21 = vpop.f32.mrb[68].mxu0 }
 0x225   : > { %10986 = vpow2.f32 %v4287_v50  ;;  %v4289_v42 = vmul.f32 1.442695, %v4256_v57  ;;  %v9938_v39 = vpop.f32.mrb[69].mxu0 }
 0x226   : > { %v9939_v55 = vadd.f32 %v9938_v39, %v9937_v21  ;;  %v9940_v51 = vpop.f32.mrb[70].mxu0 }
 0x227   : > { %10988 = vpow2.f32 %v4289_v42  ;;  %v9941_v11 = vpop.f32.mrb[71].mxu0 }
 0x228   : > { %v3944_v63 = vadd.f32 %v9939_v55, %v12856_v48  ;;  %v9942_v40 = vadd.f32 %v9941_v11, %v9940_v51 }
 0x229   : > { %v12861_v4 = vpop.f32.mrb[68].mxu1 }
 0x22a   : > { %v4112_v53 = vpop.f32.mrb[69].mxu1  ;;  %v4105_v43 = vadd.f32 %v10128_v52, %v3944_v63  ;;  %v3947_v60 = vadd.f32 %v9942_v40, %v12856_v48 }
 0x22b   : > { %v12864_v3 = vpop.f32.mrb[70].mxu1 }
 0x22c   : > { %v4115_v17 = vpop.f32.mrb[71].mxu1  ;;  %v4257_v33 = vmin.f32 %v4105_v43, 0.0  ;;  %v12866_v1 = vadd.f32 %v10129_v27, %v3947_v60  ;;  %vm4225_vm11 = vcmp.gt.f32.partialorder %v4105_v43, 0.0 }
 0x22e   : > { %v4291_v15 = vmul.f32 1.442695, %v4257_v33  ;;  %v4258_v44 = vmin.f32 %v12866_v1, 0.0  ;;  %vm4226_vm13 = vcmp.gt.f32.partialorder %v12866_v1, 0.0 }
 0x22f   : > { %v10987_v16 = vpop.eup %10986 }
 0x230   : > { %v9554_v32 = vadd.f32 -1.0, %v10987_v16  ;;  %10990 = vpow2.f32 %v4291_v15  ;;  %v4293_v24 = vmul.f32 1.442695, %v4258_v44 }
 0x231   : > { %v10989_v20 = vpop.eup %10988  ;;  %v9943_v37 = vpop.f32.mrb[72].mxu0 }
 0x232   : > { %v4383_v62 = vsel %vm4223_vm9, %v4097_v36, %v9554_v32  ;;  %v9555_v35 = vadd.f32 -1.0, %v10989_v20  ;;  %10992 = vpow2.f32 %v4293_v24  ;;  %v9944_v8 = vpop.f32.mrb[73].mxu0  ;;  %vm6015_vm9 = vcmask 1041409  }
 0x233   : > { %v4447_v58 = vcombine.high %v4383_v62, %v4383_v62  ;;  %v4454_v10 = vrot.slane %v4383_v62, %v12870_v12  ;;  %v9945_v46 = vadd.f32 %v9944_v8, %v9943_v37  ;;  %v9946_v9 = vpop.f32.mrb[74].mxu0 }
 0x234   : > { %v4384_v6 = vsel %vm4224_vm10, %v4100_v13, %v9555_v35  ;;  %v9947_v19 = vpop.f32.mrb[75].mxu0  ;;  %vm6017_vm10 = vcmask 1042434  }
 0x235   : > { %v4461_v7 = vrot.slane %v4447_v58, %v12870_v12  ;;  %v4462_v54 = vcombine.high %v4454_v10, %v4454_v10  ;;  %v4464_v31 = vcombine.high %v4384_v6, %v4384_v6  ;;  %v4471_v34 = vrot.slane %v4384_v6, %v12870_v12 }
 0x236   : > { %v9948_v47 = vadd.f32 %v9947_v19, %v9946_v9  ;;  %v3952_v61 = vadd.f32 %v9945_v46, %v12856_v48 }
 0x237   : > { %v4982_v5 = vcombine.low %v4454_v10, %v4462_v54  ;;  %v4463_v59 = vcombine.high %v4461_v7, %v4461_v7  ;;  %v4478_v52 = vrot.slane %v4464_v31, %v12870_v12  ;;  %v4479_v49 = vcombine.high %v4471_v34, %v4471_v34 }
 0x238   : > { %v12877_v27 = vadd.f32 %v4112_v53, %v3952_v61  ;;  %v3955_v2 = vadd.f32 %v9948_v47, %v12856_v48  ;;  %v4996_v28 = vrot.slane %v4461_v7, %v12870_v12 }
 0x239   : > { %v4989_v29 = vrot.slane %v4982_v5, %v12870_v12  ;;  %v4480_v0 = vcombine.high %v4478_v52, %v4478_v52  ;;  %v4998_v26 = vcombine.low %v4463_v59, %v4471_v34  ;;  %v5012_v14 = vrot.slane %v4479_v49, %v12870_v12 }
 0x23a   : > { %v10991_v18 = vpop.eup %10990  ;;  %v4259_v22 = vmin.f32 %v12877_v27, 0.0  ;;  %v12884_v36 = vadd.f32 %v4115_v17, %v3955_v2  ;;  %vm4227_vm14 = vcmp.gt.f32.partialorder %v12877_v27, 0.0 }
 0x23b   : > { %v12886_v41 = vcombine.low %v4989_v29, %v4996_v28  ;;  %v5005_v45 = vrot.slane %v4998_v26, %v12870_v12  ;;  %v5014_v13 = vcombine.low %v4478_v52, %v4480_v0  ;;  %v9556_v50 = vadd.f32 -1.0, %v10991_v18  ;;  %v9949_v42 = vpop.f32.mrb[76].mxu0 }
 0x23c   : > { %v10993_v57 = vpop.eup %10992  ;;  %v4295_v21 = vmul.f32 1.442695, %v4259_v22  ;;  %v4260_v39 = vmin.f32 %v12884_v36, 0.0  ;;  %v9950_v56 = vpop.f32.mrb[77].mxu0  ;;  %vm4228_vm15 = vcmp.gt.f32.partialorder %v12884_v36, 0.0 }
 0x23d   : > { %15295 = vst [vmem:[#allocation12_spill] sm:$0xff] %v12886_v41  ;;  %v5013_v55 = vcombine.low %v5005_v45, %v5012_v14  ;;  %v4385_v51 = vsel %vm4225_vm11, %v4105_v43, %v9556_v50  ;;  %v5021_v11 = vrot.slane %v5014_v13, %v12870_v12  ;;  %v9557_v53 = vadd.f32 -1.0, %v10993_v57  ;;  %v9952_v60 = vpop.f32.mrb[78].mxu0 }
 0x23e   : > { %v4481_v63 = vcombine.high %v4385_v51, %v4385_v51  ;;  %v4488_v40 = vrot.slane %v4385_v51, %v12870_v12  ;;  %10994 = vpow2.f32 %v4295_v21  ;;  %v4297_v33 = vmul.f32 1.442695, %v4260_v39  ;;  %v9953_v44 = vpop.f32.mrb[79].mxu0 }
 0x23f   : > { %v5704_v17 = vsel %vm5696_vm12, %v5013_v55, -inf  ;;  %v9951_v15 = vadd.f32 %v9950_v56, %v9949_v42  ;;  %v4386_v37 = vsel %vm4226_vm13, %v12866_v1, %v9557_v53  ;;  %v9954_v2 = vadd.f32 %v9953_v44, %v9952_v60 }
 0x240   : > { %v4495_v43 = vrot.slane %v4481_v63, %v12870_v12  ;;  %v4496_v32 = vcombine.high %v4488_v40, %v4488_v40  ;;  %v5028_v20 = vrot.slane %v4488_v40, %v12870_v12  ;;  %10996 = vpow2.f32 %v4297_v33 }
 0x241   : > { %v12890_v38 = vpop.f32.mrb[72].mxu1  ;;  %v3960_v62 = vadd.f32 %v9951_v15, %v12856_v48  ;;  %v5705_v35 = vrot.slane %v5704_v17, 4  ;;  %v4498_v46 = vcombine.high %v4386_v37, %v4386_v37  ;;  %v4505_v9 = vrot.slane %v4386_v37, %v12870_v12 }
 0x242   : > { %v12894_v30 = vpop.f32.mrb[73].mxu1  ;;  %v4497_v8 = vcombine.high %v4495_v43, %v4495_v43  ;;  %v5030_v58 = vcombine.low %v4496_v32, %v4495_v43  ;;  %v5029_v10 = vcombine.low %v5021_v11, %v5028_v20  ;;  %v3963_v13 = vadd.f32 %v9954_v2, %v12856_v48 }
 0x243   : > { %v12897_v16 = vpop.f32.mrb[74].mxu1  ;;  %v12908_v6 = vadd.f32 %v12861_v4, %v3960_v62  ;;  %v4513_v19 = vcombine.high %v4505_v9, %v4505_v9  ;;  %v4512_v7 = vrot.slane %v4498_v46, %v12870_v12  ;;  %v5706_v54 = vmax.f32 %v5704_v17, %v5705_v35 }
 0x244   : > { %v12901_v24 = vpop.f32.mrb[75].mxu1  ;;  %v5037_v31 = vrot.slane %v5030_v58, %v12870_v12  ;;  %v5044_v1 = vrot.slane %v4497_v8, %v12870_v12  ;;  %v5711_v61 = vsel %vm5696_vm12, %v5029_v10, -inf  ;;  %v12929_v53 = vadd.f32 %v12864_v3, %v3963_v13 }
 0x245   : > { %v5046_v34 = vcombine.low %v4505_v9, %v4513_v19  ;;  %v4261_v47 = vmin.f32 %v12908_v6, 0.0  ;;  %v5060_v52 = vrot.slane %v4512_v7, %v12870_v12  ;;  %v5707_v28 = vrot.slane %v5706_v54, 2 }
 0x246   : > { %v5045_v22 = vcombine.low %v5037_v31, %v5044_v1  ;;  %v5712_v57 = vrot.slane %v5711_v61, 4  ;;  %v4514_v55 = vcombine.high %v4512_v7, %v4512_v7  ;;  %vm4229_vm0 = vcmp.gt.f32.partialorder %v12908_v6, 0.0 }
 0x247   : > { %v5053_v4 = vrot.slane %v5046_v34, %v12870_v12  ;;  %v4299_v49 = vmul.f32 1.442695, %v4261_v47  ;;  %v5708_v15 = vmax.f32 %v5706_v54, %v5707_v28  ;;  %vm4230_vm1 = vcmp.gt.f32.partialorder %v12929_v53, 0.0 }
 0x248   : > { %v9955_v5 = vpop.f32.mrb[80].mxu0  ;;  %v10995_v59 = vpop.eup %10994  ;;  %v5718_v60 = vsel %vm5696_vm12, %v5045_v22, -inf  ;;  %v5713_v44 = vmax.f32 %v5711_v61, %v5712_v57  ;;  %vm6019_vm11 = vcmask 1043459   ;;  %vm6021_vm13 = vcmask 1044484  }
 0x249   : > { %v9956_v29 = vpop.f32.mrb[81].mxu0  ;;  %v9558_v0 = vadd.f32 -1.0, %v10995_v59  ;;  %v5061_v45 = vcombine.low %v5053_v4, %v5060_v52  ;;  %10998 = vpow2.f32 %v4299_v49  ;;  %v5719_v3 = vrot.slane %v5718_v60, 4 }
 0x24a   : > { %v9957_v26 = vadd.f32 %v9956_v29, %v9955_v5  ;;  %v9958_v18 = vpop.f32.mrb[82].mxu0  ;;  %v10997_v14 = vpop.eup %10996  ;;  %v5714_v29 = vrot.slane %v5713_v44, 2 }
 0x24b   : > { %v9959_v50 = vpop.f32.mrb[83].mxu0  ;;  %v4387_v21 = vsel %vm4227_vm14, %v12877_v27, %v9558_v0  ;;  %v9559_v42 = vadd.f32 -1.0, %v10997_v14  ;;  %v5725_v11 = vsel %vm5696_vm12, %v5061_v45, -inf  ;;  %v5720_v14 = vmax.f32 %v5718_v60, %v5719_v3 }
 0x24c   : > { %v9960_v39 = vadd.f32 %v9959_v50, %v9958_v18  ;;  %v4515_v51 = vcombine.high %v4387_v21, %v4387_v21  ;;  %v4522_v56 = vrot.slane %v4387_v21, %v12870_v12  ;;  %v5726_v63 = vrot.slane %v5725_v11, 4 }
 0x24d   : > { %v4388_v40 = vsel %vm4228_vm15, %v12884_v36, %v9559_v42  ;;  %v4262_v36 = vmin.f32 %v12929_v53, 0.0  ;;  %v3968_v19 = vadd.f32 %v9957_v26, %v12856_v48  ;;  %v5709_v42 = vrot.slane %v5708_v15, 1 }
 0x24e   : > { %v4529_v27 = vrot.slane %v4515_v51, %v12870_v12  ;;  %v4530_v17 = vcombine.high %v4522_v56, %v4522_v56  ;;  %v5062_v33 = vcombine.low %v4514_v55, %v4522_v56  ;;  %v4532_v43 = vcombine.high %v4388_v40, %v4388_v40 }
 0x24f   : > { %v4539_v32 = vrot.slane %v4388_v40, %v12870_v12  ;;  %v5727_v35 = vmax.f32 %v5725_v11, %v5726_v63  ;;  %v4301_v9 = vmul.f32 1.442695, %v4262_v36  ;;  %v3971_v34 = vadd.f32 %v9960_v39, %v12856_v48 }
 0x250   : > { %v4531_v20 = vcombine.high %v4529_v27, %v4529_v27  ;;  %v5069_v37 = vrot.slane %v5062_v33, %v12870_v12  ;;  %v5076_v62 = vrot.slane %v4530_v17, %v12870_v12  ;;  %v4546_v8 = vrot.slane %v4532_v43, %v12870_v12 }
 0x251   : > { %v4547_v58 = vcombine.high %v4539_v32, %v4539_v32  ;;  %v5092_v31 = vrot.slane %v4539_v32, %v12870_v12  ;;  %11000 = vpow2.f32 %v4301_v9  ;;  %v12946_v52 = vadd.f32 %v12894_v30, %v3968_v19 }
 0x252   : > { %v5077_v10 = vcombine.low %v5069_v37, %v5076_v62  ;;  %v5078_v46 = vcombine.low %v4529_v27, %v4531_v20  ;;  %v4548_v54 = vcombine.high %v4546_v8, %v4546_v8  ;;  %v5728_v30 = vrot.slane %v5727_v35, 2 }
 0x253   : > { %v9961_v7 = vpop.f32.mrb[84].mxu0  ;;  %v5094_v1 = vcombine.low %v4547_v58, %v4546_v8  ;;  %v10999_v5 = vpop.eup %10998  ;;  %v4263_v13 = vmin.f32 %v12946_v52, 0.0  ;;  %v12959_v21 = vadd.f32 %v12901_v24, %v3971_v34  ;;  %v12962_v56 = vmax.f32 %v5713_v44, %v5714_v29 }
 0x254   : > { %v9962_v47 = vpop.f32.mrb[85].mxu0  ;;  %v5732_v59 = vsel %vm5696_vm12, %v5077_v10, -inf  ;;  %v5085_v4 = vrot.slane %v5078_v46, %v12870_v12  ;;  %v5108_v0 = vrot.slane %v4548_v54, %v12870_v12  ;;  %v9560_v45 = vadd.f32 -1.0, %v10999_v5 }
 0x255   : > { %v9964_v49 = vpop.f32.mrb[86].mxu0  ;;  %v5101_v28 = vrot.slane %v5094_v1, %v12870_v12  ;;  %v5733_v57 = vrot.slane %v5732_v59, 4  ;;  %v4303_v55 = vmul.f32 1.442695, %v4263_v13  ;;  %v9963_v51 = vadd.f32 %v9962_v47, %v9961_v7 }
 0x256   : > { %v9965_v26 = vpop.f32.mrb[87].mxu0  ;;  %v5093_v22 = vcombine.low %v5085_v4, %v5092_v31  ;;  %v4389_v39 = vsel %vm4229_vm0, %v12908_v6, %v9560_v45  ;;  %v5721_v60 = vrot.slane %v5720_v14, 2  ;;  %v5729_v17 = vmax.f32 %v5727_v35, %v5728_v30 }
 0x257   : > { %v5109_v11 = vcombine.low %v5101_v28, %v5108_v0  ;;  %v4549_v40 = vcombine.high %v4389_v39, %v4389_v39  ;;  %v4556_v27 = vrot.slane %v4389_v39, %v12870_v12  ;;  %11002 = vpow2.f32 %v4303_v55 }
 0x258   : > { %v12941_v61 = vpop.f32.mrb[76].mxu1  ;;  %v5739_v63 = vsel %vm5696_vm12, %v5093_v22, -inf  ;;  %v5734_v33 = vmax.f32 %v5732_v59, %v5733_v57  ;;  %v4264_v24 = vmin.f32 %v12959_v21, 0.0  ;;  %v3976_v6 = vadd.f32 %v9963_v51, %v12856_v48 }
 0x259   : > { %v12948_v2 = vpop.f32.mrb[77].mxu1  ;;  %v5740_v43 = vrot.slane %v5739_v63, 4  ;;  %v4564_v32 = vcombine.high %v4556_v27, %v4556_v27  ;;  %v9966_v20 = vadd.f32 %v9965_v26, %v9964_v49  ;;  %v12968_v37 = vmax.f32 %v5708_v15, %v5709_v42 }
 0x25a   : > { %v12952_v18 = vpop.f32.mrb[78].mxu1  ;;  %v5716_v44 = vrot.slane %v12962_v56, 1  ;;  %v5746_v62 = vsel %vm5696_vm12, %v5109_v11, -inf  ;;  %v4563_v36 = vrot.slane %v4549_v40, %v12870_v12  ;;  %v12973_v58 = vmax.f32 %v5720_v14, %v5721_v60 }
 0x25b   : > { %v12955_v50 = vpop.f32.mrb[79].mxu1  ;;  %15296 = vst [vmem:[#allocation13_spill] sm:$0xff] %v12968_v37  ;;  %v11001_v8 = vpop.eup %11000  ;;  %v5110_v35 = vcombine.low %v4556_v27, %v4564_v32  ;;  %v4305_v10 = vmul.f32 1.442695, %v4264_v24  ;;  %v12976_v46 = vadd.f32 %v12890_v38, %v3976_v6  ;;  %v5730_v19 = vrot.slane %v5729_v17, 1 }
 0x25c   : > { %v5735_v7 = vrot.slane %v5734_v33, 2  ;;  %v9561_v15 = vadd.f32 -1.0, %v11001_v8  ;;  %v3979_v54 = vadd.f32 %v9966_v20, %v12856_v48  ;;  %v5741_v1 = vmax.f32 %v5739_v63, %v5740_v43 }
 0x25d   : > { %v5747_v34 = vrot.slane %v5746_v62, 4  ;;  %11004 = vpow2.f32 %v4305_v10  ;;  %v4565_v59 = vcombine.high %v4563_v36, %v4563_v36  ;;  %v4265_v4 = vmin.f32 %v12976_v46, 0.0 }
 0x25e   : > { %v4390_v5 = vsel %vm4230_vm1, %v12929_v53, %v9561_v15  ;;  %v12983_v38 = vadd.f32 %v12897_v16, %v3979_v54  ;;  %v5117_v49 = vrot.slane %v5110_v35, %v12870_v12  ;;  %vm4231_vm2 = vcmp.gt.f32.partialorder %v12946_v52, 0.0 }
 0x25f   : > { %v9967_v3 = vpop.f32.mrb[88].mxu0  ;;  %v4566_v29 = vcombine.high %v4390_v5, %v4390_v5  ;;  %v4573_v28 = vrot.slane %v4390_v5, %v12870_v12  ;;  %v12988_v0 = vmax.f32 %v5729_v17, %v5730_v19  ;;  %v12990_v26 = vmax.f32 %v5734_v33, %v5735_v7 }
 0x260   : > { %v9968_v9 = vpop.f32.mrb[89].mxu0  ;;  %v4307_v14 = vmul.f32 1.442695, %v4265_v4  ;;  %v4266_v53 = vmin.f32 %v12983_v38, 0.0  ;;  %v5748_v45 = vmax.f32 %v5746_v62, %v5747_v34  ;;  %v5124_v13 = vrot.slane %v4563_v36, %v12870_v12 }
 0x261   : > { %v9970_v31 = vpop.f32.mrb[90].mxu0  ;;  %v11003_v22 = vpop.eup %11002  ;;  %v4580_v16 = vrot.slane %v4566_v29, %v12870_v12  ;;  %v4581_v30 = vcombine.high %v4573_v28, %v4573_v28  ;;  %v5742_v57 = vrot.slane %v5741_v1, 2  ;;  %v5126_v42 = vcombine.low %v4565_v59, %v4573_v28 }
 0x262   : > { %v9971_v47 = vpop.f32.mrb[91].mxu0  ;;  %v9562_v39 = vadd.f32 -1.0, %v11003_v22  ;;  %11006 = vpow2.f32 %v4307_v14  ;;  %v5125_v55 = vcombine.low %v5117_v49, %v5124_v13  ;;  %v4309_v11 = vmul.f32 1.442695, %v4266_v53 }
 0x263   : > { %v4582_v51 = vcombine.high %v4580_v16, %v4580_v16  ;;  %v9969_v63 = vadd.f32 %v9968_v9, %v9967_v3  ;;  %v5133_v40 = vrot.slane %v5126_v42, %v12870_v12  ;;  %v5140_v60 = vrot.slane %v4581_v30, %v12870_v12 }
 0x264   : > { %v4391_v27 = vsel %vm4231_vm2, %v12946_v52, %v9562_v39  ;;  %v9972_v17 = vadd.f32 %v9971_v47, %v9970_v31  ;;  %11008 = vpow2.f32 %v4309_v11  ;;  %v5749_v32 = vrot.slane %v5748_v45, 2 }
 0x265   : > { %v4583_v33 = vcombine.high %v4391_v27, %v4391_v27  ;;  %v4590_v24 = vrot.slane %v4391_v27, %v12870_v12  ;;  %v5142_v43 = vcombine.low %v4580_v16, %v4582_v51  ;;  %v5141_v6 = vcombine.low %v5133_v40, %v5140_v60 }
 0x266   : > { %vm4232_vm4 = vcmp.gt.f32.partialorder %v12959_v21, 0.0  ;;  %v3984_v20 = vadd.f32 %v9969_v63, %v12856_v48  ;;  %v5737_v7 = vrot.slane %v12990_v26, 1  ;;  %v13015_v15 = vmax.f32 %v5741_v1, %v5742_v57 }
 0x267   : > { %v11005_v3 = vpop.eup %11004  ;;  %v4597_v8 = vrot.slane %v4583_v33, %v12870_v12  ;;  %v4598_v52 = vcombine.high %v4590_v24, %v4590_v24  ;;  %v5149_v35 = vrot.slane %v5142_v43, %v12870_v12  ;;  %v5156_v10 = vrot.slane %v4590_v24, %v12870_v12 }
 0x268   : > { %v9563_v54 = vadd.f32 -1.0, %v11005_v3  ;;  %v13018_v31 = vadd.f32 %v12948_v2, %v3984_v20  ;;  %v5753_v5 = vsel %vm5696_vm12, %v5125_v55, -inf  ;;  %v5760_v1 = vsel %vm5696_vm12, %v5141_v6, -inf }
 0x269   : > { %v4599_v59 = vcombine.high %v4597_v8, %v4597_v8  ;;  %v5157_v4 = vcombine.low %v5149_v35, %v5156_v10  ;;  %v5158_v49 = vcombine.low %v4598_v52, %v4597_v8  ;;  %v3987_v53 = vadd.f32 %v9972_v17, %v12856_v48 }
 0x26a   : > { %v13003_v62 = vpop.f32.mrb[92].mxu0  ;;  %v4392_v2 = vsel %vm4232_vm4, %v12959_v21, %v9563_v54  ;;  %v4267_v14 = vmin.f32 %v13018_v31, 0.0  ;;  %v13035_v22 = vmax.f32 %v5748_v45, %v5749_v32  ;;  %v5754_v42 = vrot.slane %v5753_v5, 4 }
 0x26b   : > { %v13005_v36 = vpop.f32.mrb[80].mxu1  ;;  %v13010_v9 = vpop.f32.mrb[93].mxu0  ;;  %v5165_v13 = vrot.slane %v5158_v49, %v12870_v12  ;;  %v5172_v16 = vrot.slane %v4599_v59, %v12870_v12  ;;  %v5767_v30 = vsel %vm5696_vm12, %v5157_v4, -inf  ;;  %v4600_v39 = vcombine.high %v4392_v2, %v4392_v2 }
 0x26c   : > { %v13012_v19 = vpop.f32.mrb[81].mxu1  ;;  %v13020_v34 = vpop.f32.mrb[94].mxu0  ;;  %v4607_v55 = vrot.slane %v4392_v2, %v12870_v12  ;;  %vm4233_vm5 = vcmp.gt.f32.partialorder %v12976_v46, 0.0  ;;  %v5761_v21 = vrot.slane %v5760_v1, 4  ;;  %v4311_v63 = vmul.f32 1.442695, %v4267_v14 }
 0x26d   : > { %v13022_v47 = vpop.f32.mrb[82].mxu1  ;;  %v13025_v29 = vpop.f32.mrb[95].mxu0  ;;  %v5173_v51 = vcombine.low %v5165_v13, %v5172_v16  ;;  %v5768_v40 = vrot.slane %v5767_v30, 4  ;;  %v4614_v45 = vrot.slane %v4600_v39, %v12870_v12  ;;  %v13044_v27 = vadd.f32 %v12955_v50, %v3987_v53 }
 0x26e   : > { %v13027_v28 = vpop.f32.mrb[83].mxu1  ;;  %v11007_v57 = vpop.eup %11006  ;;  %v4615_v60 = vcombine.high %v4607_v55, %v4607_v55  ;;  %v5744_v33 = vrot.slane %v13015_v15, 1  ;;  %11010 = vpow2.f32 %v4311_v63  ;;  %v13049_v32 = vmax.f32 %v5753_v5, %v5754_v42 }
 0x26f   : > { %v9564_v11 = vadd.f32 -1.0, %v11007_v57  ;;  %v11009_v17 = vpop.eup %11008  ;;  %v5774_v24 = vsel %vm5696_vm12, %v5173_v51, -inf  ;;  %v4616_v20 = vcombine.high %v4614_v45, %v4614_v45  ;;  %v5751_v8 = vrot.slane %v13035_v22, 1 }
 0x270   : > { %v5775_v6 = vrot.slane %v5774_v24, 4  ;;  %v5174_v3 = vcombine.low %v4607_v55, %v4615_v60  ;;  %v5762_v52 = vmax.f32 %v5760_v1, %v5761_v21  ;;  %v5769_v54 = vmax.f32 %v5767_v30, %v5768_v40 }
 0x271   : > { %v4393_v43 = vsel %vm4233_vm5, %v12976_v46, %v9564_v11  ;;  %v5188_v4 = vrot.slane %v4614_v45, %v12870_v12  ;;  %v9565_v46 = vadd.f32 -1.0, %v11009_v17  ;;  %vm4234_vm6 = vcmp.gt.f32.partialorder %v12983_v38, 0.0 }
 0x272   : > { %v4617_v35 = vcombine.high %v4393_v43, %v4393_v43  ;;  %v4624_v50 = vrot.slane %v4393_v43, %v12870_v12  ;;  %v5181_v59 = vrot.slane %v5174_v3, %v12870_v12  ;;  %v5756_v53 = vrot.slane %v13049_v32, 2 }
 0x273   : > { %v5776_v13 = vmax.f32 %v5774_v24, %v5775_v6  ;;  %v4394_v30 = vsel %vm4234_vm6, %v12983_v38, %v9565_v46  ;;  %v5763_v51 = vrot.slane %v5762_v52, 2  ;;  %v5770_v11 = vrot.slane %v5769_v54, 2 }
 0x274   : > { %v4631_v5 = vrot.slane %v4617_v35, %v12870_v12  ;;  %v4632_v2 = vcombine.high %v4624_v50, %v4624_v50  ;;  %v5190_v14 = vcombine.low %v4616_v20, %v4624_v50  ;;  %v5189_v16 = vcombine.low %v5181_v59, %v5188_v4 }
 0x275   : > { %v13053_v10 = vpop.f32.mrb[96].mxu0  ;;  %v4634_v21 = vcombine.high %v4394_v30, %v4394_v30  ;;  %v4641_v40 = vrot.slane %v4394_v30, %v12870_v12  ;;  %v5777_v38 = vrot.slane %v5776_v13, 2  ;;  %vm4235_vm7 = vcmp.gt.f32.partialorder %v13018_v31, 0.0 }
 0x276   : > { %v13057_v49 = vpop.f32.mrb[97].mxu0  ;;  %v4633_v42 = vcombine.high %v4631_v5, %v4631_v5  ;;  %v5197_v39 = vrot.slane %v5190_v14, %v12870_v12  ;;  %v5204_v55 = vrot.slane %v4632_v2, %v12870_v12  ;;  %v5781_v63 = vsel %vm5696_vm12, %v5189_v16, -inf }
 0x277   : > { %v13061_v1 = vpop.f32.mrb[98].mxu0  ;;  %v5782_v45 = vrot.slane %v5781_v63, 4  ;;  %v4648_v24 = vrot.slane %v4634_v21, %v12870_v12  ;;  %v4649_v43 = vcombine.high %v4641_v40, %v4641_v40  ;;  %v5220_v6 = vrot.slane %v4641_v40, %v12870_v12 }
 0x278   : > { %v13065_v57 = vpop.f32.mrb[99].mxu0  ;;  %v5205_v60 = vcombine.low %v5197_v39, %v5204_v55  ;;  %v5206_v17 = vcombine.low %v4631_v5, %v4633_v42  ;;  %v11011_v20 = vpop.eup %11010  ;;  %v5764_v4 = vmax.f32 %v5762_v52, %v5763_v51  ;;  %v5771_v5 = vmax.f32 %v5769_v54, %v5770_v11 }
 0x279   : > { %v5783_v3 = vmax.f32 %v5781_v63, %v5782_v45  ;;  %v4650_v50 = vcombine.high %v4648_v24, %v4648_v24  ;;  %v5222_v2 = vcombine.low %v4649_v43, %v4648_v24  ;;  %v9566_v14 = vadd.f32 -1.0, %v11011_v20 }
 0x27a   : > { %v5788_v35 = vsel %vm5696_vm12, %v5205_v60, -inf  ;;  %v5213_v59 = vrot.slane %v5206_v17, %v12870_v12  ;;  %v4268_v42 = vmin.f32 %v13044_v27, 0.0  ;;  %v9975_v52 = vadd.f32 %v13010_v9, %v13003_v62 }
 0x27b   : > { %v5789_v46 = vrot.slane %v5788_v35, 4  ;;  %v5784_v16 = vrot.slane %v5783_v3, 2  ;;  %v5229_v55 = vrot.slane %v5222_v2, %v12870_v12  ;;  %v5236_v21 = vrot.slane %v4650_v50, %v12870_v12 }
 0x27c   : > { %v5221_v30 = vcombine.low %v5213_v59, %v5220_v6  ;;  %v4395_v63 = vsel %vm4235_vm7, %v13018_v31, %v9566_v14  ;;  %v5778_v40 = vmax.f32 %v5776_v13, %v5777_v38  ;;  %v13093_v24 = vmax.f32 %v12990_v26, %v5737_v7 }
 0x27d   : > { %v5790_v45 = vmax.f32 %v5788_v35, %v5789_v46  ;;  %v4658_v11 = vrot.slane %v4395_v63, %v12870_v12  ;;  %v13096_v31 = vmax.f32 %v13049_v32, %v5756_v53  ;;  %v5765_v62 = vrot.slane %v5764_v4, 1 }
 0x27e   : > { %v5795_v54 = vsel %vm5696_vm12, %v5221_v30, -inf  ;;  %v4313_v9 = vmul.f32 1.442695, %v4268_v42  ;;  %v5772_v43 = vrot.slane %v5771_v5, 1  ;;  %v5785_v6 = vmax.f32 %v5783_v3, %v5784_v16 }
 0x27f   : > { %v4666_v20 = vcombine.high %v4658_v11, %v4658_v11  ;;  %v3992_v35 = vadd.f32 %v9975_v52, %v12856_v48  ;;  %v5237_v59 = vcombine.low %v5229_v55, %v5236_v21  ;;  %v5796_v46 = vrot.slane %v5795_v54, 4 }
 0x280   : > { %v4651_v2 = vcombine.high %v4395_v63, %v4395_v63  ;;  %11012 = vpow2.f32 %v4313_v9  ;;  %v13108_v7 = vmax.f32 %v13015_v15, %v5744_v33  ;;  %v13113_v32 = vmax.f32 %v13035_v22, %v5751_v8 }
 0x281   : > { %v9985_v39 = vpop.f32.mrb[100].mxu0  ;;  %v5779_v53 = vrot.slane %v5778_v40, 1  ;;  %v5791_v3 = vrot.slane %v5790_v45, 2  ;;  %v5758_v14 = vrot.slane %v13096_v31, 1  ;;  %v13116_v16 = vmax.f32 %v5764_v4, %v5765_v62 }
 0x282   : > { %v9986_v51 = vpop.f32.mrb[101].mxu0  ;;  %v13088_v17 = vpop.f32.mrb[84].mxu1  ;;  %v5238_v30 = vcombine.low %v4658_v11, %v4666_v20  ;;  %v13119_v42 = vadd.f32 %v12941_v61, %v3992_v35  ;;  %v13121_v55 = vmax.f32 %v5771_v5, %v5772_v43  ;;  %v5786_v21 = vrot.slane %v5785_v6, 1 }
 0x283   : > { %v13086_v60 = vpop.f32.mrb[102].mxu0  ;;  %v13098_v38 = vpop.f32.mrb[85].mxu1  ;;  %v9978_v15 = vadd.f32 %v13025_v29, %v13020_v34  ;;  %v9981_v22 = vadd.f32 %v13057_v49, %v13053_v10  ;;  %v5797_v33 = vmax.f32 %v5795_v54, %v5796_v46  ;;  %v5802_v8 = vsel %vm5696_vm12, %v5237_v59, -inf }
 0x284   : > { %v9989_v13 = vpop.f32.mrb[103].mxu0  ;;  %v13101_v50 = vpop.f32.mrb[86].mxu1  ;;  %v4665_v63 = vrot.slane %v4651_v2, %v12870_v12  ;;  %vm4236_vm8 = vcmp.gt.f32.partialorder %v13044_v27, 0.0  ;;  %v4269_v4 = vmin.f32 %v13119_v42, 0.0  ;;  %v13131_v61 = vmax.f32 %v5778_v40, %v5779_v53 }
 0x285   : > { %v13103_v26 = vpop.f32.mrb[87].mxu1  ;;  %v13133_v5 = vmax.f32 %v5790_v45, %v5791_v3  ;;  %v3995_v52 = vadd.f32 %v9978_v15, %v12856_v48  ;;  %v9984_v34 = vadd.f32 %v13065_v57, %v13061_v1  ;;  %v5245_v29 = vrot.slane %v5238_v30, %v12870_v12 }
 0x286   : > { %v4315_v10 = vmul.f32 1.442695, %v4269_v4  ;;  %v4000_v49 = vadd.f32 %v9981_v22, %v12856_v48  ;;  %v9987_v54 = vadd.f32 %v9986_v51, %v9985_v39  ;;  %v13140_v11 = vmax.f32 %v5785_v6, %v5786_v21 }
 0x287   : > { %v5803_v62 = vrot.slane %v5802_v8, 4  ;;  %v13143_v9 = vadd.f32 %v12952_v18, %v3995_v52  ;;  %v4003_v40 = vadd.f32 %v9984_v34, %v12856_v48  ;;  %v5798_v43 = vrot.slane %v5797_v33, 2 }
 0x288   : > { %v5252_v20 = vrot.slane %v4665_v63, %v12870_v12  ;;  %11014 = vpow2.f32 %v4315_v10  ;;  %v13148_v1 = vadd.f32 %v13012_v19, %v4000_v49  ;;  %v5793_v39 = vrot.slane %v13133_v5, 1 }
 0x289   : > { %v4270_v51 = vmin.f32 %v13143_v9, 0.0  ;;  %v13153_v18 = vadd.f32 %v13027_v28, %v4003_v40  ;;  %v4008_v6 = vadd.f32 %v9987_v54, %v12856_v48  ;;  %v4667_v2 = vcombine.high %v4665_v63, %v4665_v63 }
 0x28a   : > { %v11013_v59 = vpop.eup %11012  ;;  %v5253_v46 = vcombine.low %v5245_v29, %v5252_v20  ;;  %v4271_v53 = vmin.f32 %v13148_v1, 0.0  ;;  %v9990_v19 = vadd.f32 %v9989_v13, %v13086_v60  ;;  %v5804_v30 = vmax.f32 %v5802_v8, %v5803_v62 }
 0x28b   : > { %v9567_v21 = vadd.f32 -1.0, %v11013_v59  ;;  %v4317_v15 = vmul.f32 1.442695, %v4270_v51  ;;  %v4272_v22 = vmin.f32 %v13153_v18, 0.0  ;;  %v5799_v4 = vmax.f32 %v5797_v33, %v5798_v43 }
 0x28c   : > { %v4319_v28 = vmul.f32 1.442695, %v4271_v53  ;;  %v13160_v52 = vadd.f32 %v13005_v36, %v4008_v6  ;;  %v4011_v34 = vadd.f32 %v9990_v19, %v12856_v48  ;;  %v5809_v13 = vsel %vm5696_vm12, %v5253_v46, -inf }
 0x28d   : > { %v4396_v63 = vsel %vm4236_vm8, %v13044_v27, %v9567_v21  ;;  %11016 = vpow2.f32 %v4317_v15  ;;  %v4321_v29 = vmul.f32 1.442695, %v4272_v22  ;;  %v5805_v54 = vrot.slane %v5804_v30, 2 }
 0x28e   : > { %v9991_v45 = vpop.f32.mrb[104].mxu0  ;;  %v4668_v8 = vcombine.high %v4396_v63, %v4396_v63  ;;  %v4675_v10 = vrot.slane %v4396_v63, %v12870_v12  ;;  %11018 = vpow2.f32 %v4319_v28  ;;  %v4273_v33 = vmin.f32 %v13160_v52, 0.0 }
 0x28f   : > { %v9992_v57 = vpop.f32.mrb[105].mxu0  ;;  %11020 = vpow2.f32 %v4321_v29  ;;  %v13170_v36 = vadd.f32 %v13022_v47, %v4011_v34  ;;  %v6055_v40 = vsel %vm6015_vm9, %v13121_v55, %v13116_v16  ;;  %v5800_v47 = vrot.slane %v5799_v4, 1 }
 0x290   : > { %v9994_v35 = vpop.f32.mrb[106].mxu0  ;;  %v9993_v60 = vadd.f32 %v9992_v57, %v9991_v45  ;;  %v4683_v62 = vcombine.high %v4675_v10, %v4675_v10  ;;  %v5254_v27 = vcombine.low %v4667_v2, %v4675_v10  ;;  %v5810_v45 = vrot.slane %v5809_v13, 4 }
 0x291   : > { %v9995_v3 = vpop.f32.mrb[107].mxu0  ;;  %v4323_v43 = vmul.f32 1.442695, %v4273_v33  ;;  %v4274_v20 = vmin.f32 %v13170_v36, 0.0  ;;  %v6056_v57 = vsel %vm6017_vm10, %v13131_v61, %v6055_v40  ;;  %v4682_v46 = vrot.slane %v4668_v8, %v12870_v12 }
 0x292   : > { %v13172_v49 = vadd.f32 %v9995_v3, %v9994_v35  ;;  %v11015_v51 = vpop.eup %11014  ;;  %v5261_v6 = vrot.slane %v5254_v27, %v12870_v12  ;;  %v5268_v35 = vrot.slane %v4683_v62, %v12870_v12  ;;  %v6057_v59 = vsel %vm6019_vm11, %v13140_v11, %v6056_v57 }
 0x293   : > { %v9568_v2 = vadd.f32 -1.0, %v11015_v51  ;;  %11022 = vpow2.f32 %v4323_v43  ;;  %v4325_v53 = vmul.f32 1.442695, %v4274_v20  ;;  %vm6023_vm14 = vcmask 1045509   ;;  %6070 = vrot.lane.b32.xlu1 %v6057_v59, %s11124_s17 }
 0x294   : > { %v13193_v21 = vmax.f32 %v13096_v31, %v5758_v14  ;;  %v5269_v15 = vcombine.low %v5261_v6, %v5268_v35  ;;  %vm4237_vm15 = vcmp.gt.f32.partialorder %v13119_v42, 0.0  ;;  %v4016_v22 = vadd.f32 %v9993_v60, %v12856_v48 }
 0x295   : > { %v13202_v63 = vmax.f32 %v13133_v5, %v5793_v39  ;;  %v13204_v29 = vmax.f32 %v5804_v30, %v5805_v54  ;;  %v13206_v8 = vmax.f32 %v5809_v13, %v5810_v45  ;;  %v4397_v10 = vsel %vm4237_vm15, %v13119_v42, %v9568_v2 }
 0x296   : > { %v13213_v33 = vmax.f32 %v5799_v4, %v5800_v47  ;;  %v4685_v48 = vcombine.high %v4397_v10, %v4397_v10  ;;  %v13216_v60 = vrot.slane %v4397_v10, %v12870_v12  ;;  %11024 = vpow2.f32 %v4325_v53 }
 0x297   : > { %v11017_v39 = vpop.eup %11016  ;;  %v4684_v30 = vcombine.high %v4682_v46, %v4682_v46  ;;  %vm4238_vm0 = vcmp.gt.f32.partialorder %v13143_v9, 0.0  ;;  %vm4239_vm1 = vcmp.gt.f32.partialorder %v13148_v1, 0.0  ;;  %v13225_v42 = vadd.f32 %v13098_v38, %v4016_v22 }
 0x298   : > { %v11019_v4 = vpop.eup %11018  ;;  %v13228_v13 = vrot.slane %v4685_v48, %v12870_v12  ;;  %v4700_v54 = vcombine.high %v13216_v60, %v13216_v60  ;;  %v9569_v27 = vadd.f32 -1.0, %v11017_v39  ;;  %vm4240_vm2 = vcmp.gt.f32.partialorder %v13153_v18, 0.0 }
 0x299   : > { %v11021_v40 = vpop.eup %11020  ;;  %v9570_v43 = vadd.f32 -1.0, %v11019_v4  ;;  %vm4241_vm4 = vcmp.gt.f32.partialorder %v13160_v52, 0.0  ;;  %v4275_v20 = vmin.f32 %v13225_v42, 0.0  ;;  %v6298_v47 = vsel %vm6021_vm13, %v13202_v63, %v6057_v59 }
 0x29a   : > { %v13188_v3 = vpop.f32.mrb[88].mxu1  ;;  %v13237_v38 = vcombine.low %v4700_v54, %v13228_v13  ;;  %v4398_v57 = vsel %vm4238_vm0, %v13143_v9, %v9569_v27  ;;  %v9571_v51 = vadd.f32 -1.0, %v11021_v40  ;;  %v13242_v6 = vcombine.low %v4682_v46, %v4684_v30 }
 0x29b   : > { %v13186_v19 = vpop.f32.mrb[108].mxu0  ;;  %15297 = vst [vmem:[#allocation14_spill] sm:$0xff] %v13188_v3  ;;  %v13199_v34 = vpop.f32.mrb[89].mxu1  ;;  %v4702_v35 = vcombine.high %v4398_v57, %v4398_v57  ;;  %v4399_v2 = vsel %vm4239_vm1, %v13148_v1, %v9570_v43  ;;  %v4327_v53 = vmul.f32 1.442695, %v4275_v20  ;;  %vm4242_vm5 = vcmp.gt.f32.partialorder %v13170_v36, 0.0 }
 0x29c   : > { %v13197_v28 = vpop.f32.mrb[109].mxu0  ;;  %v13211_v14 = vpop.f32.mrb[90].mxu1  ;;  %15300 = vst [vmem:[#allocation17_spill] sm:$0xff] %v13237_v38  ;;  %v4719_v22 = vcombine.high %v4399_v2, %v4399_v2  ;;  %v4726_v10 = vrot.slane %v4399_v2, %v12870_v12  ;;  %v13251_v9 = vsel %vm6023_vm14, %v13213_v33, %v6298_v47  ;;  %v5723_v48 = vrot.slane %v12973_v58, 1 }
 0x29d   : > { %v13209_v31 = vpop.f32.mrb[110].mxu0  ;;  %15298 = vst [vmem:[#allocation15_spill] sm:$0xff] %v13211_v14  ;;  %v13220_v5 = vpop.f32.mrb[91].mxu1  ;;  %15301 = vst [vmem:[#allocation18_spill] sm:$0xff] %v13251_v9  ;;  %v13255_v46 = vsel %vm5696_vm12, %v5269_v15, -inf  ;;  %v13258_v39 = vrot.slane %v4702_v35, %v12870_v12  ;;  %v4400_v1 = vsel %vm4240_vm2, %v13153_v18, %v9571_v51  ;;  %11026 = vpow2.f32 %v4327_v53 }
 0x29e   : > { %v13218_v62 = vpop.f32.mrb[111].mxu0  ;;  %15299 = vst [vmem:[#allocation16_spill] sm:$0xff] %v13220_v5  ;;  %v11023_v59 = vpop.eup %11022  ;;  %v4733_v4 = vrot.slane %v4719_v22, %v12870_v12  ;;  %v4734_v54 = vcombine.high %v4726_v10, %v4726_v10  ;;  %v4736_v27 = vcombine.high %v4400_v1, %v4400_v1  ;;  %v4743_v40 = vrot.slane %v4400_v1, %v12870_v12 }
 0x29f   : > { %15302 = vst [vmem:[#allocation19_spill] sm:$0xff] %v13258_v39  ;;  %v4718_v20 = vcombine.high %v13258_v39, %v13258_v39  ;;  %v9572_v47 = vadd.f32 -1.0, %v11023_v59  ;;  %v13276_v18 = vmax.f32 %v12962_v56, %v5716_v44  ;;  %v5817_v2 = vrot.slane %v13255_v46, 4 }
 0x2a0   : > { %v11025_v35 = vpop.eup %11024  ;;  %v4735_v53 = vcombine.high %v4733_v4, %v4733_v4  ;;  %v4750_v22 = vrot.slane %v4736_v27, %v12870_v12  ;;  %v4751_v1 = vcombine.high %v4743_v40, %v4743_v40  ;;  %v5332_v25 = vrot.slane %v4734_v54, %v12870_v12 }
 0x2a1   : > { %v5318_v15 = vcombine.low %v4718_v20, %v4726_v10  ;;  %v4401_v59 = vsel %vm4241_vm4, %v13160_v52, %v9572_v47  ;;  %v13289_v56 = vmax.f32 %v12973_v58, %v5723_v48  ;;  %v5348_v27 = vrot.slane %v4743_v40, %v12870_v12 }
 0x2a2   : > { %v5334_v44 = vcombine.low %v4733_v4, %v4735_v53  ;;  %v4752_v23 = vcombine.high %v4750_v22, %v4750_v22  ;;  %v5350_v41 = vcombine.low %v4751_v1, %v4750_v22  ;;  %v4753_v9 = vcombine.high %v4401_v59, %v4401_v59 }
 0x2a3   : > { %v5325_v14 = vrot.slane %v5318_v15, %v12870_v12  ;;  %v4760_v3 = vrot.slane %v4401_v59, %v12870_v12  ;;  %v9573_v10 = vadd.f32 -1.0, %v11025_v35  ;;  %v6048_v40 = vsel %vm6015_vm9, %v13276_v18, %v12968_v37 }
 0x2a4   : > { %v5341_v54 = vrot.slane %v5334_v44, %v12870_v12  ;;  %v5357_v20 = vrot.slane %v5350_v41, %v12870_v12  ;;  %v5364_v52 = vrot.slane %v4752_v23, %v12870_v12  ;;  %v4767_v58 = vrot.slane %v4753_v9, %v12870_v12 }
 0x2a5   : > { %v5333_v48 = vcombine.low %v5325_v14, %v5332_v25  ;;  %v4768_v4 = vcombine.high %v4760_v3, %v4760_v3  ;;  %v4402_v47 = vsel %vm4242_vm5, %v13170_v36, %v9573_v10  ;;  %v4709_v35 = vrot.slane %v4398_v57, %v12870_v12 }
 0x2a6   : > { %v5349_v53 = vcombine.low %v5341_v54, %v5348_v27  ;;  %v5365_v41 = vcombine.low %v5357_v20, %v5364_v52  ;;  %v4769_v22 = vcombine.high %v4767_v58, %v4767_v58  ;;  %v4770_v1 = vcombine.high %v4402_v47, %v4402_v47 }
 0x2a7   : > { %v13263_v30 = vpop.f32.mrb[112].mxu0  ;;  %v11027_v9 = vpop.eup %11026  ;;  %v5366_v14 = vcombine.low %v4760_v3, %v4768_v4  ;;  %v4777_v36 = vrot.slane %v4402_v47, %v12870_v12  ;;  %vm4243_vm6 = vcmp.gt.f32.partialorder %v13225_v42, 0.0  ;;  %v4701_v54 = vcombine.high %v13228_v13, %v13228_v13 }
 0x2a8   : > { %v13267_v43 = vpop.f32.mrb[113].mxu0  ;;  %v5851_v44 = vsel %vm5696_vm12, %v5349_v53, -inf  ;;  %v5858_v10 = vsel %vm5696_vm12, %v5365_v41, -inf  ;;  %v9574_v57 = vadd.f32 -1.0, %v11027_v9  ;;  %v4784_v52 = vrot.slane %v4770_v1, %v12870_v12 }
 0x2a9   : > { %v13278_v51 = vpop.f32.mrb[114].mxu0  ;;  %v5852_v20 = vrot.slane %v5851_v44, 4  ;;  %v5373_v3 = vrot.slane %v5366_v14, %v12870_v12  ;;  %v4717_v47 = vcombine.high %v4709_v35, %v4709_v35  ;;  %v4785_v25 = vcombine.high %v4777_v36, %v4777_v36 }
 0x2aa   : > { %v13282_v45 = vpop.f32.mrb[115].mxu0  ;;  %v5382_v53 = vcombine.low %v4769_v22, %v4777_v36  ;;  %v4403_v41 = vsel %vm4243_vm6, %v13225_v42, %v9574_v57  ;;  %v5844_v9 = vsel %vm5696_vm12, %v5333_v48, -inf  ;;  %v4786_v13 = vcombine.high %v4784_v52, %v4784_v52 }
 0x2ab   : > { %v5853_v14 = vmax.f32 %v5851_v44, %v5852_v20  ;;  %v13337_v42 = vmax.f32 %v13255_v46, %v5817_v2  ;;  %v13344_v57 = vcombine.low %v4709_v35, %v4717_v47  ;;  %vm6025_vm7 = vcmask 1046534  }
 0x2ac   : > { %v5389_v1 = vrot.slane %v5382_v53, %v12870_v12  ;;  %v5845_v46 = vrot.slane %v5844_v9, 4  ;;  %v5398_v48 = vcombine.low %v4784_v52, %v4786_v13  ;;  %vm6027_vm8 = vcmask 1047559  }
 0x2ad   : > { %v5854_v35 = vrot.slane %v5853_v14, 2 }
 0x2af   : > { %v13304_v15 = vpop.f32.mrb[116].mxu0 }
 0x2b0   : > { %15303 = vst [vmem:[#allocation20_spill] sm:$0xff] %v13304_v15  ;;  %v13307_v23 = vpop.f32.mrb[117].mxu0  ;;  %v4787_v15 = vcombine.high %v4403_v41, %v4403_v41 }
 0x2b1   : > { %15304 = vst [vmem:[#allocation21_spill] sm:$0xff] %v13307_v23  ;;  %v13312_v59 = vpop.f32.mrb[118].mxu0 }
 0x2b2   : > { %15305 = vst [vmem:[#allocation22_spill] sm:$0xff] %v13312_v59  ;;  %v13317_v27 = vpop.f32.mrb[119].mxu0  ;;  %v5380_v59 = vrot.slane %v4767_v58, %v12870_v12  ;;  %v4794_v58 = vrot.slane %v4403_v41, %v12870_v12  ;;  %v4801_v20 = vrot.slane %v4787_v15, %v12870_v12 }
 0x2b3   : > { %15306 = vst [vmem:[#allocation23_spill] sm:$0xff] %v13317_v27  ;;  %v13323_v4 = vpop.f32.mrb[92].mxu1  ;;  %v5859_v27 = vrot.slane %v5858_v10, 4 }
 0x2b4   : > { %15307 = vst [vmem:[#allocation24_spill] sm:$0xff] %v13323_v4  ;;  %v13326_v37 = vpop.f32.mrb[93].mxu1  ;;  %v5396_v4 = vrot.slane %v4785_v25, %v12870_v12  ;;  %v5381_v22 = vcombine.low %v5373_v3, %v5380_v59  ;;  %v6049_v25 = vsel %vm6017_vm10, %v13289_v56, %v6048_v40  ;;  %v13354_v3 = vrot.slane %v4701_v54, %v12870_v12 }
 0x2b5   : > { %15308 = vst [vmem:[#allocation25_spill] sm:$0xff] %v13326_v37  ;;  %v13330_v23 = vpop.f32.mrb[94].mxu1  ;;  %v5860_v2 = vmax.f32 %v5858_v10, %v5859_v27  ;;  %v4803_v47 = vcombine.high %v4801_v20, %v4801_v20  ;;  %v5405_v10 = vrot.slane %v5398_v48, %v12870_v12  ;;  %v5412_v54 = vrot.slane %v4794_v58, %v12870_v12 }
 0x2b6   : > { %15309 = vst [vmem:[#allocation26_spill] sm:$0xff] %v13330_v23  ;;  %v13334_v5 = vpop.f32.mrb[95].mxu1  ;;  %v5397_v44 = vcombine.low %v5389_v1, %v5396_v4  ;;  %v4802_v23 = vcombine.high %v4794_v58, %v4794_v58  ;;  %15311 = vst [vmem:[#allocation28_spill] sm:$0xff] %v13354_v3  ;;  %v5865_v41 = vsel %vm5696_vm12, %v5381_v22, -inf  ;;  %v6050_v13 = vsel %vm6019_vm11, %v12988_v0, %v6049_v25 }
 0x2b7   : > { %15310 = vst [vmem:[#allocation27_spill] sm:$0xff] %v13334_v5  ;;  %v13342_v36 = vpop.f32.mrb[120].mxu0  ;;  %v5861_v38 = vrot.slane %v5860_v2, 2  ;;  %v5428_v40 = vrot.slane %v4803_v47, %v12870_v12  ;;  %v5855_v22 = vmax.f32 %v5853_v14, %v5854_v35  ;;  %v5866_v39 = vrot.slane %v5865_v41, 4 }
 0x2b8   : > { %v13349_v53 = vpop.f32.mrb[121].mxu0  ;;  %v5872_v4 = vsel %vm5696_vm12, %v5397_v44, -inf  ;;  %v5414_v52 = vcombine.low %v4802_v23, %v4801_v20  ;;  %v13368_v44 = vmax.f32 %v5844_v9, %v5845_v46  ;;  %v5413_v5 = vcombine.low %v5405_v10, %v5412_v54  ;;  %v13380_v9 = vld [vmem:[%s15252_s4] ss:$0 sm:$0xff] }
 0x2b9   : > { %v13351_v59 = vpop.f32.mrb[122].mxu0  ;;  %v5873_v1 = vrot.slane %v5872_v4, 4  ;;  %v6051_v58 = vsel %vm6021_vm13, %v13093_v24, %v6050_v13  ;;  %v6176_v23 = vsel %vm6015_vm9, %v13108_v7, %v13093_v24  ;;  %v4019_v14 = vadd.f32 %v13380_v9, %v13172_v49 }
 0x2ba   : > { %v13357_v15 = vpop.f32.mrb[123].mxu0  ;;  %v5421_v48 = vrot.slane %v5414_v52, %v12870_v12  ;;  %v5879_v46 = vsel %vm5696_vm12, %v5413_v5, -inf  ;;  %v6052_v35 = vsel %vm6023_vm14, %v13108_v7, %v6051_v58  ;;  %v5856_v5 = vrot.slane %v5855_v22, 1 }
 0x2bb   : > { %v5874_v3 = vmax.f32 %v5872_v4, %v5873_v1  ;;  %v6177_v4 = vsel %vm6017_vm10, %v13113_v32, %v6176_v23  ;;  %v13393_v1 = vmax.f32 %v5860_v2, %v5861_v38  ;;  %v5880_v10 = vrot.slane %v5879_v46, 4 }
 0x2bc   : > { %v5429_v25 = vcombine.low %v5421_v48, %v5428_v40  ;;  %v6178_v54 = vsel %vm6019_vm11, %v13193_v21, %v6177_v4  ;;  %v13398_v49 = vadd.f32 %v13103_v26, %v4019_v14  ;;  %v5867_v52 = vmax.f32 %v5865_v41, %v5866_v39 }
 0x2bd   : > { %v5875_v37 = vrot.slane %v5874_v3, 2  ;;  %v6179_v13 = vsel %vm6021_vm13, %v13116_v16, %v6178_v54  ;;  %v9999_v48 = vadd.f32 %v13197_v28, %v13186_v19  ;;  %v6053_v2 = vsel %vm6025_vm7, %v13113_v32, %v6052_v35 }
 0x2be   : > { %v6180_v26 = vsel %vm6023_vm14, %v13121_v55, %v6179_v13  ;;  %v6082_v23 = vsel %vm6015_vm9, %v13289_v56, %v13276_v18  ;;  %v5886_v39 = vsel %vm5696_vm12, %v5429_v25, -inf  ;;  %v4276_v19 = vmin.f32 %v13398_v49, 0.0 }
 0x2bf   : > { %v13384_v20 = vpop.f32.mrb[124].mxu0  ;;  %v5876_v38 = vmax.f32 %v5874_v3, %v5875_v37  ;;  %v6181_v41 = vsel %vm6025_vm7, %v13131_v61, %v6180_v26  ;;  %v4024_v28 = vadd.f32 %v13380_v9, %v9999_v48  ;;  %v5863_v37 = vrot.slane %v13393_v1, 1 }
 0x2c0   : > { %v13391_v47 = vpop.f32.mrb[125].mxu0  ;;  %v5881_v3 = vmax.f32 %v5879_v46, %v5880_v10  ;;  %v6054_v14 = vsel %vm6027_vm8, %v13193_v21, %v6053_v2  ;;  %v6182_v35 = vsel %vm6027_vm8, %v13140_v11, %v6181_v41  ;;  %v4329_v54 = vmul.f32 1.442695, %v4276_v19 }
 0x2c1   : > { %v13400_v40 = vpop.f32.mrb[126].mxu0  ;;  %v10263_v4 = vpack.i.bf16 %v6054_v14, %v6182_v35  ;;  %v13426_v25 = vadd.f32 %v13088_v17, %v4024_v28  ;;  %v6083_v13 = vsel %vm6017_vm10, %v12988_v0, %v6082_v23  ;;  %v5868_v26 = vrot.slane %v5867_v52, 2 }
 0x2c2   : > { %v13406_v58 = vpop.f32.mrb[127].mxu0  ;;  %v5877_v27 = vrot.slane %v5876_v38, 1  ;;  %v5887_v48 = vrot.slane %v5886_v39, 4  ;;  %v6084_v46 = vsel %vm6019_vm11, %v13093_v24, %v6083_v13  ;;  %11028 = vpow2.f32 %v4329_v54 }
 0x2c3   : > { %10264 = vrot.lane.b32.xlu0 %v10263_v4, %s11124_s17  ;;  %v4277_v10 = vmin.f32 %v13426_v25, 0.0  ;;  %v6085_v2 = vsel %vm6021_vm13, %v13108_v7, %v6084_v46  ;;  %v6210_v17 = vsel %vm6015_vm9, %v13113_v32, %v13108_v7  ;;  %v13439_v41 = vmax.f32 %v5855_v22, %v5856_v5 }
 0x2c4   : > { %v5882_v23 = vrot.slane %v5881_v3, 2  ;;  %v6086_v19 = vsel %vm6023_vm14, %v13113_v32, %v6085_v2  ;;  %v6211_v28 = vsel %vm6017_vm10, %v13193_v21, %v6210_v17  ;;  %v10002_v54 = vadd.f32 %v13218_v62, %v13209_v31 }
 0x2c5   : > { %v4331_v14 = vmul.f32 1.442695, %v4277_v10  ;;  %v6087_v35 = vsel %vm6025_vm7, %v13193_v21, %v6086_v19  ;;  %v6212_v4 = vsel %vm6019_vm11, %v13116_v16, %v6211_v28  ;;  %v13451_v13 = vmax.f32 %v5867_v52, %v5868_v26 }
 0x2c6   : > { %v13453_v22 = vmax.f32 %v5876_v38, %v5877_v27  ;;  %v13455_v5 = vmax.f32 %v5886_v39, %v5887_v48  ;;  %v6213_v46 = vsel %vm6021_vm13, %v13121_v55, %v6212_v4  ;;  %vm4244_vm15 = vcmp.gt.f32.partialorder %v13398_v49, 0.0 }
 0x2c7   : > { %11030 = vpow2.f32 %v4331_v14  ;;  %v6214_v10 = vsel %vm6023_vm14, %v13131_v61, %v6213_v46  ;;  %v4027_v2 = vadd.f32 %v13380_v9, %v10002_v54  ;;  %v6089_v31 = vsel %vm6015_vm9, %v13131_v61, %v13121_v55 }
 0x2c8   : > { %v13466_v62 = vmax.f32 %v5881_v3, %v5882_v23  ;;  %v6088_v27 = vsel %vm6027_vm8, %v13116_v16, %v6087_v35  ;;  %v6215_v52 = vsel %vm6025_vm7, %v13140_v11, %v6214_v10  ;;  %v6090_v38 = vsel %vm6017_vm10, %v13140_v11, %v6089_v31 }
 0x2c9   : > { %v6216_v39 = vsel %vm6027_vm8, %v13202_v63, %v6215_v52  ;;  %v13477_v26 = vadd.f32 %v13101_v50, %v4027_v2  ;;  %v6091_v48 = vsel %vm6019_vm11, %v13202_v63, %v6090_v38  ;;  %v6123_v3 = vsel %vm6015_vm9, %v13140_v11, %v13131_v61 }
 0x2ca   : > { %v10268_v17 = vpack.i.bf16 %v6088_v27, %v6216_v39  ;;  %6104 = vrot.lane.b32.xlu0 %v6091_v48, %s11125_s30  ;;  %v6124_v23 = vsel %vm6017_vm10, %v13202_v63, %v6123_v3  ;;  %v6116_v19 = vsel %vm6015_vm9, %v12988_v0, %v13289_v56  ;;  %v6244_v50 = vsel %vm6015_vm9, %v13193_v21, %v13113_v32 }
 0x2cb   : > { %vm4245_vm0 = vcmp.gt.f32.partialorder %v13426_v25, 0.0  ;;  %v4278_v28 = vmin.f32 %v13477_v26, 0.0  ;;  %v6125_v14 = vsel %vm6019_vm11, %v13213_v33, %v6124_v23  ;;  %v6117_v35 = vsel %vm6017_vm10, %v13093_v24, %v6116_v19 }
 0x2cc   : > { %v6245_v4 = vsel %vm6017_vm10, %v13116_v16, %v6244_v50  ;;  %10269 = vrot.lane.b32.xlu1 %v10268_v17, %s11125_s30  ;;  %v6118_v54 = vsel %vm6019_vm11, %v13108_v7, %v6117_v35  ;;  %v10005_v10 = vadd.f32 %v13267_v43, %v13263_v30  ;;  %v13510_v2 = vadd.f32 %v13282_v45, %v13278_v51  ;;  %v11029_v31 = vpop.eup %11028 }
 0x2cd   : > { %v6246_v46 = vsel %vm6019_vm11, %v13121_v55, %v6245_v4  ;;  %v4333_v27 = vmul.f32 1.442695, %v4278_v28  ;;  %v6119_v52 = vsel %vm6021_vm13, %v13113_v32, %v6118_v54  ;;  %v5807_v39 = vrot.slane %v13204_v29, 1 }
 0x2ce   : > { %v6247_v38 = vsel %vm6021_vm13, %v13131_v61, %v6246_v46  ;;  %v9575_v48 = vadd.f32 -1.0, %v11029_v31  ;;  %v6120_v3 = vsel %vm6023_vm14, %v13193_v21, %v6119_v52  ;;  %v15312_v45 = vrot.slane %v13206_v8, 2 }
 0x2cf   : > { %v6248_v30 = vsel %vm6023_vm14, %v13140_v11, %v6247_v38  ;;  %11032 = vpow2.f32 %v4333_v27  ;;  %v6121_v51 = vsel %vm6025_vm7, %v13116_v16, %v6120_v3  ;;  %v13529_v23 = vmax.f32 %v13204_v29, %v5807_v39 }
 0x2d0   : > { %v5813_v43 = vmax.f32 %v13206_v8, %v15312_v45  ;;  %v6249_v17 = vsel %vm6025_vm7, %v13202_v63, %v6248_v30  ;;  %v4404_v19 = vsel %vm4244_vm15, %v13398_v49, %v9575_v48  ;;  %6138 = vrot.lane.b32.xlu1 %v6125_v14, %s11126_s27  ;;  %v6122_v8 = vsel %vm6027_vm8, %v13121_v55, %v6121_v51 }
 0x2d1   : > { %v6250_v50 = vsel %vm6027_vm8, %v13213_v33, %v6249_v17  ;;  %v11031_v35 = vpop.eup %11030  ;;  %v4804_v4 = vcombine.high %v4404_v19, %v4404_v19  ;;  %v4811_v54 = vrot.slane %v4404_v19, %v12870_v12  ;;  %v6183_v46 = vsel %vm6015_vm9, %v13213_v33, %v13202_v63 }
 0x2d2   : > { %v5814_v28 = vrot.slane %v5813_v43, 1  ;;  %v10273_v29 = vpack.i.bf16 %v6122_v8, %v6250_v50  ;;  %v9576_v49 = vadd.f32 -1.0, %v11031_v35  ;;  %v6184_v14 = vsel %vm6017_vm10, %v13529_v23, %v6183_v46 }
 0x2d3   : > { %v4032_v27 = vadd.f32 %v13380_v9, %v10005_v10  ;;  %v4818_v52 = vrot.slane %v4804_v4, %v12870_v12  ;;  %v4819_v38 = vcombine.high %v4811_v54, %v4811_v54  ;;  %v15313_v39 = vrot.slane %v13216_v60, %v12870_v12 }
 0x2d4   : > { %v13543_v31 = vmax.f32 %v5813_v43, %v5814_v28  ;;  %10274 = vrot.lane.b32.xlu0 %v10273_v29, %s11126_s27  ;;  %v15314_v48 = vrot.slane %v13242_v6, %v12870_v12  ;;  %v5819_v30 = vrot.slane %v13337_v42, 2  ;;  %v5889_v45 = vrot.slane %v13455_v5, 2 }
 0x2d5   : > { %v4405_v10 = vsel %vm4245_vm0, %v13426_v25, %v9576_v49  ;;  %v13564_v51 = vadd.f32 %v13199_v34, %v4032_v27  ;;  %v4820_v17 = vcombine.high %v4818_v52, %v4818_v52  ;;  %v5430_v60 = vcombine.low %v4811_v54, %v4819_v38 }
 0x2d6   : > { %v5285_v3 = vcombine.low %v15314_v48, %v15313_v39  ;;  %v6185_v43 = vsel %vm6019_vm11, %v13543_v31, %v6184_v14  ;;  %v4821_v19 = vcombine.high %v4405_v10, %v4405_v10  ;;  %vm4246_vm1 = vcmp.gt.f32.partialorder %v13477_v26, 0.0 }
 0x2d7   : > { %v5444_v6 = vrot.slane %v4818_v52, %v12870_v12  ;;  %v4828_v8 = vrot.slane %v4405_v10, %v12870_v12  ;;  %v4279_v50 = vmin.f32 %v13564_v51, 0.0  ;;  %v5820_v28 = vmax.f32 %v13337_v42, %v5819_v30  ;;  %v10356_v30 = vld [vmem:[%s15253_s5 + $0x40] sm:$0xff]  }
 0x2d8   : > { %v5437_v25 = vrot.slane %v5430_v60, %v12870_v12  ;;  %v4835_v35 = vrot.slane %v4821_v19, %v12870_v12  ;;  %6198 = vrot.lane.b32.xlu0 %v6185_v43, %s11124_s17  ;;  %v5823_v34 = vsel %vm5696_vm12, %v5285_v3, -inf  ;;  %v6217_v4 = vsel %vm6015_vm9, %v13529_v23, %v13213_v33  ;;  %v10357_v10 = vld [vmem:[%s15253_s5] sm:$0xff]   ;;  %v10358_v43 = vld [vmem:[%s15253_s5 + $0x48] sm:$0xff]   ;;  %10049 = vmatprep.subr.bf16.mxu1 %v10356_v30 }
 0x2d9   : > { %v4836_v54 = vcombine.high %v4828_v8, %v4828_v8  ;;  %v5446_v29 = vcombine.low %v4820_v17, %v4828_v8  ;;  %v4335_v46 = vmul.f32 1.442695, %v4279_v50  ;;  %v5821_v49 = vrot.slane %v5820_v28, 1  ;;  %v11033_v14 = vpop.eup %11032  ;;  %10050 = vmatpush3.bf16.msra.mxu1 %v10357_v10  ;;  %v15315_v30 = vld [vmem:[#allocation16_spill] sm:$0xff] }
 0x2da   : > { %v5445_v27 = vcombine.low %v5437_v25, %v5444_v6  ;;  %v4837_v52 = vcombine.high %v4835_v35, %v4835_v35  ;;  %v5824_v42 = vrot.slane %v5823_v34, 4  ;;  %v6218_v38 = vsel %vm6017_vm10, %v13543_v31, %v6217_v4  ;;  %10051 = vmatprep.subr.bf16.mxu1 %v10358_v43  ;;  %v15316_v10 = vld [vmem:[#allocation20_spill] sm:$0xff]  ;;  %v15317_v43 = vld [vmem:[#allocation21_spill] sm:$0xff] }
 0x2db   : > { %v5453_v39 = vrot.slane %v5446_v29, %v12870_v12  ;;  %v5460_v48 = vrot.slane %v4836_v54, %v12870_v12  ;;  %v9577_v3 = vadd.f32 -1.0, %v11033_v14  ;;  %11034 = vpow2.f32 %v4335_v46 }
 0x2dc   : > { %v5893_v17 = vsel %vm5696_vm12, %v5445_v27, -inf  ;;  %v5462_v60 = vcombine.low %v4835_v35, %v4837_v52  ;;  %v13592_v19 = vmax.f32 %v5820_v28, %v5821_v49  ;;  %v5825_v6 = vmax.f32 %v5823_v34, %v5824_v42  ;;  %v10359_v28 = vld [vmem:[%s15253_s5 + $0x8] sm:$0xff]   ;;  %v10360_v49 = vld [vmem:[%s15253_s5 + $0x50] sm:$0xff]  }
 0x2dd   : > { %v5894_v8 = vrot.slane %v5893_v17, 4  ;;  %v5461_v50 = vcombine.low %v5453_v39, %v5460_v48  ;;  %v4406_v25 = vsel %vm4246_vm1, %v13477_v26, %v9577_v3  ;;  %v4035_v4 = vadd.f32 %v13380_v9, %v13510_v2  ;;  %10052 = vmatpush3.bf16.msra.mxu1 %v10359_v28 }
 0x2de   : > { %v4838_v54 = vcombine.high %v4406_v25, %v4406_v25  ;;  %v4845_v29 = vrot.slane %v4406_v25, %v12870_v12  ;;  %v5469_v46 = vrot.slane %v5462_v60, %v12870_v12  ;;  %v5826_v14 = vrot.slane %v5825_v6, 2  ;;  %10053 = vmatprep.subr.bf16.mxu1 %v10360_v49 }
 0x2df   : > { %v5884_v35 = vrot.slane %v13466_v62, 1  ;;  %v5895_v34 = vmax.f32 %v5893_v17, %v5894_v8  ;;  %v5900_v26 = vsel %vm5696_vm12, %v5461_v50, -inf  ;;  %v6219_v2 = vsel %vm6019_vm11, %v13592_v19, %v6218_v38 }
 0x2e0   : > { %v5901_v27 = vrot.slane %v5900_v26, 4  ;;  %v4852_v52 = vrot.slane %v4838_v54, %v12870_v12  ;;  %v4853_v42 = vcombine.high %v4845_v29, %v4845_v29  ;;  %v5476_v39 = vrot.slane %v4845_v29, %v12870_v12  ;;  %6232 = vrot.lane.b32.xlu0 %v6219_v2, %s11125_s30  ;;  %v10361_v54 = vld [vmem:[%s15253_s5 + $0x10] sm:$0xff]  }
 0x2e1   : > { %v5827_v48 = vmax.f32 %v5825_v6, %v5826_v14  ;;  %v6251_v3 = vsel %vm6015_vm9, %v13543_v31, %v13529_v23  ;;  %v13618_v38 = vadd.f32 %v15315_v30, %v4035_v4  ;;  %v10011_v17 = vadd.f32 %v15317_v43, %v15316_v10  ;;  %10054 = vmatpush3.bf16.msra.mxu1 %v10361_v54  ;;  %v10363_v43 = vld [vmem:[%s15253_s5 + $0x18] sm:$0xff]  }
 0x2e2   : > { %v5902_v60 = vmax.f32 %v5900_v26, %v5901_v27  ;;  %v4854_v8 = vcombine.high %v4852_v52, %v4852_v52  ;;  %v5477_v50 = vcombine.low %v5469_v46, %v5476_v39  ;;  %v5478_v25 = vcombine.low %v4853_v42, %v4852_v52  ;;  %v10362_v26 = vld [vmem:[%s15253_s5 + $0x58] sm:$0xff]  }
 0x2e3   : > { %v5890_v6 = vmax.f32 %v13455_v5, %v5889_v45  ;;  %v5896_v29 = vrot.slane %v5895_v34, 2  ;;  %v5828_v14 = vrot.slane %v5827_v48, 1  ;;  %v4280_v4 = vmin.f32 %v13618_v38, 0.0  ;;  %10055 = vmatprep.subr.bf16.mxu1 %v10362_v26 }
 0x2e4   : > { %v5485_v46 = vrot.slane %v5478_v25, %v12870_v12  ;;  %v5492_v28 = vrot.slane %v4854_v8, %v12870_v12  ;;  %v5907_v2 = vsel %vm5696_vm12, %v5477_v50, -inf  ;;  %v6252_v27 = vsel %vm6017_vm10, %v13592_v19, %v6251_v3 }
 0x2e5   : > { %v11035_v52 = vpop.eup %11034  ;;  %v5903_v5 = vrot.slane %v5902_v60, 2  ;;  %v5908_v45 = vrot.slane %v5907_v2, 4  ;;  %v13637_v42 = vmax.f32 %v5827_v48, %v5828_v14  ;;  %v4337_v39 = vmul.f32 1.442695, %v4280_v4  ;;  %10056 = vmatpush3.bf16.msra.mxu1 %v10363_v43 }
 0x2e6   : > { %v5493_v49 = vcombine.low %v5485_v46, %v5492_v28  ;;  %vm4247_vm2 = vcmp.gt.f32.partialorder %v13564_v51, 0.0  ;;  %v9578_v30 = vadd.f32 -1.0, %v11035_v52  ;;  %v4040_v10 = vadd.f32 %v13380_v9, %v10011_v17  ;;  %v15318_v17 = vld [vmem:[#allocation14_spill] sm:$0xff]  ;;  %v15320_v52 = vld [vmem:[#allocation23_spill] sm:$0xff] }
 0x2e7   : > { %v5897_v8 = vmax.f32 %v5895_v34, %v5896_v29  ;;  %v5909_v50 = vmax.f32 %v5907_v2, %v5908_v45  ;;  %v6253_v3 = vsel %vm6019_vm11, %v13637_v42, %v6252_v27  ;;  %11036 = vpow2.f32 %v4337_v39  ;;  %v15319_v27 = vld [vmem:[#allocation22_spill] sm:$0xff] }
 0x2e8   : > { %v5891_v48 = vrot.slane %v5890_v6, 1  ;;  %v5914_v25 = vsel %vm5696_vm12, %v5493_v49, -inf  ;;  %v4407_v14 = vsel %vm4247_vm2, %v13564_v51, %v9578_v30  ;;  %6266 = vrot.lane.b32.xlu1 %v6253_v3, %s11126_s27  ;;  %v13650_v54 = vadd.f32 %v15318_v17, %v4040_v10 }
 0x2e9   : > { %v5904_v4 = vmax.f32 %v5902_v60, %v5903_v5  ;;  %v5915_v46 = vrot.slane %v5914_v25, 4  ;;  %v4855_v28 = vcombine.high %v4407_v14, %v4407_v14  ;;  %v4862_v34 = vrot.slane %v4407_v14, %v12870_v12 }
 0x2ea   : > { %v13654_v29 = vmax.f32 %v13466_v62, %v5884_v35  ;;  %v5910_v2 = vrot.slane %v5909_v50, 2  ;;  %v4281_v26 = vmin.f32 %v13650_v54, 0.0  ;;  %v10014_v45 = vadd.f32 %v15320_v52, %v15319_v27  ;;  %v15323_v52 = vld [vmem:[#allocation27_spill] sm:$0xff] }
 0x2eb   : > { %v5898_v51 = vrot.slane %v5897_v8, 1  ;;  %v5916_v39 = vmax.f32 %v5914_v25, %v5915_v46  ;;  %v4869_v49 = vrot.slane %v4855_v28, %v12870_v12  ;;  %v4870_v30 = vcombine.high %v4862_v34, %v4862_v34  ;;  %v15321_v25 = vld [vmem:[#allocation15_spill] sm:$0xff] }
 0x2ec   : > { %v4339_v60 = vmul.f32 1.442695, %v4281_v26  ;;  %v4043_v5 = vadd.f32 %v13380_v9, %v10014_v45  ;;  %v10017_v10 = vadd.f32 %v13349_v53, %v13342_v36  ;;  %v10020_v62 = vadd.f32 %v13357_v15, %v13351_v59 }
 0x2ed   : > { %v13665_v35 = vmax.f32 %v5890_v6, %v5891_v48  ;;  %v5905_v3 = vrot.slane %v5904_v4, 1  ;;  %v5494_v14 = vcombine.low %v4862_v34, %v4870_v30  ;;  %vm4248_vm4 = vcmp.gt.f32.partialorder %v13618_v38, 0.0  ;;  %v15322_v6 = vld [vmem:[#allocation25_spill] sm:$0xff] }
 0x2ee   : > { %v5911_v43 = vmax.f32 %v5909_v50, %v5910_v2  ;;  %11038 = vpow2.f32 %v4339_v60  ;;  %v13669_v17 = vadd.f32 %v15321_v25, %v4043_v5  ;;  %v4048_v46 = vadd.f32 %v13380_v9, %v10017_v10 }
 0x2ef   : > { %v5917_v28 = vrot.slane %v5916_v39, 2  ;;  %v5501_v26 = vrot.slane %v5494_v14, %v12870_v12  ;;  %v5508_v36 = vrot.slane %v4869_v49, %v12870_v12  ;;  %v4051_v53 = vadd.f32 %v13380_v9, %v10020_v62 }
 0x2f0   : > { %v13675_v59 = vmax.f32 %v5897_v8, %v5898_v51  ;;  %v4282_v15 = vmin.f32 %v13669_v17, 0.0  ;;  %v13679_v48 = vadd.f32 %v15322_v6, %v4048_v46  ;;  %v10023_v50 = vadd.f32 %v13391_v47, %v13384_v20  ;;  %v15324_v6 = vld [vmem:[#allocation24_spill] sm:$0xff] }
 0x2f1   : > { %v11037_v34 = vpop.eup %11036  ;;  %v13683_v2 = vmax.f32 %v5904_v4, %v5905_v3  ;;  %v5509_v27 = vcombine.low %v5501_v26, %v5508_v36  ;;  %v13686_v45 = vadd.f32 %v15323_v52, %v4051_v53  ;;  %v10026_v30 = vadd.f32 %v13406_v58, %v13400_v40 }
 0x2f2   : > { %v5912_v8 = vrot.slane %v5911_v43, 1  ;;  %v9579_v51 = vadd.f32 -1.0, %v11037_v34  ;;  %vm4249_vm5 = vcmp.gt.f32.partialorder %v13650_v54, 0.0  ;;  %v4341_v60 = vmul.f32 1.442695, %v4282_v15 }
 0x2f3   : > { %v4283_v5 = vmin.f32 %v13679_v48, 0.0  ;;  %v5918_v10 = vmax.f32 %v5916_v39, %v5917_v28  ;;  %v5921_v20 = vsel %vm5696_vm12, %v5509_v27, -inf  ;;  %v4871_v47 = vcombine.high %v4869_v49, %v4869_v49  ;;  %v15325_v27 = vld [vmem:[#allocation26_spill] sm:$0xff] }
 0x2f4   : > { %v4284_v4 = vmin.f32 %v13686_v45, 0.0  ;;  %v5922_v62 = vrot.slane %v5921_v20, 4  ;;  %v4408_v3 = vsel %vm4248_vm4, %v13618_v38, %v9579_v51  ;;  %11040 = vpow2.f32 %v4341_v60 }
 0x2f5   : > { %v4343_v40 = vmul.f32 1.442695, %v4283_v5  ;;  %v4872_v58 = vcombine.high %v4408_v3, %v4408_v3  ;;  %v4879_v14 = vrot.slane %v4408_v3, %v12870_v12  ;;  %v4056_v46 = vadd.f32 %v13380_v9, %v10023_v50 }
 0x2f6   : > { %v4345_v25 = vmul.f32 1.442695, %v4284_v4  ;;  %v13699_v26 = vmax.f32 %v5911_v43, %v5912_v8  ;;  %v5923_v39 = vmax.f32 %v5921_v20, %v5922_v62  ;;  %v4059_v49 = vadd.f32 %v13380_v9, %v10026_v30 }
 0x2f7   : > { %11042 = vpow2.f32 %v4343_v40  ;;  %v4886_v28 = vrot.slane %v4872_v58, %v12870_v12  ;;  %v4887_v36 = vcombine.high %v4879_v14, %v4879_v14  ;;  %v5510_v53 = vcombine.low %v4871_v47, %v4879_v14 }
 0x2f8   : > { %11044 = vpow2.f32 %v4345_v25  ;;  %v11039_v38 = vpop.eup %11038  ;;  %v5919_v15 = vrot.slane %v5918_v10, 1  ;;  %vm4250_vm6 = vcmp.gt.f32.partialorder %v13669_v17, 0.0  ;;  %v13705_v34 = vadd.f32 %v15324_v6, %v4056_v46 }
 0x2f9   : > { %v13708_v50 = vadd.f32 %v15325_v27, %v4059_v49  ;;  %v5870_v43 = vrot.slane %v13451_v13, 1  ;;  %v4888_v52 = vcombine.high %v4886_v28, %v4886_v28  ;;  %v5517_v9 = vrot.slane %v5510_v53, %v12870_v12 }
 0x2fa   : > { %v5524_v30 = vrot.slane %v4887_v36, %v12870_v12  ;;  %v9580_v8 = vadd.f32 -1.0, %v11039_v38  ;;  %v5924_v51 = vrot.slane %v5923_v39, 2  ;;  %vm4251_vm15 = vcmp.gt.f32.partialorder %v13679_v48, 0.0 }
 0x2fb   : > { %v4285_v60 = vmin.f32 %v13705_v34, 0.0  ;;  %v13718_v5 = vmax.f32 %v13393_v1, %v5863_v37  ;;  %v5526_v47 = vcombine.low %v4886_v28, %v4888_v52  ;;  %v4286_v62 = vmin.f32 %v13708_v50, 0.0 }
 0x2fc   : > { %v5525_v20 = vcombine.low %v5517_v9, %v5524_v30  ;;  %v4409_v4 = vsel %vm4249_vm5, %v13650_v54, %v9580_v8  ;;  %v13724_v3 = vmax.f32 %v5918_v10, %v5919_v15  ;;  %vm4252_vm0 = vcmp.gt.f32.partialorder %v13686_v45, 0.0 }
 0x2fd   : > { %v4889_v40 = vcombine.high %v4409_v4, %v4409_v4  ;;  %v4896_v58 = vrot.slane %v4409_v4, %v12870_v12  ;;  %v4347_v14 = vmul.f32 1.442695, %v4285_v60  ;;  %v5533_v25 = vrot.slane %v5526_v47, %v12870_v12 }
 0x2fe   : > { %v5928_v46 = vsel %vm5696_vm12, %v5525_v20, -inf  ;;  %v4349_v1 = vmul.f32 1.442695, %v4286_v62  ;;  %v13731_v37 = vmax.f32 %v13451_v13, %v5870_v43  ;;  %v11041_v49 = vpop.eup %11040  ;;  %v13733_v54 = vmax.f32 %v5923_v39, %v5924_v51 }
 0x2ff   : > { %v5929_v28 = vrot.slane %v5928_v46, 4  ;;  %v4903_v10 = vrot.slane %v4889_v40, %v12870_v12  ;;  %v4904_v36 = vcombine.high %v4896_v58, %v4896_v58  ;;  %v5540_v53 = vrot.slane %v4896_v58, %v12870_v12 }
 0x300   : > { %v9581_v38 = vadd.f32 -1.0, %v11041_v49  ;;  %11046 = vpow2.f32 %v4347_v14  ;;  %v6058_v15 = vsel %vm6015_vm9, %v13718_v5, %v13439_v41  ;;  %vm4253_vm1 = vcmp.gt.f32.partialorder %v13705_v34, 0.0 }
 0x301   : > { %v11043_v6 = vpop.eup %11042  ;;  %v5930_v27 = vmax.f32 %v5928_v46, %v5929_v28  ;;  %v4905_v52 = vcombine.high %v4903_v10, %v4903_v10  ;;  %v5542_v13 = vcombine.low %v4904_v36, %v4903_v10  ;;  %11048 = vpow2.f32 %v4349_v1 }
 0x302   : > { %v11045_v43 = vpop.eup %11044  ;;  %v5541_v39 = vcombine.low %v5533_v25, %v5540_v53  ;;  %v4410_v9 = vsel %vm4250_vm6, %v13669_v17, %v9581_v38  ;;  %v9582_v30 = vadd.f32 -1.0, %v11043_v6  ;;  %v13745_v8 = vsel %vm6017_vm10, %v13731_v37, %v6058_v15 }
 0x303   : > { %v5931_v51 = vrot.slane %v5930_v27, 2  ;;  %v5549_v60 = vrot.slane %v5542_v13, %v12870_v12  ;;  %v5556_v20 = vrot.slane %v4905_v52, %v12870_v12  ;;  %v4906_v47 = vcombine.high %v4410_v9, %v4410_v9 }
 0x304   : > { %v5935_v4 = vsel %vm5696_vm12, %v5541_v39, -inf  ;;  %v4913_v62 = vrot.slane %v4410_v9, %v12870_v12  ;;  %v4411_v40 = vsel %vm4251_vm15, %v13679_v48, %v9582_v30  ;;  %v9583_v17 = vadd.f32 -1.0, %v11045_v43 }
 0x305   : > { %v5932_v58 = vmax.f32 %v5930_v27, %v5931_v51  ;;  %v5557_v14 = vcombine.low %v5549_v60, %v5556_v20  ;;  %v5936_v25 = vrot.slane %v5935_v4, 4  ;;  %v4920_v46 = vrot.slane %v4906_v47, %v12870_v12 }
 0x306   : > { %v5926_v1 = vrot.slane %v13733_v54, 1  ;;  %v4921_v49 = vcombine.high %v4913_v62, %v4913_v62  ;;  %v4923_v28 = vcombine.high %v4411_v40, %v4411_v40  ;;  %v4930_v10 = vrot.slane %v4411_v40, %v12870_v12 }
 0x307   : > { %v5937_v36 = vmax.f32 %v5935_v4, %v5936_v25  ;;  %v5942_v53 = vsel %vm5696_vm12, %v5557_v14, -inf  ;;  %v4922_v38 = vcombine.high %v4920_v46, %v4920_v46  ;;  %v4412_v48 = vsel %vm4252_vm0, %v13686_v45, %v9583_v17 }
 0x308   : > { %v5943_v15 = vrot.slane %v5942_v53, 4  ;;  %v5558_v6 = vcombine.low %v4913_v62, %v4921_v49  ;;  %v4937_v27 = vrot.slane %v4923_v28, %v12870_v12  ;;  %v4938_v52 = vcombine.high %v4930_v10, %v4930_v10 }
 0x309   : > { %v5933_v13 = vrot.slane %v5932_v58, 1  ;;  %v5938_v43 = vrot.slane %v5937_v36, 2  ;;  %v5572_v39 = vrot.slane %v4920_v46, %v12870_v12  ;;  %v5574_v9 = vcombine.low %v4922_v38, %v4930_v10 }
 0x30a   : > { %v11047_v30 = vpop.eup %11046  ;;  %v5944_v51 = vmax.f32 %v5942_v53, %v5943_v15  ;;  %v5565_v60 = vrot.slane %v5558_v6, %v12870_v12  ;;  %v4939_v20 = vcombine.high %v4937_v27, %v4937_v27  ;;  %v5588_v47 = vrot.slane %v4938_v52, %v12870_v12 }
 0x30b   : > { %v11049_v45 = vpop.eup %11048  ;;  %v5939_v4 = vmax.f32 %v5937_v36, %v5938_v43  ;;  %v5581_v62 = vrot.slane %v5574_v9, %v12870_v12  ;;  %v4940_v40 = vcombine.high %v4412_v48, %v4412_v48  ;;  %v4947_v17 = vrot.slane %v4412_v48, %v12870_v12  ;;  %v10364_v48 = vld [vmem:[%s15253_s5 + $0x60] sm:$0xff]  }
 0x30c   : > { %v5945_v14 = vrot.slane %v5944_v51, 2  ;;  %v5573_v25 = vcombine.low %v5565_v60, %v5572_v39  ;;  %v5590_v49 = vcombine.low %v4937_v27, %v4939_v20  ;;  %v9584_v28 = vadd.f32 -1.0, %v11047_v30  ;;  %v10365_v27 = vld [vmem:[%s15253_s5 + $0x20] sm:$0xff]   ;;  %10057 = vmatprep.subr.bf16.mxu1 %v10364_v48  ;;  %v10367_v48 = vld [vmem:[%s15253_s5 + $0x28] sm:$0xff]  }
 0x30d   : > { %v5940_v46 = vrot.slane %v5939_v4, 1  ;;  %v5589_v10 = vcombine.low %v5581_v62, %v5588_v47  ;;  %v4954_v53 = vrot.slane %v4940_v40, %v12870_v12  ;;  %v4955_v38 = vcombine.high %v4947_v17, %v4947_v17  ;;  %10058 = vmatpush3.bf16.msra.mxu1 %v10365_v27  ;;  %v10368_v27 = vld [vmem:[%s15253_s5 + $0x70] sm:$0xff]  }
 0x30e   : > { %v5946_v15 = vmax.f32 %v5944_v51, %v5945_v14  ;;  %v5949_v6 = vsel %vm5696_vm12, %v5573_v25, -inf  ;;  %v5597_v52 = vrot.slane %v5590_v49, %v12870_v12  ;;  %v5604_v36 = vrot.slane %v4947_v17, %v12870_v12 }
 0x30f   : > { %v13779_v43 = vmax.f32 %v13733_v54, %v5926_v1  ;;  %v5950_v39 = vrot.slane %v5949_v6, 4  ;;  %v5956_v9 = vsel %vm5696_vm12, %v5589_v10, -inf  ;;  %vm4254_vm2 = vcmp.gt.f32.partialorder %v13708_v50, 0.0 }
 0x310   : > { %v13783_v30 = vmax.f32 %v5932_v58, %v5933_v13  ;;  %v5957_v51 = vrot.slane %v5956_v9, 4  ;;  %v4956_v60 = vcombine.high %v4954_v53, %v4954_v53  ;;  %v5605_v20 = vcombine.low %v5597_v52, %v5604_v36  ;;  %v10366_v36 = vld [vmem:[%s15253_s5 + $0x68] sm:$0xff]  }
 0x311   : > { %v5947_v47 = vrot.slane %v5946_v15, 1  ;;  %v5951_v62 = vmax.f32 %v5949_v6, %v5950_v39  ;;  %v4413_v40 = vsel %vm4253_vm1, %v13705_v34, %v9584_v28  ;;  %v9585_v17 = vadd.f32 -1.0, %v11049_v45  ;;  %10059 = vmatprep.subr.bf16.mxu1 %v10366_v36 }
 0x312   : > { %v13788_v54 = vmax.f32 %v5939_v4, %v5940_v46  ;;  %v13790_v1 = vmax.f32 %v5956_v9, %v5957_v51  ;;  %v13792_v14 = vcombine.low %v4955_v38, %v4954_v53  ;;  %v5963_v58 = vsel %vm5696_vm12, %v5605_v20, -inf  ;;  %10060 = vmatpush3.bf16.msra.mxu1 %v10367_v48 }
 0x313   : > { %v5952_v13 = vrot.slane %v5951_v62, 2  ;;  %v5964_v25 = vrot.slane %v5963_v58, 4  ;;  %v4957_v49 = vcombine.high %v4413_v40, %v4413_v40  ;;  %v4964_v10 = vrot.slane %v4413_v40, %v12870_v12  ;;  %10061 = vmatprep.subr.bf16.mxu1 %v10368_v27 }
 0x314   : > { %v13797_v6 = vrot.slane %v4956_v60, %v12870_v12  ;;  %v4414_v34 = vsel %vm4254_vm2, %v13708_v50, %v9585_v17  ;;  %v6060_v45 = vsel %vm6019_vm11, %v13453_v22, %v13745_v8  ;;  %v6092_v4 = vsel %vm6015_vm9, %v13731_v37, %v13718_v5 }
 0x315   : > { %v13808_v28 = vmax.f32 %v5946_v15, %v5947_v47  ;;  %v13810_v46 = vmax.f32 %v5951_v62, %v5952_v13  ;;  %v13813_v53 = vrot.slane %v4957_v49, %v12870_v12  ;;  %v4972_v38 = vcombine.high %v4964_v10, %v4964_v10 }
 0x316   : > { %v5613_v52 = vrot.slane %v13792_v14, %v12870_v12  ;;  %v6061_v50 = vsel %vm6021_vm13, %v13654_v29, %v6060_v45  ;;  %v6093_v8 = vsel %vm6017_vm10, %v13453_v22, %v6092_v4  ;;  %v6126_v15 = vsel %vm6015_vm9, %v13453_v22, %v13731_v37  ;;  %v10369_v4 = vld [vmem:[%s15253_s5 + $0x30] sm:$0xff]  }
 0x317   : > { %v5959_v39 = vrot.slane %v13790_v1, 2  ;;  %v13834_v9 = vmax.f32 %v5963_v58, %v5964_v25  ;;  %v4973_v51 = vcombine.high %v13813_v53, %v13813_v53  ;;  %v13839_v60 = vrot.slane %v4414_v34, %v12870_v12  ;;  %10062 = vmatpush3.bf16.msra.mxu1 %v10369_v4 }
 0x318   : > { %v5954_v20 = vrot.slane %v13810_v46, 1  ;;  %v6062_v47 = vsel %vm6023_vm14, %v13665_v35, %v6061_v50  ;;  %v6094_v62 = vsel %vm6019_vm11, %v13654_v29, %v6093_v8  ;;  %v6127_v40 = vsel %vm6017_vm10, %v13654_v29, %v6126_v15 }
 0x319   : > { %v13848_v17 = vcombine.low %v4964_v10, %v4972_v38  ;;  %v13851_v58 = vcombine.low %v4973_v51, %v13839_v60  ;;  %v6063_v13 = vsel %vm6025_vm7, %v13675_v59, %v6062_v47  ;;  %v6095_v25 = vsel %vm6021_vm13, %v13665_v35, %v6094_v62 }
 0x31a   : > { %v5636_v49 = vrot.slane %v13813_v53, %v12870_v12  ;;  %v6064_v34 = vsel %vm6027_vm8, %v13683_v2, %v6063_v13  ;;  %v6096_v10 = vsel %vm6023_vm14, %v13675_v59, %v6095_v25  ;;  %v6128_v45 = vsel %vm6019_vm11, %v13665_v35, %v6127_v40 }
 0x31b   : > { %v4981_v38 = vcombine.high %v13839_v60, %v13839_v60  ;;  %6072 = vrot.lane.b32.xlu1 %v6064_v34, %s11124_s17  ;;  %v6097_v50 = vsel %vm6025_vm7, %v13683_v2, %v6096_v10  ;;  %v6129_v8 = vsel %vm6021_vm13, %v13675_v59, %v6128_v45  ;;  %v6065_v15 = vsel %vm6015_vm9, %v13724_v3, %v13699_v26  ;;  %v10370_v60 = vld [vmem:[%s15253_s5 + $0x78] sm:$0xff]  }
 0x31c   : > { %v6098_v36 = vsel %vm6027_vm8, %v13699_v26, %v6097_v50  ;;  %v6130_v48 = vsel %vm6023_vm14, %v13683_v2, %v6129_v8  ;;  %v6066_v27 = vsel %vm6017_vm10, %v13779_v43, %v6065_v15  ;;  %v6186_v51 = vsel %vm6015_vm9, %v13665_v35, %v13654_v29  ;;  %10063 = vmatprep.subr.bf16.mxu1 %v10370_v60  ;;  %v10371_v50 = vld [vmem:[%s15253_s5 + $0x38] sm:$0xff]  }
 0x31d   : > { %v6131_v47 = vsel %vm6025_vm7, %v13699_v26, %v6130_v48  ;;  %v6067_v62 = vsel %vm6019_vm11, %v13783_v30, %v6066_v27  ;;  %v6187_v40 = vsel %vm6017_vm10, %v13675_v59, %v6186_v51  ;;  %v6220_v13 = vsel %vm6015_vm9, %v13675_v59, %v13665_v35  ;;  %10064 = vmatpush3.bf16.msra.mxu1 %v10371_v50 }
 0x31e   : > { %v6132_v25 = vsel %vm6027_vm8, %v13724_v3, %v6131_v47  ;;  %v6305_v34 = vsel %vm6021_vm13, %v13788_v54, %v6067_v62  ;;  %v6188_v10 = vsel %vm6019_vm11, %v13683_v2, %v6187_v40  ;;  %v6221_v45 = vsel %vm6017_vm10, %v13683_v2, %v6220_v13 }
 0x31f   : > { %6106 = vrot.lane.b32.xlu1 %v6098_v36, %s11125_s30  ;;  %6140 = vrot.lane.b32.xlu0 %v6132_v25, %s11126_s27  ;;  %v6189_v4 = vsel %vm6021_vm13, %v13699_v26, %v6188_v10  ;;  %v6222_v8 = vsel %vm6019_vm11, %v13699_v26, %v6221_v45  ;;  %v6254_v15 = vsel %vm6015_vm9, %v13683_v2, %v13675_v59  ;;  %v5966_v48 = vrot.slane %v13834_v9, 2 }
 0x320   : > { %v6190_v27 = vsel %vm6023_vm14, %v13724_v3, %v6189_v4  ;;  %v6223_v36 = vsel %vm6021_vm13, %v13724_v3, %v6222_v8  ;;  %v6255_v51 = vsel %vm6017_vm10, %v13699_v26, %v6254_v15  ;;  %v6099_v60 = vsel %vm6015_vm9, %v13779_v43, %v13724_v3 }
 0x321   : > { %v6191_v47 = vsel %vm6025_vm7, %v13779_v43, %v6190_v27  ;;  %v6224_v40 = vsel %vm6023_vm14, %v13779_v43, %v6223_v36  ;;  %v6256_v13 = vsel %vm6019_vm11, %v13724_v3, %v6255_v51  ;;  %v6100_v25 = vsel %vm6017_vm10, %v13783_v30, %v6099_v60 }
 0x322   : > { %v6192_v10 = vsel %vm6027_vm8, %v13783_v30, %v6191_v47  ;;  %v6225_v45 = vsel %vm6025_vm7, %v13783_v30, %v6224_v40  ;;  %v6257_v4 = vsel %vm6021_vm13, %v13779_v43, %v6256_v13  ;;  %v6101_v8 = vsel %vm6019_vm11, %v13788_v54, %v6100_v25 }
 0x323   : > { %6074 = vrot.lane.b32.xlu1 %v6067_v62, %s11124_s17  ;;  %6200 = vrot.lane.b32.xlu0 %v6192_v10, %s11124_s17  ;;  %v6226_v15 = vsel %vm6027_vm8, %v13788_v54, %v6225_v45  ;;  %v6258_v50 = vsel %vm6023_vm14, %v13783_v30, %v6257_v4  ;;  %v6133_v27 = vsel %vm6015_vm9, %v13783_v30, %v13779_v43  ;;  %v15326_v45 = vld [vmem:[#allocation28_spill] sm:$0xff]  ;;  %v15327_v4 = vld [vmem:[#allocation17_spill] sm:$0xff]  ;;  %vm6329_vm4 = vcmask 523264  }
 0x324   : > { %v6259_v36 = vsel %vm6025_vm7, %v13788_v54, %v6258_v50  ;;  %v6134_v51 = vsel %vm6017_vm10, %v13788_v54, %v6133_v27  ;;  %v13961_v62 = vmax.f32 %v13810_v46, %v5954_v20  ;;  %v5960_v60 = vmax.f32 %v13790_v1, %v5959_v39  ;;  %v15329_v27 = vld [vmem:[#allocation19_spill] sm:$0xff] }
 0x325   : > { %v5629_v47 = vrot.slane %v13848_v17, %v12870_v12  ;;  %v6260_v40 = vsel %vm6027_vm8, %v13808_v28, %v6259_v36  ;;  %v6135_v13 = vsel %vm6019_vm11, %v13808_v28, %v6134_v51  ;;  %v6193_v25 = vsel %vm6015_vm9, %v13808_v28, %v13788_v54 }
 0x326   : > { %v5652_v46 = vrot.slane %v4981_v38, %v12870_v12  ;;  %v5961_v20 = vrot.slane %v5960_v60, 1  ;;  %v6194_v10 = vsel %vm6017_vm10, %v13961_v62, %v6193_v25  ;;  %v5967_v1 = vmax.f32 %v13834_v9, %v5966_v48 }
 0x327   : > { %v5847_v39 = vrot.slane %v13368_v44, 2  ;;  %6234 = vrot.lane.b32.xlu1 %v6226_v15, %s11125_s30  ;;  %6268 = vrot.lane.b32.xlu0 %v6260_v40, %s11126_s27  ;;  %v6227_v17 = vsel %vm6015_vm9, %v13961_v62, %v13808_v28  ;;  %v15328_v38 = vrot.slane %v15327_v4, %v12870_v12  ;;  %v15330_v36 = vrot.slane %v15329_v27, %v12870_v12 }
 0x328   : > { %v15331_v9 = vrot.slane %v13344_v57, %v12870_v12  ;;  %v5645_v15 = vrot.slane %v13851_v58, %v12870_v12  ;;  %v13997_v51 = vmax.f32 %v5960_v60, %v5961_v20  ;;  %v5968_v40 = vrot.slane %v5967_v1, 1  ;;  %v14013_v58 = vld [vmem:[%s15253_s5 + $0x80] sm:$0xff]  }
 0x329   : > { %v5301_v50 = vcombine.low %v15328_v38, %v15326_v45  ;;  %v5621_v25 = vcombine.low %v5613_v52, %v13797_v6  ;;  %v6306_v38 = vsel %vm6023_vm14, %v13808_v28, %v6305_v34  ;;  %v5637_v57 = vcombine.low %v5629_v47, %v5636_v49  ;;  %10158 = vmatprep.subr.bf16.mxu1 %v14013_v58 }
 0x32a   : > { %v5317_v48 = vcombine.low %v15331_v9, %v15330_v36  ;;  %v6195_v14 = vsel %vm6019_vm11, %v13997_v51, %v6194_v10  ;;  %v14017_v6 = vmax.f32 %v5967_v1, %v5968_v40  ;;  %v6228_v52 = vsel %vm6017_vm10, %v13997_v51, %v6227_v17  ;;  %v15332_v40 = vld [vmem:[#allocation18_spill] sm:$0xff] }
 0x32b   : > { %v5830_v45 = vsel %vm5696_vm12, %v5301_v50, -inf  ;;  %6108 = vrot.lane.b32.xlu1 %v6101_v8, %s11125_s30  ;;  %6202 = vrot.lane.b32.xlu0 %v6195_v14, %s11124_s17  ;;  %v5970_v53 = vsel %vm5696_vm12, %v5621_v25, -inf  ;;  %v6261_v49 = vsel %vm6015_vm9, %v13997_v51, %v13961_v62  ;;  %v6307_v34 = vsel %vm6025_vm7, %v13961_v62, %v6306_v38 }
 0x32c   : > { %v5837_v4 = vsel %vm5696_vm12, %v5317_v48, -inf  ;;  %v5831_v60 = vrot.slane %v5830_v45, 4  ;;  %v6229_v47 = vsel %vm6019_vm11, %v14017_v6, %v6228_v52  ;;  %v5971_v10 = vrot.slane %v5970_v53, 4 }
 0x32d   : > { %v5838_v12 = vrot.slane %v5837_v4, 4  ;;  %v6262_v8 = vsel %vm6017_vm10, %v14017_v6, %v6261_v49  ;;  %v6308_v17 = vsel %vm6027_vm8, %v13997_v51, %v6307_v34  ;;  %v5653_v50 = vcombine.low %v5645_v15, %v5652_v46 }
 0x32e   : > { %v5832_v20 = vmax.f32 %v5830_v45, %v5831_v60  ;;  %v5977_v27 = vsel %vm5696_vm12, %v5637_v57, -inf  ;;  %v5972_v9 = vmax.f32 %v5970_v53, %v5971_v10  ;;  %v6300_v25 = vsel %vm6025_vm7, %v13529_v23, %v15332_v40 }
 0x32f   : > { %v5839_v1 = vmax.f32 %v5837_v4, %v5838_v12  ;;  %v5978_v48 = vrot.slane %v5977_v27, 4  ;;  %6142 = vrot.lane.b32.xlu1 %v6135_v13, %s11126_s27  ;;  %6236 = vrot.lane.b32.xlu0 %v6229_v47, %s11125_s30  ;;  %v5984_v4 = vsel %vm5696_vm12, %v5653_v50, -inf  ;;  %v5848_v15 = vmax.f32 %v13368_v44, %v5847_v39 }
 0x330   : > { %v5833_v36 = vrot.slane %v5832_v20, 2  ;;  %v5973_v14 = vrot.slane %v5972_v9, 2  ;;  %v5985_v46 = vrot.slane %v5984_v4, 4  ;;  %v6301_v57 = vsel %vm6027_vm8, %v13543_v31, %v6300_v25 }
 0x331   : > { %v5840_v45 = vrot.slane %v5839_v1, 2  ;;  %v5979_v52 = vmax.f32 %v5977_v27, %v5978_v48  ;;  %v5849_v27 = vrot.slane %v5848_v15, 1  ;;  %v6302_v44 = vsel %vm6015_vm9, %v13637_v42, %v13592_v19 }
 0x332   : > { %v5834_v38 = vmax.f32 %v5832_v20, %v5833_v36  ;;  %v5974_v12 = vmax.f32 %v5972_v9, %v5973_v14  ;;  %v5986_v49 = vmax.f32 %v5984_v4, %v5985_v46 }
 0x333   : > { %v5841_v60 = vmax.f32 %v5839_v1, %v5840_v45  ;;  %v5980_v53 = vrot.slane %v5979_v52, 2  ;;  %6312 = vrot.lane.b32.xlu1 %v6301_v57, %s11124_s17  ;;  %v5850_v14 = vmax.f32 %v5848_v15, %v5849_v27 }
 0x334   : > { %v5835_v13 = vrot.slane %v5834_v38, 1  ;;  %v5975_v10 = vrot.slane %v5974_v12, 1  ;;  %v5987_v50 = vrot.slane %v5986_v49, 2 }
 0x335   : > { %v5842_v34 = vrot.slane %v5841_v60, 1  ;;  %v5981_v20 = vmax.f32 %v5979_v52, %v5980_v53  ;;  %v6032_v57 = vsel %vm6015_vm9, %v13439_v41, %v5850_v14  ;;  %v6160_v41 = vsel %vm6015_vm9, %v13654_v29, %v13453_v22 }
 0x336   : > { %v14047_v47 = vmax.f32 %v5834_v38, %v5835_v13  ;;  %v5976_v1 = vmax.f32 %v5974_v12, %v5975_v10  ;;  %v5988_v48 = vmax.f32 %v5986_v49, %v5987_v50  ;;  %v6033_v13 = vsel %vm6017_vm10, %v13718_v5, %v6032_v57 }
 0x337   : > { %v5843_v36 = vmax.f32 %v5841_v60, %v5842_v34  ;;  %v5982_v9 = vrot.slane %v5981_v20, 1  ;;  %v6034_v15 = vsel %vm6019_vm11, %v13731_v37, %v6033_v13  ;;  %v6167_v37 = vsel %vm6015_vm9, %v13788_v54, %v13783_v30 }
 0x338   : > { %v6303_v39 = vsel %vm6017_vm10, %v14047_v47, %v6302_v44  ;;  %v6263_v25 = vsel %vm6019_vm11, %v5976_v1, %v6262_v8  ;;  %v5989_v4 = vrot.slane %v5988_v48, 1  ;;  %v6309_v38 = vsel %vm6015_vm9, %v5976_v1, %v14017_v6 }
 0x339   : > { %v6304_v40 = vsel %vm6019_vm11, %v5843_v36, %v6303_v39  ;;  %v5983_v45 = vmax.f32 %v5981_v20, %v5982_v9  ;;  %6270 = vrot.lane.b32.xlu0 %v6263_v25, %s11126_s27  ;;  %v6039_v8 = vsel %vm6015_vm9, %v13699_v26, %v13683_v2  ;;  %v6035_v53 = vsel %vm6021_vm13, %v13453_v22, %v6034_v15 }
 0x33a   : > { %6314 = vrot.lane.b32.xlu1 %v6304_v40, %s11124_s17  ;;  %v5990_v52 = vmax.f32 %v5988_v48, %v5989_v4  ;;  %v6040_v12 = vsel %vm6017_vm10, %v13724_v3, %v6039_v8  ;;  %v6036_v49 = vsel %vm6023_vm14, %v13654_v29, %v6035_v53  ;;  %v6168_v50 = vsel %vm6017_vm10, %v13808_v28, %v6167_v37  ;;  %v14133_v40 = vpop.permute.xlu0 %10264 }
 0x33b   : > { %v6310_v46 = vsel %vm6017_vm10, %v5983_v45, %v6309_v38  ;;  %v14081_v5 = vsel %vm6019_vm11, %v13779_v43, %v6040_v12  ;;  %v6037_v10 = vsel %vm6025_vm7, %v13665_v35, %v6036_v49  ;;  %v6150_v49 = vsel %vm6015_vm9, %v13093_v24, %v12988_v0 }
 0x33c   : > { %v6311_v60 = vsel %vm6019_vm11, %v5990_v52, %v6310_v46  ;;  %v6285_v34 = vsel %vm6021_vm13, %v13783_v30, %v14081_v5  ;;  %v6038_v29 = vsel %vm6027_vm8, %v13675_v59, %v6037_v10  ;;  %v6151_v10 = vsel %vm6017_vm10, %v13108_v7, %v6150_v49 }
 0x33d   : > { %6316 = vrot.lane.b32.xlu0 %v6308_v17, %s11124_s17  ;;  %v6161_v17 = vsel %vm6017_vm10, %v13665_v35, %v6160_v41  ;;  %v14110_v35 = vsel %vm6019_vm11, %v13961_v62, %v6168_v50  ;;  %v6286_v36 = vsel %vm6023_vm14, %v13788_v54, %v6285_v34  ;;  %v6029_v41 = vsel %vm6015_vm9, %v13116_v16, %v13193_v21 }
 0x33e   : > { %v6162_v22 = vsel %vm6019_vm11, %v13675_v59, %v6161_v17  ;;  %v6289_v59 = vsel %vm6015_vm9, %v14017_v6, %v13997_v51  ;;  %v6071_v6 = vpop.permute.xlu1 %6070  ;;  %v6105_v25 = vpop.permute.xlu0 %6104  ;;  %v10267_v17 = vunpack.i.h.bf16 %v14133_v40 }
 0x33f   : > { %v6163_v20 = vsel %vm6021_vm13, %v13683_v2, %v6162_v22 }
 0x340   : > { %v6164_v30 = vsel %vm6023_vm14, %v13699_v26, %v6163_v20  ;;  %v6287_v26 = vsel %vm6025_vm7, %v13808_v28, %v6286_v36 }
 0x341   : > { %6318 = vrot.lane.b32.xlu0 %v6311_v60, %s11124_s17  ;;  %v6165_v27 = vsel %vm6025_vm7, %v13724_v3, %v6164_v30  ;;  %v6290_v3 = vsel %vm6017_vm10, %v5976_v1, %v6289_v59  ;;  %v14126_v44 = vsel %vm6027_vm8, %v13961_v62, %v6287_v26 }
 0x342   : > { %v14114_v2 = vsel %vm6027_vm8, %v13779_v43, %v6165_v27  ;;  %v14129_v39 = vsel %vm6019_vm11, %v5983_v45, %v6290_v3  ;;  %v15333_v43 = vld [vmem:[#allocation12_spill] sm:$0xff]  ;;  %v14135_v4 = vpop.permute.xlu1 %10269  ;;  %v15334_v45 = vld [vmem:[#allocation13_spill] sm:$0xff] }
 0x343   : > { %v5697_v9 = vsel %vm5696_vm12, %v15333_v43, -inf  ;;  %vm6324_vm12 = vcmask 261120   ;;  %v10272_v34 = vunpack.i.h.bf16 %v14135_v4  ;;  %v6152_v43 = vsel %vm6019_vm11, %v13113_v32, %v6151_v10  ;;  %v10374_v10 = vld [vmem:[%s15253_s5 + $0x90] sm:$0xff]  }
 0x344   : > { %v5698_v54 = vrot.slane %v5697_v9, 4 }
 0x346   : > { %v5699_v48 = vmax.f32 %v5697_v9, %v5698_v54  ;;  %v14137_v38 = vpop.permute.xlu0 %10274  ;;  %v6139_v14 = vpop.permute.xlu1 %6138 }
 0x347   : > { %v10277_v20 = vunpack.i.h.bf16 %v14137_v38 }
 0x348   : > { %v5700_v51 = vrot.slane %v5699_v48, 2 }
 0x34a   : > { %v5701_v28 = vmax.f32 %v5699_v48, %v5700_v51  ;;  %v6199_v46 = vpop.permute.xlu0 %6198  ;;  %v6153_v48 = vsel %vm6021_vm13, %v13193_v21, %v6152_v43 }
 0x34c   : > { %v5702_v1 = vrot.slane %v5701_v28, 1 }
 0x34e   : > { %v5703_v62 = vmax.f32 %v5701_v28, %v5702_v1 }
 0x350   : > { %v6016_v52 = vsel %vm6015_vm9, %v15334_v45, %v5703_v62  ;;  %v10266_v62 = vunpack.i.l.bf16 %v14133_v40  ;;  %v10271_v45 = vunpack.i.l.bf16 %v14135_v4 }
 0x351   : > { %v6018_v57 = vsel %vm6017_vm10, %v13276_v18, %v6016_v52  ;;  %v6030_v18 = vsel %vm6017_vm10, %v13121_v55, %v6029_v41 }
 0x352   : > { %v6020_v13 = vsel %vm6019_vm11, %v13289_v56, %v6018_v57  ;;  %v6233_v15 = vpop.permute.xlu0 %6232  ;;  %v6031_v37 = vsel %vm6019_vm11, %v13131_v61, %v6030_v18  ;;  %v10276_v57 = vunpack.i.l.bf16 %v14137_v38 }
 0x353   : > { %v6022_v8 = vsel %vm6021_vm13, %v12988_v0, %v6020_v13  ;;  %v6326_v22 = vsel %vm6324_vm12, %v6031_v37, %v6071_v6  ;;  %v6157_v0 = vsel %vm6015_vm9, %v13202_v63, %v13140_v11 }
 0x354   : > { %v6024_v53 = vsel %vm6023_vm14, %v13093_v24, %v6022_v8  ;;  %v6331_v59 = vsel %vm6329_vm4, %v6326_v22, %v6105_v25 }
 0x355   : > { %v6026_v56 = vsel %vm6025_vm7, %v13108_v7, %v6024_v53  ;;  %v6335_v7 = vsel %vm3852_vm3, %v6331_v59, %v6139_v14 }
 0x356   : > { %v6028_v36 = vsel %vm6027_vm8, %v13113_v32, %v6026_v56  ;;  %v6154_v32 = vsel %vm6023_vm14, %v13116_v16, %v6153_v48 }
 0x357   : > { %v6325_v26 = vsel %vm6324_vm12, %v6028_v36, %v10267_v17  ;;  %v6155_v21 = vsel %vm6025_vm7, %v13121_v55, %v6154_v32  ;;  %v10384_v32 = vld [vmem:[%s15255_s7 + $0x4] ss:$28 sps:$4 sm:$0xff]  }
 0x358   : > { %v6330_v9 = vsel %vm6329_vm4, %v6325_v26, %v10272_v34  ;;  %v6156_v40 = vsel %vm6027_vm8, %v13131_v61, %v6155_v21  ;;  %v10373_v61 = vld [vmem:[%s15253_s5 + $0x88] sm:$0xff]   ;;  %v10387_v21 = vld [vmem:[%s15255_s7 + $0x7c] ss:$28 sps:$4 sm:$0xff]  }
 0x359   : > { %v6334_v51 = vsel %vm3852_vm3, %v6330_v9, %v10277_v20  ;;  %v6338_v16 = vsel %vm6324_vm12, %v6156_v40, %v10266_v62  ;;  %v6278_v20 = vsel %vm6021_vm13, %v13140_v11, %v6031_v37  ;;  %v10378_v62 = vld [vmem:[%s15255_s7 + $0xc] ss:$28 sps:$4 sm:$0xff]   ;;  %v10399_v40 = vld [vmem:[%s15255_s7 + $0xb4] ss:$28 sps:$4 sm:$0xff]   ;;  %vm6714_vm13 = vcmask 523266  }
 0x35a   : > { %v6267_v60 = vpop.permute.xlu1 %6266  ;;  %v6342_v55 = vsel %vm6329_vm4, %v6338_v16, %v10271_v45  ;;  %7171 = vmatprep.subr.bf16.mxu0 %v10378_v62  ;;  %v10379_v45 = vld [vmem:[%s15255_s7 + $0x40] ss:$28 sps:$4 sm:$0xff]   ;;  %v10397_v16 = vld [vmem:[%s15255_s7 + $0xb0] ss:$28 sps:$4 sm:$0xff]  }
 0x38d   : > { %v6073_v12 = vpop.permute.xlu1 %6072 }
 0x38e   : > { %v6327_v50 = vsel %vm6324_vm12, %v6038_v29, %v6073_v12  ;;  %v6158_v29 = vsel %vm6017_vm10, %v13213_v33, %v6157_v0 }
 0x38f   : > { %v6159_v28 = vsel %vm6019_vm11, %v13529_v23, %v6158_v29 }
 0x390   : > { %v6339_v14 = vsel %vm6324_vm12, %v6159_v28, %v6199_v46 }
 0x391   : > { %v6107_v30 = vpop.permute.xlu1 %6106  ;;  %v6141_v27 = vpop.permute.xlu0 %6140  ;;  %v6343_v52 = vsel %vm6329_vm4, %v6339_v14, %v6233_v15  ;;  %v10382_v14 = vld [vmem:[%s15255_s7] ss:$28 sps:$4 sm:$0xff]  }
 0x392   : > { %v6332_v24 = vsel %vm6329_vm4, %v6327_v50, %v6107_v30  ;;  %v6347_v4 = vsel %vm3852_vm3, %v6343_v52, %v6267_v60  ;;  %v10390_v52 = vld [vmem:[%s15255_s7 + $0x3c] ss:$28 sps:$4 sm:$0xff]  }
 0x393   : > { %v6336_v3 = vsel %vm3852_vm3, %v6332_v24, %v6141_v27 }
 0x394   : > { %v9586_v54 = vcombine.low %v6335_v7, %v6336_v3 }
 0x395   : > { %v6075_v6 = vpop.permute.xlu1 %6074  ;;  %v6201_v25 = vpop.permute.xlu0 %6200 }
 0x396   : > { %v6392_v1 = vpack.c.bf16 %v9586_v54, %v6334_v51  ;;  %v6340_v13 = vsel %vm6324_vm12, %v14114_v2, %v6201_v25  ;;  %v6346_v2 = vsel %vm3852_vm3, %v6342_v55, %v10276_v57  ;;  %v6328_v56 = vsel %vm6324_vm12, %v14081_v5, %v6075_v6  ;;  %v10388_v57 = vld [vmem:[%s15255_s7 + $0x38] ss:$28 sps:$4 sm:$0xff]   ;;  %v10402_v55 = vld [vmem:[%s15255_s7 + $0xe4] ss:$28 sps:$4 sm:$0xff]  }
 0x397   : > { %v6279_v5 = vsel %vm6023_vm14, %v13202_v63, %v6278_v20  ;;  %v10418_v20 = vld [vmem:[%s15255_s7 + $0x188] ss:$28 sps:$4 sm:$0xff]   ;;  %vm6695_vm14 = vcmask 521216  }
 0x398   : > { %v6280_v30 = vsel %vm6025_vm7, %v13213_v33, %v6279_v5  ;;  %v6282_v33 = vsel %vm6015_vm9, %v13592_v19, %v13543_v31  ;;  %vm9214_vm7 = vcmask 25600  }
 0x399   : > { %v6235_v8 = vpop.permute.xlu1 %6234  ;;  %v6269_v12 = vpop.permute.xlu0 %6268  ;;  %v6281_v36 = vsel %vm6027_vm8, %v13529_v23, %v6280_v30  ;;  %v6283_v23 = vsel %vm6017_vm10, %v13637_v42, %v6282_v33 }
 0x39a   : > { %v6344_v46 = vsel %vm6329_vm4, %v6340_v13, %v6235_v8  ;;  %v10393_v13 = vld [vmem:[%s15255_s7 + $0x74] ss:$28 sps:$4 sm:$0xff]  }
 0x39b   : > { %v6348_v15 = vsel %vm3852_vm3, %v6344_v46, %v6269_v12  ;;  %v10385_v8 = vld [vmem:[%s15255_s7 + $0x78] ss:$28 sps:$4 sm:$0xff]   ;;  %v10391_v12 = vld [vmem:[%s15255_s7 + $0x70] ss:$28 sps:$4 sm:$0xff]  }
 0x39c   : > { %v6371_v41 = vcombine.high %v6336_v3, %v6348_v15  ;;  %v9587_v38 = vcombine.low %v6347_v4, %v6348_v15  ;;  %v10396_v46 = vld [vmem:[%s15255_s7 + $0xac] ss:$28 sps:$4 sm:$0xff]  }
 0x39d   : > { %v6109_v53 = vpop.permute.xlu1 %6108  ;;  %v6203_v17 = vpop.permute.xlu0 %6202  ;;  %v10394_v4 = vld [vmem:[%s15255_s7 + $0xa8] ss:$28 sps:$4 sm:$0xff]  }
 0x39e   : > { %v6393_v18 = vpack.c.bf16 %v9587_v38, %v6346_v2  ;;  %v6333_v60 = vsel %vm6329_vm4, %v6328_v56, %v6109_v53  ;;  %v6341_v11 = vsel %vm6324_vm12, %v14110_v35, %v6203_v17  ;;  %v6284_v35 = vsel %vm6019_vm11, %v14047_v47, %v6283_v23  ;;  %v10400_v38 = vld [vmem:[%s15255_s7 + $0xe0] ss:$28 sps:$4 sm:$0xff]   ;;  %v10406_v17 = vld [vmem:[%s15255_s7 + $0x118] ss:$28 sps:$4 sm:$0xff]  }
 0x39f   : > { %v10411_v53 = vld [vmem:[%s15255_s7 + $0x124] ss:$28 sps:$4 sm:$0xff]   ;;  %v10408_v2 = vld [vmem:[%s15255_s7 + $0x11c] ss:$28 sps:$4 sm:$0xff]   ;;  %v10414_v56 = vld [vmem:[%s15255_s7 + $0x154] ss:$28 sps:$4 sm:$0xff]  }
 0x3a0   : > { %6603 = vmatprep.mubr.bf16.mxu1 %v6393_v18  ;;  %v10409_v18 = vld [vmem:[%s15255_s7 + $0x120] ss:$28 sps:$4 sm:$0xff]  }
 0x3a1   : > { %v6143_v49 = vpop.permute.xlu1 %6142  ;;  %6604 = vmatmul.mubr.bf16.vlgmr.msra.gmra.mrb[96].mxu1 %v6392_v1  ;;  %v6237_v50 = vpop.permute.xlu0 %6236  ;;  %v15335_v1 = vmov 0  }
 0x3a2   : > { %v6337_v34 = vsel %vm3852_vm3, %v6333_v60, %v6143_v49  ;;  %10159 = vmatpush3.bf16.msra.mxu1 %v14013_v58  ;;  %v10375_v58 = vld [vmem:[%s15253_s5 + $0x98] sm:$0xff]   ;;  %v6345_v63 = vsel %vm6329_vm4, %v6341_v11, %v6237_v50  ;;  %v10412_v49 = vld [vmem:[%s15255_s7 + $0x150] ss:$28 sps:$4 sm:$0xff]  }
 0x3a3   : > { %v9588_v22 = vcombine.low %v6371_v41, %v6337_v34  ;;  %10160 = vmatprep.subr.bf16.mxu1 %v10373_v61  ;;  %v10403_v41 = vld [vmem:[%s15255_s7 + $0xe8] ss:$28 sps:$4 sm:$0xff]   ;;  %v10415_v60 = vld [vmem:[%s15255_s7 + $0x158] ss:$28 sps:$4 sm:$0xff]  }
 0x3a5   : > { %v6313_v27 = vpop.permute.xlu1 %6312  ;;  %v6395_v48 = vpack.c.bf16 %v9588_v22, %v9588_v22  ;;  %v10420_v22 = vld [vmem:[%s15255_s7 + $0x18c] ss:$28 sps:$4 sm:$0xff]  }
 0x3a6   : > { %10161 = vmatpush3.bf16.msra.mxu1 %v10373_v61  ;;  %v6350_v37 = vsel %vm6324_vm12, %v6281_v36, %v6313_v27  ;;  %v10417_v61 = vld [vmem:[%s15255_s7 + $0x15c] ss:$28 sps:$4 sm:$0xff]  }
 0x3a7   : > { %10162 = vmatprep.subr.bf16.mxu1 %v10374_v10  ;;  %v6368_v24 = vcombine.high %v6350_v37, %v6350_v37 }
 0x3a9   : > { %v6376_v19 = vcombine.low %v6350_v37, %v6368_v24 }
 0x3aa   : > { %10163 = vmatpush3.bf16.msra.mxu1 %v10374_v10  ;;  %v10421_v10 = vld [vmem:[%s15255_s7 + $0x190] ss:$28 sps:$4 sm:$0xff]  }
 0x3ab   : > { %v6271_v59 = vpop.permute.xlu0 %6270  ;;  %10164 = vmatprep.subr.bf16.mxu1 %v10375_v58 }
 0x3ac   : > { %v6349_v0 = vsel %vm3852_vm3, %v6345_v63, %v6271_v59  ;;  %v6315_v26 = vpop.permute.xlu1 %6314 }
 0x3ad   : > { %v6373_v7 = vcombine.low %v6337_v34, %v6349_v0  ;;  %v6351_v43 = vsel %vm6324_vm12, %v6284_v35, %v6315_v26  ;;  %v10423_v34 = vld [vmem:[%s15255_s7 + $0x194] ss:$28 sps:$4 sm:$0xff]   ;;  %v9590_v0 = vld [vmem:[%s15254_s6] ss:$0 sm:$0xff] }
 0x3ae   : > { %10165 = vmatpush3.bf16.msra.mxu1 %v10375_v58 }
 0x3af   : > { %v6317_v29 = vpop.permute.xlu0 %6316  ;;  %v9589_v3 = vcombine.high %v6348_v15, %v6373_v7  ;;  %7130 = vmatprep.subr.bf16.mxu1 %v10384_v32  ;;  %v10405_v15 = vld [vmem:[%s15255_s7 + $0xec] ss:$28 sps:$4 sm:$0xff]  }
 0x3b0   : > { %v6352_v31 = vsel %vm6324_vm12, %v14126_v44, %v6317_v29  ;;  %v10376_v44 = vld [vmem:[%s15255_s7 + $0x8] ss:$28 sps:$4 sm:$0xff]  }
 0x3b1   : > { %v6379_v9 = vcombine.low %v6351_v43, %v6352_v31  ;;  %v6396_v54 = vpack.c.bf16 %v9589_v3, %v9589_v3  ;;  %v6372_v51 = vcombine.high %v6352_v31, %v6352_v31  ;;  %7172 = vmatpush1.bf16.msra.mxu0 %v10376_v44 }
 0x3b3   : > { %v6394_v6 = vpack.c.bf16 %v6379_v9, %v6376_v19  ;;  %v6319_v25 = vpop.permute.xlu0 %6318  ;;  %6611 = vmatprep.mubr.bf16.mxu1 %v6396_v54 }
 0x3b4   : > { %v6353_v42 = vsel %vm6324_vm12, %v14129_v39, %v6319_v25  ;;  %6612 = vmatmul.mubr.bf16.gmra.mrb[100].mxu1 %v6395_v48  ;;  %v10381_v39 = vld [vmem:[%s15255_s7 + $0x44] ss:$28 sps:$4 sm:$0xff]  }
 0x3b5   : > { %v6382_v47 = vcombine.low %v6372_v51, %v6353_v42  ;;  %10166 = vmatprep.mubr.msk.bf16.mxu1 %vm6329_vm4, %v6394_v6  ;;  %7173 = vmatprep.subr.bf16.mxu0 %v10381_v39 }
 0x3b6   : > { %7174 = vmatpush1.bf16.msra.mxu0 %v10379_v45 }
 0x3b7   : > { %v6397_v28 = vpack.c.bf16 %v6382_v47, %v6382_v47  ;;  %7175 = vmatprep.subr.bf16.mxu0 %v10387_v21 }
 0x3ba   : > { %7176 = vmatpush1.bf16.msra.mxu0 %v10385_v8 }
 0x3bb   : > { %7177 = vmatprep.subr.bf16.mxu0 %v10399_v40 }
 0x3bc   : > { %10167 = vmatmul.mubr.msk.bf16.vlgmr.msra.gmra.mrb[104].mxu1 %vm6329_vm4, %v6397_v28 }
 0x3bd   : > { %7162 = vmatprep.mubr.bf16.mxu1 %v15335_v1  ;;  %7131 = vmatpush1.bf16.msra.mxu1 %v10382_v14 }
 0x3be   : > { %7132 = vmatprep.subr.bf16.mxu1 %v10390_v52  ;;  %7178 = vmatpush1.bf16.msra.mxu0 %v10397_v16 }
 0x3bf   : > { %7179 = vmatprep.subr.bf16.mxu0 %v10405_v15 }
 0x3c1   : > { %7133 = vmatpush1.bf16.msra.mxu1 %v10388_v57 }
 0x3c2   : > { %7134 = vmatprep.subr.bf16.mxu1 %v10393_v13  ;;  %7180 = vmatpush1.bf16.msra.mxu0 %v10403_v41 }
 0x3c3   : > { %7181 = vmatprep.subr.bf16.mxu0 %v10411_v53 }
 0x3c5   : > { %7135 = vmatpush1.bf16.msra.mxu1 %v10391_v12 }
 0x3c6   : > { %7136 = vmatprep.subr.bf16.mxu1 %v10396_v46  ;;  %7182 = vmatpush1.bf16.msra.mxu0 %v10409_v18 }
 0x3c7   : > { %7183 = vmatprep.subr.bf16.mxu0 %v10417_v61 }
 0x3c9   : > { %7137 = vmatpush1.bf16.msra.mxu1 %v10394_v4 }
 0x3ca   : > { %7138 = vmatprep.subr.bf16.mxu1 %v10402_v55  ;;  %7184 = vmatpush1.bf16.msra.mxu0 %v10415_v60 }
 0x3cb   : > { %7185 = vmatprep.subr.bf16.mxu0 %v10423_v34 }
 0x3cd   : > { %7139 = vmatpush1.bf16.msra.mxu1 %v10400_v38 }
 0x3ce   : > { %7140 = vmatprep.subr.bf16.mxu1 %v10408_v2  ;;  %7186 = vmatpush1.bf16.msra.mxu0 %v10421_v10  ;;  %v10426_v2 = vld [vmem:[%s15255_s7 + $0x14] ss:$28 sps:$4 sm:$0xff]  }
 0x3d1   : > { %7141 = vmatpush1.bf16.msra.mxu1 %v10406_v17 }
 0x3d2   : > { %7142 = vmatprep.subr.bf16.mxu1 %v10414_v56  ;;  %v11127_v56 = vmov 0.0  }
 0x3d3   : > { %10170 = vmatprep.subr.bf16.mxu0 %v11127_v56 }
 0x3d5   : > { %7143 = vmatpush1.bf16.msra.mxu1 %v10412_v49 }
 0x3d6   : > { %7144 = vmatprep.subr.bf16.mxu1 %v10420_v22 }
 0x3d9   : > { %7145 = vmatpush1.bf16.msra.mxu1 %v10418_v20 }
 0x3da   : > { %7212 = vmatprep.subr.bf16.mxu1 %v10426_v2  ;;  %v10479_v2 = vld [vmem:[%s15257_s9 + $0x6c] ss:$16 sps:$4 sm:$0xff]  }
 0x474   : > { %v10065_v5 = vpop.f32.mrb[96].mxu1 }
 0x475   : > { %v10066_v50 = vpop.f32.mrb[97].mxu1 }
 0x476   : > { %v10067_v30 = vadd.f32 %v10066_v50, %v10065_v5  ;;  %v10068_v27 = vpop.f32.mrb[98].mxu1 }
 0x477   : > { %v10069_v58 = vpop.f32.mrb[99].mxu1 }
 0x478   : > { %v10070_v36 = vadd.f32 %v10069_v58, %v10068_v27  ;;  %v6606_v7 = vadd.f32 %v10067_v30, %v9590_v0 }
 0x47a   : > { %v6609_v43 = vadd.f32 %v10070_v36, %v9590_v0 }
 0x487   : > { %v10071_v11 = vpop.f32.mrb[100].mxu1 }
 0x488   : > { %v10072_v37 = vpop.f32.mrb[101].mxu1 }
 0x489   : > { %v10073_v63 = vadd.f32 %v10072_v37, %v10071_v11  ;;  %v10074_v33 = vpop.f32.mrb[102].mxu1 }
 0x48a   : > { %v10075_v59 = vpop.f32.mrb[103].mxu1 }
 0x48b   : > { %v6614_v24 = vadd.f32 %v10073_v63, %v9590_v0 }
 0x48f   : > { %v10168_v26 = vpop.f32.mrb[104].mxu1 }
 0x490   : > { %v6662_v23 = vadd.f32 %v10168_v26, %v6614_v24  ;;  %v6653_v35 = vpop.f32.mrb[105].mxu1 }
 0x491   : > { %v6654_v29 = vadd.f32 %v6653_v35, %v6606_v7  ;;  %v10169_v3 = vpop.f32.mrb[106].mxu1  ;;  %v10427_v35 = vld [vmem:[%s15255_s7 + $0x18] ss:$28 sps:$4 sm:$0xff]  }
 0x492   : > { %v6672_v31 = vmin.f32 %v6662_v23, 0.0  ;;  %v6656_v19 = vpop.f32.mrb[107].mxu1  ;;  %vm6669_vm3 = vcmp.gt.f32.partialorder %v6662_v23, 0.0  ;;  %v10430_v3 = vld [vmem:[%s15255_s7 + $0x4c] ss:$28 sps:$4 sm:$0xff]  }
 0x493   : > { %v6670_v9 = vmin.f32 %v6654_v29, 0.0  ;;  %v6657_v54 = vadd.f32 %v6656_v19, %v6609_v43  ;;  %vm6667_vm10 = vcmp.gt.f32.partialorder %v6654_v29, 0.0  ;;  %v10428_v43 = vld [vmem:[%s15255_s7 + $0x48] ss:$28 sps:$4 sm:$0xff]  }
 0x494   : > { %v6677_v48 = vmul.f32 1.442695, %v6672_v31  ;;  %v10431_v31 = vld [vmem:[%s15255_s7 + $0x50] ss:$28 sps:$4 sm:$0xff]   ;;  %v10434_v19 = vld [vmem:[%s15255_s7 + $0x84] ss:$28 sps:$4 sm:$0xff]  }
 0x495   : > { %v6673_v51 = vmul.f32 1.442695, %v6670_v9  ;;  %v6671_v6 = vmin.f32 %v6657_v54, 0.0  ;;  %vm6668_vm11 = vcmp.gt.f32.partialorder %v6657_v54, 0.0  ;;  %v10432_v9 = vld [vmem:[%s15255_s7 + $0x80] ss:$28 sps:$4 sm:$0xff]  }
 0x496   : > { %11050 = vpow2.f32 %v6677_v48  ;;  %v10438_v48 = vld [vmem:[%s15255_s7 + $0xbc] ss:$28 sps:$4 sm:$0xff]  }
 0x497   : > { %11052 = vpow2.f32 %v6673_v51  ;;  %v6675_v25 = vmul.f32 1.442695, %v6671_v6  ;;  %v10436_v51 = vld [vmem:[%s15255_s7 + $0xb8] ss:$28 sps:$4 sm:$0xff]   ;;  %v10439_v6 = vld [vmem:[%s15255_s7 + $0xc0] ss:$28 sps:$4 sm:$0xff]  }
 0x499   : > { %11054 = vpow2.f32 %v6675_v25  ;;  %v10442_v25 = vld [vmem:[%s15255_s7 + $0xf4] ss:$28 sps:$4 sm:$0xff]  }
 0x4a0   : > { %v11051_v42 = vpop.eup %11050 }
 0x4a1   : > { %v11053_v47 = vpop.eup %11052  ;;  %v9615_v28 = vadd.f32 -1.0, %v11051_v42  ;;  %v10440_v42 = vld [vmem:[%s15255_s7 + $0xf0] ss:$28 sps:$4 sm:$0xff]  }
 0x4a2   : > { %v9613_v44 = vadd.f32 -1.0, %v11053_v47  ;;  %v10443_v47 = vld [vmem:[%s15255_s7 + $0xf8] ss:$28 sps:$4 sm:$0xff]  }
 0x4a3   : > { %v11055_v62 = vpop.eup %11054  ;;  %v6684_v39 = vsel %vm6669_vm3, %v6662_v23, %v9615_v28  ;;  %v10424_v23 = vld [vmem:[%s15255_s7 + $0x10] ss:$28 sps:$4 sm:$0xff]  }
 0x4a4   : > { %v6690_v14 = vcombine.high %v6684_v39, %v6684_v39  ;;  %v6682_v32 = vsel %vm6667_vm10, %v6654_v29, %v9613_v44  ;;  %v9614_v45 = vadd.f32 -1.0, %v11055_v62  ;;  %v10446_v28 = vld [vmem:[%s15255_s7 + $0x12c] ss:$28 sps:$4 sm:$0xff]  }
 0x4a5   : > { %v6688_v52 = vcombine.high %v6682_v32, %v6682_v32  ;;  %v10444_v44 = vld [vmem:[%s15255_s7 + $0x128] ss:$28 sps:$4 sm:$0xff]   ;;  %v10447_v62 = vld [vmem:[%s15255_s7 + $0x130] ss:$28 sps:$4 sm:$0xff]  }
 0x4a6   : > { %v6711_v21 = vcombine.low %v6684_v39, %v6690_v14  ;;  %v6683_v57 = vsel %vm6668_vm11, %v6657_v54, %v9614_v45  ;;  %v10435_v54 = vld [vmem:[%s15255_s7 + $0x88] ss:$28 sps:$4 sm:$0xff]   ;;  %v10448_v14 = vld [vmem:[%s15255_s7 + $0x160] ss:$28 sps:$4 sm:$0xff]  }
 0x4a7   : > { %v6691_v13 = vcombine.low %v6682_v32, %v6688_v52  ;;  %v6689_v8 = vcombine.high %v6683_v57, %v6683_v57  ;;  %v6710_v12 = vcombine.low %v6688_v52, %v6683_v57  ;;  %v10451_v32 = vld [vmem:[%s15255_s7 + $0x168] ss:$28 sps:$4 sm:$0xff]   ;;  %v10454_v45 = vld [vmem:[%s15255_s7 + $0x19c] ss:$28 sps:$4 sm:$0xff]  }
 0x4a8   : > { %v6722_v40 = vsel %vm6714_vm13, %v6711_v21, -inf  ;;  %v10452_v52 = vld [vmem:[%s15255_s7 + $0x198] ss:$28 sps:$4 sm:$0xff]   ;;  %v10455_v21 = vld [vmem:[%s15255_s7 + $0x1a0] ss:$28 sps:$4 sm:$0xff]  }
 0x4a9   : > { %v6696_v46 = vsel %vm6695_vm14, %v6691_v13, -inf  ;;  %v6692_v16 = vcombine.low %v6689_v8, %v6684_v39  ;;  %v6715_v4 = vsel %vm6714_vm13, %v6710_v12, -inf  ;;  %v6723_v15 = vrot.slane %v6722_v40, 4  ;;  %v10450_v39 = vld [vmem:[%s15255_s7 + $0x164] ss:$28 sps:$4 sm:$0xff]  }
 0x4aa   : > { %v6697_v55 = vrot.slane %v6696_v46, 4  ;;  %v6716_v41 = vrot.slane %v6715_v4, 4  ;;  %v10458_v57 = vld [vmem:[%s15257_s9 + $0x4] ss:$16 sps:$4 sm:$0xff]   ;;  %v10461_v13 = vld [vmem:[%s15257_s9 + $0xc] ss:$16 sps:$4 sm:$0xff]  }
 0x4ab   : > { %v6703_v38 = vsel %vm6695_vm14, %v6692_v16, -inf  ;;  %v6724_v53 = vmax.f32 %v6722_v40, %v6723_v15  ;;  %v10456_v8 = vld [vmem:[%s15257_s9] ss:$16 sps:$4 sm:$0xff]   ;;  %v10459_v12 = vld [vmem:[%s15257_s9 + $0x8] ss:$16 sps:$4 sm:$0xff]  }
 0x4ac   : > { %v6698_v18 = vmax.f32 %v6696_v46, %v6697_v55  ;;  %v6704_v17 = vrot.slane %v6703_v38, 4  ;;  %v6717_v61 = vmax.f32 %v6715_v4, %v6716_v41  ;;  %v10464_v40 = vld [vmem:[%s15257_s9 + $0x24] ss:$16 sps:$4 sm:$0xff]   ;;  %v10467_v46 = vld [vmem:[%s15257_s9 + $0x2c] ss:$16 sps:$4 sm:$0xff]  }
 0x4ad   : > { %v6725_v60 = vrot.slane %v6724_v53, 2  ;;  %v10462_v16 = vld [vmem:[%s15257_s9 + $0x20] ss:$16 sps:$4 sm:$0xff]   ;;  %v10465_v4 = vld [vmem:[%s15257_s9 + $0x28] ss:$16 sps:$4 sm:$0xff]  }
 0x4ae   : > { %v6699_v49 = vrot.slane %v6698_v18, 2  ;;  %v6705_v34 = vmax.f32 %v6703_v38, %v6704_v17  ;;  %v6718_v22 = vrot.slane %v6717_v61, 2  ;;  %v10470_v15 = vld [vmem:[%s15257_s9 + $0x44] ss:$16 sps:$4 sm:$0xff]   ;;  %v10473_v55 = vld [vmem:[%s15257_s9 + $0x4c] ss:$16 sps:$4 sm:$0xff]  }
 0x4af   : > { %v6726_v10 = vmax.f32 %v6724_v53, %v6725_v60  ;;  %v10468_v41 = vld [vmem:[%s15257_s9 + $0x40] ss:$16 sps:$4 sm:$0xff]   ;;  %v10471_v38 = vld [vmem:[%s15257_s9 + $0x48] ss:$16 sps:$4 sm:$0xff]   ;;  %v10476_v53 = vld [vmem:[%s15257_s9 + $0x64] ss:$16 sps:$4 sm:$0xff]  }
 0x4b0   : > { %v6719_v20 = vmax.f32 %v6717_v61, %v6718_v22  ;;  %v6706_v5 = vrot.slane %v6705_v34, 2  ;;  %v6700_v50 = vmax.f32 %v6698_v18, %v6699_v49  ;;  %v10474_v18 = vld [vmem:[%s15257_s9 + $0x60] ss:$16 sps:$4 sm:$0xff]   ;;  %v10477_v17 = vld [vmem:[%s15257_s9 + $0x68] ss:$16 sps:$4 sm:$0xff]  }
 0x4b1   : > { %v6727_v30 = vrot.slane %v6726_v10, 1  ;;  %v10482_v61 = vld [vmem:[%s15257_s9 + $0x84] ss:$16 sps:$4 sm:$0xff]   ;;  %v10480_v60 = vld [vmem:[%s15257_s9 + $0x80] ss:$16 sps:$4 sm:$0xff]  }
 0x4b2   : > { %v6720_v27 = vrot.slane %v6719_v20, 1  ;;  %v6707_v58 = vmax.f32 %v6705_v34, %v6706_v5  ;;  %v6701_v36 = vrot.slane %v6700_v50, 1  ;;  %v10483_v49 = vld [vmem:[%s15257_s9 + $0x88] ss:$16 sps:$4 sm:$0xff]   ;;  %v10488_v34 = vld [vmem:[%s15257_s9 + $0xa4] ss:$16 sps:$4 sm:$0xff]  }
 0x4b3   : > { %v6728_v11 = vmax.f32 %v6726_v10, %v6727_v30  ;;  %v10491_v22 = vld [vmem:[%s15257_s9 + $0xac] ss:$16 sps:$4 sm:$0xff]   ;;  %v10486_v10 = vld [vmem:[%s15257_s9 + $0xa0] ss:$16 sps:$4 sm:$0xff]   ;;  %v10494_v5 = vld [vmem:[%s15257_s9 + $0xc4] ss:$16 sps:$4 sm:$0xff]  }
 0x4b4   : > { %v6721_v37 = vmax.f32 %v6719_v20, %v6720_v27  ;;  %v6708_v63 = vrot.slane %v6707_v58, 1  ;;  %v6702_v0 = vmax.f32 %v6700_v50, %v6701_v36  ;;  %v10489_v20 = vld [vmem:[%s15257_s9 + $0xa8] ss:$16 sps:$4 sm:$0xff]   ;;  %v10497_v50 = vld [vmem:[%s15257_s9 + $0xcc] ss:$16 sps:$4 sm:$0xff]  }
 0x4b5   : > { %v10492_v30 = vld [vmem:[%s15257_s9 + $0xc0] ss:$16 sps:$4 sm:$0xff]   ;;  %v10495_v27 = vld [vmem:[%s15257_s9 + $0xc8] ss:$16 sps:$4 sm:$0xff]   ;;  %v10503_v36 = vld [vmem:[%s15257_s9 + $0xec] ss:$16 sps:$4 sm:$0xff]  }
 0x4b6   : > { %v6735_v33 = vsel %vm6015_vm9, %v6728_v11, %v6721_v37  ;;  %v6709_v59 = vmax.f32 %v6707_v58, %v6708_v63  ;;  %v10500_v58 = vld [vmem:[%s15257_s9 + $0xe4] ss:$16 sps:$4 sm:$0xff]   ;;  %v10498_v11 = vld [vmem:[%s15257_s9 + $0xe0] ss:$16 sps:$4 sm:$0xff]   ;;  %v10501_v37 = vld [vmem:[%s15257_s9 + $0xe8] ss:$16 sps:$4 sm:$0xff]  }
 0x4b7   : > { %6736 = vrot.lane.b32.xlu1 %v6735_v33, %s11125_s30  ;;  %v10506_v63 = vld [vmem:[%s15257_s9 + $0x104] ss:$16 sps:$4 sm:$0xff]   ;;  %v10509_v33 = vld [vmem:[%s15257_s9 + $0x10c] ss:$16 sps:$4 sm:$0xff]   ;;  %s436_s30 = scalar_lea.vmem [#allocation2], %s9293_s21  ;;  %s11129_s21 = smov [#allocation2]  }
 0x4b8   : > { %v6731_v24 = vsel %vm6015_vm9, %v6709_v59, %v6702_v0  ;;  %vm11128_vm9 = vmmov 0   ;;  %v10504_v59 = vld [vmem:[%s15257_s9 + $0x100] ss:$16 sps:$4 sm:$0xff]   ;;  %v10507_v0 = vld [vmem:[%s15257_s9 + $0x108] ss:$16 sps:$4 sm:$0xff]   ;;  %s9230_s17 = sshll.u32 %s436_s30, 4  ;;  %s15208_s17 = int_to_ptr.vmem [resolvable:$true] %s9230_s17 }
 0x4b9   : > { %s11057_s16 = scalar_lea.vmem %s15208_s17, 32  ;;  %s11061_s22 = sshll.u32 %s11129_s21, 4  ;;  %s11062_s22 = int_to_ptr.vmem [resolvable:$false] %s11061_s22 }
 0x4ba   : > { %p11058_p11 = scmp.ne.s32.totalorder %s15208_s17, %s11057_s16  ;;  %s11063_s15 = scalar_lea.vmem %s11062_s22, 64 }
 0x4bb   : > { %p11064_p0 = scmp.lt.s32.totalorder %s15208_s17, %s11062_s22  ;;  %p11065_p1 = scmp.lt.s32.totalorder %s11063_s15, %s11057_s16 }
 0x4bc   : > { %p11059_p12 = pnand %p11058_p11, %p11238_p5 }
 0x4bd   : > { %p11066_p2 = por %p11065_p1, %p11064_p0 }
 0x4be   : > { %p11060_p13 = pneg %p11059_p12 }
 0x4c0   : > { %p11067_p3 = pnand %p11066_p2, %p11060_p13 }
 0x529   : > { %v6737_v26 = vpop.permute.xlu1 %6736 }
 0x52a   : > { %v6739_v7 = vsel %vm6329_vm4, %v6731_v24, %v6737_v26  ;;  %v10512_v24 = vld [vmem:[%s15257_s9 + $0x124] ss:$16 sps:$4 sm:$0xff]   ;;  %v10515_v26 = vld [vmem:[%s15257_s9 + $0x12c] ss:$16 sps:$4 sm:$0xff]  }
 0x52b   : > { %v14362_v29 = vpack.c.bf16 %v6739_v7, %v6739_v7  ;;  %v10510_v7 = vld [vmem:[%s15257_s9 + $0x120] ss:$16 sps:$4 sm:$0xff]  }
 0x52d   : > { %7163 = vmatmul.mubr.bf16.vlgmr.msra.gmra.mrb[108].mxu1 %v14362_v29  ;;  %7204 = vmatmul.mubr.bf16.vlgmr.msra.gmra.mrb[128].mxu0 %v14362_v29 }
 0x52e   : > { %7213 = vmatpush1.bf16.msra.mxu1 %v10424_v23  ;;  %10171 = vmatpush3.bf16.msra.mxu0 %v10427_v35  ;;  %v10513_v23 = vld [vmem:[%s15257_s9 + $0x128] ss:$16 sps:$4 sm:$0xff]   ;;  %v10518_v35 = vld [vmem:[%s15257_s9 + $0x144] ss:$16 sps:$4 sm:$0xff]  }
 0x52f   : > { %7214 = vmatprep.subr.bf16.mxu1 %v10430_v3  ;;  %10172 = vmatprep.subr.bf16.mxu0 %v11127_v56  ;;  %v10516_v3 = vld [vmem:[%s15257_s9 + $0x140] ss:$16 sps:$4 sm:$0xff]  }
 0x530   : > { %7244 = vmatprep.mubr.bf16.mxu1 %v15335_v1  ;;  %10186 = vmatprep.mubr.msk.bf16.mxu0 %vm11128_vm9, %v11127_v56 }
 0x532   : > { %7215 = vmatpush1.bf16.msra.mxu1 %v10428_v43  ;;  %10173 = vmatpush3.bf16.msra.mxu0 %v10431_v31  ;;  %v10519_v43 = vld [vmem:[%s15257_s9 + $0x148] ss:$16 sps:$4 sm:$0xff]   ;;  %v10524_v31 = vld [vmem:[%s15257_s9 + $0x164] ss:$16 sps:$4 sm:$0xff]  }
 0x533   : > { %7216 = vmatprep.subr.bf16.mxu1 %v10434_v19  ;;  %10174 = vmatprep.subr.bf16.mxu0 %v11127_v56  ;;  %v10527_v19 = vld [vmem:[%s15257_s9 + $0x16c] ss:$16 sps:$4 sm:$0xff]  }
 0x536   : > { %7217 = vmatpush1.bf16.msra.mxu1 %v10432_v9  ;;  %10175 = vmatpush3.bf16.msra.mxu0 %v10435_v54  ;;  %v10522_v9 = vld [vmem:[%s15257_s9 + $0x160] ss:$16 sps:$4 sm:$0xff]   ;;  %v10525_v54 = vld [vmem:[%s15257_s9 + $0x168] ss:$16 sps:$4 sm:$0xff]  }
 0x537   : > { %7218 = vmatprep.subr.bf16.mxu1 %v10438_v48  ;;  %10176 = vmatprep.subr.bf16.mxu0 %v11127_v56  ;;  %v10530_v48 = vld [vmem:[%s15257_s9 + $0x184] ss:$16 sps:$4 sm:$0xff]  }
 0x53a   : > { %7219 = vmatpush1.bf16.msra.mxu1 %v10436_v51  ;;  %10177 = vmatpush3.bf16.msra.mxu0 %v10439_v6  ;;  %v10533_v51 = vld [vmem:[%s15257_s9 + $0x18c] ss:$16 sps:$4 sm:$0xff]   ;;  %v10528_v6 = vld [vmem:[%s15257_s9 + $0x180] ss:$16 sps:$4 sm:$0xff]  }
 0x53b   : > { %7220 = vmatprep.subr.bf16.mxu1 %v10442_v25  ;;  %10178 = vmatprep.subr.bf16.mxu0 %v11127_v56  ;;  %v10531_v25 = vld [vmem:[%s15257_s9 + $0x188] ss:$16 sps:$4 sm:$0xff]  }
 0x53e   : > { %7221 = vmatpush1.bf16.msra.mxu1 %v10440_v42  ;;  %10179 = vmatpush3.bf16.msra.mxu0 %v10443_v47  ;;  %v10536_v42 = vld [vmem:[%s15257_s9 + $0x1a4] ss:$16 sps:$4 sm:$0xff]   ;;  %v10539_v47 = vld [vmem:[%s15257_s9 + $0x1ac] ss:$16 sps:$4 sm:$0xff]  }
 0x53f   : > { %7222 = vmatprep.subr.bf16.mxu1 %v10446_v28  ;;  %10180 = vmatprep.subr.bf16.mxu0 %v11127_v56  ;;  %v10534_v28 = vld [vmem:[%s15257_s9 + $0x1a0] ss:$16 sps:$4 sm:$0xff]  }
 0x542   : > { %7223 = vmatpush1.bf16.msra.mxu1 %v10444_v44  ;;  %10181 = vmatpush3.bf16.msra.mxu0 %v10447_v62  ;;  %v10537_v44 = vld [vmem:[%s15257_s9 + $0x1a8] ss:$16 sps:$4 sm:$0xff]   ;;  %v10540_v62 = vld [vmem:[%s15257_s9 + $0x1c0] ss:$16 sps:$4 sm:$0xff]  }
 0x543   : > { %7224 = vmatprep.subr.bf16.mxu1 %v10450_v39  ;;  %10182 = vmatprep.subr.bf16.mxu0 %v11127_v56  ;;  %v10542_v39 = vld [vmem:[%s15257_s9 + $0x1c4] ss:$16 sps:$4 sm:$0xff]  }
 0x546   : > { %7225 = vmatpush1.bf16.msra.mxu1 %v10448_v14  ;;  %10183 = vmatpush3.bf16.msra.mxu0 %v10451_v32  ;;  %v10543_v14 = vld [vmem:[%s15257_s9 + $0x1c8] ss:$16 sps:$4 sm:$0xff]   ;;  %v10545_v32 = vld [vmem:[%s15257_s9 + $0x1cc] ss:$16 sps:$4 sm:$0xff]  }
 0x547   : > { %7226 = vmatprep.subr.bf16.mxu1 %v10454_v45  ;;  %10184 = vmatprep.subr.bf16.mxu0 %v11127_v56  ;;  %v10485_v56 = vld [vmem:[%s15257_s9 + $0x8c] ss:$16 sps:$4 sm:$0xff]   ;;  %v10548_v45 = vld [vmem:[%s15257_s9 + $0x1e4] ss:$16 sps:$4 sm:$0xff]  }
 0x54a   : > { %7227 = vmatpush1.bf16.msra.mxu1 %v10452_v52  ;;  %10185 = vmatpush3.bf16.msra.mxu0 %v10455_v21  ;;  %v10551_v52 = vld [vmem:[%s15257_s9 + $0x1ec] ss:$16 sps:$4 sm:$0xff]   ;;  %v10546_v21 = vld [vmem:[%s15257_s9 + $0x1e0] ss:$16 sps:$4 sm:$0xff]  }
 0x54b   : > { %8580 = vmatprep.subr.bf16.mxu1 %v10458_v57  ;;  %8744 = vmatprep.subr.bf16.mxu0 %v10461_v13  ;;  %v10549_v57 = vld [vmem:[%s15257_s9 + $0x1e8] ss:$16 sps:$4 sm:$0xff]   ;;  %v10554_v13 = vld [vmem:[%s15257_s9 + $0x204] ss:$16 sps:$4 sm:$0xff]  }
 0x54d   : > { %7245 = vmatmul.mubr.bf16.vlgmr.msra.gmra.mrb[112].mxu1 %v14362_v29  ;;  %10187 = vmatmul.mubr.bf16.vlgmr.msra.gmra.mrb[132].mxu0 %v14362_v29  ;;  %v10521_v29 = vld [vmem:[%s15257_s9 + $0x14c] ss:$16 sps:$4 sm:$0xff]  }
 0x54e   : > { %8581 = vmatpush1.bf16.msra.mxu1 %v10456_v8  ;;  %8745 = vmatpush1.bf16.msra.mxu0 %v10459_v12  ;;  %v10557_v8 = vld [vmem:[%s15257_s9 + $0x20c] ss:$16 sps:$4 sm:$0xff]   ;;  %v14641_v12 = vld [vmem:[%s15256_s8] sm:$0x7f] }
 0x54f   : > { %8582 = vmatprep.subr.bf16.mxu1 %v10464_v40  ;;  %8746 = vmatprep.subr.bf16.mxu0 %v10467_v46  ;;  %v15336_v40 = vld [vmem:[#allocation8_spill] sm:$0xff] }
 0x550   : > { %v6821_v46 = vsub.s32 3, %v15336_v40 }
 0x552   : > { %8583 = vmatpush1.bf16.msra.mxu1 %v10462_v16  ;;  %8747 = vmatpush1.bf16.msra.mxu0 %v10465_v4  ;;  %v15337_v16 = vld [vmem:[#allocation10_spill] sm:$0xff] }
 0x553   : > { %8584 = vmatprep.subr.bf16.mxu1 %v10470_v15  ;;  %8748 = vmatprep.subr.bf16.mxu0 %v10473_v55  ;;  %v6810_v4 = vrot.slane %v14641_v12, %v15337_v16  ;;  %v15338_v15 = vld [vmem:[#allocation11_spill] sm:$0xff] }
 0x554   : > { %v6814_v55 = vrot.slane %v14641_v12, %v15338_v15 }
 0x556   : > { %8585 = vmatpush1.bf16.msra.mxu1 %v10468_v41  ;;  %8749 = vmatpush1.bf16.msra.mxu0 %v10471_v38  ;;  %v6822_v41 = vrot.slane %v14641_v12, %v6821_v46 }
 0x557   : > { %8586 = vmatprep.subr.bf16.mxu1 %v10476_v53  ;;  %8750 = vmatprep.subr.bf16.mxu0 %v10479_v2 }
 0x55a   : > { %8587 = vmatpush1.bf16.msra.mxu1 %v10474_v18  ;;  %8751 = vmatpush1.bf16.msra.mxu0 %v10477_v17 }
 0x55b   : > { %8588 = vmatprep.subr.bf16.mxu1 %v10482_v61  ;;  %8752 = vmatprep.subr.bf16.mxu0 %v10485_v56 }
 0x55e   : > { %8589 = vmatpush1.bf16.msra.mxu1 %v10480_v60  ;;  %8753 = vmatpush1.bf16.msra.mxu0 %v10483_v49 }
 0x55f   : > { %8590 = vmatprep.subr.bf16.mxu1 %v10488_v34  ;;  %8754 = vmatprep.subr.bf16.mxu0 %v10491_v22 }
 0x562   : > { %8591 = vmatpush1.bf16.msra.mxu1 %v10486_v10  ;;  %8755 = vmatpush1.bf16.msra.mxu0 %v10489_v20 }
 0x563   : > { %8592 = vmatprep.subr.bf16.mxu1 %v10494_v5  ;;  %8756 = vmatprep.subr.bf16.mxu0 %v10497_v50 }
 0x566   : > { %8593 = vmatpush1.bf16.msra.mxu1 %v10492_v30  ;;  %8757 = vmatpush1.bf16.msra.mxu0 %v10495_v27  ;;  %v10552_v30 = vld [vmem:[%s15257_s9 + $0x200] ss:$16 sps:$4 sm:$0xff]   ;;  %v10555_v27 = vld [vmem:[%s15257_s9 + $0x208] ss:$16 sps:$4 sm:$0xff]  }
 0x567   : > { %8594 = vmatprep.subr.bf16.mxu1 %v10500_v58  ;;  %8758 = vmatprep.subr.bf16.mxu0 %v10503_v36  ;;  %v10560_v36 = vld [vmem:[%s15257_s9 + $0x224] ss:$16 sps:$4 sm:$0xff]  }
 0x56a   : > { %8595 = vmatpush1.bf16.msra.mxu1 %v10498_v11  ;;  %8759 = vmatpush1.bf16.msra.mxu0 %v10501_v37  ;;  %v10563_v11 = vld [vmem:[%s15257_s9 + $0x22c] ss:$16 sps:$4 sm:$0xff]  }
 0x56b   : > { %8596 = vmatprep.subr.bf16.mxu1 %v10506_v63  ;;  %8760 = vmatprep.subr.bf16.mxu0 %v10509_v33  ;;  %v10558_v63 = vld [vmem:[%s15257_s9 + $0x220] ss:$16 sps:$4 sm:$0xff]   ;;  %v10561_v33 = vld [vmem:[%s15257_s9 + $0x228] ss:$16 sps:$4 sm:$0xff]  }
 0x56e   : > { %8597 = vmatpush1.bf16.msra.mxu1 %v10504_v59  ;;  %8761 = vmatpush1.bf16.msra.mxu0 %v10507_v0  ;;  %v10566_v59 = vld [vmem:[%s15257_s9 + $0x244] ss:$16 sps:$4 sm:$0xff]   ;;  %v10569_v0 = vld [vmem:[%s15257_s9 + $0x24c] ss:$16 sps:$4 sm:$0xff]  }
 0x56f   : > { %8598 = vmatprep.subr.bf16.mxu1 %v10512_v24  ;;  %8762 = vmatprep.subr.bf16.mxu0 %v10515_v26  ;;  %v10564_v24 = vld [vmem:[%s15257_s9 + $0x240] ss:$16 sps:$4 sm:$0xff]   ;;  %v10567_v26 = vld [vmem:[%s15257_s9 + $0x248] ss:$16 sps:$4 sm:$0xff]  }
 0x572   : > { %8599 = vmatpush1.bf16.msra.mxu1 %v10510_v7  ;;  %8763 = vmatpush1.bf16.msra.mxu0 %v10513_v23  ;;  %v10572_v7 = vld [vmem:[%s15257_s9 + $0x264] ss:$16 sps:$4 sm:$0xff]   ;;  %v10575_v23 = vld [vmem:[%s15257_s9 + $0x26c] ss:$16 sps:$4 sm:$0xff]  }
 0x573   : > { %8600 = vmatprep.subr.bf16.mxu1 %v10518_v35  ;;  %8764 = vmatprep.subr.bf16.mxu0 %v10521_v29  ;;  %v10570_v35 = vld [vmem:[%s15257_s9 + $0x260] ss:$16 sps:$4 sm:$0xff]   ;;  %v10573_v29 = vld [vmem:[%s15257_s9 + $0x268] ss:$16 sps:$4 sm:$0xff]  }
 0x576   : > { %8601 = vmatpush1.bf16.msra.mxu1 %v10516_v3  ;;  %8765 = vmatpush1.bf16.msra.mxu0 %v10519_v43  ;;  %v10578_v3 = vld [vmem:[%s15257_s9 + $0x284] ss:$16 sps:$4 sm:$0xff]   ;;  %v10581_v43 = vld [vmem:[%s15257_s9 + $0x28c] ss:$16 sps:$4 sm:$0xff]  }
 0x577   : > { %8602 = vmatprep.subr.bf16.mxu1 %v10524_v31  ;;  %8766 = vmatprep.subr.bf16.mxu0 %v10527_v19  ;;  %v10576_v31 = vld [vmem:[%s15257_s9 + $0x280] ss:$16 sps:$4 sm:$0xff]   ;;  %v10579_v19 = vld [vmem:[%s15257_s9 + $0x288] ss:$16 sps:$4 sm:$0xff]  }
 0x57a   : > { %8603 = vmatpush1.bf16.msra.mxu1 %v10522_v9  ;;  %8767 = vmatpush1.bf16.msra.mxu0 %v10525_v54  ;;  %v10584_v9 = vld [vmem:[%s15257_s9 + $0x2a4] ss:$16 sps:$4 sm:$0xff]   ;;  %v10587_v54 = vld [vmem:[%s15257_s9 + $0x2ac] ss:$16 sps:$4 sm:$0xff]  }
 0x57b   : > { %8604 = vmatprep.subr.bf16.mxu1 %v10530_v48  ;;  %8768 = vmatprep.subr.bf16.mxu0 %v10533_v51  ;;  %v10582_v48 = vld [vmem:[%s15257_s9 + $0x2a0] ss:$16 sps:$4 sm:$0xff]   ;;  %v10585_v51 = vld [vmem:[%s15257_s9 + $0x2a8] ss:$16 sps:$4 sm:$0xff]  }
 0x57e   : > { %8605 = vmatpush1.bf16.msra.mxu1 %v10528_v6  ;;  %8769 = vmatpush1.bf16.msra.mxu0 %v10531_v25  ;;  %v10590_v6 = vld [vmem:[%s15257_s9 + $0x2c4] ss:$16 sps:$4 sm:$0xff]   ;;  %v10593_v25 = vld [vmem:[%s15257_s9 + $0x2cc] ss:$16 sps:$4 sm:$0xff]  }
 0x57f   : > { %8606 = vmatprep.subr.bf16.mxu1 %v10536_v42  ;;  %8770 = vmatprep.subr.bf16.mxu0 %v10539_v47  ;;  %v10588_v42 = vld [vmem:[%s15257_s9 + $0x2c0] ss:$16 sps:$4 sm:$0xff]   ;;  %v10591_v47 = vld [vmem:[%s15257_s9 + $0x2c8] ss:$16 sps:$4 sm:$0xff]  }
 0x582   : > { %8607 = vmatpush1.bf16.msra.mxu1 %v10534_v28  ;;  %8771 = vmatpush1.bf16.msra.mxu0 %v10537_v44  ;;  %v10596_v28 = vld [vmem:[%s15257_s9 + $0x2e4] ss:$16 sps:$4 sm:$0xff]   ;;  %v10599_v44 = vld [vmem:[%s15257_s9 + $0x2ec] ss:$16 sps:$4 sm:$0xff]  }
 0x583   : > { %8608 = vmatprep.subr.bf16.mxu1 %v10542_v39  ;;  %8772 = vmatprep.subr.bf16.mxu0 %v10545_v32 }
 0x586   : > { %8609 = vmatpush1.bf16.msra.mxu1 %v10540_v62  ;;  %8773 = vmatpush1.bf16.msra.mxu0 %v10543_v14 }
 0x587   : > { %8610 = vmatprep.subr.bf16.mxu1 %v10548_v45  ;;  %8774 = vmatprep.subr.bf16.mxu0 %v10551_v52 }
 0x58a   : > { %8611 = vmatpush1.bf16.msra.mxu1 %v10546_v21  ;;  %8775 = vmatpush1.bf16.msra.mxu0 %v10549_v57  ;;  %v10594_v21 = vld [vmem:[%s15257_s9 + $0x2e0] ss:$16 sps:$4 sm:$0xff]   ;;  %v10597_v57 = vld [vmem:[%s15257_s9 + $0x2e8] ss:$16 sps:$4 sm:$0xff]  }
 0x58b   : > { %8621 = vmatprep.subr.bf16.mxu1 %v10554_v13  ;;  %8785 = vmatprep.subr.bf16.mxu0 %v10557_v8 }
 0x600   : > { %v7164_v38 = vpop.f32.mrb[108].mxu1  ;;  %v14651_v53 = vpop.f32.mrb[128].mxu0 }
 0x601   : > { %v7165_v2 = vadd.f32 %v7164_v38, %v6810_v4  ;;  %v7166_v18 = vpop.f32.mrb[109].mxu1  ;;  %v7207_v17 = vpop.f32.mrb[129].mxu0  ;;  %v10602_v4 = vld [vmem:[%s15257_s9 + $0x304] ss:$16 sps:$4 sm:$0xff]   ;;  %v10603_v38 = vld [vmem:[%s15257_s9 + $0x308] ss:$16 sps:$4 sm:$0xff]  }
 0x602   : > { %v7167_v61 = vadd.f32 %v7166_v18, %v6814_v55  ;;  %v7208_v56 = vadd.f32 %v7207_v17, %v6822_v41  ;;  %v7168_v60 = vpop.f32.mrb[110].mxu1  ;;  %v7209_v49 = vpop.f32.mrb[130].mxu0  ;;  %v10605_v55 = vld [vmem:[%s15257_s9 + $0x30c] ss:$16 sps:$4 sm:$0xff]   ;;  %v10600_v41 = vld [vmem:[%s15257_s9 + $0x300] ss:$16 sps:$4 sm:$0xff]  }
 0x603   : > { %v7293_v34 = vmax.f32 %v7165_v2, 0.0  ;;  %v7169_v22 = vpop.f32.mrb[111].mxu1  ;;  %v7210_v10 = vpop.f32.mrb[131].mxu0  ;;  %v10608_v2 = vld [vmem:[%s15257_s9 + $0x324] ss:$16 sps:$4 sm:$0xff]  }
 0x604   : > { %v7294_v20 = vmax.f32 %v7167_v61, 0.0  ;;  %v7296_v5 = vmax.f32 %v7208_v56, 0.0  ;;  %v10611_v18 = vld [vmem:[%s15257_s9 + $0x32c] ss:$16 sps:$4 sm:$0xff]   ;;  %v10606_v17 = vld [vmem:[%s15257_s9 + $0x320] ss:$16 sps:$4 sm:$0xff]  }
 0x605   : > { %v7300_v58 = vpack.c.bf16 %v7293_v34, %v7293_v34  ;;  %v10609_v61 = vld [vmem:[%s15257_s9 + $0x328] ss:$16 sps:$4 sm:$0xff]   ;;  %v10614_v56 = vld [vmem:[%s15257_s9 + $0x344] ss:$16 sps:$4 sm:$0xff]   ;;  %v10617_v60 = vld [vmem:[%s15257_s9 + $0x34c] ss:$16 sps:$4 sm:$0xff]  }
 0x606   : > { %v7301_v50 = vpack.c.bf16 %v7294_v20, %v7294_v20  ;;  %v7303_v37 = vpack.c.bf16 %v7296_v5, %v7296_v5  ;;  %v10612_v49 = vld [vmem:[%s15257_s9 + $0x340] ss:$16 sps:$4 sm:$0xff]   ;;  %v10615_v34 = vld [vmem:[%s15257_s9 + $0x348] ss:$16 sps:$4 sm:$0xff]   ;;  %v10620_v22 = vld [vmem:[%s15257_s9 + $0x364] ss:$16 sps:$4 sm:$0xff]  }
 0x607   : > { %v10623_v10 = vld [vmem:[%s15257_s9 + $0x36c] ss:$16 sps:$4 sm:$0xff]   ;;  %v10618_v20 = vld [vmem:[%s15257_s9 + $0x360] ss:$16 sps:$4 sm:$0xff]   ;;  %v10621_v5 = vld [vmem:[%s15257_s9 + $0x368] ss:$16 sps:$4 sm:$0xff]  }
 0x608   : > { %8612 = vmatprep.mubr.bf16.mxu1 %v7301_v50  ;;  %8776 = vmatprep.mubr.bf16.mxu0 %v7301_v50  ;;  %v10626_v50 = vld [vmem:[%s15257_s9 + $0x384] ss:$16 sps:$4 sm:$0xff]  }
 0x609   : > { %8613 = vmatmul.mubr.bf16.vlgmr.msra.gmra.mrb[116].mxu1 %v7300_v58  ;;  %8777 = vmatmul.mubr.bf16.vlgmr.msra.gmra.mrb[136].mxu0 %v7300_v58  ;;  %v10627_v58 = vld [vmem:[%s15257_s9 + $0x388] ss:$16 sps:$4 sm:$0xff]  }
 0x60a   : > { %8622 = vmatpush1.bf16.msra.mxu1 %v10552_v30  ;;  %8786 = vmatpush1.bf16.msra.mxu0 %v10555_v27  ;;  %v10629_v30 = vld [vmem:[%s15257_s9 + $0x38c] ss:$16 sps:$4 sm:$0xff]   ;;  %v10624_v27 = vld [vmem:[%s15257_s9 + $0x380] ss:$16 sps:$4 sm:$0xff]  }
 0x60b   : > { %8653 = vmatprep.mubr.bf16.mxu1 %v7303_v37  ;;  %8817 = vmatprep.mubr.bf16.mxu0 %v7303_v37  ;;  %v6829_v37 = vsub.s32 5, %v15336_v40 }
 0x60c   : > { %8623 = vmatprep.subr.bf16.mxu1 %v10560_v36  ;;  %8787 = vmatprep.subr.bf16.mxu0 %v10563_v11  ;;  %v10632_v36 = vld [vmem:[%s15257_s9 + $0x3a4] ss:$16 sps:$4 sm:$0xff]   ;;  %v10635_v11 = vld [vmem:[%s15257_s9 + $0x3ac] ss:$16 sps:$4 sm:$0xff]  }
 0x60e   : > { %8624 = vmatpush1.bf16.msra.mxu1 %v10558_v63  ;;  %8788 = vmatpush1.bf16.msra.mxu0 %v10561_v33  ;;  %v10630_v63 = vld [vmem:[%s15257_s9 + $0x3a0] ss:$16 sps:$4 sm:$0xff]   ;;  %v10633_v33 = vld [vmem:[%s15257_s9 + $0x3a8] ss:$16 sps:$4 sm:$0xff]  }
 0x60f   : > { %8625 = vmatprep.subr.bf16.mxu1 %v10566_v59  ;;  %8789 = vmatprep.subr.bf16.mxu0 %v10569_v0  ;;  %v15339_v59 = vld [vmem:[#allocation9_spill] sm:$0xff] }
 0x610   : > { %v6818_v0 = vrot.slane %v14641_v12, %v15339_v59 }
 0x612   : > { %8626 = vmatpush1.bf16.msra.mxu1 %v10564_v24  ;;  %8790 = vmatpush1.bf16.msra.mxu0 %v10567_v26  ;;  %v10638_v24 = vld [vmem:[%s15257_s9 + $0x3c4] ss:$16 sps:$4 sm:$0xff]   ;;  %v10641_v26 = vld [vmem:[%s15257_s9 + $0x3cc] ss:$16 sps:$4 sm:$0xff]  }
 0x613   : > { %8627 = vmatprep.subr.bf16.mxu1 %v10572_v7  ;;  %8791 = vmatprep.subr.bf16.mxu0 %v10575_v23  ;;  %v6830_v7 = vrot.slane %v14641_v12, %v6829_v37  ;;  %v10636_v23 = vld [vmem:[%s15257_s9 + $0x3c0] ss:$16 sps:$4 sm:$0xff]   ;;  %v10704_v37 = vld [vmem:[%s15257_s9 + $0x524] ss:$16 sps:$4 sm:$0xff]  }
 0x616   : > { %8628 = vmatpush1.bf16.msra.mxu1 %v10570_v35  ;;  %8792 = vmatpush1.bf16.msra.mxu0 %v10573_v29  ;;  %v10639_v35 = vld [vmem:[%s15257_s9 + $0x3c8] ss:$16 sps:$4 sm:$0xff]   ;;  %v7206_v29 = vadd.f32 %v14651_v53, %v6818_v0 }
 0x617   : > { %8629 = vmatprep.subr.bf16.mxu1 %v10578_v3  ;;  %8793 = vmatprep.subr.bf16.mxu0 %v10581_v43  ;;  %v10644_v3 = vld [vmem:[%s15257_s9 + $0x3e4] ss:$16 sps:$4 sm:$0xff]   ;;  %v10647_v43 = vld [vmem:[%s15257_s9 + $0x3ec] ss:$16 sps:$4 sm:$0xff]   ;;  %v10645_v53 = vld [vmem:[%s15257_s9 + $0x3e8] ss:$16 sps:$4 sm:$0xff]  }
 0x618   : > { %v10705_v0 = vld [vmem:[%s15257_s9 + $0x528] ss:$16 sps:$4 sm:$0xff]  }
 0x61a   : > { %8630 = vmatpush1.bf16.msra.mxu1 %v10576_v31  ;;  %8794 = vmatpush1.bf16.msra.mxu0 %v10579_v19  ;;  %v10642_v19 = vld [vmem:[%s15257_s9 + $0x3e0] ss:$16 sps:$4 sm:$0xff]  }
 0x61b   : > { %8631 = vmatprep.subr.bf16.mxu1 %v10584_v9  ;;  %8795 = vmatprep.subr.bf16.mxu0 %v10587_v54  ;;  %v7295_v9 = vmax.f32 %v7206_v29, 0.0  ;;  %v10650_v54 = vld [vmem:[%s15257_s9 + $0x404] ss:$16 sps:$4 sm:$0xff]   ;;  %v10719_v29 = vld [vmem:[%s15257_s9 + $0x56c] ss:$16 sps:$4 sm:$0xff]  }
 0x61e   : > { %8632 = vmatpush1.bf16.msra.mxu1 %v10582_v48  ;;  %8796 = vmatpush1.bf16.msra.mxu0 %v10585_v51  ;;  %v10653_v48 = vld [vmem:[%s15257_s9 + $0x40c] ss:$16 sps:$4 sm:$0xff]  }
 0x61f   : > { %8633 = vmatprep.subr.bf16.mxu1 %v10590_v6  ;;  %8797 = vmatprep.subr.bf16.mxu0 %v10593_v25  ;;  %v10648_v6 = vld [vmem:[%s15257_s9 + $0x400] ss:$16 sps:$4 sm:$0xff]   ;;  %v7302_v25 = vpack.c.bf16 %v7295_v9, %v7295_v9  ;;  %v6825_v9 = vsub.s32 4, %v15336_v40 }
 0x620   : > { %v14737_v62 = vpop.f32.mrb[112].mxu1  ;;  %v14739_v39 = vpop.f32.mrb[132].mxu0 }
 0x621   : > { %v14741_v14 = vpop.f32.mrb[113].mxu1  ;;  %v10188_v32 = vpop.f32.mrb[133].mxu0 }
 0x622   : > { %v7250_v45 = vpop.f32.mrb[114].mxu1  ;;  %v7290_v52 = vpop.f32.mrb[134].mxu0  ;;  %8634 = vmatpush1.bf16.msra.mxu1 %v10588_v42  ;;  %8798 = vmatpush1.bf16.msra.mxu0 %v10591_v47  ;;  %v7249_v31 = vadd.f32 %v14741_v14, %v6830_v7  ;;  %v10651_v42 = vld [vmem:[%s15257_s9 + $0x408] ss:$16 sps:$4 sm:$0xff]   ;;  %v10654_v14 = vld [vmem:[%s15257_s9 + $0x420] ss:$16 sps:$4 sm:$0xff]  }
 0x623   : > { %v7251_v13 = vpop.f32.mrb[115].mxu1  ;;  %v10189_v8 = vpop.f32.mrb[135].mxu0  ;;  %8635 = vmatprep.subr.bf16.mxu1 %v10596_v28  ;;  %8799 = vmatprep.subr.bf16.mxu0 %v10599_v44  ;;  %v10656_v28 = vld [vmem:[%s15257_s9 + $0x424] ss:$16 sps:$4 sm:$0xff]   ;;  %v10659_v44 = vld [vmem:[%s15257_s9 + $0x42c] ss:$16 sps:$4 sm:$0xff]  }
 0x624   : > { %v7298_v51 = vmax.f32 %v7249_v31, 0.0  ;;  %v10657_v32 = vld [vmem:[%s15257_s9 + $0x428] ss:$16 sps:$4 sm:$0xff]   ;;  %v10662_v45 = vld [vmem:[%s15257_s9 + $0x444] ss:$16 sps:$4 sm:$0xff]  }
 0x625   : > { %v10665_v52 = vld [vmem:[%s15257_s9 + $0x44c] ss:$16 sps:$4 sm:$0xff]   ;;  %v10668_v13 = vld [vmem:[%s15257_s9 + $0x464] ss:$16 sps:$4 sm:$0xff]   ;;  %v10708_v7 = vld [vmem:[%s15257_s9 + $0x540] ss:$16 sps:$4 sm:$0xff]  }
 0x626   : > { %8636 = vmatpush1.bf16.msra.mxu1 %v10594_v21  ;;  %8800 = vmatpush1.bf16.msra.mxu0 %v10597_v57  ;;  %v7305_v47 = vpack.c.bf16 %v7298_v51, %v7298_v51  ;;  %v10660_v21 = vld [vmem:[%s15257_s9 + $0x440] ss:$16 sps:$4 sm:$0xff]   ;;  %v10663_v57 = vld [vmem:[%s15257_s9 + $0x448] ss:$16 sps:$4 sm:$0xff]   ;;  %v10671_v8 = vld [vmem:[%s15257_s9 + $0x46c] ss:$16 sps:$4 sm:$0xff]  }
 0x627   : > { %8637 = vmatprep.subr.bf16.mxu1 %v10602_v4  ;;  %8801 = vmatprep.subr.bf16.mxu0 %v10605_v55  ;;  %v10666_v4 = vld [vmem:[%s15257_s9 + $0x460] ss:$16 sps:$4 sm:$0xff]   ;;  %v10669_v55 = vld [vmem:[%s15257_s9 + $0x468] ss:$16 sps:$4 sm:$0xff]   ;;  %v10722_v31 = vld [vmem:[%s15257_s9 + $0x584] ss:$16 sps:$4 sm:$0xff]  }
 0x628   : > { %v10731_v51 = vld [vmem:[%s15257_s9 + $0x5ac] ss:$16 sps:$4 sm:$0xff]  }
 0x62a   : > { %8638 = vmatpush1.bf16.msra.mxu1 %v10600_v41  ;;  %8802 = vmatpush1.bf16.msra.mxu0 %v10603_v38  ;;  %v10674_v41 = vld [vmem:[%s15257_s9 + $0x484] ss:$16 sps:$4 sm:$0xff]   ;;  %v10677_v38 = vld [vmem:[%s15257_s9 + $0x48c] ss:$16 sps:$4 sm:$0xff]  }
 0x62b   : > { %8639 = vmatprep.subr.bf16.mxu1 %v10608_v2  ;;  %8803 = vmatprep.subr.bf16.mxu0 %v10611_v18  ;;  %v10672_v2 = vld [vmem:[%s15257_s9 + $0x480] ss:$16 sps:$4 sm:$0xff]   ;;  %v10675_v18 = vld [vmem:[%s15257_s9 + $0x488] ss:$16 sps:$4 sm:$0xff]  }
 0x62e   : > { %8640 = vmatpush1.bf16.msra.mxu1 %v10606_v17  ;;  %8804 = vmatpush1.bf16.msra.mxu0 %v10609_v61  ;;  %v10680_v17 = vld [vmem:[%s15257_s9 + $0x4a4] ss:$16 sps:$4 sm:$0xff]   ;;  %v10683_v61 = vld [vmem:[%s15257_s9 + $0x4ac] ss:$16 sps:$4 sm:$0xff]  }
 0x62f   : > { %8641 = vmatprep.subr.bf16.mxu1 %v10614_v56  ;;  %8805 = vmatprep.subr.bf16.mxu0 %v10617_v60  ;;  %v10678_v56 = vld [vmem:[%s15257_s9 + $0x4a0] ss:$16 sps:$4 sm:$0xff]   ;;  %v10681_v60 = vld [vmem:[%s15257_s9 + $0x4a8] ss:$16 sps:$4 sm:$0xff]  }
 0x632   : > { %8642 = vmatpush1.bf16.msra.mxu1 %v10612_v49  ;;  %8806 = vmatpush1.bf16.msra.mxu0 %v10615_v34  ;;  %v10686_v49 = vld [vmem:[%s15257_s9 + $0x4c4] ss:$16 sps:$4 sm:$0xff]   ;;  %v10689_v34 = vld [vmem:[%s15257_s9 + $0x4cc] ss:$16 sps:$4 sm:$0xff]  }
 0x633   : > { %8643 = vmatprep.subr.bf16.mxu1 %v10620_v22  ;;  %8807 = vmatprep.subr.bf16.mxu0 %v10623_v10  ;;  %v10684_v22 = vld [vmem:[%s15257_s9 + $0x4c0] ss:$16 sps:$4 sm:$0xff]   ;;  %v10687_v10 = vld [vmem:[%s15257_s9 + $0x4c8] ss:$16 sps:$4 sm:$0xff]  }
 0x636   : > { %8644 = vmatpush1.bf16.msra.mxu1 %v10618_v20  ;;  %8808 = vmatpush1.bf16.msra.mxu0 %v10621_v5  ;;  %v10692_v20 = vld [vmem:[%s15257_s9 + $0x4e4] ss:$16 sps:$4 sm:$0xff]   ;;  %v10695_v5 = vld [vmem:[%s15257_s9 + $0x4ec] ss:$16 sps:$4 sm:$0xff]  }
 0x637   : > { %8645 = vmatprep.subr.bf16.mxu1 %v10626_v50  ;;  %8809 = vmatprep.subr.bf16.mxu0 %v10629_v30  ;;  %v10690_v50 = vld [vmem:[%s15257_s9 + $0x4e0] ss:$16 sps:$4 sm:$0xff]   ;;  %v10693_v30 = vld [vmem:[%s15257_s9 + $0x4e8] ss:$16 sps:$4 sm:$0xff]  }
 0x63a   : > { %8646 = vmatpush1.bf16.msra.mxu1 %v10624_v27  ;;  %8810 = vmatpush1.bf16.msra.mxu0 %v10627_v58  ;;  %v10698_v27 = vld [vmem:[%s15257_s9 + $0x504] ss:$16 sps:$4 sm:$0xff]   ;;  %v10701_v58 = vld [vmem:[%s15257_s9 + $0x50c] ss:$16 sps:$4 sm:$0xff]  }
 0x63b   : > { %8647 = vmatprep.subr.bf16.mxu1 %v10632_v36  ;;  %8811 = vmatprep.subr.bf16.mxu0 %v10635_v11  ;;  %v10696_v36 = vld [vmem:[%s15257_s9 + $0x500] ss:$16 sps:$4 sm:$0xff]   ;;  %v10699_v11 = vld [vmem:[%s15257_s9 + $0x508] ss:$16 sps:$4 sm:$0xff]  }
 0x63e   : > { %8648 = vmatpush1.bf16.msra.mxu1 %v10630_v63  ;;  %8812 = vmatpush1.bf16.msra.mxu0 %v10633_v33  ;;  %v10707_v63 = vld [vmem:[%s15257_s9 + $0x52c] ss:$16 sps:$4 sm:$0xff]   ;;  %v10702_v33 = vld [vmem:[%s15257_s9 + $0x520] ss:$16 sps:$4 sm:$0xff]  }
 0x63f   : > { %8649 = vmatprep.subr.bf16.mxu1 %v10638_v24  ;;  %8813 = vmatprep.subr.bf16.mxu0 %v10641_v26  ;;  %v10710_v24 = vld [vmem:[%s15257_s9 + $0x544] ss:$16 sps:$4 sm:$0xff]   ;;  %v10713_v26 = vld [vmem:[%s15257_s9 + $0x54c] ss:$16 sps:$4 sm:$0xff]  }
 0x642   : > { %8650 = vmatpush1.bf16.msra.mxu1 %v10636_v23  ;;  %8814 = vmatpush1.bf16.msra.mxu0 %v10639_v35  ;;  %v10711_v23 = vld [vmem:[%s15257_s9 + $0x548] ss:$16 sps:$4 sm:$0xff]   ;;  %v10716_v35 = vld [vmem:[%s15257_s9 + $0x564] ss:$16 sps:$4 sm:$0xff]  }
 0x643   : > { %8651 = vmatprep.subr.bf16.mxu1 %v10644_v3  ;;  %8815 = vmatprep.subr.bf16.mxu0 %v10647_v43  ;;  %v10714_v3 = vld [vmem:[%s15257_s9 + $0x560] ss:$16 sps:$4 sm:$0xff]   ;;  %v10717_v43 = vld [vmem:[%s15257_s9 + $0x568] ss:$16 sps:$4 sm:$0xff]  }
 0x646   : > { %8652 = vmatpush1.bf16.msra.mxu1 %v10642_v19  ;;  %8816 = vmatpush1.bf16.msra.mxu0 %v10645_v53  ;;  %v10725_v19 = vld [vmem:[%s15257_s9 + $0x58c] ss:$16 sps:$4 sm:$0xff]   ;;  %v10720_v53 = vld [vmem:[%s15257_s9 + $0x580] ss:$16 sps:$4 sm:$0xff]  }
 0x647   : > { %8662 = vmatprep.subr.bf16.mxu1 %v10650_v54  ;;  %8826 = vmatprep.subr.bf16.mxu0 %v10653_v48  ;;  %v10723_v54 = vld [vmem:[%s15257_s9 + $0x588] ss:$16 sps:$4 sm:$0xff]   ;;  %v10728_v48 = vld [vmem:[%s15257_s9 + $0x5a4] ss:$16 sps:$4 sm:$0xff]  }
 0x649   : > { %8654 = vmatmul.mubr.bf16.vlgmr.msra.gmra.mrb[116].mxu1 %v7302_v25  ;;  %8818 = vmatmul.mubr.bf16.vlgmr.msra.gmra.mrb[136].mxu0 %v7302_v25  ;;  %v6826_v25 = vrot.slane %v14641_v12, %v6825_v9  ;;  %v10787_v9 = vld [vmem:[%s15259_s11 + $0x78] sm:$0xff]  }
 0x64a   : > { %8663 = vmatpush1.bf16.msra.mxu1 %v10648_v6  ;;  %8694 = vmatprep.mubr.bf16.mxu1 %v7305_v47  ;;  %v10726_v6 = vld [vmem:[%s15257_s9 + $0x5a0] ss:$16 sps:$4 sm:$0xff]  }
 0x64b   : > { %8827 = vmatpush1.bf16.msra.mxu0 %v10651_v42  ;;  %8858 = vmatprep.mubr.bf16.mxu0 %v7305_v47  ;;  %v10729_v42 = vld [vmem:[%s15257_s9 + $0x5a8] ss:$16 sps:$4 sm:$0xff]   ;;  %v10734_v47 = vld [vmem:[%s15257_s9 + $0x5c4] ss:$16 sps:$4 sm:$0xff]  }
 0x64c   : > { %8664 = vmatprep.subr.bf16.mxu1 %v10656_v28  ;;  %8828 = vmatprep.subr.bf16.mxu0 %v10659_v44  ;;  %v10737_v28 = vld [vmem:[%s15257_s9 + $0x5cc] ss:$16 sps:$4 sm:$0xff]   ;;  %v10732_v44 = vld [vmem:[%s15257_s9 + $0x5c0] ss:$16 sps:$4 sm:$0xff]  }
 0x64e   : > { %8665 = vmatpush1.bf16.msra.mxu1 %v10654_v14  ;;  %v7247_v14 = vadd.f32 %v14737_v62, %v6826_v25  ;;  %v10738_v62 = vld [vmem:[%s15257_s9 + $0x5e0] ss:$16 sps:$4 sm:$0xff]  }
 0x64f   : > { %8829 = vmatpush1.bf16.msra.mxu0 %v10657_v32  ;;  %8666 = vmatprep.subr.bf16.mxu1 %v10662_v45  ;;  %v10735_v32 = vld [vmem:[%s15257_s9 + $0x5c8] ss:$16 sps:$4 sm:$0xff]   ;;  %v10740_v45 = vld [vmem:[%s15257_s9 + $0x5e4] ss:$16 sps:$4 sm:$0xff]  }
 0x650   : > { %8830 = vmatprep.subr.bf16.mxu0 %v10665_v52  ;;  %v10743_v52 = vld [vmem:[%s15257_s9 + $0x5ec] ss:$16 sps:$4 sm:$0xff]   ;;  %v10792_v25 = vld [vmem:[%s15259_s11 + $0xc0] sm:$0xff]  }
 0x652   : > { %8667 = vmatpush1.bf16.msra.mxu1 %v10660_v21  ;;  %v7297_v21 = vmax.f32 %v7247_v14, 0.0 }
 0x653   : > { %8831 = vmatpush1.bf16.msra.mxu0 %v10663_v57  ;;  %8668 = vmatprep.subr.bf16.mxu1 %v10668_v13  ;;  %v10741_v57 = vld [vmem:[%s15257_s9 + $0x5e8] ss:$16 sps:$4 sm:$0xff]   ;;  %v10746_v13 = vld [vmem:[%s15257_s9 + $0x604] ss:$16 sps:$4 sm:$0xff]  }
 0x654   : > { %8832 = vmatprep.subr.bf16.mxu0 %v10671_v8  ;;  %v10744_v8 = vld [vmem:[%s15257_s9 + $0x600] ss:$16 sps:$4 sm:$0xff]  }
 0x656   : > { %8669 = vmatpush1.bf16.msra.mxu1 %v10666_v4  ;;  %v7304_v4 = vpack.c.bf16 %v7297_v21, %v7297_v21 }
 0x657   : > { %8833 = vmatpush1.bf16.msra.mxu0 %v10669_v55  ;;  %8670 = vmatprep.subr.bf16.mxu1 %v10674_v41  ;;  %v6833_v55 = vsub.s32 6, %v15336_v40  ;;  %v10749_v41 = vld [vmem:[%s15257_s9 + $0x624] ss:$16 sps:$4 sm:$0xff]  }
 0x658   : > { %8834 = vmatprep.subr.bf16.mxu0 %v10677_v38  ;;  %v10747_v38 = vld [vmem:[%s15257_s9 + $0x620] ss:$16 sps:$4 sm:$0xff]  }
 0x65a   : > { %8671 = vmatpush1.bf16.msra.mxu1 %v10672_v2  ;;  %v6834_v2 = vrot.slane %v14641_v12, %v6833_v55  ;;  %v10753_v12 = vld [vmem:[%s15257_s9 + $0x660] ss:$16 sps:$4 sm:$0xff]  }
 0x65b   : > { %8835 = vmatpush1.bf16.msra.mxu0 %v10675_v18  ;;  %8672 = vmatprep.subr.bf16.mxu1 %v10680_v17  ;;  %v10752_v18 = vld [vmem:[%s15257_s9 + $0x644] ss:$16 sps:$4 sm:$0xff]   ;;  %v10750_v17 = vld [vmem:[%s15257_s9 + $0x640] ss:$16 sps:$4 sm:$0xff]  }
 0x65c   : > { %8836 = vmatprep.subr.bf16.mxu0 %v10683_v61  ;;  %v7288_v61 = vadd.f32 %v14739_v39, %v6834_v2  ;;  %v10756_v39 = vld [vmem:[%s15257_s9 + $0x608] ss:$16 sps:$4 sm:$0xff]  }
 0x65e   : > { %8673 = vmatpush1.bf16.msra.mxu1 %v10678_v56  ;;  %v10755_v56 = vld [vmem:[%s15257_s9 + $0x664] ss:$16 sps:$4 sm:$0xff]  }
 0x65f   : > { %8837 = vmatpush1.bf16.msra.mxu0 %v10681_v60  ;;  %8674 = vmatprep.subr.bf16.mxu1 %v10686_v49  ;;  %v7299_v60 = vmax.f32 %v7288_v61, 0.0  ;;  %v10758_v49 = vld [vmem:[%s15257_s9 + $0x60c] ss:$16 sps:$4 sm:$0xff]  }
 0x660   : > { %8838 = vmatprep.subr.bf16.mxu0 %v10689_v34 }
 0x661   : > { %v7306_v34 = vpack.c.bf16 %v7299_v60, %v7299_v60 }
 0x662   : > { %8675 = vmatpush1.bf16.msra.mxu1 %v10684_v22  ;;  %v10761_v22 = vld [vmem:[%s15257_s9 + $0x62c] ss:$16 sps:$4 sm:$0xff]  }
 0x663   : > { %8839 = vmatpush1.bf16.msra.mxu0 %v10687_v10  ;;  %8676 = vmatprep.subr.bf16.mxu1 %v10692_v20  ;;  %v10759_v10 = vld [vmem:[%s15257_s9 + $0x628] ss:$16 sps:$4 sm:$0xff]   ;;  %v10764_v20 = vld [vmem:[%s15257_s9 + $0x64c] ss:$16 sps:$4 sm:$0xff]  }
 0x664   : > { %8840 = vmatprep.subr.bf16.mxu0 %v10695_v5  ;;  %v10762_v5 = vld [vmem:[%s15257_s9 + $0x648] ss:$16 sps:$4 sm:$0xff]  }
 0x666   : > { %8677 = vmatpush1.bf16.msra.mxu1 %v10690_v50  ;;  %v10767_v50 = vld [vmem:[%s15257_s9 + $0x66c] ss:$16 sps:$4 sm:$0xff]  }
 0x667   : > { %8841 = vmatpush1.bf16.msra.mxu0 %v10693_v30  ;;  %8678 = vmatprep.subr.bf16.mxu1 %v10698_v27  ;;  %v10765_v30 = vld [vmem:[%s15257_s9 + $0x668] ss:$16 sps:$4 sm:$0xff]   ;;  %v10768_v27 = vld [vmem:[%s15259_s11 + $0x40] sm:$0xff]  }
 0x668   : > { %8842 = vmatprep.subr.bf16.mxu0 %v10701_v58  ;;  %v10769_v58 = vld [vmem:[%s15259_s11] sm:$0xff]  }
 0x66a   : > { %8679 = vmatpush1.bf16.msra.mxu1 %v10696_v36  ;;  %v10770_v36 = vld [vmem:[%s15259_s11 + $0x48] sm:$0xff]  }
 0x66b   : > { %8843 = vmatpush1.bf16.msra.mxu0 %v10699_v11  ;;  %8680 = vmatprep.subr.bf16.mxu1 %v10704_v37  ;;  %v10771_v11 = vld [vmem:[%s15259_s11 + $0x8] sm:$0xff]   ;;  %v10772_v37 = vld [vmem:[%s15259_s11 + $0x50] sm:$0xff]  }
 0x66c   : > { %8844 = vmatprep.subr.bf16.mxu0 %v10707_v63  ;;  %v10773_v63 = vld [vmem:[%s15259_s11 + $0x10] sm:$0xff]  }
 0x66e   : > { %8681 = vmatpush1.bf16.msra.mxu1 %v10702_v33  ;;  %v10774_v33 = vld [vmem:[%s15259_s11 + $0x80] sm:$0xff]  }
 0x66f   : > { %8845 = vmatpush1.bf16.msra.mxu0 %v10705_v0  ;;  %8682 = vmatprep.subr.bf16.mxu1 %v10710_v24  ;;  %v10775_v0 = vld [vmem:[%s15259_s11 + $0x58] sm:$0xff]   ;;  %v10777_v24 = vld [vmem:[%s15259_s11 + $0x88] sm:$0xff]  }
 0x670   : > { %8846 = vmatprep.subr.bf16.mxu0 %v10713_v26  ;;  %v10776_v26 = vld [vmem:[%s15259_s11 + $0x18] sm:$0xff]  }
 0x672   : > { %8683 = vmatpush1.bf16.msra.mxu1 %v10708_v7  ;;  %v10778_v7 = vld [vmem:[%s15259_s11 + $0x60] sm:$0xff]  }
 0x673   : > { %8847 = vmatpush1.bf16.msra.mxu0 %v10711_v23  ;;  %8684 = vmatprep.subr.bf16.mxu1 %v10716_v35  ;;  %v10780_v23 = vld [vmem:[%s15259_s11 + $0x90] sm:$0xff]   ;;  %v10779_v35 = vld [vmem:[%s15259_s11 + $0x20] sm:$0xff]  }
 0x674   : > { %8848 = vmatprep.subr.bf16.mxu0 %v10719_v29  ;;  %v10781_v29 = vld [vmem:[%s15259_s11 + $0x68] sm:$0xff]  }
 0x676   : > { %8685 = vmatpush1.bf16.msra.mxu1 %v10714_v3  ;;  %v10783_v3 = vld [vmem:[%s15259_s11 + $0x98] sm:$0xff]  }
 0x677   : > { %8849 = vmatpush1.bf16.msra.mxu0 %v10717_v43  ;;  %8686 = vmatprep.subr.bf16.mxu1 %v10722_v31  ;;  %v10782_v43 = vld [vmem:[%s15259_s11 + $0x28] sm:$0xff]   ;;  %v10784_v31 = vld [vmem:[%s15259_s11 + $0x70] sm:$0xff]  }
 0x678   : > { %8850 = vmatprep.subr.bf16.mxu0 %v10725_v19  ;;  %v10785_v19 = vld [vmem:[%s15259_s11 + $0x30] sm:$0xff]  }
 0x67a   : > { %8687 = vmatpush1.bf16.msra.mxu1 %v10720_v53  ;;  %v10786_v53 = vld [vmem:[%s15259_s11 + $0xa0] sm:$0xff]  }
 0x67b   : > { %8851 = vmatpush1.bf16.msra.mxu0 %v10723_v54  ;;  %8688 = vmatprep.subr.bf16.mxu1 %v10728_v48  ;;  %v10789_v54 = vld [vmem:[%s15259_s11 + $0xa8] sm:$0xff]   ;;  %v10788_v48 = vld [vmem:[%s15259_s11 + $0x38] sm:$0xff]  }
 0x67c   : > { %8852 = vmatprep.subr.bf16.mxu0 %v10731_v51  ;;  %v10790_v51 = vld [vmem:[%s15259_s11 + $0xb0] sm:$0xff]  }
 0x67e   : > { %8689 = vmatpush1.bf16.msra.mxu1 %v10726_v6  ;;  %v10791_v6 = vld [vmem:[%s15259_s11 + $0xb8] sm:$0xff]  }
 0x67f   : > { %8853 = vmatpush1.bf16.msra.mxu0 %v10729_v42  ;;  %8690 = vmatprep.subr.bf16.mxu1 %v10734_v47  ;;  %v10793_v42 = vld [vmem:[%s15259_s11 + $0xc8] sm:$0xff]  }
 0x680   : > { %8854 = vmatprep.subr.bf16.mxu0 %v10737_v28 }
 0x682   : > { %8691 = vmatpush1.bf16.msra.mxu1 %v10732_v44 }
 0x683   : > { %8855 = vmatpush1.bf16.msra.mxu0 %v10735_v32  ;;  %8692 = vmatprep.subr.bf16.mxu1 %v10740_v45  ;;  %v7515_v32 = vld [vmem:[%s15258_s10] sm:$0xf] }
 0x684   : > { %8856 = vmatprep.subr.bf16.mxu0 %v10743_v52  ;;  %v7520_v45 = vrot.slane %v7515_v32, %v15337_v16  ;;  %v7524_v52 = vrot.slane %v7515_v32, %v15338_v15  ;;  %v7528_v2 = vrot.slane %v7515_v32, %v15339_v59 }
 0x686   : > { %8693 = vmatpush1.bf16.msra.mxu1 %v10738_v62 }
 0x687   : > { %8857 = vmatpush1.bf16.msra.mxu0 %v10741_v57  ;;  %8703 = vmatprep.subr.bf16.mxu1 %v10746_v13 }
 0x688   : > { %9174 = vmatprep.subr.bf16.mxu0 %v15335_v1 }
 0x689   : > { %8695 = vmatmul.mubr.bf16.vlgmr.msra.gmra.mrb[116].mxu1 %v7304_v4 }
 0x68a   : > { %8859 = vmatmul.mubr.bf16.vlgmr.msra.gmra.mrb[136].mxu0 %v7304_v4  ;;  %8704 = vmatpush1.bf16.msra.mxu1 %v10744_v8 }
 0x68b   : > { %8705 = vmatprep.subr.bf16.mxu1 %v10749_v41  ;;  %8735 = vmatprep.mubr.bf16.mxu1 %v15335_v1 }
 0x68c   : > { %9175 = vmatpush1.bf16.msra.mxu0 %v10774_v33 }
 0x68d   : > { %9176 = vmatprep.subr.bf16.mxu0 %v15335_v1 }
 0x68e   : > { %8706 = vmatpush1.bf16.msra.mxu1 %v10747_v38 }
 0x68f   : > { %8707 = vmatprep.subr.bf16.mxu1 %v10752_v18  ;;  %v7532_v18 = vrot.slane %v7515_v32, %v6821_v46 }
 0x690   : > { %9177 = vmatpush1.bf16.msra.mxu0 %v10777_v24 }
 0x691   : > { %9178 = vmatprep.subr.bf16.mxu0 %v15335_v1 }
 0x692   : > { %8708 = vmatpush1.bf16.msra.mxu1 %v10750_v17 }
 0x693   : > { %8709 = vmatprep.subr.bf16.mxu1 %v10755_v56 }
 0x694   : > { %9179 = vmatpush1.bf16.msra.mxu0 %v10780_v23 }
 0x695   : > { %9180 = vmatprep.subr.bf16.mxu0 %v15335_v1 }
 0x696   : > { %8710 = vmatpush1.bf16.msra.mxu1 %v10753_v12 }
 0x697   : > { %8867 = vmatprep.subr.bf16.mxu1 %v10758_v49 }
 0x698   : > { %9181 = vmatpush1.bf16.msra.mxu0 %v10783_v3 }
 0x699   : > { %9880 = vmatmul.mubr.msk.bf16.vlgmr.msra.gmra.mrb[116].mxu1 %vm6329_vm4, %v7306_v34  ;;  %9182 = vmatprep.subr.bf16.mxu0 %v15335_v1 }
 0x69a   : > { %8868 = vmatpush1.bf16.msra.mxu1 %v10756_v39  ;;  %8899 = vmatprep.mubr.bf16.mxu1 %v15335_v1 }
 0x69b   : > { %8869 = vmatprep.subr.bf16.mxu1 %v10761_v22 }
 0x69c   : > { %9183 = vmatpush1.bf16.msra.mxu0 %v10786_v53 }
 0x69d   : > { %9184 = vmatprep.subr.bf16.mxu0 %v15335_v1 }
 0x69e   : > { %8870 = vmatpush1.bf16.msra.mxu1 %v10759_v10 }
 0x69f   : > { %8871 = vmatprep.subr.bf16.mxu1 %v10764_v20 }
 0x6a0   : > { %9185 = vmatpush1.bf16.msra.mxu0 %v10789_v54 }
 0x6a1   : > { %9186 = vmatprep.subr.bf16.mxu0 %v15335_v1 }
 0x6a2   : > { %8872 = vmatpush1.bf16.msra.mxu1 %v10762_v5 }
 0x6a3   : > { %8873 = vmatprep.subr.bf16.mxu1 %v10767_v50  ;;  %v9882_v50 = vld [vmem:[%s15260_s12] ss:$0 sm:$0xff] }
 0x6a4   : > { %9187 = vmatpush1.bf16.msra.mxu0 %v10790_v51 }
 0x6a5   : > { %9188 = vmatprep.subr.bf16.mxu0 %v15335_v1 }
 0x6a6   : > { %8874 = vmatpush1.bf16.msra.mxu1 %v10765_v30 }
 0x6a7   : > { %10092 = vmatprep.subr.bf16.mxu1 %v10768_v27 }
 0x6a8   : > { %9189 = vmatpush1.bf16.msra.mxu0 %v10791_v6 }
 0x6a9   : > { %9881 = vmatmul.mubr.msk.bf16.vlgmr.msra.gmra.mrb[120].mxu1 %vm6329_vm4, %v7306_v34  ;;  %9190 = vmatprep.subr.bf16.mxu0 %v15335_v1 }
 0x6aa   : > { %10093 = vmatpush3.bf16.msra.mxu1 %v10769_v58 }
 0x6ab   : > { %10094 = vmatprep.subr.bf16.mxu1 %v10770_v36 }
 0x6ac   : > { %9191 = vmatpush1.bf16.msra.mxu0 %v10792_v25 }
 0x6ad   : > { %9192 = vmatprep.subr.bf16.mxu0 %v15335_v1 }
 0x6ae   : > { %10095 = vmatpush3.bf16.msra.mxu1 %v10771_v11 }
 0x6af   : > { %10096 = vmatprep.subr.bf16.mxu1 %v10772_v37 }
 0x6b0   : > { %9193 = vmatpush1.bf16.msra.mxu0 %v10793_v42 }
 0x6b2   : > { %10097 = vmatpush3.bf16.msra.mxu1 %v10773_v63 }
 0x6b3   : > { %10098 = vmatprep.subr.bf16.mxu1 %v10775_v0 }
 0x6b6   : > { %10099 = vmatpush3.bf16.msra.mxu1 %v10776_v26 }
 0x6b7   : > { %10100 = vmatprep.subr.bf16.mxu1 %v10778_v7 }
 0x6ba   : > { %10101 = vmatpush3.bf16.msra.mxu1 %v10779_v35 }
 0x6bb   : > { %10102 = vmatprep.subr.bf16.mxu1 %v10781_v29 }
 0x6be   : > { %10103 = vmatpush3.bf16.msra.mxu1 %v10782_v43 }
 0x6bf   : > { %10104 = vmatprep.subr.bf16.mxu1 %v10784_v31 }
 0x6c2   : > { %10105 = vmatpush3.bf16.msra.mxu1 %v10785_v19 }
 0x6c3   : > { %10106 = vmatprep.subr.bf16.mxu1 %v10787_v9 }
 0x6c6   : > { %10107 = vmatpush3.bf16.msra.mxu1 %v10788_v48 }
 0x75d   : > { %v8860_v47 = vpop.f32.mrb[136].mxu0 }
 0x75e   : > { %v8862_v28 = vpop.f32.mrb[137].mxu0  ;;  %v10192_v16 = vadd.f32 %v8860_v47, %v7528_v2 }
 0x75f   : > { %v8864_v44 = vpop.f32.mrb[138].mxu0  ;;  %v10194_v17 = vadd.f32 %v8862_v28, %v7532_v18 }
 0x760   : > { %v8865_v14 = vpop.f32.mrb[139].mxu0 }
 0x76c   : > { %v8737_v62 = vpop.f32.mrb[116].mxu1 }
 0x76d   : > { %v10190_v21 = vadd.f32 %v8737_v62, %v7520_v45  ;;  %v8739_v57 = vpop.f32.mrb[117].mxu1 }
 0x76e   : > { %v10191_v13 = vadd.f32 %v8739_v57, %v7524_v52  ;;  %v8741_v8 = vpop.f32.mrb[118].mxu1 }
 0x76f   : > { %v8908_v4 = vmax.f32 %v10190_v21, 0.0  ;;  %v8742_v1 = vpop.f32.mrb[119].mxu1 }
 0x770   : > { %v8909_v55 = vmax.f32 %v10191_v13, 0.0 }
 0x771   : > { %v8912_v38 = vpack.c.bf16 %v8908_v4, %v8908_v4 }
 0x772   : > { %v8913_v41 = vpack.c.bf16 %v8909_v55, %v8909_v55 }
 0x774   : > { %9166 = vmatprep.mubr.bf16.mxu1 %v8913_v41 }
 0x775   : > { %9167 = vmatmul.mubr.bf16.vlgmr.msra.gmra.mrb[124].mxu1 %v8912_v38 }
 0x77c   : > { %v8901_v15 = vpop.f32.mrb[120].mxu1 }
 0x77d   : > { %v10193_v61 = vadd.f32 %v10192_v16, %v8901_v15  ;;  %v8903_v56 = vpop.f32.mrb[121].mxu1 }
 0x77e   : > { %v10195_v12 = vadd.f32 %v10194_v17, %v8903_v56  ;;  %v8905_v60 = vpop.f32.mrb[122].mxu1 }
 0x77f   : > { %v8910_v49 = vmax.f32 %v10193_v61, 0.0  ;;  %v8906_v39 = vpop.f32.mrb[123].mxu1 }
 0x780   : > { %v8911_v34 = vmax.f32 %v10195_v12, 0.0 }
 0x781   : > { %v8914_v10 = vpack.c.bf16 %v8910_v49, %v8910_v49 }
 0x782   : > { %v8915_v22 = vpack.c.bf16 %v8911_v34, %v8911_v34 }
 0x784   : > { %9909 = vmatprep.mubr.msk.bf16.mxu0 %vm6324_vm12, %v8915_v22 }
 0x785   : > { %9207 = vmatmul.mubr.bf16.vlgmr.msra.gmra.mrb[140].mxu0 %v8914_v10 }
 0x848   : > { %v10108_v59 = vpop.f32.mrb[124].mxu1 }
 0x849   : > { %v10109_v40 = vpop.f32.mrb[125].mxu1 }
 0x84a   : > { %v10110_v46 = vadd.f32 %v10109_v40, %v10108_v59  ;;  %v10111_v20 = vpop.f32.mrb[126].mxu1 }
 0x84b   : > { %v10112_v5 = vpop.f32.mrb[127].mxu1 }
 0x84c   : > { %v9169_v30 = vadd.f32 %v10110_v46, %v9882_v50 }
 0x858   : > { %v9208_v27 = vpop.f32.mrb[140].mxu0 }
 0x859   : > { %v9209_v58 = vadd.f32 %v9208_v27, %v9169_v30  ;;  %v9210_v36 = vpop.f32.mrb[141].mxu0 }
 0x85a   : > { %v9211_v11 = vpop.f32.mrb[142].mxu0 }
 0x85b   : > { %v9212_v37 = vpop.f32.mrb[143].mxu0  ;;  %9215 = vst.msk [vmem:[%s436_s30] sm:$0x3] %vm9214_vm7, %v9209_v58 }
 0x85c   : > { %11070 = shalt.err (!%p11067_p3)
}
 0x85d   : > { %s11071_s20 = scalar_lea.hbm %s15206_s23, 32  ;;  %s11075_s27 = scalar_lea.hbm %s15261_s13, 64 }
 0x85e   : > { %p11072_p4 = scmp.ne.s32.totalorder %s15206_s23, %s11071_s20  ;;  %p11076_p9 = scmp.lt.u32.totalorder %s15206_s23, %s15261_s13 }
 0x85f   : > { %p11077_p10 = scmp.lt.u32.totalorder %s11075_s27, %s11071_s20  ;;  %p11079_p12 = scmp.lt.u32.totalorder %s11071_s20, %s15206_s23 }
 0x860   : > { %p11073_p7 = pnand %p11072_p4, %p11238_p5 }
 0x861   : > { %p11078_p11 = por %p11077_p10, %p11076_p9 }
 0x862   : > { %p11074_p8 = pneg %p11073_p7 }
 0x863   : > { %p11080_p13 = por %p11079_p12, %p11078_p11 }
 0x865   : > { %p11081_p0 = pnand %p11080_p13, %p11074_p8 }
 0x867   : > { %11084 = shalt.err (!%p11081_p0)
}
 0x868   : > { %10216 = dma.vmem_to_hbm [thread:$0]  (%p11238_p5), %s15208_s17, 32, %s15206_s23, %s9217_s29  }
 0x869 PF: > { %p10222_p1 = scmp.ge.s32.totalorder %s11119_s28, 2  ;;  %s9242_s16 = sand.u32 1, %s11107_s25  }
 0x86a   : > { %s9243_s22 = scalar_lea.sflag [#allocation3], %s9242_s16 }
 0x86b   : > { %p10219_p2 = pnand %p10222_p1, %p11242_p6 }
 0x86d   : > { %11102 = dma.done.wait (!%p10219_p2), %s9243_s22, 32  }
 0x86e   : > { %11104 = vsyncadd (!%p10219_p2), %s9243_s22, 4294967264  ;;  %s15340_s28 = sld [smem:[#allocation6_spill]]  ;;  %s15341_s15 = sld [smem:[#allocation5_spill]] }
 0x86f   : > { %s15342_s27 = sld [smem:[#allocation7_spill]]  ;;  %s15343_s25 = smov %s11111_s26 }
 0x874   : > { %p23_p3 = scmp.ge.s32.totalorder %s15340_s28, 4   ;;  %s15344_s26 = smov %s15341_s15 }
 0x876   :  { %25 = sbr.rel (!%p23_p3) target bundleno = 3 (0x3), region = 107 }
 0x87d   :  { %9248 = vsyncpa [#allocation3], 1 }
 0x87e   :  { %9250 = vsyncpa [#allocation3 + $0x1], 1 }

</bundles_post_ra>
